<compile_context>
chip_gen: v7x
topology: tpu7x:2x2x1
jax: 0.10.0
libtpu: 0.0.40
codegen_flags: <defaults>
</compile_context>

<pallas_src>
import math
from functools import partial

import numpy as np
import jax
import jax.numpy as jnp
from jax import lax
from jax.experimental import pallas as pl
from jax.experimental.pallas import tpu as pltpu


# ------------------------------ fused kernel ------------------------------- #

def _simple_cnn_kernel(x_ref, w1_ref, b1_ref, w2_ref, b2_ref,
                       wfc1_ref, bfc1_ref, wfc2_ref, bfc2_ref, out_ref):
    """One grid step == TB images.

    x_ref    : [28, TB, 28]   (input row, batch, input col) — cols in lanes
    w1_ref   : [3, 28, 1024]  conv1 banded weights; lane = half*512 + v*32 + c
    b1_ref   : [1, 512]       conv1 bias tiled over (v, c) lanes
    w2_ref   : [3, 512, 768]  conv2 banded weights; row = v*32 + c,
                              lane = half*384 + n*64 + c2
    b2_ref   : [1, 384]       conv2 bias tiled over (n, c2) lanes
    wfc1_ref : [5, 384, 128]  fc1 split per pooled row m (NCHW flatten folded in)
    wfc2_ref : [128, 128]     fc2 weights zero-padded 10 -> 128 columns
    out_ref  : [TB, 128]      logits in columns 0..9
    """
    f32 = jnp.float32
    tb = x_ref.shape[1]

    # ---- conv1 (3x3, 1->32): 3 accumulating banded row-matmuls on the MXU -- #
    # TODO(synk): optionally cast MXU operands to bf16 (review item); kept f32
    # to preserve the validation margin against the f32 reference.
    y = None
    for a in range(3):
        lhs = x_ref[a:a + 26].reshape(26 * tb, 28)           # rows = (i, b)
        part = jnp.dot(lhs, w1_ref[a], preferred_element_type=f32)
        y = part if y is None else y + part                  # [26*TB, 1024]

    # 2x2 max-pool: columns via the 128-aligned parity halves, rows via a
    # leading-dim split.  relu(pool(conv) + b) == pool(relu(conv + b)).
    y = jnp.maximum(y[:, :512], y[:, 512:])                  # [26*TB, 512]
    y = y.reshape(13, 2, tb, 512)
    p1 = jnp.maximum(y[:, 0], y[:, 1])                       # [13, TB, 512]
    p1 = jnp.maximum(p1 + b1_ref[...], 0.0)                  # lane = v*32 + c

    # ---- conv2 (3x3, 32->64): 3 accumulating banded row-matmuls ------------ #
    y2 = None
    for a in range(3):
        lhs = p1[a:a + 10].reshape(10 * tb, 512)             # rows = (i2, b)
        part = jnp.dot(lhs, w2_ref[a], preferred_element_type=f32)
        y2 = part if y2 is None else y2 + part               # [10*TB, 768]

    y2 = jnp.maximum(y2[:, :384], y2[:, 384:])               # [10*TB, 384]
    y2 = y2.reshape(5, 2, tb, 384)
    p2 = jnp.maximum(y2[:, 0], y2[:, 1])                     # [5, TB, 384]
    p2 = jnp.maximum(p2 + b2_ref[...], 0.0)                  # lane = n*64 + c2

    # ---- fc1 + ReLU: 5 accumulating matmuls, no flatten scratch ------------ #
    h = None
    for m in range(5):
        part = jnp.dot(p2[m], wfc1_ref[m], preferred_element_type=f32)
        h = part if h is None else h + part                  # [TB, 128]
    h = jnp.maximum(h + bfc1_ref[...], 0.0)

    # ---- fc2 (columns 10..127 are zero-padded) ------------------------------ #
    out_ref[...] = (jnp.dot(h, wfc2_ref[...], preferred_element_type=f32)
                    + bfc2_ref[...])


# ------------------------------ host wrapper ------------------------------- #

def _round_up(n, m):
    return ((n + m - 1) // m) * m


@partial(jax.jit, static_argnames=("tb",))
def simple_cnn_forward(x_nchw, packed, tb=64):
    B = x_nchw.shape[0]
    assert x_nchw.shape[1:] == (1, 28, 28), "SimpleCNN expects 1x28x28 inputs"
    tb = _round_up(min(tb, _round_up(B, 8)), 8)
    b_pad = _round_up(B, tb)

    x = x_nchw.reshape(B, 28, 28).astype(jnp.float32)
    if b_pad != B:
        x = jnp.pad(x, ((0, b_pad - B), (0, 0), (0, 0)))
    x_t = jnp.transpose(x, (1, 0, 2))                 # [28, B_pad, 28]

    grid_spec = pltpu.PrefetchScalarGridSpec(
        num_scalar_prefetch=0,
        grid=(b_pad // tb,),
        in_specs=[
            pl.BlockSpec((28, tb, 28), lambda g: (0, g, 0)),    # x
            pl.BlockSpec((3, 28, 1024), lambda g: (0, 0, 0)),   # conv1 banded
            pl.BlockSpec((1, 512), lambda g: (0, 0)),           # b1 lanes
            pl.BlockSpec((3, 512, 768), lambda g: (0, 0, 0)),   # conv2 banded
            pl.BlockSpec((1, 384), lambda g: (0, 0)),           # b2 lanes
            pl.BlockSpec((5, 384, 128), lambda g: (0, 0, 0)),   # fc1 per-row
            pl.BlockSpec((1, 128), lambda g: (0, 0)),           # bfc1
            pl.BlockSpec((128, 128), lambda g: (0, 0)),         # fc2 (padded)
            pl.BlockSpec((1, 128), lambda g: (0, 0)),           # bfc2 (padded)
        ],
        out_specs=pl.BlockSpec((tb, 128), lambda g: (g, 0)),
    )
    out = pl.pallas_call(
        _simple_cnn_kernel,
        out_shape=jax.ShapeDtypeStruct((b_pad, 128), jnp.float32),
        grid_spec=grid_spec,
        compiler_params=pltpu.CompilerParams(
            dimension_semantics=("parallel",),
            vmem_limit_bytes=48 * 1024 * 1024),
    )(x_t, packed["w1"], packed["b1"], packed["w2"], packed["b2"],
      packed["wfc1"], packed["bfc1"], packed["wfc2"], packed["bfc2"])
    return out[:B, :10]


# --------------------------- params & packing ------------------------------ #

def init_params(key):
    """PyTorch-style U(-1/sqrt(fan_in), +) init, torch-equivalent layouts."""
    ks = jax.random.split(key, 8)

    def u(k, shape, fan_in):
        bound = 1.0 / math.sqrt(fan_in)
        return jax.random.uniform(k, shape, jnp.float32, -bound, bound)

    return {
        "w1": u(ks[0], (3, 3, 32), 9),            # (kh, kw, cout), cin == 1
        "b1": u(ks[1], (32,), 9),
        "w2": u(ks[2], (3, 3, 32, 64), 9 * 32),   # (kh, kw, cin, cout)
        "b2": u(ks[3], (64,), 9 * 32),
        "wfc1": u(ks[4], (1600, 128), 1600),      # rows in torch (c, h, w) order
        "bfc1": u(ks[5], (128,), 1600),
        "wfc2": u(ks[6], (128, 10), 128),
        "bfc2": u(ks[7], (10,), 128),
    }


def pack_params(raw):
    """Build the banded / lane-tiled kernel weights once at init time.

    conv1:  W1[a, j+d, half*512 + v*32 + c]        = w1[a, d, c],   j  = 2v + half
    conv2:  W2[a, (j2+d)*32 + c, half*384+n*64+c2] = w2[a, d, c, c2], j2 = 2n + half
    fc1:    WF1[m, n*64 + c2, :] = wfc1[c2*25 + m*5 + n, :]   (NCHW flatten folded)
    fc2:    columns zero-padded 10 -> 128 so the output store is unmasked.
    NOTE: this only works for 28x28 inputs / floor-mode pooling (conv2 col/row
    10 is deliberately never mapped because pool2 discards it).
    """
    w1 = np.asarray(raw["w1"], np.float32)
    b1 = np.asarray(raw["b1"], np.float32)
    w2 = np.asarray(raw["w2"], np.float32)
    b2 = np.asarray(raw["b2"], np.float32)
    wfc1 = np.asarray(raw["wfc1"], np.float32)
    bfc1 = np.asarray(raw["bfc1"], np.float32)
    wfc2 = np.asarray(raw["wfc2"], np.float32)
    bfc2 = np.asarray(raw["bfc2"], np.float32)

    W1 = np.zeros((3, 28, 1024), np.float32)
    for a in range(3):
        for v in range(13):
            for half in range(2):
                j = 2 * v + half
                for d in range(3):
                    W1[a, j + d,
                       half * 512 + v * 32: half * 512 + (v + 1) * 32] = w1[a, d]
    B1 = np.zeros((1, 512), np.float32)
    for v in range(13):
        B1[0, v * 32:(v + 1) * 32] = b1

    W2 = np.zeros((3, 512, 768), np.float32)
    for a in range(3):
        for n in range(5):
            for half in range(2):
                j2 = 2 * n + half
                for d in range(3):
                    v = j2 + d
                    W2[a, v * 32:(v + 1) * 32,
                       half * 384 + n * 64: half * 384 + (n + 1) * 64] = w2[a, d]
    B2 = np.zeros((1, 384), np.float32)
    for n in range(5):
        B2[0, n * 64:(n + 1) * 64] = b2

    WF1 = np.zeros((5, 384, 128), np.float32)
    wfc1_r = wfc1.reshape(64, 5, 5, 128)            # (c2, m, n, out)
    for m in range(5):
        for n in range(5):
            WF1[m, n * 64:(n + 1) * 64, :] = wfc1_r[:, m, n, :]
    BF1 = bfc1.reshape(1, 128)

    WF2 = np.zeros((128, 128), np.float32)
    WF2[:, :10] = wfc2
    BF2 = np.zeros((1, 128), np.float32)
    BF2[0, :10] = bfc2

    return {k: jnp.asarray(v) for k, v in
            dict(w1=W1, b1=B1, w2=W2, b2=B2,
                 wfc1=WF1, bfc1=BF1, wfc2=WF2, bfc2=BF2).items()}


# ------------------------------ validation --------------------------------- #

@jax.jit
def reference_forward(x_nchw, raw):
    """Pure-JAX/XLA reference with identical semantics."""
    B = x_nchw.shape[0]
    x = jnp.transpose(x_nchw, (0, 2, 3, 1))                       # NHWC
    dn = ("NHWC", "HWIO", "NHWC")
    w1 = raw["w1"].reshape(3, 3, 1, 32)
    y = lax.conv_general_dilated(x, w1, (1, 1), "VALID", dimension_numbers=dn)
    y = jnp.maximum(y + raw["b1"], 0.0)
    y = lax.reduce_window(y, -jnp.inf, lax.max, (1, 2, 2, 1), (1, 2, 2, 1), "VALID")
    y = lax.conv_general_dilated(y, raw["w2"], (1, 1), "VALID", dimension_numbers=dn)
    y = jnp.maximum(y + raw["b2"], 0.0)
    y = lax.reduce_window(y, -jnp.inf, lax.max, (1, 2, 2, 1), (1, 2, 2, 1), "VALID")
    y = jnp.transpose(y, (0, 3, 1, 2)).reshape(B, 64 * 5 * 5)     # torch NCHW flatten
    y = jnp.maximum(y @ raw["wfc1"] + raw["bfc1"], 0.0)
    return y @ raw["wfc2"] + raw["bfc2"]


if __name__ == "__main__":
    key = jax.random.PRNGKey(0)
    k_x, k_p = jax.random.split(key)
    B = 12                                         # exercises batch padding (12 -> 16)
    x = jax.random.normal(k_x, (B, 1, 28, 28), jnp.float32)       # NCHW like PyTorch
    raw = init_params(k_p)
    packed = pack_params(raw)

    out = simple_cnn_forward(x, packed, tb=8)      # grid=(2,): two TB=8 steps
    out = jax.block_until_ready(out)
    assert out.shape == (B, 10) and out.dtype == jnp.float32

    ref = jax.block_until_ready(reference_forward(x, raw))
    max_err = float(jnp.max(jnp.abs(out - ref)))
    assert bool(jnp.allclose(out, ref, rtol=5e-2, atol=5e-2)), (
        f"kernel/reference mismatch: max_err={max_err}")
    print("KERNEL_OK")
</pallas_src>

<mosaic_0001>
module attributes {stable_mosaic.version = 11 : i64} {
  func.func @_simple_cnn_kernel(%arg0: i32, %arg1: memref<28x8x28xf32, #tpu.memory_space<vmem>>, %arg2: memref<3x28x1024xf32, #tpu.memory_space<vmem>>, %arg3: memref<1x512xf32, #tpu.memory_space<vmem>>, %arg4: memref<3x512x768xf32, #tpu.memory_space<vmem>>, %arg5: memref<1x384xf32, #tpu.memory_space<vmem>>, %arg6: memref<5x384x128xf32, #tpu.memory_space<vmem>>, %arg7: memref<1x128xf32, #tpu.memory_space<vmem>>, %arg8: memref<128x128xf32, #tpu.memory_space<vmem>>, %arg9: memref<1x128xf32, #tpu.memory_space<vmem>>, %arg10: memref<8x128xf32, #tpu.memory_space<vmem>>) attributes {dimension_semantics = [#tpu.dimension_semantics<parallel>], iteration_bounds = array<i64: 2>, scalar_prefetch = 0 : i64, scratch_operands = 0 : i64, tpu.core_type = #tpu.core_type<tc>, window_params = [{transform_indices = @transform_0, window_bounds = array<i64: 28, 8, 28>}, {pipeline_mode = #tpu.pipeline_mode<synchronous>, transform_indices = @transform_1, window_bounds = array<i64: 3, 28, 1024>}, {pipeline_mode = #tpu.pipeline_mode<synchronous>, transform_indices = @transform_2, window_bounds = array<i64: 1, 512>}, {pipeline_mode = #tpu.pipeline_mode<synchronous>, transform_indices = @transform_3, window_bounds = array<i64: 3, 512, 768>}, {pipeline_mode = #tpu.pipeline_mode<synchronous>, transform_indices = @transform_4, window_bounds = array<i64: 1, 384>}, {pipeline_mode = #tpu.pipeline_mode<synchronous>, transform_indices = @transform_5, window_bounds = array<i64: 5, 384, 128>}, {pipeline_mode = #tpu.pipeline_mode<synchronous>, transform_indices = @transform_6, window_bounds = array<i64: 1, 128>}, {pipeline_mode = #tpu.pipeline_mode<synchronous>, transform_indices = @transform_7, window_bounds = array<i64: 128, 128>}, {pipeline_mode = #tpu.pipeline_mode<synchronous>, transform_indices = @transform_8, window_bounds = array<i64: 1, 128>}, {transform_indices = @transform_9, window_bounds = array<i64: 8, 128>}]} {
    %c0 = arith.constant 0 : index
    %c0_0 = arith.constant 0 : index
    %c0_1 = arith.constant 0 : index
    %0 = vector.load %arg1[%c0, %c0_0, %c0_1] : memref<28x8x28xf32, #tpu.memory_space<vmem>>, vector<26x8x28xf32>
    %1 = vector.shape_cast %0 : vector<26x8x28xf32> to vector<208x28xf32>
    %c0_2 = arith.constant 0 : index
    %c0_3 = arith.constant 0 : index
    %c0_4 = arith.constant 0 : index
    %2 = vector.load %arg2[%c0_2, %c0_3, %c0_4] : memref<3x28x1024xf32, #tpu.memory_space<vmem>>, vector<1x28x1024xf32>
    %3 = vector.shape_cast %2 : vector<1x28x1024xf32> to vector<28x1024xf32>
    %cst = arith.constant dense<0.000000e+00> : vector<208x1024xf32>
    %4 = tpu.matmul %1, %3, %cst {dimension_numbers = #tpu.dot_dimension_numbers<[1], [0], [0], [1], [0, 0, 1, 1], [], []>} : vector<208x28xf32>, vector<28x1024xf32>, vector<208x1024xf32> -> vector<208x1024xf32>
    %c1 = arith.constant 1 : index
    %c0_5 = arith.constant 0 : index
    %c0_6 = arith.constant 0 : index
    %5 = vector.load %arg1[%c1, %c0_5, %c0_6] : memref<28x8x28xf32, #tpu.memory_space<vmem>>, vector<26x8x28xf32>
    %6 = vector.shape_cast %5 : vector<26x8x28xf32> to vector<208x28xf32>
    %c1_7 = arith.constant 1 : index
    %c0_8 = arith.constant 0 : index
    %c0_9 = arith.constant 0 : index
    %7 = vector.load %arg2[%c1_7, %c0_8, %c0_9] : memref<3x28x1024xf32, #tpu.memory_space<vmem>>, vector<1x28x1024xf32>
    %8 = vector.shape_cast %7 : vector<1x28x1024xf32> to vector<28x1024xf32>
    %cst_10 = arith.constant dense<0.000000e+00> : vector<208x1024xf32>
    %9 = tpu.matmul %6, %8, %cst_10 {dimension_numbers = #tpu.dot_dimension_numbers<[1], [0], [0], [1], [0, 0, 1, 1], [], []>} : vector<208x28xf32>, vector<28x1024xf32>, vector<208x1024xf32> -> vector<208x1024xf32>
    %10 = arith.addf %4, %9 : vector<208x1024xf32>
    %c2 = arith.constant 2 : index
    %c0_11 = arith.constant 0 : index
    %c0_12 = arith.constant 0 : index
    %11 = vector.load %arg1[%c2, %c0_11, %c0_12] : memref<28x8x28xf32, #tpu.memory_space<vmem>>, vector<26x8x28xf32>
    %12 = vector.shape_cast %11 : vector<26x8x28xf32> to vector<208x28xf32>
    %c2_13 = arith.constant 2 : index
    %c0_14 = arith.constant 0 : index
    %c0_15 = arith.constant 0 : index
    %13 = vector.load %arg2[%c2_13, %c0_14, %c0_15] : memref<3x28x1024xf32, #tpu.memory_space<vmem>>, vector<1x28x1024xf32>
    %14 = vector.shape_cast %13 : vector<1x28x1024xf32> to vector<28x1024xf32>
    %cst_16 = arith.constant dense<0.000000e+00> : vector<208x1024xf32>
    %15 = tpu.matmul %12, %14, %cst_16 {dimension_numbers = #tpu.dot_dimension_numbers<[1], [0], [0], [1], [0, 0, 1, 1], [], []>} : vector<208x28xf32>, vector<28x1024xf32>, vector<208x1024xf32> -> vector<208x1024xf32>
    %16 = arith.addf %10, %15 : vector<208x1024xf32>
    %17 = vector.extract_strided_slice %16 {offsets = [0, 0], sizes = [208, 512], strides = [1, 1]} : vector<208x1024xf32> to vector<208x512xf32>
    %18 = vector.extract_strided_slice %16 {offsets = [0, 512], sizes = [208, 512], strides = [1, 1]} : vector<208x1024xf32> to vector<208x512xf32>
    %19 = arith.maximumf %17, %18 : vector<208x512xf32>
    %20 = vector.shape_cast %19 : vector<208x512xf32> to vector<13x2x8x512xf32>
    %21 = vector.extract_strided_slice %20 {offsets = [0, 0, 0, 0], sizes = [13, 1, 8, 512], strides = [1, 1, 1, 1]} : vector<13x2x8x512xf32> to vector<13x1x8x512xf32>
    %22 = vector.shape_cast %21 : vector<13x1x8x512xf32> to vector<13x8x512xf32>
    %23 = vector.extract_strided_slice %20 {offsets = [0, 1, 0, 0], sizes = [13, 1, 8, 512], strides = [1, 1, 1, 1]} : vector<13x2x8x512xf32> to vector<13x1x8x512xf32>
    %24 = vector.shape_cast %23 : vector<13x1x8x512xf32> to vector<13x8x512xf32>
    %25 = arith.maximumf %22, %24 : vector<13x8x512xf32>
    %c0_17 = arith.constant 0 : index
    %c0_18 = arith.constant 0 : index
    %26 = vector.load %arg3[%c0_17, %c0_18] : memref<1x512xf32, #tpu.memory_space<vmem>>, vector<1x512xf32>
    %27 = vector.shape_cast %26 : vector<1x512xf32> to vector<1x1x512xf32>
    %28 = vector.broadcast %27 : vector<1x1x512xf32> to vector<13x8x512xf32>
    %29 = arith.addf %25, %28 : vector<13x8x512xf32>
    %cst_19 = arith.constant 0.000000e+00 : f32
    %30 = vector.broadcast %cst_19 : f32 to vector<13x8x512xf32>
    %31 = arith.maximumf %29, %30 : vector<13x8x512xf32>
    %32 = vector.extract_strided_slice %31 {offsets = [0, 0, 0], sizes = [10, 8, 512], strides = [1, 1, 1]} : vector<13x8x512xf32> to vector<10x8x512xf32>
    %33 = vector.shape_cast %32 : vector<10x8x512xf32> to vector<80x512xf32>
    %c0_20 = arith.constant 0 : index
    %c0_21 = arith.constant 0 : index
    %c0_22 = arith.constant 0 : index
    %34 = vector.load %arg4[%c0_20, %c0_21, %c0_22] : memref<3x512x768xf32, #tpu.memory_space<vmem>>, vector<1x512x768xf32>
    %35 = vector.shape_cast %34 : vector<1x512x768xf32> to vector<512x768xf32>
    %cst_23 = arith.constant dense<0.000000e+00> : vector<80x768xf32>
    %36 = tpu.matmul %33, %35, %cst_23 {dimension_numbers = #tpu.dot_dimension_numbers<[1], [0], [0], [1], [0, 0, 1, 1], [], []>} : vector<80x512xf32>, vector<512x768xf32>, vector<80x768xf32> -> vector<80x768xf32>
    %37 = vector.extract_strided_slice %31 {offsets = [1, 0, 0], sizes = [10, 8, 512], strides = [1, 1, 1]} : vector<13x8x512xf32> to vector<10x8x512xf32>
    %38 = vector.shape_cast %37 : vector<10x8x512xf32> to vector<80x512xf32>
    %c1_24 = arith.constant 1 : index
    %c0_25 = arith.constant 0 : index
    %c0_26 = arith.constant 0 : index
    %39 = vector.load %arg4[%c1_24, %c0_25, %c0_26] : memref<3x512x768xf32, #tpu.memory_space<vmem>>, vector<1x512x768xf32>
    %40 = vector.shape_cast %39 : vector<1x512x768xf32> to vector<512x768xf32>
    %cst_27 = arith.constant dense<0.000000e+00> : vector<80x768xf32>
    %41 = tpu.matmul %38, %40, %cst_27 {dimension_numbers = #tpu.dot_dimension_numbers<[1], [0], [0], [1], [0, 0, 1, 1], [], []>} : vector<80x512xf32>, vector<512x768xf32>, vector<80x768xf32> -> vector<80x768xf32>
    %42 = arith.addf %36, %41 : vector<80x768xf32>
    %43 = vector.extract_strided_slice %31 {offsets = [2, 0, 0], sizes = [10, 8, 512], strides = [1, 1, 1]} : vector<13x8x512xf32> to vector<10x8x512xf32>
    %44 = vector.shape_cast %43 : vector<10x8x512xf32> to vector<80x512xf32>
    %c2_28 = arith.constant 2 : index
    %c0_29 = arith.constant 0 : index
    %c0_30 = arith.constant 0 : index
    %45 = vector.load %arg4[%c2_28, %c0_29, %c0_30] : memref<3x512x768xf32, #tpu.memory_space<vmem>>, vector<1x512x768xf32>
    %46 = vector.shape_cast %45 : vector<1x512x768xf32> to vector<512x768xf32>
    %cst_31 = arith.constant dense<0.000000e+00> : vector<80x768xf32>
    %47 = tpu.matmul %44, %46, %cst_31 {dimension_numbers = #tpu.dot_dimension_numbers<[1], [0], [0], [1], [0, 0, 1, 1], [], []>} : vector<80x512xf32>, vector<512x768xf32>, vector<80x768xf32> -> vector<80x768xf32>
    %48 = arith.addf %42, %47 : vector<80x768xf32>
    %49 = vector.extract_strided_slice %48 {offsets = [0, 0], sizes = [80, 384], strides = [1, 1]} : vector<80x768xf32> to vector<80x384xf32>
    %50 = vector.extract_strided_slice %48 {offsets = [0, 384], sizes = [80, 384], strides = [1, 1]} : vector<80x768xf32> to vector<80x384xf32>
    %51 = arith.maximumf %49, %50 : vector<80x384xf32>
    %52 = vector.shape_cast %51 : vector<80x384xf32> to vector<5x2x8x384xf32>
    %53 = vector.extract_strided_slice %52 {offsets = [0, 0, 0, 0], sizes = [5, 1, 8, 384], strides = [1, 1, 1, 1]} : vector<5x2x8x384xf32> to vector<5x1x8x384xf32>
    %54 = vector.shape_cast %53 : vector<5x1x8x384xf32> to vector<5x8x384xf32>
    %55 = vector.extract_strided_slice %52 {offsets = [0, 1, 0, 0], sizes = [5, 1, 8, 384], strides = [1, 1, 1, 1]} : vector<5x2x8x384xf32> to vector<5x1x8x384xf32>
    %56 = vector.shape_cast %55 : vector<5x1x8x384xf32> to vector<5x8x384xf32>
    %57 = arith.maximumf %54, %56 : vector<5x8x384xf32>
    %c0_32 = arith.constant 0 : index
    %c0_33 = arith.constant 0 : index
    %58 = vector.load %arg5[%c0_32, %c0_33] : memref<1x384xf32, #tpu.memory_space<vmem>>, vector<1x384xf32>
    %59 = vector.shape_cast %58 : vector<1x384xf32> to vector<1x1x384xf32>
    %60 = vector.broadcast %59 : vector<1x1x384xf32> to vector<5x8x384xf32>
    %61 = arith.addf %57, %60 : vector<5x8x384xf32>
    %cst_34 = arith.constant 0.000000e+00 : f32
    %62 = vector.broadcast %cst_34 : f32 to vector<5x8x384xf32>
    %63 = arith.maximumf %61, %62 : vector<5x8x384xf32>
    %64 = vector.extract_strided_slice %63 {offsets = [0, 0, 0], sizes = [1, 8, 384], strides = [1, 1, 1]} : vector<5x8x384xf32> to vector<1x8x384xf32>
    %65 = vector.shape_cast %64 : vector<1x8x384xf32> to vector<8x384xf32>
    %c0_35 = arith.constant 0 : index
    %c0_36 = arith.constant 0 : index
    %c0_37 = arith.constant 0 : index
    %66 = vector.load %arg6[%c0_35, %c0_36, %c0_37] : memref<5x384x128xf32, #tpu.memory_space<vmem>>, vector<1x384x128xf32>
    %67 = vector.shape_cast %66 : vector<1x384x128xf32> to vector<384x128xf32>
    %cst_38 = arith.constant dense<0.000000e+00> : vector<8x128xf32>
    %68 = tpu.matmul %65, %67, %cst_38 {dimension_numbers = #tpu.dot_dimension_numbers<[1], [0], [0], [1], [0, 0, 1, 1], [], []>} : vector<8x384xf32>, vector<384x128xf32>, vector<8x128xf32> -> vector<8x128xf32>
    %69 = vector.extract_strided_slice %63 {offsets = [1, 0, 0], sizes = [1, 8, 384], strides = [1, 1, 1]} : vector<5x8x384xf32> to vector<1x8x384xf32>
    %70 = vector.shape_cast %69 : vector<1x8x384xf32> to vector<8x384xf32>
    %c1_39 = arith.constant 1 : index
    %c0_40 = arith.constant 0 : index
    %c0_41 = arith.constant 0 : index
    %71 = vector.load %arg6[%c1_39, %c0_40, %c0_41] : memref<5x384x128xf32, #tpu.memory_space<vmem>>, vector<1x384x128xf32>
    %72 = vector.shape_cast %71 : vector<1x384x128xf32> to vector<384x128xf32>
    %cst_42 = arith.constant dense<0.000000e+00> : vector<8x128xf32>
    %73 = tpu.matmul %70, %72, %cst_42 {dimension_numbers = #tpu.dot_dimension_numbers<[1], [0], [0], [1], [0, 0, 1, 1], [], []>} : vector<8x384xf32>, vector<384x128xf32>, vector<8x128xf32> -> vector<8x128xf32>
    %74 = arith.addf %68, %73 : vector<8x128xf32>
    %75 = vector.extract_strided_slice %63 {offsets = [2, 0, 0], sizes = [1, 8, 384], strides = [1, 1, 1]} : vector<5x8x384xf32> to vector<1x8x384xf32>
    %76 = vector.shape_cast %75 : vector<1x8x384xf32> to vector<8x384xf32>
    %c2_43 = arith.constant 2 : index
    %c0_44 = arith.constant 0 : index
    %c0_45 = arith.constant 0 : index
    %77 = vector.load %arg6[%c2_43, %c0_44, %c0_45] : memref<5x384x128xf32, #tpu.memory_space<vmem>>, vector<1x384x128xf32>
    %78 = vector.shape_cast %77 : vector<1x384x128xf32> to vector<384x128xf32>
    %cst_46 = arith.constant dense<0.000000e+00> : vector<8x128xf32>
    %79 = tpu.matmul %76, %78, %cst_46 {dimension_numbers = #tpu.dot_dimension_numbers<[1], [0], [0], [1], [0, 0, 1, 1], [], []>} : vector<8x384xf32>, vector<384x128xf32>, vector<8x128xf32> -> vector<8x128xf32>
    %80 = arith.addf %74, %79 : vector<8x128xf32>
    %81 = vector.extract_strided_slice %63 {offsets = [3, 0, 0], sizes = [1, 8, 384], strides = [1, 1, 1]} : vector<5x8x384xf32> to vector<1x8x384xf32>
    %82 = vector.shape_cast %81 : vector<1x8x384xf32> to vector<8x384xf32>
    %c3 = arith.constant 3 : index
    %c0_47 = arith.constant 0 : index
    %c0_48 = arith.constant 0 : index
    %83 = vector.load %arg6[%c3, %c0_47, %c0_48] : memref<5x384x128xf32, #tpu.memory_space<vmem>>, vector<1x384x128xf32>
    %84 = vector.shape_cast %83 : vector<1x384x128xf32> to vector<384x128xf32>
    %cst_49 = arith.constant dense<0.000000e+00> : vector<8x128xf32>
    %85 = tpu.matmul %82, %84, %cst_49 {dimension_numbers = #tpu.dot_dimension_numbers<[1], [0], [0], [1], [0, 0, 1, 1], [], []>} : vector<8x384xf32>, vector<384x128xf32>, vector<8x128xf32> -> vector<8x128xf32>
    %86 = arith.addf %80, %85 : vector<8x128xf32>
    %87 = vector.extract_strided_slice %63 {offsets = [4, 0, 0], sizes = [1, 8, 384], strides = [1, 1, 1]} : vector<5x8x384xf32> to vector<1x8x384xf32>
    %88 = vector.shape_cast %87 : vector<1x8x384xf32> to vector<8x384xf32>
    %c4 = arith.constant 4 : index
    %c0_50 = arith.constant 0 : index
    %c0_51 = arith.constant 0 : index
    %89 = vector.load %arg6[%c4, %c0_50, %c0_51] : memref<5x384x128xf32, #tpu.memory_space<vmem>>, vector<1x384x128xf32>
    %90 = vector.shape_cast %89 : vector<1x384x128xf32> to vector<384x128xf32>
    %cst_52 = arith.constant dense<0.000000e+00> : vector<8x128xf32>
    %91 = tpu.matmul %88, %90, %cst_52 {dimension_numbers = #tpu.dot_dimension_numbers<[1], [0], [0], [1], [0, 0, 1, 1], [], []>} : vector<8x384xf32>, vector<384x128xf32>, vector<8x128xf32> -> vector<8x128xf32>
    %92 = arith.addf %86, %91 : vector<8x128xf32>
    %c0_53 = arith.constant 0 : index
    %c0_54 = arith.constant 0 : index
    %93 = vector.load %arg7[%c0_53, %c0_54] : memref<1x128xf32, #tpu.memory_space<vmem>>, vector<1x128xf32>
    %94 = vector.broadcast %93 : vector<1x128xf32> to vector<8x128xf32>
    %95 = arith.addf %92, %94 : vector<8x128xf32>
    %cst_55 = arith.constant 0.000000e+00 : f32
    %96 = vector.broadcast %cst_55 : f32 to vector<8x128xf32>
    %97 = arith.maximumf %95, %96 : vector<8x128xf32>
    %c0_56 = arith.constant 0 : index
    %c0_57 = arith.constant 0 : index
    %98 = vector.load %arg8[%c0_56, %c0_57] : memref<128x128xf32, #tpu.memory_space<vmem>>, vector<128x128xf32>
    %cst_58 = arith.constant dense<0.000000e+00> : vector<8x128xf32>
    %99 = tpu.matmul %97, %98, %cst_58 {dimension_numbers = #tpu.dot_dimension_numbers<[1], [0], [0], [1], [0, 0, 1, 1], [], []>} : vector<8x128xf32>, vector<128x128xf32>, vector<8x128xf32> -> vector<8x128xf32>
    %c0_59 = arith.constant 0 : index
    %c0_60 = arith.constant 0 : index
    %100 = vector.load %arg9[%c0_59, %c0_60] : memref<1x128xf32, #tpu.memory_space<vmem>>, vector<1x128xf32>
    %101 = vector.broadcast %100 : vector<1x128xf32> to vector<8x128xf32>
    %102 = arith.addf %99, %101 : vector<8x128xf32>
    %c0_61 = arith.constant 0 : index
    %c0_62 = arith.constant 0 : index
    %103 = vector.load %arg10[%c0_61, %c0_62] : memref<8x128xf32, #tpu.memory_space<vmem>>, vector<8x128xf32>
    tpu.vector_store %arg10[%c0_61, %c0_62], %102 {strides = array<i32>} : memref<8x128xf32, #tpu.memory_space<vmem>>, vector<8x128xf32>,
    return
  }
  func.func @transform_0(%arg0: i32) -> (i32, i32, i32) {
    %c0_i32 = arith.constant 0 : i32
    %c0_i32_0 = arith.constant 0 : i32
    %c0_i32_1 = arith.constant 0 : i32
    return %c0_i32, %arg0, %c0_i32_0 : i32, i32, i32
  }
  func.func @transform_1(%arg0: i32) -> (i32, i32, i32) {
    %c0_i32 = arith.constant 0 : i32
    %c0_i32_0 = arith.constant 0 : i32
    %c0_i32_1 = arith.constant 0 : i32
    %c0_i32_2 = arith.constant 0 : i32
    return %c0_i32, %c0_i32_0, %c0_i32_1 : i32, i32, i32
  }
  func.func @transform_2(%arg0: i32) -> (i32, i32) {
    %c0_i32 = arith.constant 0 : i32
    %c0_i32_0 = arith.constant 0 : i32
    %c0_i32_1 = arith.constant 0 : i32
    return %c0_i32, %c0_i32_0 : i32, i32
  }
  func.func @transform_3(%arg0: i32) -> (i32, i32, i32) {
    %c0_i32 = arith.constant 0 : i32
    %c0_i32_0 = arith.constant 0 : i32
    %c0_i32_1 = arith.constant 0 : i32
    %c0_i32_2 = arith.constant 0 : i32
    return %c0_i32, %c0_i32_0, %c0_i32_1 : i32, i32, i32
  }
  func.func @transform_4(%arg0: i32) -> (i32, i32) {
    %c0_i32 = arith.constant 0 : i32
    %c0_i32_0 = arith.constant 0 : i32
    %c0_i32_1 = arith.constant 0 : i32
    return %c0_i32, %c0_i32_0 : i32, i32
  }
  func.func @transform_5(%arg0: i32) -> (i32, i32, i32) {
    %c0_i32 = arith.constant 0 : i32
    %c0_i32_0 = arith.constant 0 : i32
    %c0_i32_1 = arith.constant 0 : i32
    %c0_i32_2 = arith.constant 0 : i32
    return %c0_i32, %c0_i32_0, %c0_i32_1 : i32, i32, i32
  }
  func.func @transform_6(%arg0: i32) -> (i32, i32) {
    %c0_i32 = arith.constant 0 : i32
    %c0_i32_0 = arith.constant 0 : i32
    %c0_i32_1 = arith.constant 0 : i32
    return %c0_i32, %c0_i32_0 : i32, i32
  }
  func.func @transform_7(%arg0: i32) -> (i32, i32) {
    %c0_i32 = arith.constant 0 : i32
    %c0_i32_0 = arith.constant 0 : i32
    %c0_i32_1 = arith.constant 0 : i32
    return %c0_i32, %c0_i32_0 : i32, i32
  }
  func.func @transform_8(%arg0: i32) -> (i32, i32) {
    %c0_i32 = arith.constant 0 : i32
    %c0_i32_0 = arith.constant 0 : i32
    %c0_i32_1 = arith.constant 0 : i32
    return %c0_i32, %c0_i32_0 : i32, i32
  }
  func.func @transform_9(%arg0: i32) -> (i32, i32) {
    %c0_i32 = arith.constant 0 : i32
    %c0_i32_0 = arith.constant 0 : i32
    return %arg0, %c0_i32 : i32, i32
  }
}

</mosaic_0001>

<bundles_post_ra>
// kernel: simple_cnn_forward.1
= control target key start
LH: loop header
LB: loop body
LE: loop exit
PB: predicated region body
PF: predicated region fallthrough
CT: control target
= control target key end

     0   :  { %s15256_s0 = inlined_call_operand.vmem [shape: f32[28,16,28], index: 0, kind: input, shape index: {}]   ;;  %s15257_s1 = inlined_call_operand.hbm [shape: f32[3,28,1024], index: 1, kind: input, shape index: {}]   ;;  %s15258_s2 = inlined_call_operand.hbm [shape: f32[1,512], index: 2, kind: input, shape index: {}]   ;;  %s15259_s3 = inlined_call_operand.hbm [shape: f32[3,512,768], index: 3, kind: input, shape index: {}]   ;;  %s15260_s4 = inlined_call_operand.hbm [shape: f32[1,384], index: 4, kind: input, shape index: {}]   ;;  %s15261_s5 = inlined_call_operand.hbm [shape: f32[5,384,128], index: 5, kind: input, shape index: {}]   ;;  %s15262_s6 = inlined_call_operand.hbm [shape: f32[1,128], index: 6, kind: input, shape index: {}]   ;;  %s15263_s7 = inlined_call_operand.hbm [shape: f32[128,128], index: 7, kind: input, shape index: {}]   ;;  %s15264_s8 = inlined_call_operand.hbm [shape: f32[1,128], index: 8, kind: input, shape index: {}]   ;;  %s15265_s9 = inlined_call_operand.hbm [shape: f32[16,128], index: 9, kind: output, shape index: {}]  }
   0x1   :  { %15331 = sst [smem:[#allocation81_spill]] %s15258_s2 }
   0x2   :  { %15332 = sst [smem:[#allocation82_spill]] %s15260_s4 }
   0x3   :  { %14 = vsyncpa [#allocation4], 0 }
   0x4   :  { %15 = vsyncpa [#allocation7], 0 }
   0x5   :  { %16 = vsyncpa [#allocation10], 0 }
   0x6   :  { %17 = vsyncpa [#allocation13], 0 }
   0x7   :  { %18 = vsyncpa [#allocation16], 0 }
   0x8   :  { %19 = vsyncpa [#allocation5], 0 }
   0x9   :  { %21 = vsyncpa [#allocation5 + $0x1], 0  ;;  %s12575_s30 = smov 0   ;;  %s12577_s10 = smov 0  }
   0xa   :  { %s12579_s11 = smov 0   ;;  %s12581_s12 = smov 0  }
   0xb LB: > { %15333 = sst [smem:[#allocation24_spill]] %s12492_s30  ;;  %s12596_s13 = sadd.s32 4294967295, %s12504_s12   ;;  %s12504_s12 = sphi %s12581_s12, %s15548_s12   ;;  %s12500_s11 = sphi %s12579_s11, %s15552_s11   ;;  %s12496_s10 = sphi %s12577_s10, %s15551_s10   ;;  %s12492_s30 = sphi %s12575_s30, %s15550_s30  }
   0xc   : > { %s8890_s14 = sadd.s32 4294967294, %s12504_s12   ;;  %s12600_s15 = sadd.s32 1, %s12504_s12  }
   0xd   : > { %15334 = sst [smem:[#allocation25_spill]] %s12600_s15  ;;  %s34_s16 = sadd.s32 1, %s12500_s11 }
   0xe   : > { %s31_s17 = ssub.s32 %s12504_s12, %s12600_s15  ;;  %p41_p0 = scmp.ne.s32.totalorder %s12500_s11, %s12496_s10 }
   0xf   : > { %p32_p1 = scmp.eq.s32.totalorder %s31_s17, 0  ;;  %p42_p2 = scmp.eq.s32.totalorder %s12504_s12, 0 }
  0x10   : > { %p239_p3 = scmp.eq.s32.totalorder %s12596_s13, 1  ;;  %p244_p4 = scmp.ne.s32.totalorder %s12496_s10, %s12492_s30 }
  0x11   : > { %s12612_s18 = scalar_select %p32_p1, %s12500_s11, %s34_s16  }
  0x12   : > { %p12614_p5 = por %p42_p2, %p41_p0  ;;  %p12618_p6 = por %p239_p3, %p41_p0 }
  0x13   : > { %15335 = sst [smem:[#allocation26_spill]] %s12612_s18  ;;  %p245_p7 = scmp.eq.s32.totalorder %s8890_s14, 1 }
  0x14   : > { %s15336_s19 = scalar_select %p12614_p5, 1, 0 }
  0x15   : > { %s15337_s20 = scalar_select %p12618_p6, 1, 0 }
  0x16   : > { %p8891_p8 = scmp.ge.s32.totalorder %s12504_s12, 1  ;;  %p252_p9 = scmp.lt.s32.totalorder %s12504_s12, 3 }
  0x17   : > { %p12624_p10 = por %p245_p7, %p244_p4  ;;  %p15268_p11 = scmp.eq.s32.totalorder %s12596_s13, 0 }
  0x18   : > { %p12629_p12 = pnand %p8891_p8, %p252_p9  ;;  %s12506_s23 = smov [#allocation6]  }
  0x19   : > { %s15338_s21 = scalar_select %p12624_p10, 1, 0 }
  0x1a   : > { %s15340_s22 = scalar_select %p12629_p12, 1, 0 }
  0x1b   : > { %15339 = sst [smem:[#allocation27_spill]] %s15338_s21  ;;  %s278_s24 = sshll.u32 %s12506_s23, 4  ;;  %s279_s24 = int_to_ptr.vmem [resolvable:$true] %s278_s24 }
  0x1c   : > { %p12093_p13 = pneg %p12629_p12  ;;  %s12507_s25 = smov [#allocation9]  }
  0x1d   : > { %s302_s26 = sshll.u32 %s12507_s25, 4  ;;  %s12508_s28 = smov [#allocation12]   ;;  %s12641_s26 = int_to_ptr.vmem [resolvable:$true] %s302_s26 }
  0x1e   : > { %p12637_p0 = pnand %p15268_p11, %p12093_p13  ;;  %s326_s29 = sshll.u32 %s12508_s28, 4  ;;  %s12643_s29 = int_to_ptr.vmem [resolvable:$true] %s326_s29 }
  0x1f   : > { %s15342_s2 = sld [smem:[#allocation81_spill]] }
  0x20   : > { %p12653_p2 = pneg %p12637_p0 }
  0x25   : > { %s12198_s17 = scalar_lea.hbm %s15342_s2, 64 }
  0x26   : > { %p12199_p1 = scmp.ne.s32.totalorder %s15342_s2, %s12198_s17  ;;  %p12205_p7 = scmp.lt.u32.totalorder %s12198_s17, %s15342_s2 }
  0x28   : > { %p12201_p3 = pnand %p12653_p2, %p12199_p1 }
  0x2a   : > { %p12202_p4 = pneg %p12201_p3 }
  0x2c   : > { %p12207_p8 = pnand %p12205_p7, %p12202_p4 }
  0x2e   : > { %12210 = shalt.err (!%p12207_p8)
}
  0x2f   : > { %s12211_s14 = scalar_lea.vmem %s279_s24, 64  ;;  %p12219_p10 = scmp.lt.s32.totalorder %s279_s24, %s279_s24 }
  0x30   : > { %p12212_p9 = scmp.ne.s32.totalorder %s279_s24, %s12211_s14  ;;  %p12220_p6 = scmp.lt.s32.totalorder %s12211_s14, %s12211_s14 }
  0x32   : > { %p12214_p13 = pnand %p12212_p9, %p12653_p2  ;;  %p12221_p12 = por %p12220_p6, %p12219_p10 }
  0x34   : > { %p12215_p11 = pneg %p12214_p13 }
  0x36   : > { %p12222_p5 = pnand %p12221_p12, %p12215_p11 }
  0x38   : > { %12225 = shalt.err (!%p12222_p5)
}
  0x39   : > { %12099 = dma.hbm_to_vmem [thread:$0]  (!%p12637_p0), %s15342_s2, 64, %s279_s24, [#allocation7]  }
  0x3a   : > { %s15344_s4 = sld [smem:[#allocation82_spill]] }
  0x40   : > { %s12226_s23 = scalar_lea.hbm %s15344_s4, 48 }
  0x41   : > { %p12227_p1 = scmp.ne.s32.totalorder %s15344_s4, %s12226_s23  ;;  %p12233_p5 = scmp.lt.u32.totalorder %s12226_s23, %s15344_s4 }
  0x43   : > { %p12229_p3 = pnand %p12227_p1, %p12653_p2 }
  0x45   : > { %p12230_p6 = pneg %p12229_p3 }
  0x47   : > { %p12235_p10 = pnand %p12233_p5, %p12230_p6 }
  0x49   : > { %12238 = shalt.err (!%p12235_p10)
}
  0x4a   : > { %s12239_s24 = scalar_lea.vmem %s12641_s26, 48  ;;  %s12246_s21 = scalar_lea.vmem %s12641_s26, 64 }
  0x4b   : > { %p12240_p11 = scmp.ne.s32.totalorder %s12641_s26, %s12239_s24  ;;  %p12247_p7 = scmp.lt.s32.totalorder %s12641_s26, %s12641_s26 }
  0x4c   : > { %p12248_p8 = scmp.lt.s32.totalorder %s12246_s21, %s12239_s24 }
  0x4d   : > { %p12242_p12 = pnand %p12240_p11, %p12653_p2 }
  0x4e   : > { %p12249_p9 = por %p12248_p8, %p12247_p7 }
  0x4f   : > { %p12243_p4 = pneg %p12242_p12 }
  0x51   : > { %p12250_p13 = pnand %p12249_p9, %p12243_p4 }
  0x53   : > { %12253 = shalt.err (!%p12250_p13)
}
  0x54   : > { %12105 = dma.hbm_to_vmem [thread:$0]  (!%p12637_p0), %s15344_s4, 48, %s12641_s26, [#allocation10]  }
  0x55   : > { %s12254_s17 = scalar_lea.hbm %s15262_s6, 16 }
  0x56   : > { %p12255_p1 = scmp.ne.s32.totalorder %s15262_s6, %s12254_s17  ;;  %p12261_p5 = scmp.lt.u32.totalorder %s12254_s17, %s15262_s6 }
  0x58   : > { %p12257_p3 = pnand %p12255_p1, %p12653_p2 }
  0x5a   : > { %p12258_p6 = pneg %p12257_p3 }
  0x5c   : > { %p12263_p10 = pnand %p12261_p5, %p12258_p6 }
  0x5e   : > { %12266 = shalt.err (!%p12263_p10)
}
  0x5f   : > { %s12267_s26 = scalar_lea.vmem %s12643_s29, 16  ;;  %s12274_s21 = scalar_lea.vmem %s12643_s29, 32 }
  0x60   : > { %p12268_p11 = scmp.ne.s32.totalorder %s12643_s29, %s12267_s26  ;;  %p12275_p7 = scmp.lt.s32.totalorder %s12643_s29, %s12643_s29 }
  0x61   : > { %p12276_p8 = scmp.lt.s32.totalorder %s12274_s21, %s12267_s26 }
  0x62   : > { %p12270_p12 = pnand %p12268_p11, %p12653_p2 }
  0x63   : > { %p12277_p9 = por %p12276_p8, %p12275_p7 }
  0x64   : > { %p12271_p4 = pneg %p12270_p12 }
  0x66   : > { %p12278_p13 = pnand %p12277_p9, %p12271_p4 }
  0x68   : > { %12281 = shalt.err (!%p12278_p13)
}
  0x69   : > { %12111 = dma.hbm_to_vmem [thread:$0]  (!%p12637_p0), %s15262_s6, 16, %s12643_s29, [#allocation13]  }
  0x6a   : > { %s12509_s16 = smov [#allocation3]   ;;  %s12282_s28 = scalar_lea.hbm %s15257_s1, 12288 }
  0x6b   : > { %s264_s15 = sshll.u32 %s12509_s16, 4  ;;  %p12283_p1 = scmp.ne.s32.totalorder %s15257_s1, %s12282_s28  ;;  %s265_s15 = int_to_ptr.vmem [resolvable:$true] %s264_s15 }
  0x6c   : > { %p12289_p5 = scmp.lt.u32.totalorder %s12282_s28, %s15257_s1 }
  0x6d   : > { %p12285_p3 = pnand %p12283_p1, %p12653_p2 }
  0x6f   : > { %p12286_p6 = pneg %p12285_p3 }
  0x71   : > { %p12291_p10 = pnand %p12289_p5, %p12286_p6 }
  0x73   : > { %12294 = shalt.err (!%p12291_p10)
}
  0x74   : > { %s12295_s29 = scalar_lea.vmem %s265_s15, 12288  ;;  %p12303_p7 = scmp.lt.s32.totalorder %s265_s15, %s265_s15 }
  0x75   : > { %p12296_p11 = scmp.ne.s32.totalorder %s265_s15, %s12295_s29  ;;  %p12304_p8 = scmp.lt.s32.totalorder %s12295_s29, %s12295_s29 }
  0x77   : > { %p12298_p12 = pnand %p12296_p11, %p12653_p2  ;;  %p12305_p9 = por %p12304_p8, %p12303_p7 }
  0x79   : > { %p12299_p4 = pneg %p12298_p12 }
  0x7b   : > { %p12306_p13 = pnand %p12305_p9, %p12299_p4 }
  0x7d   : > { %12309 = shalt.err (!%p12306_p13)
}
  0x7e   : > { %s12510_s30 = smov 1024   ;;  %s12511_s18 = smov 64  }
  0x7f   : > { %12096 = dma.hbm_to_vmem [thread:$0]  (!%p12637_p0), %s15257_s1, 12288, %s265_s15, [#allocation4], %s12510_s30, %s12510_s30, %s12511_s18  }
  0x80   : > { %s12512_s23 = smov [#allocation8]   ;;  %s12310_s26 = scalar_lea.hbm %s15259_s3, 147456 }
  0x81   : > { %s288_s28 = sshll.u32 %s12512_s23, 4  ;;  %p12311_p1 = scmp.ne.s32.totalorder %s15259_s3, %s12310_s26  ;;  %s289_s28 = int_to_ptr.vmem [resolvable:$true] %s288_s28 }
  0x82   : > { %p12317_p5 = scmp.lt.u32.totalorder %s12310_s26, %s15259_s3 }
  0x83   : > { %p12313_p3 = pnand %p12311_p1, %p12653_p2 }
  0x85   : > { %p12314_p6 = pneg %p12313_p3 }
  0x87   : > { %p12319_p10 = pnand %p12317_p5, %p12314_p6 }
  0x89   : > { %12322 = shalt.err (!%p12319_p10)
}
  0x8a   : > { %s12323_s15 = scalar_lea.vmem %s289_s28, 147456  ;;  %p12331_p7 = scmp.lt.s32.totalorder %s289_s28, %s289_s28 }
  0x8b   : > { %p12324_p11 = scmp.ne.s32.totalorder %s289_s28, %s12323_s15  ;;  %p12332_p8 = scmp.lt.s32.totalorder %s12323_s15, %s12323_s15 }
  0x8d   : > { %p12326_p12 = pnand %p12324_p11, %p12653_p2  ;;  %p12333_p9 = por %p12332_p8, %p12331_p7 }
  0x8f   : > { %p12327_p4 = pneg %p12326_p12 }
  0x91   : > { %p12334_p13 = pnand %p12333_p9, %p12327_p4 }
  0x93   : > { %12337 = shalt.err (!%p12334_p13)
}
  0x94   : > { %s12513_s30 = smov 768   ;;  %s12514_s18 = smov 48  }
  0x95   : > { %12102 = dma.hbm_to_vmem [thread:$0]  (!%p12637_p0), %s15259_s3, 147456, %s289_s28, [#allocation7], %s12513_s30, %s12513_s30, %s12514_s18  }
  0x96   : > { %s12515_s16 = smov [#allocation11]   ;;  %s12338_s24 = scalar_lea.hbm %s15261_s5, 30720 }
  0x97   : > { %s312_s17 = sshll.u32 %s12515_s16, 4  ;;  %p12339_p1 = scmp.ne.s32.totalorder %s15261_s5, %s12338_s24  ;;  %s313_s17 = int_to_ptr.vmem [resolvable:$true] %s312_s17 }
  0x98   : > { %p12345_p5 = scmp.lt.u32.totalorder %s12338_s24, %s15261_s5 }
  0x99   : > { %p12341_p3 = pnand %p12339_p1, %p12653_p2 }
  0x9b   : > { %p12342_p6 = pneg %p12341_p3 }
  0x9d   : > { %p12347_p10 = pnand %p12345_p5, %p12342_p6 }
  0x9f   : > { %12350 = shalt.err (!%p12347_p10)
}
  0xa0   : > { %s12351_s28 = scalar_lea.vmem %s313_s17, 30720  ;;  %p12359_p7 = scmp.lt.s32.totalorder %s313_s17, %s313_s17 }
  0xa1   : > { %p12352_p11 = scmp.ne.s32.totalorder %s313_s17, %s12351_s28  ;;  %p12360_p8 = scmp.lt.s32.totalorder %s12351_s28, %s12351_s28 }
  0xa3   : > { %p12354_p12 = pnand %p12352_p11, %p12653_p2  ;;  %p12361_p9 = por %p12360_p8, %p12359_p7 }
  0xa5   : > { %p12355_p4 = pneg %p12354_p12 }
  0xa7   : > { %p12362_p13 = pnand %p12361_p9, %p12355_p4 }
  0xa9   : > { %12365 = shalt.err (!%p12362_p13)
}
  0xaa   : > { %s12516_s30 = smov 128   ;;  %s12517_s18 = smov 8  }
  0xab   : > { %12108 = dma.hbm_to_vmem [thread:$0]  (!%p12637_p0), %s15261_s5, 30720, %s313_s17, [#allocation10], %s12516_s30, %s12516_s30, %s12517_s18  }
  0xac   : > { %s12518_s16 = smov [#allocation14]   ;;  %s12519_s14 = smov [#allocation15]  }
  0xad   : > { %s336_s23 = sshll.u32 %s12518_s16, 4  ;;  %s350_s24 = sshll.u32 %s12519_s14, 4  ;;  %s337_s23 = int_to_ptr.vmem [resolvable:$true] %s336_s23  ;;  %s12771_s24 = int_to_ptr.vmem [resolvable:$true] %s350_s24 }
  0xae   : > { %s12366_s29 = scalar_lea.hbm %s15263_s7, 2048 }
  0xaf   : > { %p12367_p1 = scmp.ne.s32.totalorder %s15263_s7, %s12366_s29  ;;  %p12373_p5 = scmp.lt.u32.totalorder %s12366_s29, %s15263_s7 }
  0xb1   : > { %p12369_p3 = pnand %p12367_p1, %p12653_p2 }
  0xb3   : > { %p12370_p6 = pneg %p12369_p3 }
  0xb5   : > { %p12375_p10 = pnand %p12373_p5, %p12370_p6 }
  0xb7   : > { %12378 = shalt.err (!%p12375_p10)
}
  0xb8   : > { %s12379_s4 = scalar_lea.vmem %s337_s23, 2048  ;;  %p12387_p7 = scmp.lt.s32.totalorder %s337_s23, %s337_s23 }
  0xb9   : > { %p12380_p11 = scmp.ne.s32.totalorder %s337_s23, %s12379_s4  ;;  %p12388_p8 = scmp.lt.s32.totalorder %s12379_s4, %s12379_s4 }
  0xbb   : > { %p12382_p12 = pnand %p12380_p11, %p12653_p2  ;;  %p12389_p9 = por %p12388_p8, %p12387_p7 }
  0xbd   : > { %p12383_p4 = pneg %p12382_p12 }
  0xbf   : > { %p12390_p13 = pnand %p12389_p9, %p12383_p4 }
  0xc1   : > { %12393 = shalt.err (!%p12390_p13)
}
  0xc2   : > { %12114 = dma.hbm_to_vmem [thread:$0]  (!%p12637_p0), %s15263_s7, 2048, %s337_s23, [#allocation13], %s12516_s30, %s12516_s30, %s12517_s18  }
  0xc3   : > { %s12394_s29 = scalar_lea.hbm %s15264_s8, 16 }
  0xc4   : > { %p12395_p1 = scmp.ne.s32.totalorder %s15264_s8, %s12394_s29  ;;  %p12401_p5 = scmp.lt.u32.totalorder %s12394_s29, %s15264_s8 }
  0xc6   : > { %p12397_p3 = pnand %p12395_p1, %p12653_p2 }
  0xc8   : > { %p12398_p6 = pneg %p12397_p3 }
  0xca   : > { %p12403_p10 = pnand %p12401_p5, %p12398_p6 }
  0xcc   : > { %12406 = shalt.err (!%p12403_p10)
}
  0xcd   : > { %s12407_s30 = scalar_lea.vmem %s12771_s24, 16  ;;  %s12414_s18 = scalar_lea.vmem %s12771_s24, 32 }
  0xce   : > { %p12408_p11 = scmp.ne.s32.totalorder %s12771_s24, %s12407_s30  ;;  %p12415_p7 = scmp.lt.s32.totalorder %s12771_s24, %s12771_s24 }
  0xcf   : > { %p12416_p8 = scmp.lt.s32.totalorder %s12414_s18, %s12407_s30 }
  0xd0   : > { %p12410_p12 = pnand %p12408_p11, %p12653_p2 }
  0xd1   : > { %p12417_p9 = por %p12416_p8, %p12415_p7 }
  0xd2   : > { %p12411_p4 = pneg %p12410_p12 }
  0xd4   : > { %p12418_p13 = pnand %p12417_p9, %p12411_p4 }
  0xd6   : > { %12421 = shalt.err (!%p12418_p13)
}
  0xd7   : > { %12117 = dma.hbm_to_vmem [thread:$0]  (!%p12637_p0), %s15264_s8, 16, %s12771_s24, [#allocation16]  }
  0xd8   : > { %p8900_p1 = scmp.ge.s32.totalorder %s12504_s12, 2 }
  0xd9   : > { %p15345_p2 = scmp.ne.s32.totalorder (!%p8900_p1), %s15336_s19, 0 }
  0xda   : > { %357 = sbr.rel (%p8900_p1) target bundleno = 243 (0xf3), region = 48 }
  0xe1   : > { %360 = sbr.rel (!%p15345_p2) target bundleno = 243 (0xf3), region = 52  ;;  %s362_s25 = sand.u32 (%p15345_p2), 1, %s12500_s11  }
  0xe2   : > { %s8901_s16 = sshll.u32 (%p15345_p2), %s12504_s12, 3  ;;  %s12057_s14 = smul.u32 (%p15345_p2), 224, %s362_s25 }
  0xe3   : > { %s12825_s21 = scalar_lea.vmem (%p15345_p2), %s15256_s0, %s8901_s16 }
  0xe4   : > { %v448_v0 = vld [vmem:[%s12825_s21] sm:$0xff] (%p15345_p2)  ;;  %v450_v1 = vld [vmem:[%s12825_s21 + $0x10] sm:$0xff] (%p15345_p2)  ;;  %s12833_s19 = scalar_lea.vmem (%p15345_p2), [#allocation2], %s12057_s14 }
  0xe5   : > { %v452_v2 = vld [vmem:[%s12825_s21 + $0x20] sm:$0xff] (%p15345_p2)  ;;  %v454_v3 = vld [vmem:[%s12825_s21 + $0x30] sm:$0xff] (%p15345_p2)  ;;  %449 = vst [vmem:[%s12833_s19] sm:$0xff] (%p15345_p2), %v448_v0  ;;  %451 = vst [vmem:[%s12833_s19 + $0x8] sm:$0xff] (%p15345_p2), %v450_v1 }
  0xe6   : > { %v456_v4 = vld [vmem:[%s12825_s21 + $0x40] sm:$0xff] (%p15345_p2)  ;;  %v458_v5 = vld [vmem:[%s12825_s21 + $0x50] sm:$0xff] (%p15345_p2)  ;;  %453 = vst [vmem:[%s12833_s19 + $0x10] sm:$0xff] (%p15345_p2), %v452_v2  ;;  %455 = vst [vmem:[%s12833_s19 + $0x18] sm:$0xff] (%p15345_p2), %v454_v3 }
  0xe7   : > { %457 = vst [vmem:[%s12833_s19 + $0x20] sm:$0xff] (%p15345_p2), %v456_v4  ;;  %459 = vst [vmem:[%s12833_s19 + $0x28] sm:$0xff] (%p15345_p2), %v458_v5  ;;  %v460_v6 = vld [vmem:[%s12825_s21 + $0x60] sm:$0xff] (%p15345_p2)  ;;  %v462_v7 = vld [vmem:[%s12825_s21 + $0x70] sm:$0xff] (%p15345_p2) }
  0xe8   : > { %v464_v8 = vld [vmem:[%s12825_s21 + $0x80] sm:$0xff]  ;;  %461 = vst [vmem:[%s12833_s19 + $0x30] sm:$0xff] %v460_v6  ;;  %463 = vst [vmem:[%s12833_s19 + $0x38] sm:$0xff] %v462_v7  ;;  %v466_v9 = vld [vmem:[%s12825_s21 + $0x90] sm:$0xff] }
  0xe9   : > { %465 = vst [vmem:[%s12833_s19 + $0x40] sm:$0xff] %v464_v8  ;;  %v468_v10 = vld [vmem:[%s12825_s21 + $0xa0] sm:$0xff]  ;;  %v470_v11 = vld [vmem:[%s12825_s21 + $0xb0] sm:$0xff]  ;;  %467 = vst [vmem:[%s12833_s19 + $0x48] sm:$0xff] %v466_v9 }
  0xea   : > { %469 = vst [vmem:[%s12833_s19 + $0x50] sm:$0xff] %v468_v10  ;;  %471 = vst [vmem:[%s12833_s19 + $0x58] sm:$0xff] %v470_v11  ;;  %v472_v12 = vld [vmem:[%s12825_s21 + $0xc0] sm:$0xff]  ;;  %v474_v13 = vld [vmem:[%s12825_s21 + $0xd0] sm:$0xff] }
  0xeb   : > { %v476_v14 = vld [vmem:[%s12825_s21 + $0xe0] sm:$0xff]  ;;  %473 = vst [vmem:[%s12833_s19 + $0x60] sm:$0xff] %v472_v12  ;;  %475 = vst [vmem:[%s12833_s19 + $0x68] sm:$0xff] %v474_v13  ;;  %v478_v15 = vld [vmem:[%s12825_s21 + $0xf0] sm:$0xff] }
  0xec   : > { %477 = vst [vmem:[%s12833_s19 + $0x70] sm:$0xff] %v476_v14  ;;  %v480_v16 = vld [vmem:[%s12825_s21 + $0x100] sm:$0xff]  ;;  %v482_v17 = vld [vmem:[%s12825_s21 + $0x110] sm:$0xff]  ;;  %479 = vst [vmem:[%s12833_s19 + $0x78] sm:$0xff] %v478_v15 }
  0xed   : > { %481 = vst [vmem:[%s12833_s19 + $0x80] sm:$0xff] %v480_v16  ;;  %483 = vst [vmem:[%s12833_s19 + $0x88] sm:$0xff] %v482_v17  ;;  %v484_v18 = vld [vmem:[%s12825_s21 + $0x120] sm:$0xff]  ;;  %v486_v19 = vld [vmem:[%s12825_s21 + $0x130] sm:$0xff] }
  0xee   : > { %v488_v20 = vld [vmem:[%s12825_s21 + $0x140] sm:$0xff]  ;;  %485 = vst [vmem:[%s12833_s19 + $0x90] sm:$0xff] %v484_v18  ;;  %487 = vst [vmem:[%s12833_s19 + $0x98] sm:$0xff] %v486_v19  ;;  %v490_v21 = vld [vmem:[%s12825_s21 + $0x150] sm:$0xff] }
  0xef   : > { %489 = vst [vmem:[%s12833_s19 + $0xa0] sm:$0xff] %v488_v20  ;;  %v492_v22 = vld [vmem:[%s12825_s21 + $0x160] sm:$0xff]  ;;  %v494_v23 = vld [vmem:[%s12825_s21 + $0x170] sm:$0xff]  ;;  %491 = vst [vmem:[%s12833_s19 + $0xa8] sm:$0xff] %v490_v21 }
  0xf0   : > { %493 = vst [vmem:[%s12833_s19 + $0xb0] sm:$0xff] %v492_v22  ;;  %495 = vst [vmem:[%s12833_s19 + $0xb8] sm:$0xff] %v494_v23  ;;  %v496_v24 = vld [vmem:[%s12825_s21 + $0x180] sm:$0xff]  ;;  %v498_v25 = vld [vmem:[%s12825_s21 + $0x190] sm:$0xff] }
  0xf1   : > { %v500_v26 = vld [vmem:[%s12825_s21 + $0x1a0] sm:$0xff]  ;;  %497 = vst [vmem:[%s12833_s19 + $0xc0] sm:$0xff] %v496_v24  ;;  %499 = vst [vmem:[%s12833_s19 + $0xc8] sm:$0xff] %v498_v25  ;;  %v502_v27 = vld [vmem:[%s12825_s21 + $0x1b0] sm:$0xff] }
  0xf2   : > { %501 = vst [vmem:[%s12833_s19 + $0xd0] sm:$0xff] %v500_v26  ;;  %503 = vst [vmem:[%s12833_s19 + $0xd8] sm:$0xff] %v502_v27 }
  0xf3 PF: > { %p15346_p0 = scmp.ne.s32.totalorder %s15340_s22, 0 }
  0xf5   : > { %512 = sbr.rel (%p15346_p0) target bundleno = 2695 (0xa87), region = 90 }
  0xfc   : > { %s12888_s24 = sand.u32 1, %s12496_s10   ;;  %p15347_p3 = scmp.eq.s32.totalorder %s12596_s13, 0 }
  0xfd   : > { %s12058_s29 = smul.u32 224, %s12888_s24 }
  0xff   : > { %s12891_s15 = scalar_lea.vmem [#allocation2], %s12058_s29 }
 0x100   : > { %12467 = dma.done.wait (%p15347_p3), [#allocation4], 12288   ;;  %p15348_p6 = pmov %p15347_p3 }
 0x101   : > { %p15349_p5 = pmov %p15347_p3 }
 0x102   : > { %12469 = vsyncadd (%p15348_p6), [#allocation4], 4294955008 }
 0x103   : > { %12471 = dma.done.wait (%p15349_p5), [#allocation7], 147520   ;;  %p15350_p10 = pmov %p15347_p3 }
 0x104   : > { %p15351_p11 = pmov %p15347_p3 }
 0x105   : > { %12473 = vsyncadd (%p15350_p10), [#allocation7], 4294819776 }
 0x106   : > { %12475 = dma.done.wait (%p15351_p11), [#allocation10], 30768   ;;  %p15352_p12 = pmov %p15347_p3 }
 0x107   : > { %p15353_p4 = pmov %p15347_p3 }
 0x108   : > { %12477 = vsyncadd (%p15352_p12), [#allocation10], 4294936528 }
 0x109   : > { %12479 = dma.done.wait (%p15353_p4), [#allocation13], 2064   ;;  %p15354_p7 = pmov %p15347_p3 }
 0x10a   : > { %p15355_p8 = pmov %p15347_p3 }
 0x10b   : > { %12481 = vsyncadd (%p15354_p7), [#allocation13], 4294965232 }
 0x10c   : > { %12483 = dma.done.wait (%p15355_p8), [#allocation16], 16   ;;  %p15356_p9 = pmov %p15347_p3 }
 0x10d   : > { %v15273_v28 = vmov 0.0   ;;  %vm779_vm0 = vcmask 1043456   ;;  %v669_v29 = vld [vmem:[#allocation3 + $0x108] sm:$0xff]  ;;  %v668_v31 = vld [vmem:[#allocation3 + $0x100] sm:$0xff]  ;;  %vm12521_vm1 = vmmov 1   ;;  %v671_v47 = vld [vmem:[#allocation3 + $0x118] sm:$0xff] }
 0x10e   : > { %12485 = vsyncadd (%p15356_p9), [#allocation16], 4294967280  ;;  %868 = vmatprep.mubr.f32.mxu0 %v15273_v28  ;;  %982 = vmatprep.mubr.f32.mxu1 %v15273_v28  ;;  %v677_v30 = vld [vmem:[#allocation3 + $0x148] sm:$0xff]  ;;  %v676_v33 = vld [vmem:[#allocation3 + $0x140] sm:$0xff]  ;;  %vm700_vm3 = vcmask 228352   ;;  %vm12523_vm4 = vmmov 0  }
 0x10f   : > { %v9793_v32 = vpack.c.bf16 %v677_v30, %v669_v29  ;;  %v685_v34 = vld [vmem:[#allocation3 + $0x188] sm:$0xff]  ;;  %v9795_v36 = vpack.c.bf16 %v676_v33, %v668_v31  ;;  %vm12915_vm2 = vmpackc.low %vm779_vm0, %vm12521_vm1  ;;  %v684_v39 = vld [vmem:[#allocation3 + $0x180] sm:$0xff]  ;;  %s8911_s22 = sshll.u32 %s12888_s24, 3  ;;  %s9303_s28 = sshll.u32 %s12596_s13, 7 }
 0x110   : > { %v693_v35 = vld [vmem:[#allocation3 + $0x1c8] sm:$0xf]  ;;  %v692_v40 = vld [vmem:[#allocation3 + $0x1c0] sm:$0xf]  ;;  %v679_v48 = vld [vmem:[#allocation3 + $0x158] sm:$0xff]  ;;  %s581_s2 = scalar_lea.vmem [#allocation17], %s8911_s22  ;;  %s15212_s23 = scalar_lea.hbm %s15265_s9, %s9303_s28 }
 0x111   : > { %v9797_v37 = vpack.c.bf16 %v693_v35, %v685_v34  ;;  %9794 = vmatprep.subr.bf16.mxu0 %v9793_v32  ;;  %11369 = vmatprep.subr.bf16.mxu1 %v9793_v32  ;;  %v673_v41 = vld [vmem:[#allocation3 + $0x128] sm:$0xff]  ;;  %v9800_v43 = vpack.c.bf16 %v692_v40, %v684_v39  ;;  %v672_v45 = vld [vmem:[#allocation3 + $0x120] sm:$0xff]  ;;  %v670_v49 = vld [vmem:[#allocation3 + $0x110] sm:$0xff]  ;;  %v9803_v50 = vpack.c.bf16 %v679_v48, %v671_v47  ;;  %s8746_s17 = sshll.u32 %s581_s2, 4  ;;  %s8733_s4 = scalar_lea.sflag [#allocation5], %s12888_s24  ;;  %s15214_s17 = int_to_ptr.vmem [resolvable:$true] %s8746_s17 }
 0x112   : > { %v681_v42 = vld [vmem:[#allocation3 + $0x168] sm:$0xff]  ;;  %9796 = vmatpush1.bf16.msra.mxu0 %v9795_v36  ;;  %11371 = vmatpush1.bf16.msra.mxu1 %v9795_v36  ;;  %v680_v46 = vld [vmem:[#allocation3 + $0x160] sm:$0xff]  ;;  %v678_v51 = vld [vmem:[#allocation3 + $0x150] sm:$0xff]  ;;  %s12422_s25 = scalar_lea.vmem %s15214_s17, 128  ;;  %p15544_p2 = scmp.ne.s32.totalorder %s15337_s20, 0 }
 0x113   : > { %9799 = vmatprep.subr.msk.bf16.mxu0 %vm12915_vm2, %v9797_v37  ;;  %11370 = vmatprep.subr.msk.bf16.mxu1 %vm12915_vm2, %v9797_v37  ;;  %v9813_v44 = vpack.c.bf16 %v681_v42, %v673_v41  ;;  %v12928_v52 = vld [vmem:[%s12891_s15 + $0x8] sm:$0xff]  ;;  %v12931_v53 = vld [vmem:[%s12891_s15 + $0xa0] sm:$0xff]  ;;  %v9815_v54 = vpack.c.bf16 %v680_v46, %v672_v45  ;;  %v9805_v55 = vpack.c.bf16 %v678_v51, %v670_v49  ;;  %v687_v56 = vld [vmem:[#allocation3 + $0x198] sm:$0xff]  ;;  %p12423_p13 = scmp.ne.s32.totalorder %s15214_s17, %s12422_s25  ;;  %s12524_s13 = smov [#allocation17]  }
 0x114   : > { %v695_v57 = vld [vmem:[#allocation3 + $0x1d8] sm:$0xf]  ;;  %v686_v59 = vld [vmem:[#allocation3 + $0x190] sm:$0xff]  ;;  %v12942_v62 = vld [vmem:[%s12891_s15 + $0xa8] sm:$0xff]  ;;  %s12426_s16 = sshll.u32 %s12524_s13, 4  ;;  %s12427_s16 = int_to_ptr.vmem [resolvable:$false] %s12426_s16 }
 0x115   : > { %v9807_v58 = vpack.c.bf16 %v695_v57, %v687_v56  ;;  %v694_v60 = vld [vmem:[#allocation3 + $0x1d0] sm:$0xf]  ;;  %v675_v63 = vld [vmem:[#allocation3 + $0x138] sm:$0xff]  ;;  %v689_v2 = vld [vmem:[#allocation3 + $0x1a8] sm:$0xff]  ;;  %p12424_p0 = pnand %p12423_p13, %p15544_p2  ;;  %s12428_s14 = scalar_lea.vmem %s12427_s16, 256 }
 0x116   : > { %9802 = vmatpush1.bf16.msk.msra.mxu0 %vm12915_vm2, %v9800_v43  ;;  %11372 = vmatpush1.bf16.msk.msra.mxu1 %vm12915_vm2, %v9800_v43  ;;  %v12938_v61 = vld [vmem:[%s12891_s15 + $0x10] sm:$0xff]  ;;  %v683_v0 = vld [vmem:[#allocation3 + $0x178] sm:$0xff]  ;;  %v9810_v1 = vpack.c.bf16 %v694_v60, %v686_v59  ;;  %v697_v4 = vld [vmem:[#allocation3 + $0x1e8] sm:$0xf]  ;;  %p12429_p6 = scmp.lt.s32.totalorder %s15214_s17, %s12427_s16  ;;  %p12430_p5 = scmp.lt.s32.totalorder %s12428_s14, %s12422_s25 }
 0x117   : > { %9814 = vmatprep.subr.bf16.mxu0 %v9813_v44  ;;  %9804 = vmatprep.subr.bf16.mxu1 %v9803_v50  ;;  %v9823_v3 = vpack.c.bf16 %v683_v0, %v675_v63  ;;  %v688_v5 = vld [vmem:[#allocation3 + $0x1a0] sm:$0xff]  ;;  %v9817_v7 = vpack.c.bf16 %v697_v4, %v689_v2  ;;  %v12954_v9 = vld [vmem:[%s12891_s15 + $0x18] sm:$0xff]  ;;  %v12957_v10 = vld [vmem:[%s12891_s15 + $0xb0] sm:$0xff]  ;;  %p12425_p3 = pneg %p12424_p0 }
 0x118   : > { %v696_v6 = vld [vmem:[#allocation3 + $0x1e0] sm:$0xf]  ;;  %v609_v11 = vld [vmem:[#allocation3 + $0x8] sm:$0xff]  ;;  %v12975_v15 = vld [vmem:[%s12891_s15 + $0xb8] sm:$0xff]  ;;  %p12431_p10 = por %p12430_p5, %p12429_p6 }
 0x119   : > { %8940 = vmatmul.mubr.msk.f32.vlgmr.msra.gmra.mrb[0].mxu0 %vm700_vm3, %v12928_v52  ;;  %8959 = vmatmul.mubr.msk.f32.vlgmr.msra.gmra.mrb[0].mxu1 %vm700_vm3, %v12931_v53  ;;  %v9820_v8 = vpack.c.bf16 %v696_v6, %v688_v5  ;;  %v617_v12 = vld [vmem:[#allocation3 + $0x48] sm:$0xff]  ;;  %v12972_v14 = vld [vmem:[%s12891_s15 + $0x20] sm:$0xff]  ;;  %v12996_v18 = vld [vmem:[%s12891_s15 + $0x30] sm:$0xff] }
 0x11a   : > { %9816 = vmatpush1.bf16.msra.mxu0 %v9815_v54  ;;  %874 = vmatprep.mubr.f32.mxu0 %v15273_v28  ;;  %v9833_v13 = vpack.c.bf16 %v617_v12, %v609_v11  ;;  %v12984_v16 = vld [vmem:[%s12891_s15 + $0x28] sm:$0xff]  ;;  %v12987_v17 = vld [vmem:[%s12891_s15 + $0xc0] sm:$0xff]  ;;  %v13008_v20 = vld [vmem:[%s12891_s15 + $0x38] sm:$0xff]  ;;  %p12432_p11 = pnand %p12431_p10, %p12425_p3 }
 0x11b   : > { %988 = vmatprep.mubr.f32.mxu1 %v15273_v28  ;;  %9806 = vmatpush1.bf16.msra.mxu1 %v9805_v55  ;;  %v12999_v19 = vld [vmem:[%s12891_s15 + $0xc8] sm:$0xff]  ;;  %v13011_v21 = vld [vmem:[%s12891_s15 + $0xd0] sm:$0xff]  ;;  %v691_v24 = vld [vmem:[#allocation3 + $0x1b8] sm:$0xff] }
 0x11c   : > { %9809 = vmatprep.subr.msk.bf16.mxu1 %vm12915_vm2, %v9807_v58  ;;  %9819 = vmatprep.subr.msk.bf16.mxu0 %vm12915_vm2, %v9817_v7  ;;  %v674_v22 = vld [vmem:[#allocation3 + $0x130] sm:$0xff]  ;;  %v699_v25 = vld [vmem:[#allocation3 + $0x1f8] sm:$0xf]  ;;  %v13020_v26 = vld [vmem:[%s12891_s15 + $0x40] sm:$0xff] }
 0x11d   : > { %8941 = vmatmul.mubr.msk.f32.gmra.mrb[2].mxu0 %vm700_vm3, %v12938_v61  ;;  %8960 = vmatmul.mubr.msk.f32.gmra.mrb[2].mxu1 %vm700_vm3, %v12942_v62  ;;  %v682_v23 = vld [vmem:[#allocation3 + $0x170] sm:$0xff]  ;;  %v9827_v29 = vpack.c.bf16 %v699_v25, %v691_v24  ;;  %v611_v32 = vld [vmem:[#allocation3 + $0x18] sm:$0xff]  ;;  %v13029_v34 = vld [vmem:[%s12891_s15 + $0x48] sm:$0xff] }
 0x11e   : > { %880 = vmatprep.mubr.f32.mxu0 %v15273_v28  ;;  %994 = vmatprep.mubr.f32.mxu1 %v15273_v28  ;;  %v9825_v27 = vpack.c.bf16 %v682_v23, %v674_v22  ;;  %v690_v30 = vld [vmem:[#allocation3 + $0x1b0] sm:$0xff]  ;;  %v619_v33 = vld [vmem:[#allocation3 + $0x58] sm:$0xff]  ;;  %v13060_v40 = vld [vmem:[%s12891_s15 + $0x60] sm:$0xff] }
 0x11f   : > { %9812 = vmatpush1.bf16.msk.msra.mxu1 %vm12915_vm2, %v9810_v1  ;;  %9822 = vmatpush1.bf16.msk.msra.mxu0 %vm12915_vm2, %v9820_v8  ;;  %v698_v31 = vld [vmem:[#allocation3 + $0x1f0] sm:$0xf]  ;;  %v9843_v36 = vpack.c.bf16 %v619_v33, %v611_v32  ;;  %v13051_v39 = vld [vmem:[%s12891_s15 + $0x58] sm:$0xff]  ;;  %v13069_v41 = vld [vmem:[%s12891_s15 + $0x68] sm:$0xff] }
 0x120   : > { %9824 = vmatprep.subr.bf16.mxu1 %v9823_v3  ;;  %9834 = vmatprep.subr.bf16.mxu0 %v9833_v13  ;;  %v9830_v35 = vpack.c.bf16 %v698_v31, %v690_v30  ;;  %v13040_v37 = vld [vmem:[%s12891_s15 + $0x50] sm:$0xff]  ;;  %v13087_v43 = vld [vmem:[%s12891_s15 + $0x78] sm:$0xff]  ;;  %v13096_v44 = vld [vmem:[%s12891_s15 + $0x80] sm:$0xff] }
 0x121   : > { %8942 = vmatmul.mubr.msk.f32.gmra.mrb[4].mxu0 %vm700_vm3, %v12954_v9  ;;  %8961 = vmatmul.mubr.msk.f32.gmra.mrb[4].mxu1 %vm700_vm3, %v12957_v10  ;;  %v13078_v42 = vld [vmem:[%s12891_s15 + $0x70] sm:$0xff]  ;;  %v13105_v45 = vld [vmem:[%s12891_s15 + $0x88] sm:$0xff]  ;;  %v13123_v47 = vld [vmem:[%s12891_s15 + $0x98] sm:$0xff] }
 0x122   : > { %886 = vmatprep.mubr.f32.mxu0 %v15273_v28  ;;  %1000 = vmatprep.mubr.f32.mxu1 %v15273_v28  ;;  %v13114_v46 = vld [vmem:[%s12891_s15 + $0x90] sm:$0xff]  ;;  %v608_v48 = vld [vmem:[#allocation3] sm:$0xff]  ;;  %v625_v50 = vld [vmem:[#allocation3 + $0x88] sm:$0xff] }
 0x123   : > { %v616_v49 = vld [vmem:[#allocation3 + $0x40] sm:$0xff]  ;;  %v633_v51 = vld [vmem:[#allocation3 + $0xc8] sm:$0xf]  ;;  %v610_v0 = vld [vmem:[#allocation3 + $0x10] sm:$0xff] }
 0x124   : > { %v9835_v54 = vpack.c.bf16 %v616_v49, %v608_v48  ;;  %v9837_v55 = vpack.c.bf16 %v633_v51, %v625_v50  ;;  %v624_v56 = vld [vmem:[#allocation3 + $0x80] sm:$0xff]  ;;  %v613_v58 = vld [vmem:[#allocation3 + $0x28] sm:$0xff]  ;;  %v618_v1 = vld [vmem:[#allocation3 + $0x50] sm:$0xff] }
 0x125   : > { %8943 = vmatmul.mubr.msk.f32.gmra.mrb[6].mxu0 %vm700_vm3, %v12972_v14  ;;  %8962 = vmatmul.mubr.msk.f32.gmra.mrb[6].mxu1 %vm700_vm3, %v12975_v15  ;;  %v632_v57 = vld [vmem:[#allocation3 + $0xc0] sm:$0xf]  ;;  %v621_v59 = vld [vmem:[#allocation3 + $0x68] sm:$0xff]  ;;  %v627_v2 = vld [vmem:[#allocation3 + $0x98] sm:$0xff]  ;;  %v9845_v4 = vpack.c.bf16 %v618_v1, %v610_v0 }
 0x126   : > { %892 = vmatprep.mubr.f32.mxu0 %v15273_v28  ;;  %1006 = vmatprep.mubr.f32.mxu1 %v15273_v28  ;;  %v9840_v60 = vpack.c.bf16 %v632_v57, %v624_v56  ;;  %v9853_v63 = vpack.c.bf16 %v621_v59, %v613_v58  ;;  %v635_v3 = vld [vmem:[#allocation3 + $0xd8] sm:$0xf]  ;;  %v626_v6 = vld [vmem:[#allocation3 + $0x90] sm:$0xff]  ;;  %v612_v22 = vld [vmem:[#allocation3 + $0x20] sm:$0xff] }
 0x127   : > { %v9847_v5 = vpack.c.bf16 %v635_v3, %v627_v2  ;;  %v634_v7 = vld [vmem:[#allocation3 + $0xd0] sm:$0xf]  ;;  %v615_v8 = vld [vmem:[#allocation3 + $0x38] sm:$0xff]  ;;  %v620_v23 = vld [vmem:[#allocation3 + $0x60] sm:$0xff] }
 0x128   : > { %v623_v11 = vld [vmem:[#allocation3 + $0x78] sm:$0xff]  ;;  %v9850_v12 = vpack.c.bf16 %v634_v7, %v626_v6  ;;  %v629_v24 = vld [vmem:[#allocation3 + $0xa8] sm:$0xff]  ;;  %v628_v31 = vld [vmem:[#allocation3 + $0xa0] sm:$0xff] }
 0x129   : > { %8944 = vmatmul.mubr.msk.f32.gmra.mrb[8].mxu0 %vm700_vm3, %v12984_v16  ;;  %8963 = vmatmul.mubr.msk.f32.gmra.mrb[8].mxu1 %vm700_vm3, %v12987_v17  ;;  %v9863_v13 = vpack.c.bf16 %v623_v11, %v615_v8  ;;  %v637_v25 = vld [vmem:[#allocation3 + $0xe8] sm:$0xf]  ;;  %v636_v32 = vld [vmem:[#allocation3 + $0xe0] sm:$0xf]  ;;  %v614_v0 = vld [vmem:[#allocation3 + $0x30] sm:$0xff] }
 0x12a   : > { %898 = vmatprep.mubr.f32.mxu0 %v15273_v28  ;;  %1012 = vmatprep.mubr.f32.mxu1 %v15273_v28  ;;  %v9857_v30 = vpack.c.bf16 %v637_v25, %v629_v24  ;;  %v2671_v33 = vld [vmem:[#allocation3 + $0x208] sm:$0xff]  ;;  %v622_v1 = vld [vmem:[#allocation3 + $0x70] sm:$0xff]  ;;  %v631_v3 = vld [vmem:[#allocation3 + $0xb8] sm:$0xff] }
 0x12b   : > { %v630_v8 = vld [vmem:[#allocation3 + $0xb0] sm:$0xff]  ;;  %v2670_v24 = vld [vmem:[#allocation3 + $0x200] sm:$0xff] }
 0x12c   : > { %v638_v11 = vld [vmem:[#allocation3 + $0xf0] sm:$0xf]  ;;  %v2678_v25 = vld [vmem:[#allocation3 + $0x240] sm:$0xff] }
 0x12d   : > { %8945 = vmatmul.mubr.msk.f32.gmra.mrb[10].mxu0 %vm700_vm3, %v12996_v18  ;;  %8964 = vmatmul.mubr.msk.f32.gmra.mrb[10].mxu1 %vm700_vm3, %v12999_v19  ;;  %v13835_v38 = vld [vmem:[%s12891_s15 + $0xa0] sm:$0xff] }
 0x12e   : > { %904 = vmatprep.mubr.f32.mxu0 %v15273_v28  ;;  %1016 = vmatprep.mubr.f32.mxu1 %v15273_v28 }
 0x131   : > { %8946 = vmatmul.mubr.msk.f32.gmra.mrb[12].mxu0 %vm700_vm3, %v13008_v20  ;;  %8965 = vmatmul.mubr.msk.f32.gmra.mrb[12].mxu1 %vm700_vm3, %v13011_v21 }
 0x132   : > { %910 = vmatprep.mubr.f32.mxu0 %v15273_v28  ;;  %1085 = vmatprep.mubr.f32.mxu1 %v15273_v28 }
 0x135   : > { %8947 = vmatmul.mubr.msk.f32.gmra.mrb[14].mxu0 %vm700_vm3, %v13020_v26  ;;  %8968 = vmatmul.mubr.msk.f32.vlgmr.msra.gmra.mrb[14].mxu1 %vm700_vm3, %v12928_v52 }
 0x136   : > { %916 = vmatprep.mubr.f32.mxu0 %v15273_v28  ;;  %1091 = vmatprep.mubr.f32.mxu1 %v15273_v28 }
 0x137   : > { %9826 = vmatpush1.bf16.msra.mxu1 %v9825_v27  ;;  %v13296_v27 = vld [vmem:[%s12891_s15] sm:$0xff] }
 0x138   : > { %9829 = vmatprep.subr.msk.bf16.mxu1 %vm12915_vm2, %v9827_v29  ;;  %v9855_v29 = vpack.c.bf16 %v620_v23, %v612_v22  ;;  %v9870_v22 = vpack.c.bf16 %v638_v11, %v630_v8  ;;  %v12189_v11 = vld [vmem:[%s12891_s15 + $0x8] sm:$0xff] }
 0x139   : > { %8948 = vmatmul.mubr.msk.f32.gmra.mrb[16].mxu0 %vm700_vm3, %v13029_v34  ;;  %8969 = vmatmul.mubr.msk.f32.gmra.mrb[16].mxu1 %vm700_vm3, %v12938_v61 }
 0x13a   : > { %922 = vmatprep.mubr.f32.mxu0 %v15273_v28  ;;  %1097 = vmatprep.mubr.f32.mxu1 %v15273_v28 }
 0x13b   : > { %9832 = vmatpush1.bf16.msk.msra.mxu1 %vm12915_vm2, %v9830_v35  ;;  %v2679_v35 = vld [vmem:[#allocation3 + $0x248] sm:$0xff] }
 0x13c   : > { %9844 = vmatprep.subr.bf16.mxu1 %v9843_v36  ;;  %v9860_v36 = vpack.c.bf16 %v636_v32, %v628_v31  ;;  %v9873_v48 = vpack.c.bf16 %v2679_v35, %v2671_v33  ;;  %v9875_v31 = vpack.c.bf16 %v2678_v25, %v2670_v24  ;;  %v2686_v33 = vld [vmem:[#allocation3 + $0x280] sm:$0xff] }
 0x13d   : > { %8949 = vmatmul.mubr.msk.f32.gmra.mrb[18].mxu0 %vm700_vm3, %v13040_v37  ;;  %8970 = vmatmul.mubr.msk.f32.gmra.mrb[18].mxu1 %vm700_vm3, %v12954_v9  ;;  %v2694_v35 = vld [vmem:[#allocation3 + $0x2c0] sm:$0xf] }
 0x13e   : > { %928 = vmatprep.mubr.f32.mxu0 %v15273_v28  ;;  %1103 = vmatprep.mubr.f32.mxu1 %v15273_v28 }
 0x141   : > { %8950 = vmatmul.mubr.msk.f32.gmra.mrb[20].mxu0 %vm700_vm3, %v13051_v39  ;;  %8971 = vmatmul.mubr.msk.f32.gmra.mrb[20].mxu1 %vm700_vm3, %v12972_v14 }
 0x142   : > { %934 = vmatprep.mubr.f32.mxu0 %v15273_v28  ;;  %1109 = vmatprep.mubr.f32.mxu1 %v15273_v28 }
 0x145   : > { %8951 = vmatmul.mubr.msk.f32.gmra.mrb[22].mxu0 %vm700_vm3, %v13060_v40  ;;  %8972 = vmatmul.mubr.msk.f32.gmra.mrb[22].mxu1 %vm700_vm3, %v12984_v16 }
 0x146   : > { %940 = vmatprep.mubr.f32.mxu0 %v15273_v28  ;;  %1115 = vmatprep.mubr.f32.mxu1 %v15273_v28 }
 0x149   : > { %8952 = vmatmul.mubr.msk.f32.gmra.mrb[24].mxu0 %vm700_vm3, %v13069_v41  ;;  %8973 = vmatmul.mubr.msk.f32.gmra.mrb[24].mxu1 %vm700_vm3, %v12996_v18 }
 0x14a   : > { %946 = vmatprep.mubr.f32.mxu0 %v15273_v28  ;;  %1121 = vmatprep.mubr.f32.mxu1 %v15273_v28 }
 0x14d   : > { %8953 = vmatmul.mubr.msk.f32.gmra.mrb[26].mxu0 %vm700_vm3, %v13078_v42  ;;  %8974 = vmatmul.mubr.msk.f32.gmra.mrb[26].mxu1 %vm700_vm3, %v13008_v20 }
 0x14e   : > { %952 = vmatprep.mubr.f32.mxu0 %v15273_v28  ;;  %1127 = vmatprep.mubr.f32.mxu1 %v15273_v28 }
 0x151   : > { %8954 = vmatmul.mubr.msk.f32.gmra.mrb[28].mxu0 %vm700_vm3, %v13087_v43  ;;  %8975 = vmatmul.mubr.msk.f32.gmra.mrb[28].mxu1 %vm700_vm3, %v13020_v26 }
 0x152   : > { %958 = vmatprep.mubr.f32.mxu0 %v15273_v28  ;;  %1133 = vmatprep.mubr.f32.mxu1 %v15273_v28 }
 0x155   : > { %8955 = vmatmul.mubr.msk.f32.gmra.mrb[30].mxu0 %vm700_vm3, %v13096_v44  ;;  %8976 = vmatmul.mubr.msk.f32.gmra.mrb[30].mxu1 %vm700_vm3, %v13029_v34 }
 0x156   : > { %964 = vmatprep.mubr.f32.mxu0 %v15273_v28  ;;  %1139 = vmatprep.mubr.f32.mxu1 %v15273_v28 }
 0x159   : > { %8956 = vmatmul.mubr.msk.f32.gmra.mrb[32].mxu0 %vm700_vm3, %v13105_v45  ;;  %8977 = vmatmul.mubr.msk.f32.gmra.mrb[32].mxu1 %vm700_vm3, %v13040_v37 }
 0x15a   : > { %970 = vmatprep.mubr.f32.mxu0 %v15273_v28  ;;  %1145 = vmatprep.mubr.f32.mxu1 %v15273_v28 }
 0x15d   : > { %8957 = vmatmul.mubr.msk.f32.gmra.mrb[34].mxu0 %vm700_vm3, %v13114_v46  ;;  %8978 = vmatmul.mubr.msk.f32.gmra.mrb[34].mxu1 %vm700_vm3, %v13051_v39 }
 0x15e   : > { %976 = vmatprep.mubr.f32.mxu0 %v15273_v28  ;;  %1151 = vmatprep.mubr.f32.mxu1 %v15273_v28 }
 0x161   : > { %8958 = vmatmul.mubr.msk.f32.gmra.mrb[36].mxu0 %vm700_vm3, %v13123_v47  ;;  %8979 = vmatmul.mubr.msk.f32.gmra.mrb[36].mxu1 %vm700_vm3, %v13060_v40 }
 0x162   : > { %1157 = vmatprep.mubr.f32.mxu1 %v15273_v28  ;;  %1302 = vmatprep.mubr.f32.mxu0 %v15273_v28 }
 0x165   : > { %8980 = vmatmul.mubr.msk.f32.gmra.mrb[38].mxu1 %vm700_vm3, %v13069_v41  ;;  %8996 = vmatmul.mubr.msk.f32.vlgmr.msra.gmra.mrb[38].mxu0 %vm700_vm3, %v12928_v52 }
 0x166   : > { %9836 = vmatpush1.bf16.msra.mxu0 %v9835_v54  ;;  %1163 = vmatprep.mubr.f32.mxu1 %v15273_v28 }
 0x167   : > { %1308 = vmatprep.mubr.f32.mxu0 %v15273_v28  ;;  %9839 = vmatprep.subr.msk.bf16.mxu0 %vm12915_vm2, %v9837_v55 }
 0x169   : > { %8981 = vmatmul.mubr.msk.f32.gmra.mrb[40].mxu1 %vm700_vm3, %v13078_v42  ;;  %8997 = vmatmul.mubr.msk.f32.gmra.mrb[40].mxu0 %vm700_vm3, %v12938_v61 }
 0x16a   : > { %1169 = vmatprep.mubr.f32.mxu1 %v15273_v28  ;;  %1314 = vmatprep.mubr.f32.mxu0 %v15273_v28 }
 0x16b   : > { %9842 = vmatpush1.bf16.msk.msra.mxu0 %vm12915_vm2, %v9840_v60 }
 0x16c   : > { %9854 = vmatprep.subr.bf16.mxu0 %v9853_v63 }
 0x16d   : > { %8982 = vmatmul.mubr.msk.f32.gmra.mrb[42].mxu1 %vm700_vm3, %v13087_v43  ;;  %8998 = vmatmul.mubr.msk.f32.gmra.mrb[42].mxu0 %vm700_vm3, %v12954_v9 }
 0x16e   : > { %1175 = vmatprep.mubr.f32.mxu1 %v15273_v28  ;;  %1320 = vmatprep.mubr.f32.mxu0 %v15273_v28 }
 0x171   : > { %8983 = vmatmul.mubr.msk.f32.gmra.mrb[44].mxu1 %vm700_vm3, %v13096_v44  ;;  %8999 = vmatmul.mubr.msk.f32.gmra.mrb[44].mxu0 %vm700_vm3, %v12972_v14 }
 0x172   : > { %1181 = vmatprep.mubr.f32.mxu1 %v15273_v28  ;;  %1326 = vmatprep.mubr.f32.mxu0 %v15273_v28 }
 0x175   : > { %8984 = vmatmul.mubr.msk.f32.gmra.mrb[46].mxu1 %vm700_vm3, %v13105_v45  ;;  %9000 = vmatmul.mubr.msk.f32.gmra.mrb[46].mxu0 %vm700_vm3, %v12984_v16 }
 0x176   : > { %1187 = vmatprep.mubr.f32.mxu1 %v15273_v28  ;;  %1332 = vmatprep.mubr.f32.mxu0 %v15273_v28 }
 0x179   : > { %8985 = vmatmul.mubr.msk.f32.gmra.mrb[48].mxu1 %vm700_vm3, %v13114_v46  ;;  %9001 = vmatmul.mubr.msk.f32.gmra.mrb[48].mxu0 %vm700_vm3, %v12996_v18 }
 0x17a   : > { %1193 = vmatprep.mubr.f32.mxu1 %v15273_v28  ;;  %1338 = vmatprep.mubr.f32.mxu0 %v15273_v28 }
 0x17d   : > { %8986 = vmatmul.mubr.msk.f32.gmra.mrb[50].mxu1 %vm700_vm3, %v13123_v47  ;;  %9002 = vmatmul.mubr.msk.f32.gmra.mrb[50].mxu0 %vm700_vm3, %v13008_v20 }
 0x17e   : > { %1199 = vmatprep.mubr.f32.mxu1 %v15273_v28  ;;  %1344 = vmatprep.mubr.f32.mxu0 %v15273_v28 }
 0x181   : > { %8987 = vmatmul.mubr.msk.f32.gmra.mrb[52].mxu1 %vm700_vm3, %v12931_v53  ;;  %9003 = vmatmul.mubr.msk.f32.gmra.mrb[52].mxu0 %vm700_vm3, %v13020_v26 }
 0x182   : > { %1205 = vmatprep.mubr.f32.mxu1 %v15273_v28  ;;  %1350 = vmatprep.mubr.f32.mxu0 %v15273_v28 }
 0x185   : > { %8988 = vmatmul.mubr.msk.f32.gmra.mrb[54].mxu1 %vm700_vm3, %v12942_v62  ;;  %9004 = vmatmul.mubr.msk.f32.gmra.mrb[54].mxu0 %vm700_vm3, %v13029_v34 }
 0x186   : > { %1211 = vmatprep.mubr.f32.mxu1 %v15273_v28  ;;  %1356 = vmatprep.mubr.f32.mxu0 %v15273_v28 }
 0x189   : > { %8989 = vmatmul.mubr.msk.f32.gmra.mrb[56].mxu1 %vm700_vm3, %v12957_v10  ;;  %9005 = vmatmul.mubr.msk.f32.gmra.mrb[56].mxu0 %vm700_vm3, %v13040_v37 }
 0x18a   : > { %1217 = vmatprep.mubr.f32.mxu1 %v15273_v28  ;;  %1362 = vmatprep.mubr.f32.mxu0 %v15273_v28 }
 0x18d   : > { %8990 = vmatmul.mubr.msk.f32.gmra.mrb[58].mxu1 %vm700_vm3, %v12975_v15  ;;  %9006 = vmatmul.mubr.msk.f32.gmra.mrb[58].mxu0 %vm700_vm3, %v13051_v39 }
 0x18e   : > { %1223 = vmatprep.mubr.f32.mxu1 %v15273_v28  ;;  %1368 = vmatprep.mubr.f32.mxu0 %v15273_v28 }
 0x191   : > { %8991 = vmatmul.mubr.msk.f32.gmra.mrb[60].mxu1 %vm700_vm3, %v12987_v17  ;;  %9007 = vmatmul.mubr.msk.f32.gmra.mrb[60].mxu0 %vm700_vm3, %v13060_v40 }
 0x192   : > { %1229 = vmatprep.mubr.f32.mxu1 %v15273_v28  ;;  %1374 = vmatprep.mubr.f32.mxu0 %v15273_v28 }
 0x195   : > { %8992 = vmatmul.mubr.msk.f32.gmra.mrb[62].mxu1 %vm700_vm3, %v12999_v19  ;;  %9008 = vmatmul.mubr.msk.f32.gmra.mrb[62].mxu0 %vm700_vm3, %v13069_v41 }
 0x196   : > { %1233 = vmatprep.mubr.f32.mxu1 %v15273_v28  ;;  %1380 = vmatprep.mubr.f32.mxu0 %v15273_v28 }
 0x199   : > { %8993 = vmatmul.mubr.msk.f32.gmra.mrb[64].mxu1 %vm700_vm3, %v13011_v21  ;;  %9009 = vmatmul.mubr.msk.f32.gmra.mrb[64].mxu0 %vm700_vm3, %v13078_v42 }
 0x19a   : > { %1386 = vmatprep.mubr.f32.mxu0 %v15273_v28  ;;  %1519 = vmatprep.mubr.f32.mxu1 %v15273_v28 }
 0x19d   : > { %9010 = vmatmul.mubr.msk.f32.gmra.mrb[66].mxu0 %vm700_vm3, %v13087_v43  ;;  %9024 = vmatmul.mubr.msk.f32.vlgmr.msra.gmra.mrb[66].mxu1 %vm700_vm3, %v12928_v52 }
 0x19e   : > { %1392 = vmatprep.mubr.f32.mxu0 %v15273_v28  ;;  %1525 = vmatprep.mubr.f32.mxu1 %v15273_v28 }
 0x19f   : > { %9846 = vmatpush1.bf16.msra.mxu1 %v9845_v4  ;;  %v639_v4 = vld [vmem:[#allocation3 + $0xf8] sm:$0xf] }
 0x1a0   : > { %9849 = vmatprep.subr.msk.bf16.mxu1 %vm12915_vm2, %v9847_v5  ;;  %v9865_v5 = vpack.c.bf16 %v622_v1, %v614_v0  ;;  %v9867_v7 = vpack.c.bf16 %v639_v4, %v631_v3  ;;  %v2688_v3 = vld [vmem:[#allocation3 + $0x290] sm:$0xff] }
 0x1a1   : > { %9011 = vmatmul.mubr.msk.f32.gmra.mrb[68].mxu0 %vm700_vm3, %v13096_v44  ;;  %9025 = vmatmul.mubr.msk.f32.gmra.mrb[68].mxu1 %vm700_vm3, %v12938_v61  ;;  %v2696_v4 = vld [vmem:[#allocation3 + $0x2d0] sm:$0xf] }
 0x1a2   : > { %1398 = vmatprep.mubr.f32.mxu0 %v15273_v28  ;;  %1531 = vmatprep.mubr.f32.mxu1 %v15273_v28 }
 0x1a3   : > { %9852 = vmatpush1.bf16.msk.msra.mxu1 %vm12915_vm2, %v9850_v12  ;;  %v2673_v12 = vld [vmem:[#allocation3 + $0x218] sm:$0xff] }
 0x1a4   : > { %9864 = vmatprep.subr.bf16.mxu1 %v9863_v13  ;;  %v2681_v13 = vld [vmem:[#allocation3 + $0x258] sm:$0xff] }
 0x1a5   : > { %9012 = vmatmul.mubr.msk.f32.gmra.mrb[70].mxu0 %vm700_vm3, %v13105_v45  ;;  %9026 = vmatmul.mubr.msk.f32.gmra.mrb[70].mxu1 %vm700_vm3, %v12954_v9  ;;  %v9883_v23 = vpack.c.bf16 %v2681_v13, %v2673_v12  ;;  %v2691_v12 = vld [vmem:[#allocation3 + $0x2a8] sm:$0xff] }
 0x1a6   : > { %1404 = vmatprep.mubr.f32.mxu0 %v15273_v28  ;;  %1537 = vmatprep.mubr.f32.mxu1 %v15273_v28  ;;  %v2699_v13 = vld [vmem:[#allocation3 + $0x2e8] sm:$0xf] }
 0x1a7   : > { %v9897_v25 = vpack.c.bf16 %v2699_v13, %v2691_v12  ;;  %v4512_v13 = vld [vmem:[#allocation8 + $0xc08] sm:$0xff] }
 0x1a9   : > { %9013 = vmatmul.mubr.msk.f32.gmra.mrb[72].mxu0 %vm700_vm3, %v13114_v46  ;;  %9027 = vmatmul.mubr.msk.f32.gmra.mrb[72].mxu1 %vm700_vm3, %v12972_v14 }
 0x1aa   : > { %1410 = vmatprep.mubr.f32.mxu0 %v15273_v28  ;;  %1543 = vmatprep.mubr.f32.mxu1 %v15273_v28 }
 0x1ad   : > { %9014 = vmatmul.mubr.msk.f32.gmra.mrb[74].mxu0 %vm700_vm3, %v13123_v47  ;;  %9028 = vmatmul.mubr.msk.f32.gmra.mrb[74].mxu1 %vm700_vm3, %v12984_v16 }
 0x1ae   : > { %1416 = vmatprep.mubr.f32.mxu0 %v15273_v28  ;;  %1549 = vmatprep.mubr.f32.mxu1 %v15273_v28 }
 0x1b1   : > { %9015 = vmatmul.mubr.msk.f32.gmra.mrb[76].mxu0 %vm700_vm3, %v12931_v53  ;;  %9029 = vmatmul.mubr.msk.f32.gmra.mrb[76].mxu1 %vm700_vm3, %v12996_v18 }
 0x1b2   : > { %1422 = vmatprep.mubr.f32.mxu0 %v15273_v28  ;;  %1555 = vmatprep.mubr.f32.mxu1 %v15273_v28 }
 0x1b5   : > { %9016 = vmatmul.mubr.msk.f32.gmra.mrb[78].mxu0 %vm700_vm3, %v12942_v62  ;;  %9030 = vmatmul.mubr.msk.f32.gmra.mrb[78].mxu1 %vm700_vm3, %v13008_v20 }
 0x1b6   : > { %1428 = vmatprep.mubr.f32.mxu0 %v15273_v28  ;;  %1561 = vmatprep.mubr.f32.mxu1 %v15273_v28 }
 0x1b9   : > { %9017 = vmatmul.mubr.msk.f32.gmra.mrb[80].mxu0 %vm700_vm3, %v12957_v10  ;;  %9031 = vmatmul.mubr.msk.f32.gmra.mrb[80].mxu1 %vm700_vm3, %v13020_v26 }
 0x1ba   : > { %1434 = vmatprep.mubr.f32.mxu0 %v15273_v28  ;;  %1567 = vmatprep.mubr.f32.mxu1 %v15273_v28 }
 0x1bd   : > { %9018 = vmatmul.mubr.msk.f32.gmra.mrb[82].mxu0 %vm700_vm3, %v12975_v15  ;;  %9032 = vmatmul.mubr.msk.f32.gmra.mrb[82].mxu1 %vm700_vm3, %v13029_v34 }
 0x1be   : > { %1440 = vmatprep.mubr.f32.mxu0 %v15273_v28  ;;  %1573 = vmatprep.mubr.f32.mxu1 %v15273_v28 }
 0x1c1   : > { %9019 = vmatmul.mubr.msk.f32.gmra.mrb[84].mxu0 %vm700_vm3, %v12987_v17  ;;  %9033 = vmatmul.mubr.msk.f32.gmra.mrb[84].mxu1 %vm700_vm3, %v13040_v37 }
 0x1c2   : > { %1446 = vmatprep.mubr.f32.mxu0 %v15273_v28  ;;  %1579 = vmatprep.mubr.f32.mxu1 %v15273_v28 }
 0x1c5   : > { %9020 = vmatmul.mubr.msk.f32.gmra.mrb[86].mxu0 %vm700_vm3, %v12999_v19  ;;  %9034 = vmatmul.mubr.msk.f32.gmra.mrb[86].mxu1 %vm700_vm3, %v13051_v39 }
 0x1c6   : > { %1450 = vmatprep.mubr.f32.mxu0 %v15273_v28  ;;  %1585 = vmatprep.mubr.f32.mxu1 %v15273_v28 }
 0x1c9   : > { %9021 = vmatmul.mubr.msk.f32.gmra.mrb[88].mxu0 %vm700_vm3, %v13011_v21  ;;  %9035 = vmatmul.mubr.msk.f32.gmra.mrb[88].mxu1 %vm700_vm3, %v13060_v40 }
 0x1ca   : > { %1591 = vmatprep.mubr.f32.mxu1 %v15273_v28  ;;  %1838 = vmatprep.mubr.f32.mxu0 %v15273_v28 }
 0x1cd   : > { %9036 = vmatmul.mubr.msk.f32.gmra.mrb[90].mxu1 %vm700_vm3, %v13069_v41  ;;  %9052 = vmatmul.mubr.msk.f32.vlgmr.msra.gmra.mrb[0].mxu0 %vm700_vm3, %v13296_v27 }
 0x1ce   : > { %9856 = vmatpush1.bf16.msra.mxu0 %v9855_v29  ;;  %1597 = vmatprep.mubr.f32.mxu1 %v15273_v28  ;;  %v2687_v29 = vld [vmem:[#allocation3 + $0x288] sm:$0xff] }
 0x1cf   : > { %1844 = vmatprep.mubr.f32.mxu0 %v15273_v28  ;;  %9859 = vmatprep.subr.msk.bf16.mxu0 %vm12915_vm2, %v9857_v30  ;;  %v2695_v30 = vld [vmem:[#allocation3 + $0x2c8] sm:$0xf] }
 0x1d0   : > { %v9877_v32 = vpack.c.bf16 %v2695_v30, %v2687_v29  ;;  %v2690_v30 = vld [vmem:[#allocation3 + $0x2a0] sm:$0xff] }
 0x1d1   : > { %9037 = vmatmul.mubr.msk.f32.gmra.mrb[92].mxu1 %vm700_vm3, %v13078_v42  ;;  %9053 = vmatmul.mubr.msk.f32.gmra.mrb[2].mxu0 %vm700_vm3, %v12928_v52 }
 0x1d2   : > { %1603 = vmatprep.mubr.f32.mxu1 %v15273_v28  ;;  %1850 = vmatprep.mubr.f32.mxu0 %v15273_v28 }
 0x1d3   : > { %9862 = vmatpush1.bf16.msk.msra.mxu0 %vm12915_vm2, %v9860_v36  ;;  %v2675_v36 = vld [vmem:[#allocation3 + $0x228] sm:$0xff] }
 0x1d4   : > { %9874 = vmatprep.subr.bf16.mxu0 %v9873_v48  ;;  %v2683_v48 = vld [vmem:[#allocation3 + $0x268] sm:$0xff] }
 0x1d5   : > { %9038 = vmatmul.mubr.msk.f32.gmra.mrb[94].mxu1 %vm700_vm3, %v13087_v43  ;;  %9054 = vmatmul.mubr.msk.f32.gmra.mrb[4].mxu0 %vm700_vm3, %v12938_v61  ;;  %v9893_v0 = vpack.c.bf16 %v2683_v48, %v2675_v36  ;;  %v13768_v36 = vld [vmem:[%s12891_s15 + $0x68] sm:$0xff]  ;;  %v13777_v48 = vld [vmem:[%s12891_s15 + $0x70] sm:$0xff] }
 0x1d6   : > { %1609 = vmatprep.mubr.f32.mxu1 %v15273_v28  ;;  %1856 = vmatprep.mubr.f32.mxu0 %v15273_v28 }
 0x1d9   : > { %9039 = vmatmul.mubr.msk.f32.gmra.mrb[96].mxu1 %vm700_vm3, %v13096_v44  ;;  %9055 = vmatmul.mubr.msk.f32.gmra.mrb[6].mxu0 %vm700_vm3, %v12954_v9 }
 0x1da   : > { %1615 = vmatprep.mubr.f32.mxu1 %v15273_v28  ;;  %1862 = vmatprep.mubr.f32.mxu0 %v15273_v28 }
 0x1dd   : > { %9040 = vmatmul.mubr.msk.f32.gmra.mrb[98].mxu1 %vm700_vm3, %v13105_v45  ;;  %9056 = vmatmul.mubr.msk.f32.gmra.mrb[8].mxu0 %vm700_vm3, %v12972_v14 }
 0x1de   : > { %1621 = vmatprep.mubr.f32.mxu1 %v15273_v28  ;;  %1868 = vmatprep.mubr.f32.mxu0 %v15273_v28 }
 0x1e1   : > { %9041 = vmatmul.mubr.msk.f32.gmra.mrb[100].mxu1 %vm700_vm3, %v13114_v46  ;;  %9057 = vmatmul.mubr.msk.f32.gmra.mrb[10].mxu0 %vm700_vm3, %v12984_v16 }
 0x1e2   : > { %1627 = vmatprep.mubr.f32.mxu1 %v15273_v28  ;;  %1874 = vmatprep.mubr.f32.mxu0 %v15273_v28 }
 0x1e5   : > { %9042 = vmatmul.mubr.msk.f32.gmra.mrb[102].mxu1 %vm700_vm3, %v13123_v47  ;;  %9058 = vmatmul.mubr.msk.f32.gmra.mrb[12].mxu0 %vm700_vm3, %v12996_v18 }
 0x1e6   : > { %1633 = vmatprep.mubr.f32.mxu1 %v15273_v28  ;;  %1880 = vmatprep.mubr.f32.mxu0 %v15273_v28 }
 0x1e9   : > { %9043 = vmatmul.mubr.msk.f32.gmra.mrb[104].mxu1 %vm700_vm3, %v12931_v53  ;;  %9059 = vmatmul.mubr.msk.f32.gmra.mrb[14].mxu0 %vm700_vm3, %v13008_v20 }
 0x1ea   : > { %1639 = vmatprep.mubr.f32.mxu1 %v15273_v28  ;;  %1886 = vmatprep.mubr.f32.mxu0 %v15273_v28 }
 0x1ec   : > { %v13350_v49 = vpop.f32.mrb[0].mxu1 }
 0x1ed   : > { %9044 = vmatmul.mubr.msk.f32.gmra.mrb[106].mxu1 %vm700_vm3, %v12942_v62  ;;  %9060 = vmatmul.mubr.msk.f32.gmra.mrb[16].mxu0 %vm700_vm3, %v13020_v26  ;;  %v13356_v50 = vpop.f32.mrb[1].mxu1 }
 0x1ee   : > { %1645 = vmatprep.mubr.f32.mxu1 %v15273_v28  ;;  %1892 = vmatprep.mubr.f32.mxu0 %v15273_v28 }
 0x1f0   : > { %v13360_v51 = vpop.f32.mrb[2].mxu1 }
 0x1f1   : > { %9045 = vmatmul.mubr.msk.f32.gmra.mrb[108].mxu1 %vm700_vm3, %v12957_v10  ;;  %9061 = vmatmul.mubr.msk.f32.gmra.mrb[18].mxu0 %vm700_vm3, %v13029_v34  ;;  %v13366_v54 = vpop.f32.mrb[3].mxu1 }
 0x1f2   : > { %1651 = vmatprep.mubr.f32.mxu1 %v15273_v28  ;;  %1898 = vmatprep.mubr.f32.mxu0 %v15273_v28 }
 0x1f4   : > { %v13370_v55 = vpop.f32.mrb[4].mxu1 }
 0x1f5   : > { %9046 = vmatmul.mubr.msk.f32.gmra.mrb[110].mxu1 %vm700_vm3, %v12975_v15  ;;  %9062 = vmatmul.mubr.msk.f32.gmra.mrb[20].mxu0 %vm700_vm3, %v13040_v37  ;;  %v13376_v56 = vpop.f32.mrb[5].mxu1 }
 0x1f6   : > { %1657 = vmatprep.mubr.f32.mxu1 %v15273_v28  ;;  %1904 = vmatprep.mubr.f32.mxu0 %v15273_v28 }
 0x1f8   : > { %v13380_v57 = vpop.f32.mrb[6].mxu1 }
 0x1f9   : > { %9047 = vmatmul.mubr.msk.f32.gmra.mrb[112].mxu1 %vm700_vm3, %v12987_v17  ;;  %9063 = vmatmul.mubr.msk.f32.gmra.mrb[22].mxu0 %vm700_vm3, %v13051_v39  ;;  %v13386_v58 = vpop.f32.mrb[7].mxu1 }
 0x1fa   : > { %1663 = vmatprep.mubr.f32.mxu1 %v15273_v28  ;;  %1910 = vmatprep.mubr.f32.mxu0 %v15273_v28 }
 0x1fc   : > { %v13390_v59 = vpop.f32.mrb[8].mxu1 }
 0x1fd   : > { %9048 = vmatmul.mubr.msk.f32.gmra.mrb[114].mxu1 %vm700_vm3, %v12999_v19  ;;  %9064 = vmatmul.mubr.msk.f32.gmra.mrb[24].mxu0 %vm700_vm3, %v13060_v40  ;;  %v13396_v60 = vpop.f32.mrb[9].mxu1 }
 0x1fe   : > { %1667 = vmatprep.mubr.f32.mxu1 %v15273_v28  ;;  %1916 = vmatprep.mubr.f32.mxu0 %v15273_v28 }
 0x200   : > { %v1014_v63 = vpop.f32.mrb[10].mxu1 }
 0x201   : > { %9049 = vmatmul.mubr.msk.f32.gmra.mrb[116].mxu1 %vm700_vm3, %v13011_v21  ;;  %9065 = vmatmul.mubr.msk.f32.gmra.mrb[26].mxu0 %vm700_vm3, %v13069_v41  ;;  %v1015_v2 = vpop.f32.mrb[11].mxu1  ;;  %v9880_v63 = vpack.c.bf16 %v2694_v35, %v2686_v33  ;;  %v13759_v35 = vld [vmem:[%s12891_s15 + $0x60] sm:$0xff] }
 0x202   : > { %1922 = vmatprep.mubr.f32.mxu0 %v15273_v28  ;;  %2055 = vmatprep.mubr.f32.mxu1 %v15273_v28 }
 0x204   : > { %v1018_v6 = vpop.f32.mrb[12].mxu1 }
 0x205   : > { %9066 = vmatmul.mubr.msk.f32.gmra.mrb[28].mxu0 %vm700_vm3, %v13078_v42  ;;  %9080 = vmatmul.mubr.msk.f32.vlgmr.msra.gmra.mrb[14].mxu1 %vm700_vm3, %v13296_v27  ;;  %v1019_v21 = vpop.f32.mrb[13].mxu1  ;;  %v2685_v6 = vld [vmem:[#allocation3 + $0x278] sm:$0xff] }
 0x206   : > { %1928 = vmatprep.mubr.f32.mxu0 %v15273_v28  ;;  %2061 = vmatprep.mubr.f32.mxu1 %v15273_v28  ;;  %v2682_v21 = vld [vmem:[#allocation3 + $0x260] sm:$0xff] }
 0x207   : > { %9866 = vmatpush1.bf16.msra.mxu1 %v9865_v5  ;;  %v2677_v5 = vld [vmem:[#allocation3 + $0x238] sm:$0xff] }
 0x208   : > { %9869 = vmatprep.subr.msk.bf16.mxu1 %vm12915_vm2, %v9867_v7  ;;  %v9890_v7 = vpack.c.bf16 %v2696_v4, %v2688_v3  ;;  %v9903_v8 = vpack.c.bf16 %v2685_v6, %v2677_v5  ;;  %v2692_v3 = vld [vmem:[#allocation3 + $0x2b0] sm:$0xff]  ;;  %v13804_v5 = vld [vmem:[%s12891_s15 + $0x88] sm:$0xff] }
 0x209   : > { %9067 = vmatmul.mubr.msk.f32.gmra.mrb[30].mxu0 %vm700_vm3, %v13087_v43  ;;  %9081 = vmatmul.mubr.msk.f32.gmra.mrb[16].mxu1 %vm700_vm3, %v12928_v52  ;;  %v2700_v4 = vld [vmem:[#allocation3 + $0x2f0] sm:$0xf] }
 0x20a   : > { %1934 = vmatprep.mubr.f32.mxu0 %v15273_v28  ;;  %2067 = vmatprep.mubr.f32.mxu1 %v15273_v28  ;;  %v9910_v6 = vpack.c.bf16 %v2700_v4, %v2692_v3  ;;  %v4554_v3 = vld [vmem:[#allocation8 + $0xd58] sm:$0xff] }
 0x20b   : > { %9872 = vmatpush1.bf16.msk.msra.mxu1 %vm12915_vm2, %v9870_v22 }
 0x20c   : > { %9884 = vmatprep.subr.bf16.mxu1 %v9883_v23  ;;  %v13656_v23 = vld [vmem:[%s12891_s15 + $0xc8] sm:$0xff] }
 0x20d   : > { %9068 = vmatmul.mubr.msk.f32.gmra.mrb[32].mxu0 %vm700_vm3, %v13096_v44  ;;  %9082 = vmatmul.mubr.msk.f32.gmra.mrb[18].mxu1 %vm700_vm3, %v12938_v61 }
 0x20e   : > { %1940 = vmatprep.mubr.f32.mxu0 %v15273_v28  ;;  %2073 = vmatprep.mubr.f32.mxu1 %v15273_v28 }
 0x211   : > { %9069 = vmatmul.mubr.msk.f32.gmra.mrb[34].mxu0 %vm700_vm3, %v13105_v45  ;;  %9083 = vmatmul.mubr.msk.f32.gmra.mrb[20].mxu1 %vm700_vm3, %v12954_v9 }
 0x212   : > { %1946 = vmatprep.mubr.f32.mxu0 %v15273_v28  ;;  %2079 = vmatprep.mubr.f32.mxu1 %v15273_v28 }
 0x215   : > { %9070 = vmatmul.mubr.msk.f32.gmra.mrb[36].mxu0 %vm700_vm3, %v13114_v46  ;;  %9084 = vmatmul.mubr.msk.f32.gmra.mrb[22].mxu1 %vm700_vm3, %v12972_v14 }
 0x216   : > { %1952 = vmatprep.mubr.f32.mxu0 %v15273_v28  ;;  %2085 = vmatprep.mubr.f32.mxu1 %v15273_v28 }
 0x219   : > { %9071 = vmatmul.mubr.msk.f32.gmra.mrb[90].mxu0 %vm700_vm3, %v13123_v47  ;;  %9085 = vmatmul.mubr.msk.f32.gmra.mrb[24].mxu1 %vm700_vm3, %v12984_v16 }
 0x21a   : > { %1958 = vmatprep.mubr.f32.mxu0 %v15273_v28  ;;  %2091 = vmatprep.mubr.f32.mxu1 %v15273_v28 }
 0x21d   : > { %9072 = vmatmul.mubr.msk.f32.gmra.mrb[92].mxu0 %vm700_vm3, %v12931_v53  ;;  %9086 = vmatmul.mubr.msk.f32.gmra.mrb[26].mxu1 %vm700_vm3, %v12996_v18 }
 0x21e   : > { %1964 = vmatprep.mubr.f32.mxu0 %v15273_v28  ;;  %2097 = vmatprep.mubr.f32.mxu1 %v15273_v28 }
 0x221   : > { %9073 = vmatmul.mubr.msk.f32.gmra.mrb[94].mxu0 %vm700_vm3, %v12942_v62  ;;  %9087 = vmatmul.mubr.msk.f32.gmra.mrb[28].mxu1 %vm700_vm3, %v13008_v20 }
 0x222   : > { %1970 = vmatprep.mubr.f32.mxu0 %v15273_v28  ;;  %2103 = vmatprep.mubr.f32.mxu1 %v15273_v28 }
 0x225   : > { %9074 = vmatmul.mubr.msk.f32.gmra.mrb[96].mxu0 %vm700_vm3, %v12957_v10  ;;  %9088 = vmatmul.mubr.msk.f32.gmra.mrb[30].mxu1 %vm700_vm3, %v13020_v26 }
 0x226   : > { %1976 = vmatprep.mubr.f32.mxu0 %v15273_v28  ;;  %2109 = vmatprep.mubr.f32.mxu1 %v15273_v28 }
 0x229   : > { %9075 = vmatmul.mubr.msk.f32.gmra.mrb[98].mxu0 %vm700_vm3, %v12975_v15  ;;  %9089 = vmatmul.mubr.msk.f32.gmra.mrb[32].mxu1 %vm700_vm3, %v13029_v34 }
 0x22a   : > { %1982 = vmatprep.mubr.f32.mxu0 %v15273_v28  ;;  %2115 = vmatprep.mubr.f32.mxu1 %v15273_v28 }
 0x22d   : > { %9076 = vmatmul.mubr.msk.f32.gmra.mrb[100].mxu0 %vm700_vm3, %v12987_v17  ;;  %9090 = vmatmul.mubr.msk.f32.gmra.mrb[34].mxu1 %vm700_vm3, %v13040_v37 }
 0x22e   : > { %1986 = vmatprep.mubr.f32.mxu0 %v15273_v28  ;;  %2121 = vmatprep.mubr.f32.mxu1 %v15273_v28 }
 0x231   : > { %9077 = vmatmul.mubr.msk.f32.gmra.mrb[102].mxu0 %vm700_vm3, %v12999_v19  ;;  %9091 = vmatmul.mubr.msk.f32.gmra.mrb[36].mxu1 %vm700_vm3, %v13051_v39 }
 0x232   : > { %2127 = vmatprep.mubr.f32.mxu1 %v15273_v28  ;;  %2272 = vmatprep.mubr.f32.mxu0 %v15273_v28 }
 0x235   : > { %9092 = vmatmul.mubr.msk.f32.gmra.mrb[38].mxu1 %vm700_vm3, %v13060_v40  ;;  %9108 = vmatmul.mubr.msk.f32.vlgmr.msra.gmra.mrb[38].mxu0 %vm700_vm3, %v13296_v27 }
 0x236   : > { %9876 = vmatpush1.bf16.msra.mxu0 %v9875_v31  ;;  %2133 = vmatprep.mubr.f32.mxu1 %v15273_v28  ;;  %v2698_v31 = vld [vmem:[#allocation3 + $0x2e0] sm:$0xf] }
 0x237   : > { %2278 = vmatprep.mubr.f32.mxu0 %v15273_v28  ;;  %9879 = vmatprep.subr.msk.bf16.mxu0 %vm12915_vm2, %v9877_v32  ;;  %v9900_v33 = vpack.c.bf16 %v2698_v31, %v2690_v30  ;;  %v4524_v30 = vld [vmem:[#allocation8 + $0xc68] sm:$0xff]  ;;  %v4530_v31 = vld [vmem:[#allocation8 + $0xc98] sm:$0xff] }
 0x239   : > { %9093 = vmatmul.mubr.msk.f32.gmra.mrb[40].mxu1 %vm700_vm3, %v13069_v41  ;;  %9109 = vmatmul.mubr.msk.f32.gmra.mrb[40].mxu0 %vm700_vm3, %v12928_v52 }
 0x23a   : > { %2139 = vmatprep.mubr.f32.mxu1 %v15273_v28  ;;  %2284 = vmatprep.mubr.f32.mxu0 %v15273_v28 }
 0x23b   : > { %9882 = vmatpush1.bf16.msk.msra.mxu0 %vm12915_vm2, %v9880_v63  ;;  %v13786_v63 = vld [vmem:[%s12891_s15 + $0x78] sm:$0xff] }
 0x23c   : > { %9894 = vmatprep.subr.bf16.mxu0 %v9893_v0 }
 0x23d   : > { %9094 = vmatmul.mubr.msk.f32.gmra.mrb[42].mxu1 %vm700_vm3, %v13078_v42  ;;  %9110 = vmatmul.mubr.msk.f32.gmra.mrb[42].mxu0 %vm700_vm3, %v12938_v61  ;;  %v2680_v61 = vld [vmem:[#allocation3 + $0x250] sm:$0xff] }
 0x23e   : > { %2145 = vmatprep.mubr.f32.mxu1 %v15273_v28  ;;  %2290 = vmatprep.mubr.f32.mxu0 %v15273_v28 }
 0x241   : > { %9095 = vmatmul.mubr.msk.f32.gmra.mrb[44].mxu1 %vm700_vm3, %v13087_v43  ;;  %9111 = vmatmul.mubr.msk.f32.gmra.mrb[44].mxu0 %vm700_vm3, %v12954_v9 }
 0x242   : > { %2151 = vmatprep.mubr.f32.mxu1 %v15273_v28  ;;  %2296 = vmatprep.mubr.f32.mxu0 %v15273_v28 }
 0x245   : > { %9096 = vmatmul.mubr.msk.f32.gmra.mrb[46].mxu1 %vm700_vm3, %v13096_v44  ;;  %9112 = vmatmul.mubr.msk.f32.gmra.mrb[46].mxu0 %vm700_vm3, %v12972_v14 }
 0x246   : > { %2157 = vmatprep.mubr.f32.mxu1 %v15273_v28  ;;  %2302 = vmatprep.mubr.f32.mxu0 %v15273_v28 }
 0x249   : > { %9097 = vmatmul.mubr.msk.f32.gmra.mrb[48].mxu1 %vm700_vm3, %v13105_v45  ;;  %9113 = vmatmul.mubr.msk.f32.gmra.mrb[48].mxu0 %vm700_vm3, %v12984_v16 }
 0x24a   : > { %2163 = vmatprep.mubr.f32.mxu1 %v15273_v28  ;;  %2308 = vmatprep.mubr.f32.mxu0 %v15273_v28 }
 0x24d   : > { %9098 = vmatmul.mubr.msk.f32.gmra.mrb[50].mxu1 %vm700_vm3, %v13114_v46  ;;  %9114 = vmatmul.mubr.msk.f32.gmra.mrb[50].mxu0 %vm700_vm3, %v12996_v18 }
 0x24e   : > { %2169 = vmatprep.mubr.f32.mxu1 %v15273_v28  ;;  %2314 = vmatprep.mubr.f32.mxu0 %v15273_v28 }
 0x251   : > { %9099 = vmatmul.mubr.msk.f32.gmra.mrb[52].mxu1 %vm700_vm3, %v13123_v47  ;;  %9115 = vmatmul.mubr.msk.f32.gmra.mrb[52].mxu0 %vm700_vm3, %v13008_v20 }
 0x252   : > { %2175 = vmatprep.mubr.f32.mxu1 %v15273_v28  ;;  %2320 = vmatprep.mubr.f32.mxu0 %v15273_v28 }
 0x255   : > { %9100 = vmatmul.mubr.msk.f32.gmra.mrb[54].mxu1 %vm700_vm3, %v12931_v53  ;;  %9116 = vmatmul.mubr.msk.f32.gmra.mrb[54].mxu0 %vm700_vm3, %v13020_v26  ;;  %v2672_v53 = vld [vmem:[#allocation3 + $0x210] sm:$0xff] }
 0x256   : > { %2181 = vmatprep.mubr.f32.mxu1 %v15273_v28  ;;  %2326 = vmatprep.mubr.f32.mxu0 %v15273_v28 }
 0x259   : > { %9101 = vmatmul.mubr.msk.f32.gmra.mrb[56].mxu1 %vm700_vm3, %v12942_v62  ;;  %9117 = vmatmul.mubr.msk.f32.gmra.mrb[56].mxu0 %vm700_vm3, %v13029_v34 }
 0x25a   : > { %2187 = vmatprep.mubr.f32.mxu1 %v15273_v28  ;;  %2332 = vmatprep.mubr.f32.mxu0 %v15273_v28 }
 0x25d   : > { %9102 = vmatmul.mubr.msk.f32.gmra.mrb[58].mxu1 %vm700_vm3, %v12957_v10  ;;  %9118 = vmatmul.mubr.msk.f32.gmra.mrb[58].mxu0 %vm700_vm3, %v13040_v37  ;;  %v2689_v10 = vld [vmem:[#allocation3 + $0x298] sm:$0xff] }
 0x25e   : > { %2193 = vmatprep.mubr.f32.mxu1 %v15273_v28  ;;  %2338 = vmatprep.mubr.f32.mxu0 %v15273_v28 }
 0x261   : > { %9103 = vmatmul.mubr.msk.f32.gmra.mrb[60].mxu1 %vm700_vm3, %v12975_v15  ;;  %9119 = vmatmul.mubr.msk.f32.gmra.mrb[60].mxu0 %vm700_vm3, %v13051_v39  ;;  %v2697_v15 = vld [vmem:[#allocation3 + $0x2d8] sm:$0xf] }
 0x262   : > { %2199 = vmatprep.mubr.f32.mxu1 %v15273_v28  ;;  %2344 = vmatprep.mubr.f32.mxu0 %v15273_v28  ;;  %v9887_v2 = vpack.c.bf16 %v2697_v15, %v2689_v10  ;;  %v2701_v10 = vld [vmem:[#allocation3 + $0x2f8] sm:$0xf]  ;;  %v13795_v15 = vld [vmem:[%s12891_s15 + $0x80] sm:$0xff] }
 0x265   : > { %9104 = vmatmul.mubr.msk.f32.gmra.mrb[118].mxu1 %vm700_vm3, %v12987_v17  ;;  %9120 = vmatmul.mubr.msk.f32.gmra.mrb[62].mxu0 %vm700_vm3, %v13060_v40  ;;  %v9885_v17 = vpack.c.bf16 %v2680_v61, %v2672_v53  ;;  %v2684_v53 = vld [vmem:[#allocation3 + $0x270] sm:$0xff] }
 0x266   : > { %2203 = vmatprep.mubr.f32.mxu1 %v15273_v28  ;;  %2350 = vmatprep.mubr.f32.mxu0 %v15273_v28 }
 0x268   : > { %v1231_v52 = vpop.f32.mrb[62].mxu1 }
 0x269   : > { %9105 = vmatmul.mubr.msk.f32.gmra.mrb[120].mxu1 %vm700_vm3, %v12999_v19  ;;  %9121 = vmatmul.mubr.msk.f32.gmra.mrb[64].mxu0 %vm700_vm3, %v13069_v41  ;;  %v1232_v62 = vpop.f32.mrb[63].mxu1  ;;  %v2676_v52 = vld [vmem:[#allocation3 + $0x230] sm:$0xff] }
 0x26a   : > { %2356 = vmatprep.mubr.f32.mxu0 %v15273_v28  ;;  %2489 = vmatprep.mubr.f32.mxu1 %v15273_v28  ;;  %v2693_v62 = vld [vmem:[#allocation3 + $0x2b8] sm:$0xff] }
 0x26c   : > { %v1235_v1 = vpop.f32.mrb[64].mxu1 }
 0x26d   : > { %9122 = vmatmul.mubr.msk.f32.gmra.mrb[66].mxu0 %vm700_vm3, %v13078_v42  ;;  %9136 = vmatmul.mubr.msk.f32.vlgmr.msra.gmra.mrb[66].mxu1 %vm700_vm3, %v13296_v27  ;;  %v1236_v19 = vpop.f32.mrb[65].mxu1  ;;  %v12190_v27 = vld [vmem:[%s12891_s15 + $0x10] sm:$0xff] }
 0x26e   : > { %2362 = vmatprep.mubr.f32.mxu0 %v15273_v28  ;;  %2495 = vmatprep.mubr.f32.mxu1 %v15273_v28 }
 0x26f   : > { %9886 = vmatpush1.bf16.msra.mxu1 %v9885_v17  ;;  %v9905_v17 = vpack.c.bf16 %v2684_v53, %v2676_v52  ;;  %v4536_v53 = vld [vmem:[#allocation8 + $0xcc8] sm:$0xff] }
 0x270   : > { %9889 = vmatprep.subr.msk.bf16.mxu1 %vm12915_vm2, %v9887_v2  ;;  %v9907_v2 = vpack.c.bf16 %v2701_v10, %v2693_v62  ;;  %v4535_v10 = vld [vmem:[#allocation8 + $0xcc0] sm:$0xff] }
 0x271   : > { %9123 = vmatmul.mubr.msk.f32.gmra.mrb[68].mxu0 %vm700_vm3, %v13087_v43  ;;  %9137 = vmatmul.mubr.msk.f32.gmra.mrb[68].mxu1 %vm700_vm3, %v12189_v11  ;;  %v13844_v11 = vld [vmem:[%s12891_s15 + $0xa8] sm:$0xff] }
 0x272   : > { %2368 = vmatprep.mubr.f32.mxu0 %v15273_v28  ;;  %2501 = vmatprep.mubr.f32.mxu1 %v15273_v28 }
 0x273   : > { %9892 = vmatpush1.bf16.msk.msra.mxu1 %vm12915_vm2, %v9890_v7  ;;  %v13815_v7 = vld [vmem:[%s12891_s15 + $0x90] sm:$0xff] }
 0x274   : > { %9904 = vmatprep.subr.bf16.mxu1 %v9903_v8  ;;  %v13826_v8 = vld [vmem:[%s12891_s15 + $0x98] sm:$0xff] }
 0x275   : > { %9124 = vmatmul.mubr.msk.f32.gmra.mrb[70].mxu0 %vm700_vm3, %v13096_v44  ;;  %9138 = vmatmul.mubr.msk.f32.gmra.mrb[70].mxu1 %vm700_vm3, %v12190_v27  ;;  %v13853_v27 = vld [vmem:[%s12891_s15 + $0xb0] sm:$0xff] }
 0x276   : > { %2374 = vmatprep.mubr.f32.mxu0 %v15273_v28  ;;  %2507 = vmatprep.mubr.f32.mxu1 %v15273_v28 }
 0x279   : > { %9125 = vmatmul.mubr.msk.f32.gmra.mrb[72].mxu0 %vm700_vm3, %v13105_v45  ;;  %9139 = vmatmul.mubr.msk.f32.gmra.mrb[72].mxu1 %vm700_vm3, %v12954_v9  ;;  %v13611_v9 = vld [vmem:[%s12891_s15 + $0xa0] sm:$0xff] }
 0x27a   : > { %2380 = vmatprep.mubr.f32.mxu0 %v15273_v28  ;;  %2513 = vmatprep.mubr.f32.mxu1 %v15273_v28 }
 0x27d   : > { %9126 = vmatmul.mubr.msk.f32.gmra.mrb[74].mxu0 %vm700_vm3, %v13114_v46  ;;  %9140 = vmatmul.mubr.msk.f32.gmra.mrb[74].mxu1 %vm700_vm3, %v12972_v14  ;;  %v13620_v14 = vld [vmem:[%s12891_s15 + $0xa8] sm:$0xff] }
 0x27e   : > { %2386 = vmatprep.mubr.f32.mxu0 %v15273_v28  ;;  %2519 = vmatprep.mubr.f32.mxu1 %v15273_v28 }
 0x281   : > { %9127 = vmatmul.mubr.msk.f32.gmra.mrb[76].mxu0 %vm700_vm3, %v13123_v47  ;;  %9141 = vmatmul.mubr.msk.f32.gmra.mrb[76].mxu1 %vm700_vm3, %v12984_v16  ;;  %v13629_v16 = vld [vmem:[%s12891_s15 + $0xb0] sm:$0xff] }
 0x282   : > { %2392 = vmatprep.mubr.f32.mxu0 %v15273_v28  ;;  %2525 = vmatprep.mubr.f32.mxu1 %v15273_v28 }
 0x285   : > { %9128 = vmatmul.mubr.msk.f32.gmra.mrb[78].mxu0 %vm700_vm3, %v13611_v9  ;;  %9142 = vmatmul.mubr.msk.f32.gmra.mrb[78].mxu1 %vm700_vm3, %v12996_v18  ;;  %v13638_v18 = vld [vmem:[%s12891_s15 + $0xb8] sm:$0xff] }
 0x286   : > { %2398 = vmatprep.mubr.f32.mxu0 %v15273_v28  ;;  %2531 = vmatprep.mubr.f32.mxu1 %v15273_v28 }
 0x289   : > { %9129 = vmatmul.mubr.msk.f32.gmra.mrb[80].mxu0 %vm700_vm3, %v13620_v14  ;;  %9143 = vmatmul.mubr.msk.f32.gmra.mrb[80].mxu1 %vm700_vm3, %v13008_v20  ;;  %v13647_v20 = vld [vmem:[%s12891_s15 + $0xc0] sm:$0xff] }
 0x28a   : > { %2404 = vmatprep.mubr.f32.mxu0 %v15273_v28  ;;  %2537 = vmatprep.mubr.f32.mxu1 %v15273_v28 }
 0x28d   : > { %9130 = vmatmul.mubr.msk.f32.gmra.mrb[82].mxu0 %vm700_vm3, %v13629_v16  ;;  %9144 = vmatmul.mubr.msk.f32.gmra.mrb[82].mxu1 %vm700_vm3, %v13020_v26  ;;  %v2674_v26 = vld [vmem:[#allocation3 + $0x220] sm:$0xff] }
 0x28e   : > { %2410 = vmatprep.mubr.f32.mxu0 %v15273_v28  ;;  %2543 = vmatprep.mubr.f32.mxu1 %v15273_v28  ;;  %v9895_v24 = vpack.c.bf16 %v2682_v21, %v2674_v26 }
 0x291   : > { %9131 = vmatmul.mubr.msk.f32.gmra.mrb[84].mxu0 %vm700_vm3, %v13638_v18  ;;  %9145 = vmatmul.mubr.msk.f32.gmra.mrb[84].mxu1 %vm700_vm3, %v13029_v34 }
 0x292   : > { %2416 = vmatprep.mubr.f32.mxu0 %v15273_v28  ;;  %2549 = vmatprep.mubr.f32.mxu1 %v15273_v28 }
 0x295   : > { %9132 = vmatmul.mubr.msk.f32.gmra.mrb[104].mxu0 %vm700_vm3, %v13647_v20  ;;  %9146 = vmatmul.mubr.msk.f32.gmra.mrb[86].mxu1 %vm700_vm3, %v13040_v37  ;;  %v13665_v37 = vld [vmem:[%s12891_s15 + $0x10] sm:$0xff] }
 0x296   : > { %2420 = vmatprep.mubr.f32.mxu0 %v15273_v28  ;;  %2555 = vmatprep.mubr.f32.mxu1 %v15273_v28 }
 0x298   : > { %v1448_v34 = vpop.f32.mrb[86].mxu0 }
 0x299   : > { %v1449_v22 = vpop.f32.mrb[87].mxu0  ;;  %9133 = vmatmul.mubr.msk.f32.gmra.mrb[106].mxu0 %vm700_vm3, %v13656_v23  ;;  %9147 = vmatmul.mubr.msk.f32.gmra.mrb[88].mxu1 %vm700_vm3, %v13051_v39  ;;  %v13673_v39 = vld [vmem:[%s12891_s15 + $0x18] sm:$0xff] }
 0x29a   : > { %2561 = vmatprep.mubr.f32.mxu1 %v15273_v28  ;;  %2868 = vmatprep.mubr.f32.mxu0 %v15273_v28  ;;  %v4518_v22 = vld [vmem:[#allocation8 + $0xc38] sm:$0xff] }
 0x29c   : > { %v1452_v29 = vpop.f32.mrb[88].mxu0 }
 0x29d   : > { %v1453_v32 = vpop.f32.mrb[89].mxu0  ;;  %9148 = vmatmul.mubr.msk.f32.gmra.mrb[90].mxu1 %vm700_vm3, %v13060_v40  ;;  %9190 = vmatmul.mubr.msk.f32.vlgmr.msra.gmra.mrb[0].mxu0 %vm700_vm3, %v13665_v37  ;;  %v13685_v40 = vld [vmem:[%s12891_s15 + $0x20] sm:$0xff] }
 0x29e   : > { %9896 = vmatpush1.bf16.msra.mxu0 %v9895_v24  ;;  %2567 = vmatprep.mubr.f32.mxu1 %v15273_v28  ;;  %v4511_v24 = vld [vmem:[#allocation8 + $0xc00] sm:$0xff] }
 0x29f   : > { %2874 = vmatprep.mubr.f32.mxu0 %v15273_v28  ;;  %9899 = vmatprep.subr.msk.bf16.mxu0 %vm12915_vm2, %v9897_v25  ;;  %v4517_v25 = vld [vmem:[#allocation8 + $0xc30] sm:$0xff]  ;;  %v4523_v32 = vld [vmem:[#allocation8 + $0xc60] sm:$0xff] }
 0x2a0   : > { %v9915_v29 = vpack.c.bf16 %v4517_v25, %v4511_v24  ;;  %v4565_v25 = vld [vmem:[#allocation8 + $0xdb0] sm:$0xff] }
 0x2a1   : > { %9149 = vmatmul.mubr.msk.f32.gmra.mrb[92].mxu1 %vm700_vm3, %v13069_v41  ;;  %9191 = vmatmul.mubr.msk.f32.gmra.mrb[2].mxu0 %vm700_vm3, %v13673_v39  ;;  %v13696_v41 = vld [vmem:[%s12891_s15 + $0x28] sm:$0xff] }
 0x2a2   : > { %2573 = vmatprep.mubr.f32.mxu1 %v15273_v28  ;;  %2880 = vmatprep.mubr.f32.mxu0 %v15273_v28 }
 0x2a3   : > { %9902 = vmatpush1.bf16.msk.msra.mxu0 %vm12915_vm2, %v9900_v33  ;;  %v9917_v33 = vpack.c.bf16 %v4530_v31, %v4524_v30  ;;  %v4572_v30 = vld [vmem:[#allocation8 + $0xde8] sm:$0xff]  ;;  %v4578_v31 = vld [vmem:[#allocation8 + $0xe18] sm:$0xff] }
 0x2a5   : > { %9150 = vmatmul.mubr.msk.f32.gmra.mrb[94].mxu1 %vm700_vm3, %v13078_v42  ;;  %9192 = vmatmul.mubr.msk.f32.gmra.mrb[4].mxu0 %vm700_vm3, %v13685_v40  ;;  %v13705_v42 = vld [vmem:[%s12891_s15 + $0x30] sm:$0xff] }
 0x2a6   : > { %2579 = vmatprep.mubr.f32.mxu1 %v15273_v28  ;;  %2886 = vmatprep.mubr.f32.mxu0 %v15273_v28 }
 0x2a9   : > { %9151 = vmatmul.mubr.msk.f32.gmra.mrb[96].mxu1 %vm700_vm3, %v13087_v43  ;;  %9193 = vmatmul.mubr.msk.f32.gmra.mrb[6].mxu0 %vm700_vm3, %v13696_v41  ;;  %v13714_v43 = vld [vmem:[%s12891_s15 + $0x38] sm:$0xff] }
 0x2aa   : > { %2585 = vmatprep.mubr.f32.mxu1 %v15273_v28  ;;  %2892 = vmatprep.mubr.f32.mxu0 %v15273_v28 }
 0x2ad   : > { %9152 = vmatmul.mubr.msk.f32.gmra.mrb[98].mxu1 %vm700_vm3, %v13096_v44  ;;  %9194 = vmatmul.mubr.msk.f32.gmra.mrb[8].mxu0 %vm700_vm3, %v13705_v42  ;;  %v13723_v44 = vld [vmem:[%s12891_s15 + $0x40] sm:$0xff] }
 0x2ae   : > { %2591 = vmatprep.mubr.f32.mxu1 %v15273_v28  ;;  %2898 = vmatprep.mubr.f32.mxu0 %v15273_v28 }
 0x2b1   : > { %9153 = vmatmul.mubr.msk.f32.gmra.mrb[100].mxu1 %vm700_vm3, %v13105_v45  ;;  %9195 = vmatmul.mubr.msk.f32.gmra.mrb[10].mxu0 %vm700_vm3, %v13714_v43  ;;  %v13732_v45 = vld [vmem:[%s12891_s15 + $0x48] sm:$0xff] }
 0x2b2   : > { %2597 = vmatprep.mubr.f32.mxu1 %v15273_v28  ;;  %2904 = vmatprep.mubr.f32.mxu0 %v15273_v28 }
 0x2b5   : > { %9154 = vmatmul.mubr.msk.f32.gmra.mrb[102].mxu1 %vm700_vm3, %v13114_v46  ;;  %9196 = vmatmul.mubr.msk.f32.gmra.mrb[12].mxu0 %vm700_vm3, %v13723_v44  ;;  %v13741_v46 = vld [vmem:[%s12891_s15 + $0x50] sm:$0xff] }
 0x2b6   : > { %2603 = vmatprep.mubr.f32.mxu1 %v15273_v28  ;;  %2910 = vmatprep.mubr.f32.mxu0 %v15273_v28 }
 0x2b9   : > { %9155 = vmatmul.mubr.msk.f32.gmra.mrb[104].mxu1 %vm700_vm3, %v13123_v47  ;;  %9197 = vmatmul.mubr.msk.f32.gmra.mrb[14].mxu0 %vm700_vm3, %v13732_v45  ;;  %v13750_v47 = vld [vmem:[%s12891_s15 + $0x58] sm:$0xff] }
 0x2ba   : > { %2609 = vmatprep.mubr.f32.mxu1 %v15273_v28  ;;  %2916 = vmatprep.mubr.f32.mxu0 %v15273_v28 }
 0x2bd   : > { %9156 = vmatmul.mubr.msk.f32.gmra.mrb[106].mxu1 %vm700_vm3, %v13611_v9  ;;  %9198 = vmatmul.mubr.msk.f32.gmra.mrb[16].mxu0 %vm700_vm3, %v13741_v46  ;;  %v13862_v9 = vld [vmem:[%s12891_s15 + $0xb8] sm:$0xff] }
 0x2be   : > { %2615 = vmatprep.mubr.f32.mxu1 %v15273_v28  ;;  %2922 = vmatprep.mubr.f32.mxu0 %v15273_v28 }
 0x2c1   : > { %9157 = vmatmul.mubr.msk.f32.gmra.mrb[108].mxu1 %vm700_vm3, %v13620_v14  ;;  %9199 = vmatmul.mubr.msk.f32.gmra.mrb[18].mxu0 %vm700_vm3, %v13750_v47  ;;  %v13871_v14 = vld [vmem:[%s12891_s15 + $0xc0] sm:$0xff] }
 0x2c2   : > { %2621 = vmatprep.mubr.f32.mxu1 %v15273_v28  ;;  %2928 = vmatprep.mubr.f32.mxu0 %v15273_v28 }
 0x2c5   : > { %9158 = vmatmul.mubr.msk.f32.gmra.mrb[110].mxu1 %vm700_vm3, %v13629_v16  ;;  %9200 = vmatmul.mubr.msk.f32.gmra.mrb[20].mxu0 %vm700_vm3, %v13759_v35  ;;  %v13880_v16 = vld [vmem:[%s12891_s15 + $0xc8] sm:$0xff] }
 0x2c6   : > { %2627 = vmatprep.mubr.f32.mxu1 %v15273_v28  ;;  %2934 = vmatprep.mubr.f32.mxu0 %v15273_v28 }
 0x2c9   : > { %9159 = vmatmul.mubr.msk.f32.gmra.mrb[112].mxu1 %vm700_vm3, %v13638_v18  ;;  %9201 = vmatmul.mubr.msk.f32.gmra.mrb[22].mxu0 %vm700_vm3, %v13768_v36  ;;  %v13889_v18 = vld [vmem:[%s12891_s15 + $0xd0] sm:$0xff] }
 0x2ca   : > { %2633 = vmatprep.mubr.f32.mxu1 %v15273_v28  ;;  %2940 = vmatprep.mubr.f32.mxu0 %v15273_v28 }
 0x2cd   : > { %9160 = vmatmul.mubr.msk.f32.gmra.mrb[122].mxu1 %vm700_vm3, %v13647_v20  ;;  %9202 = vmatmul.mubr.msk.f32.gmra.mrb[24].mxu0 %vm700_vm3, %v13777_v48  ;;  %v13898_v20 = vld [vmem:[%s12891_s15 + $0xd8] sm:$0xff] }
 0x2ce   : > { %2637 = vmatprep.mubr.f32.mxu1 %v15273_v28  ;;  %2946 = vmatprep.mubr.f32.mxu0 %v15273_v28 }
 0x2d0   : > { %v1665_v0 = vpop.f32.mrb[114].mxu1 }
 0x2d1   : > { %9161 = vmatmul.mubr.msk.f32.gmra.mrb[124].mxu1 %vm700_vm3, %v13656_v23  ;;  %9203 = vmatmul.mubr.msk.f32.gmra.mrb[26].mxu0 %vm700_vm3, %v13786_v63  ;;  %v1666_v61 = vpop.f32.mrb[115].mxu1  ;;  %v9913_v23 = vpack.c.bf16 %v4518_v22, %v4512_v13  ;;  %v4529_v0 = vld [vmem:[#allocation8 + $0xc90] sm:$0xff]  ;;  %v4566_v13 = vld [vmem:[#allocation8 + $0xdb8] sm:$0xff]  ;;  %v4559_v22 = vld [vmem:[#allocation8 + $0xd80] sm:$0xff] }
 0x2d2   : > { %2952 = vmatprep.mubr.f32.mxu0 %v15273_v28  ;;  %3085 = vmatprep.mubr.f32.mxu1 %v15273_v28  ;;  %v9919_v52 = vpack.c.bf16 %v4529_v0, %v4523_v32  ;;  %v4542_v61 = vld [vmem:[#allocation8 + $0xcf8] sm:$0xff]  ;;  %v9933_v32 = vpack.c.bf16 %v4578_v31, %v4572_v30  ;;  %v4577_v0 = vld [vmem:[#allocation8 + $0xe10] sm:$0xff] }
 0x2d3   : > { %9914 = vmatprep.subr.bf16.mxu0 %v9913_v23  ;;  %v9921_v62 = vpack.c.bf16 %v4542_v61, %v4536_v53  ;;  %v4513_v53 = vld [vmem:[#allocation8 + $0xc10] sm:$0xff] }
 0x2d4   : > { %v1669_v1 = vpop.f32.mrb[116].mxu1  ;;  %v4537_v31 = vld [vmem:[#allocation8 + $0xcd0] sm:$0xff] }
 0x2d5   : > { %9204 = vmatmul.mubr.msk.f32.gmra.mrb[28].mxu0 %vm700_vm3, %v13795_v15  ;;  %9218 = vmatmul.mubr.msk.f32.vlgmr.msra.gmra.mrb[14].mxu1 %vm700_vm3, %v13665_v37  ;;  %v1670_v19 = vpop.f32.mrb[117].mxu1 }
 0x2d6   : > { %2958 = vmatprep.mubr.f32.mxu0 %v15273_v28  ;;  %3091 = vmatprep.mubr.f32.mxu1 %v15273_v28  ;;  %v4547_v19 = vld [vmem:[#allocation8 + $0xd20] sm:$0xff] }
 0x2d7   : > { %9906 = vmatpush1.bf16.msra.mxu1 %v9905_v17  ;;  %v4541_v17 = vld [vmem:[#allocation8 + $0xcf0] sm:$0xff] }
 0x2d8   : > { %9909 = vmatprep.subr.msk.bf16.mxu1 %vm12915_vm2, %v9907_v2  ;;  %v9923_v1 = vpack.c.bf16 %v4541_v17, %v4535_v10  ;;  %v4548_v2 = vld [vmem:[#allocation8 + $0xd28] sm:$0xff]  ;;  %v4526_v10 = vld [vmem:[#allocation8 + $0xc78] sm:$0xff] }
 0x2d9   : > { %9205 = vmatmul.mubr.msk.f32.gmra.mrb[30].mxu0 %vm700_vm3, %v13804_v5  ;;  %9219 = vmatmul.mubr.msk.f32.gmra.mrb[16].mxu1 %vm700_vm3, %v13673_v39  ;;  %v9925_v4 = vpack.c.bf16 %v4554_v3, %v4548_v2  ;;  %v4532_v17 = vld [vmem:[#allocation8 + $0xca8] sm:$0xff]  ;;  %v4590_v3 = vld [vmem:[#allocation8 + $0xe78] sm:$0xff] }
 0x2da   : > { %2964 = vmatprep.mubr.f32.mxu0 %v15273_v28  ;;  %3097 = vmatprep.mubr.f32.mxu1 %v15273_v28  ;;  %v4584_v2 = vld [vmem:[#allocation8 + $0xe48] sm:$0xff] }
 0x2db   : > { %9912 = vmatpush1.bf16.msk.msra.mxu1 %vm12915_vm2, %v9910_v6  ;;  %v4553_v6 = vld [vmem:[#allocation8 + $0xd50] sm:$0xff] }
 0x2dd   : > { %9206 = vmatmul.mubr.msk.f32.gmra.mrb[32].mxu0 %vm700_vm3, %v13815_v7  ;;  %9220 = vmatmul.mubr.msk.f32.gmra.mrb[18].mxu1 %vm700_vm3, %v13685_v40 }
 0x2de   : > { %2970 = vmatprep.mubr.f32.mxu0 %v15273_v28  ;;  %3103 = vmatprep.mubr.f32.mxu1 %v15273_v28 }
 0x2e1   : > { %9207 = vmatmul.mubr.msk.f32.gmra.mrb[34].mxu0 %vm700_vm3, %v13826_v8  ;;  %9221 = vmatmul.mubr.msk.f32.gmra.mrb[20].mxu1 %vm700_vm3, %v13696_v41 }
 0x2e2   : > { %2976 = vmatprep.mubr.f32.mxu0 %v15273_v28  ;;  %3109 = vmatprep.mubr.f32.mxu1 %v15273_v28 }
 0x2e5   : > { %9208 = vmatmul.mubr.msk.f32.gmra.mrb[36].mxu0 %vm700_vm3, %v13835_v38  ;;  %9222 = vmatmul.mubr.msk.f32.gmra.mrb[22].mxu1 %vm700_vm3, %v13705_v42 }
 0x2e6   : > { %2982 = vmatprep.mubr.f32.mxu0 %v15273_v28  ;;  %3115 = vmatprep.mubr.f32.mxu1 %v15273_v28 }
 0x2e9   : > { %9209 = vmatmul.mubr.msk.f32.gmra.mrb[90].mxu0 %vm700_vm3, %v13844_v11  ;;  %9223 = vmatmul.mubr.msk.f32.gmra.mrb[24].mxu1 %vm700_vm3, %v13714_v43 }
 0x2ea   : > { %2988 = vmatprep.mubr.f32.mxu0 %v15273_v28  ;;  %3121 = vmatprep.mubr.f32.mxu1 %v15273_v28 }
 0x2ed   : > { %9210 = vmatmul.mubr.msk.f32.gmra.mrb[92].mxu0 %vm700_vm3, %v13853_v27  ;;  %9224 = vmatmul.mubr.msk.f32.gmra.mrb[26].mxu1 %vm700_vm3, %v13723_v44 }
 0x2ee   : > { %2994 = vmatprep.mubr.f32.mxu0 %v15273_v28  ;;  %3127 = vmatprep.mubr.f32.mxu1 %v15273_v28 }
 0x2f1   : > { %9211 = vmatmul.mubr.msk.f32.gmra.mrb[94].mxu0 %vm700_vm3, %v13862_v9  ;;  %9225 = vmatmul.mubr.msk.f32.gmra.mrb[28].mxu1 %vm700_vm3, %v13732_v45 }
 0x2f2   : > { %3000 = vmatprep.mubr.f32.mxu0 %v15273_v28  ;;  %3133 = vmatprep.mubr.f32.mxu1 %v15273_v28 }
 0x2f5   : > { %9212 = vmatmul.mubr.msk.f32.gmra.mrb[96].mxu0 %vm700_vm3, %v13871_v14  ;;  %9226 = vmatmul.mubr.msk.f32.gmra.mrb[30].mxu1 %vm700_vm3, %v13741_v46 }
 0x2f6   : > { %3006 = vmatprep.mubr.f32.mxu0 %v15273_v28  ;;  %3139 = vmatprep.mubr.f32.mxu1 %v15273_v28 }
 0x2f9   : > { %9213 = vmatmul.mubr.msk.f32.gmra.mrb[98].mxu0 %vm700_vm3, %v13880_v16  ;;  %9227 = vmatmul.mubr.msk.f32.gmra.mrb[32].mxu1 %vm700_vm3, %v13750_v47 }
 0x2fa   : > { %3012 = vmatprep.mubr.f32.mxu0 %v15273_v28  ;;  %3145 = vmatprep.mubr.f32.mxu1 %v15273_v28 }
 0x2fd   : > { %9214 = vmatmul.mubr.msk.f32.gmra.mrb[108].mxu0 %vm700_vm3, %v13889_v18  ;;  %9228 = vmatmul.mubr.msk.f32.gmra.mrb[34].mxu1 %vm700_vm3, %v13759_v35 }
 0x2fe   : > { %3016 = vmatprep.mubr.f32.mxu0 %v15273_v28  ;;  %3151 = vmatprep.mubr.f32.mxu1 %v15273_v28 }
 0x300   : > { %v1984_v26 = vpop.f32.mrb[100].mxu0 }
 0x301   : > { %v1985_v21 = vpop.f32.mrb[101].mxu0  ;;  %9215 = vmatmul.mubr.msk.f32.gmra.mrb[110].mxu0 %vm700_vm3, %v13898_v20  ;;  %9229 = vmatmul.mubr.msk.f32.gmra.mrb[36].mxu1 %vm700_vm3, %v13768_v36  ;;  %v9927_v26 = vpack.c.bf16 %v4553_v6, %v4547_v19  ;;  %v9937_v19 = vpack.c.bf16 %v4590_v3, %v4584_v2  ;;  %v4589_v6 = vld [vmem:[#allocation8 + $0xe70] sm:$0xff]  ;;  %v4555_v2 = vld [vmem:[#allocation8 + $0xd60] sm:$0xff] }
 0x302   : > { %3157 = vmatprep.mubr.f32.mxu1 %v15273_v28  ;;  %3302 = vmatprep.mubr.f32.mxu0 %v15273_v28  ;;  %v4514_v21 = vld [vmem:[#allocation8 + $0xc18] sm:$0xff] }
 0x304   : > { %v1988_v34 = vpop.f32.mrb[102].mxu0 }
 0x305   : > { %v1989_v12 = vpop.f32.mrb[103].mxu0  ;;  %9230 = vmatmul.mubr.msk.f32.gmra.mrb[38].mxu1 %vm700_vm3, %v13777_v48  ;;  %9246 = vmatmul.mubr.msk.f32.vlgmr.msra.gmra.mrb[38].mxu0 %vm700_vm3, %v13665_v37  ;;  %v4520_v34 = vld [vmem:[#allocation8 + $0xc48] sm:$0xff] }
 0x306   : > { %3163 = vmatprep.mubr.f32.mxu1 %v15273_v28  ;;  %3308 = vmatprep.mubr.f32.mxu0 %v15273_v28  ;;  %v4560_v12 = vld [vmem:[#allocation8 + $0xd88] sm:$0xff]  ;;  %v10041_v23 = vpack.c.bf16 %v4520_v34, %v4514_v21 }
 0x307   : > { %9916 = vmatpush1.bf16.msra.mxu0 %v9915_v29  ;;  %v9929_v24 = vpack.c.bf16 %v4566_v13, %v4560_v12  ;;  %v9931_v29 = vpack.c.bf16 %v4565_v25, %v4559_v22  ;;  %v10045_v12 = vpack.c.bf16 %v4532_v17, %v4526_v10  ;;  %v4525_v13 = vld [vmem:[#allocation8 + $0xc70] sm:$0xff]  ;;  %v4531_v22 = vld [vmem:[#allocation8 + $0xca0] sm:$0xff]  ;;  %v4544_v25 = vld [vmem:[#allocation8 + $0xd08] sm:$0xff] }
 0x308   : > { %9918 = vmatprep.subr.bf16.mxu0 %v9917_v33  ;;  %10042 = vmatprep.subr.bf16.mxu1 %v10041_v23  ;;  %v4571_v33 = vld [vmem:[#allocation8 + $0xde0] sm:$0xff]  ;;  %v4601_v10 = vld [vmem:[#allocation8 + $0xed0] sm:$0xff] }
 0x309   : > { %9231 = vmatmul.mubr.msk.f32.gmra.mrb[40].mxu1 %vm700_vm3, %v13786_v63  ;;  %9247 = vmatmul.mubr.msk.f32.gmra.mrb[40].mxu0 %vm700_vm3, %v13673_v39 }
 0x30a   : > { %3169 = vmatprep.mubr.f32.mxu1 %v15273_v28  ;;  %3314 = vmatprep.mubr.f32.mxu0 %v15273_v28 }
 0x30b   : > { %9920 = vmatpush1.bf16.msra.mxu0 %v9919_v52  ;;  %v9935_v52 = vpack.c.bf16 %v4577_v0, %v4571_v33  ;;  %v4556_v33 = vld [vmem:[#allocation8 + $0xd68] sm:$0xff] }
 0x30c   : > { %9922 = vmatprep.subr.bf16.mxu0 %v9921_v62  ;;  %v4519_v62 = vld [vmem:[#allocation8 + $0xc40] sm:$0xff]  ;;  %v4596_v0 = vld [vmem:[#allocation8 + $0xea8] sm:$0xff] }
 0x30d   : > { %9232 = vmatmul.mubr.msk.f32.gmra.mrb[42].mxu1 %vm700_vm3, %v13795_v15  ;;  %9248 = vmatmul.mubr.msk.f32.gmra.mrb[42].mxu0 %vm700_vm3, %v13685_v40 }
 0x30e   : > { %3175 = vmatprep.mubr.f32.mxu1 %v15273_v28  ;;  %3320 = vmatprep.mubr.f32.mxu0 %v15273_v28 }
 0x30f   : > { %9924 = vmatpush1.bf16.msra.mxu0 %v9923_v1 }
 0x310   : > { %9926 = vmatprep.subr.bf16.mxu0 %v9925_v4  ;;  %v4583_v4 = vld [vmem:[#allocation8 + $0xe40] sm:$0xff] }
 0x311   : > { %9233 = vmatmul.mubr.msk.f32.gmra.mrb[44].mxu1 %vm700_vm3, %v13804_v5  ;;  %9249 = vmatmul.mubr.msk.f32.gmra.mrb[44].mxu0 %vm700_vm3, %v13696_v41  ;;  %v9939_v21 = vpack.c.bf16 %v4589_v6, %v4583_v4  ;;  %v4568_v4 = vld [vmem:[#allocation8 + $0xdc8] sm:$0xff]  ;;  %v4614_v6 = vld [vmem:[#allocation8 + $0xf38] sm:$0xff] }
 0x312   : > { %3181 = vmatprep.mubr.f32.mxu1 %v15273_v28  ;;  %3326 = vmatprep.mubr.f32.mxu0 %v15273_v28 }
 0x313   : > { %9928 = vmatpush1.bf16.msra.mxu0 %v9927_v26  ;;  %v10043_v26 = vpack.c.bf16 %v4519_v62, %v4513_v53  ;;  %v4595_v53 = vld [vmem:[#allocation8 + $0xea0] sm:$0xff] }
 0x314   : > { %9930 = vmatprep.subr.bf16.mxu0 %v9929_v24  ;;  %v4538_v24 = vld [vmem:[#allocation8 + $0xcd8] sm:$0xff]  ;;  %v9943_v3 = vpack.c.bf16 %v4601_v10, %v4595_v53 }
 0x315   : > { %9234 = vmatmul.mubr.msk.f32.gmra.mrb[46].mxu1 %vm700_vm3, %v13815_v7  ;;  %9250 = vmatmul.mubr.msk.f32.gmra.mrb[46].mxu0 %vm700_vm3, %v13705_v42  ;;  %v10049_v30 = vpack.c.bf16 %v4544_v25, %v4538_v24  ;;  %v4613_v24 = vld [vmem:[#allocation8 + $0xf30] sm:$0xff] }
 0x316   : > { %3187 = vmatprep.mubr.f32.mxu1 %v15273_v28  ;;  %3332 = vmatprep.mubr.f32.mxu0 %v15273_v28 }
 0x317   : > { %9932 = vmatpush1.bf16.msra.mxu0 %v9931_v29  ;;  %v10047_v29 = vpack.c.bf16 %v4531_v22, %v4525_v13  ;;  %v4567_v13 = vld [vmem:[#allocation8 + $0xdc0] sm:$0xff]  ;;  %v4574_v22 = vld [vmem:[#allocation8 + $0xdf8] sm:$0xff] }
 0x318   : > { %9934 = vmatprep.subr.bf16.mxu0 %v9933_v32  ;;  %v4543_v32 = vld [vmem:[#allocation8 + $0xd00] sm:$0xff] }
 0x319   : > { %9235 = vmatmul.mubr.msk.f32.gmra.mrb[48].mxu1 %vm700_vm3, %v13826_v8  ;;  %9251 = vmatmul.mubr.msk.f32.gmra.mrb[48].mxu0 %vm700_vm3, %v13714_v43 }
 0x31a   : > { %3193 = vmatprep.mubr.f32.mxu1 %v15273_v28  ;;  %3338 = vmatprep.mubr.f32.mxu0 %v15273_v28 }
 0x31b   : > { %9936 = vmatpush1.bf16.msra.mxu0 %v9935_v52  ;;  %v4602_v52 = vld [vmem:[#allocation8 + $0xed8] sm:$0xff] }
 0x31c   : > { %9938 = vmatprep.subr.bf16.mxu0 %v9937_v19  ;;  %v9941_v62 = vpack.c.bf16 %v4602_v52, %v4596_v0  ;;  %v4608_v19 = vld [vmem:[#allocation8 + $0xf08] sm:$0xff]  ;;  %v4626_v0 = vld [vmem:[#allocation8 + $0xf98] sm:$0xff]  ;;  %v4619_v52 = vld [vmem:[#allocation8 + $0xf60] sm:$0xff] }
 0x31d   : > { %9236 = vmatmul.mubr.msk.f32.gmra.mrb[50].mxu1 %vm700_vm3, %v13835_v38  ;;  %9252 = vmatmul.mubr.msk.f32.gmra.mrb[50].mxu0 %vm700_vm3, %v13723_v44 }
 0x31e   : > { %3199 = vmatprep.mubr.f32.mxu1 %v15273_v28  ;;  %3344 = vmatprep.mubr.f32.mxu0 %v15273_v28 }
 0x31f   : > { %9940 = vmatpush1.bf16.msra.mxu0 %v9939_v21  ;;  %v9945_v21 = vpack.c.bf16 %v4614_v6, %v4608_v19  ;;  %v4603_v19 = vld [vmem:[#allocation8 + $0xee0] sm:$0xff] }
 0x320   : > { %9942 = vmatprep.subr.bf16.mxu0 %v9941_v62  ;;  %v4625_v62 = vld [vmem:[#allocation8 + $0xf90] sm:$0xff] }
 0x321   : > { %9237 = vmatmul.mubr.msk.f32.gmra.mrb[52].mxu1 %vm700_vm3, %v13844_v11  ;;  %9253 = vmatmul.mubr.msk.f32.gmra.mrb[52].mxu0 %vm700_vm3, %v13732_v45 }
 0x322   : > { %3205 = vmatprep.mubr.f32.mxu1 %v15273_v28  ;;  %3350 = vmatprep.mubr.f32.mxu0 %v15273_v28 }
 0x323   : > { %9944 = vmatpush1.bf16.msra.mxu0 %v9943_v3  ;;  %v4604_v3 = vld [vmem:[#allocation8 + $0xee8] sm:$0xff] }
 0x324   : > { %9946 = vmatprep.subr.bf16.mxu0 %v9945_v21  ;;  %v4632_v21 = vld [vmem:[#allocation8 + $0xfc8] sm:$0xff] }
 0x325   : > { %9238 = vmatmul.mubr.msk.f32.gmra.mrb[54].mxu1 %vm700_vm3, %v13853_v27  ;;  %9254 = vmatmul.mubr.msk.f32.gmra.mrb[54].mxu0 %vm700_vm3, %v13741_v46 }
 0x326   : > { %3211 = vmatprep.mubr.f32.mxu1 %v15273_v28  ;;  %3356 = vmatprep.mubr.f32.mxu0 %v15273_v28 }
 0x329   : > { %9239 = vmatmul.mubr.msk.f32.gmra.mrb[56].mxu1 %vm700_vm3, %v13862_v9  ;;  %9255 = vmatmul.mubr.msk.f32.gmra.mrb[56].mxu0 %vm700_vm3, %v13750_v47 }
 0x32a   : > { %3217 = vmatprep.mubr.f32.mxu1 %v15273_v28  ;;  %3362 = vmatprep.mubr.f32.mxu0 %v15273_v28 }
 0x32d   : > { %9240 = vmatmul.mubr.msk.f32.gmra.mrb[58].mxu1 %vm700_vm3, %v13871_v14  ;;  %9256 = vmatmul.mubr.msk.f32.gmra.mrb[58].mxu0 %vm700_vm3, %v13759_v35 }
 0x32e   : > { %3223 = vmatprep.mubr.f32.mxu1 %v15273_v28  ;;  %3368 = vmatprep.mubr.f32.mxu0 %v15273_v28 }
 0x331   : > { %9241 = vmatmul.mubr.msk.f32.gmra.mrb[60].mxu1 %vm700_vm3, %v13880_v16  ;;  %9257 = vmatmul.mubr.msk.f32.gmra.mrb[60].mxu0 %vm700_vm3, %v13768_v36 }
 0x332   : > { %3229 = vmatprep.mubr.f32.mxu1 %v15273_v28  ;;  %3374 = vmatprep.mubr.f32.mxu0 %v15273_v28 }
 0x335   : > { %9242 = vmatmul.mubr.msk.f32.gmra.mrb[126].mxu1 %vm700_vm3, %v13889_v18  ;;  %9258 = vmatmul.mubr.msk.f32.gmra.mrb[62].mxu0 %vm700_vm3, %v13777_v48 }
 0x336   : > { %3233 = vmatprep.mubr.f32.mxu1 %v15273_v28  ;;  %3380 = vmatprep.mubr.f32.mxu0 %v15273_v28 }
 0x338   : > { %v2201_v61 = vpop.f32.mrb[118].mxu1 }
 0x339   : > { %9243 = vmatmul.mubr.msk.f32.gmra.mrb[128].mxu1 %vm700_vm3, %v13898_v20  ;;  %9259 = vmatmul.mubr.msk.f32.gmra.mrb[64].mxu0 %vm700_vm3, %v13786_v63  ;;  %v2202_v1 = vpop.f32.mrb[119].mxu1  ;;  %v10051_v61 = vpack.c.bf16 %v4543_v32, %v4537_v31  ;;  %v4573_v31 = vld [vmem:[#allocation8 + $0xdf0] sm:$0xff]  ;;  %v4579_v32 = vld [vmem:[#allocation8 + $0xe20] sm:$0xff] }
 0x33a   : > { %3386 = vmatprep.mubr.f32.mxu0 %v15273_v28  ;;  %3519 = vmatprep.mubr.f32.mxu1 %v15273_v28  ;;  %v4549_v1 = vld [vmem:[#allocation8 + $0xd30] sm:$0xff]  ;;  %v10063_v53 = vpack.c.bf16 %v4579_v32, %v4573_v31  ;;  %v4644_v31 = vld [vmem:[#allocation8 + $0x1028] sm:$0xff] }
 0x33b   : > { %v4628_v32 = vld [vmem:[#allocation8 + $0xfa8] sm:$0xff] }
 0x33c   : > { %v2205_v34 = vpop.f32.mrb[120].mxu1 }
 0x33d   : > { %9260 = vmatmul.mubr.msk.f32.gmra.mrb[66].mxu0 %vm700_vm3, %v13795_v15  ;;  %9274 = vmatmul.mubr.msk.f32.vlgmr.msra.gmra.mrb[66].mxu1 %vm700_vm3, %v13665_v37  ;;  %v2206_v23 = vpop.f32.mrb[121].mxu1  ;;  %v4550_v37 = vld [vmem:[#allocation8 + $0xd38] sm:$0xff] }
 0x33e   : > { %3392 = vmatprep.mubr.f32.mxu0 %v15273_v28  ;;  %3525 = vmatprep.mubr.f32.mxu1 %v15273_v28  ;;  %v10053_v17 = vpack.c.bf16 %v4556_v33, %v4550_v37  ;;  %v4607_v23 = vld [vmem:[#allocation8 + $0xf00] sm:$0xff]  ;;  %v4592_v37 = vld [vmem:[#allocation8 + $0xe88] sm:$0xff] }
 0x33f   : > { %10044 = vmatpush1.bf16.msra.mxu1 %v10043_v26  ;;  %v10055_v26 = vpack.c.bf16 %v4555_v2, %v4549_v1  ;;  %v9947_v25 = vpack.c.bf16 %v4613_v24, %v4607_v23  ;;  %v4620_v33 = vld [vmem:[#allocation8 + $0xf68] sm:$0xff]  ;;  %v4591_v1 = vld [vmem:[#allocation8 + $0xe80] sm:$0xff]  ;;  %v9951_v2 = vpack.c.bf16 %v4625_v62, %v4619_v52  ;;  %v4609_v24 = vld [vmem:[#allocation8 + $0xf10] sm:$0xff] }
 0x340   : > { %10046 = vmatprep.subr.bf16.mxu1 %v10045_v12  ;;  %v4561_v12 = vld [vmem:[#allocation8 + $0xd90] sm:$0xff] }
 0x341   : > { %9261 = vmatmul.mubr.msk.f32.gmra.mrb[68].mxu0 %vm700_vm3, %v13804_v5  ;;  %9275 = vmatmul.mubr.msk.f32.gmra.mrb[68].mxu1 %vm700_vm3, %v13673_v39  ;;  %v4562_v39 = vld [vmem:[#allocation8 + $0xd98] sm:$0xff] }
 0x342   : > { %3398 = vmatprep.mubr.f32.mxu0 %v15273_v28  ;;  %3531 = vmatprep.mubr.f32.mxu1 %v15273_v28  ;;  %v10057_v34 = vpack.c.bf16 %v4568_v4, %v4562_v39  ;;  %v4597_v4 = vld [vmem:[#allocation8 + $0xeb0] sm:$0xff] }
 0x343   : > { %10048 = vmatpush1.bf16.msra.mxu1 %v10047_v29  ;;  %v10059_v29 = vpack.c.bf16 %v4567_v13, %v4561_v12  ;;  %9948 = vmatpush1.bf16.msra.mxu0 %v9947_v25  ;;  %v4631_v13 = vld [vmem:[#allocation8 + $0xfc0] sm:$0xff]  ;;  %v10071_v23 = vpack.c.bf16 %v4603_v19, %v4597_v4  ;;  %v4633_v19 = vld [vmem:[#allocation8 + $0xfd0] sm:$0xff] }
 0x344   : > { %10050 = vmatprep.subr.bf16.mxu1 %v10049_v30  ;;  %v4615_v25 = vld [vmem:[#allocation8 + $0xf40] sm:$0xff] }
 0x345   : > { %9262 = vmatmul.mubr.msk.f32.gmra.mrb[70].mxu0 %vm700_vm3, %v13815_v7  ;;  %9276 = vmatmul.mubr.msk.f32.gmra.mrb[70].mxu1 %vm700_vm3, %v13685_v40  ;;  %v4580_v40 = vld [vmem:[#allocation8 + $0xe28] sm:$0xff]  ;;  %v10075_v52 = vpack.c.bf16 %v4615_v25, %v4609_v24  ;;  %v4645_v24 = vld [vmem:[#allocation8 + $0x1030] sm:$0xff]  ;;  %v4651_v25 = vld [vmem:[#allocation8 + $0x1060] sm:$0xff] }
 0x346   : > { %3404 = vmatprep.mubr.f32.mxu0 %v15273_v28  ;;  %3537 = vmatprep.mubr.f32.mxu1 %v15273_v28  ;;  %v10061_v30 = vpack.c.bf16 %v4580_v40, %v4574_v22  ;;  %v4637_v22 = vld [vmem:[#allocation8 + $0xff0] sm:$0xff] }
 0x347   : > { %10052 = vmatpush1.bf16.msra.mxu1 %v10051_v61  ;;  %v9949_v61 = vpack.c.bf16 %v4626_v0, %v4620_v33  ;;  %v9955_v40 = vpack.c.bf16 %v4637_v22, %v4631_v13  ;;  %v4649_v33 = vld [vmem:[#allocation8 + $0x1050] sm:$0xff]  ;;  %v4667_v13 = vld [vmem:[#allocation8 + $0x10e0] sm:$0xff] }
 0x348   : > { %10054 = vmatprep.subr.bf16.mxu1 %v10053_v17  ;;  %v4585_v17 = vld [vmem:[#allocation8 + $0xe50] sm:$0xff] }
 0x349   : > { %9263 = vmatmul.mubr.msk.f32.gmra.mrb[72].mxu0 %vm700_vm3, %v13826_v8  ;;  %9277 = vmatmul.mubr.msk.f32.gmra.mrb[72].mxu1 %vm700_vm3, %v13696_v41  ;;  %v4586_v41 = vld [vmem:[#allocation8 + $0xe58] sm:$0xff]  ;;  %v10067_v39 = vpack.c.bf16 %v4591_v1, %v4585_v17  ;;  %v4656_v17 = vld [vmem:[#allocation8 + $0x1088] sm:$0xff]  ;;  %v4673_v22 = vld [vmem:[#allocation8 + $0x1110] sm:$0xff] }
 0x34a   : > { %3410 = vmatprep.mubr.f32.mxu0 %v15273_v28  ;;  %3543 = vmatprep.mubr.f32.mxu1 %v15273_v28  ;;  %v10065_v10 = vpack.c.bf16 %v4592_v37, %v4586_v41  ;;  %v4643_v37 = vld [vmem:[#allocation8 + $0x1020] sm:$0xff]  ;;  %v4640_v1 = vld [vmem:[#allocation8 + $0x1008] sm:$0xff] }
 0x34b   : > { %10056 = vmatpush1.bf16.msra.mxu1 %v10055_v26  ;;  %9950 = vmatprep.subr.bf16.mxu0 %v9949_v61  ;;  %v4610_v26 = vld [vmem:[#allocation8 + $0xf18] sm:$0xff]  ;;  %v9959_v0 = vpack.c.bf16 %v4649_v33, %v4643_v37  ;;  %v4627_v61 = vld [vmem:[#allocation8 + $0xfa0] sm:$0xff]  ;;  %v4685_v37 = vld [vmem:[#allocation8 + $0x1170] sm:$0xff] }
 0x34c   : > { %10058 = vmatprep.subr.bf16.mxu1 %v10057_v34  ;;  %9952 = vmatpush1.bf16.msra.mxu0 %v9951_v2  ;;  %v4638_v34 = vld [vmem:[#allocation8 + $0xff8] sm:$0xff] }
 0x34d   : > { %9264 = vmatmul.mubr.msk.f32.gmra.mrb[74].mxu0 %vm700_vm3, %v13835_v38  ;;  %9278 = vmatmul.mubr.msk.f32.gmra.mrb[74].mxu1 %vm700_vm3, %v13705_v42  ;;  %v4598_v42 = vld [vmem:[#allocation8 + $0xeb8] sm:$0xff]  ;;  %v9953_v12 = vpack.c.bf16 %v4638_v34, %v4632_v21  ;;  %v4668_v34 = vld [vmem:[#allocation8 + $0x10e8] sm:$0xff] }
 0x34e   : > { %3416 = vmatprep.mubr.f32.mxu0 %v15273_v28  ;;  %3549 = vmatprep.mubr.f32.mxu1 %v15273_v28  ;;  %v10069_v6 = vpack.c.bf16 %v4604_v3, %v4598_v42  ;;  %v4655_v42 = vld [vmem:[#allocation8 + $0x1080] sm:$0xff]  ;;  %v4661_v3 = vld [vmem:[#allocation8 + $0x10b0] sm:$0xff]  ;;  %v4646_v21 = vld [vmem:[#allocation8 + $0x1038] sm:$0xff] }
 0x34f   : > { %10060 = vmatpush1.bf16.msra.mxu1 %v10059_v29  ;;  %9954 = vmatprep.subr.bf16.mxu0 %v9953_v12 }
 0x350   : > { %10062 = vmatprep.subr.bf16.mxu1 %v10061_v30  ;;  %v4622_v30 = vld [vmem:[#allocation8 + $0xf78] sm:$0xff]  ;;  %9956 = vmatpush1.bf16.msra.mxu0 %v9955_v40  ;;  %v9967_v40 = vpack.c.bf16 %v4673_v22, %v4667_v13  ;;  %v4681_v22 = vld [vmem:[#allocation8 + $0x1150] sm:$0xff] }
 0x351   : > { %9265 = vmatmul.mubr.msk.f32.gmra.mrb[76].mxu0 %vm700_vm3, %v13844_v11  ;;  %9279 = vmatmul.mubr.msk.f32.gmra.mrb[76].mxu1 %vm700_vm3, %v13714_v43  ;;  %v4616_v43 = vld [vmem:[#allocation8 + $0xf48] sm:$0xff]  ;;  %v10077_v62 = vpack.c.bf16 %v4628_v32, %v4622_v30  ;;  %v4658_v30 = vld [vmem:[#allocation8 + $0x1098] sm:$0xff] }
 0x352   : > { %3422 = vmatprep.mubr.f32.mxu0 %v15273_v28  ;;  %3555 = vmatprep.mubr.f32.mxu1 %v15273_v28  ;;  %v10073_v29 = vpack.c.bf16 %v4616_v43, %v4610_v26  ;;  %v4652_v43 = vld [vmem:[#allocation8 + $0x1068] sm:$0xff] }
 0x353   : > { %10064 = vmatpush1.bf16.msra.mxu1 %v10063_v53  ;;  %v4621_v53 = vld [vmem:[#allocation8 + $0xf70] sm:$0xff] }
 0x354   : > { %10066 = vmatprep.subr.bf16.mxu1 %v10065_v10  ;;  %v4634_v10 = vld [vmem:[#allocation8 + $0xfd8] sm:$0xff]  ;;  %v10079_v4 = vpack.c.bf16 %v4627_v61, %v4621_v53  ;;  %v4663_v53 = vld [vmem:[#allocation8 + $0x10c0] sm:$0xff] }
 0x355   : > { %9266 = vmatmul.mubr.msk.f32.gmra.mrb[78].mxu0 %vm700_vm3, %v13853_v27  ;;  %9280 = vmatmul.mubr.msk.f32.gmra.mrb[78].mxu1 %vm700_vm3, %v13723_v44  ;;  %v4650_v44 = vld [vmem:[#allocation8 + $0x1058] sm:$0xff]  ;;  %v10081_v26 = vpack.c.bf16 %v4640_v1, %v4634_v10  ;;  %v4692_v10 = vld [vmem:[#allocation8 + $0x11a8] sm:$0xff] }
 0x356   : > { %3428 = vmatprep.mubr.f32.mxu0 %v15273_v28  ;;  %3561 = vmatprep.mubr.f32.mxu1 %v15273_v28  ;;  %v9957_v41 = vpack.c.bf16 %v4650_v44, %v4644_v31  ;;  %v4680_v31 = vld [vmem:[#allocation8 + $0x1148] sm:$0xff] }
 0x357   : > { %10068 = vmatpush1.bf16.msra.mxu1 %v10067_v39  ;;  %v9963_v39 = vpack.c.bf16 %v4661_v3, %v4655_v42  ;;  %v4664_v44 = vld [vmem:[#allocation8 + $0x10c8] sm:$0xff]  ;;  %v4691_v42 = vld [vmem:[#allocation8 + $0x11a0] sm:$0xff]  ;;  %v4697_v3 = vld [vmem:[#allocation8 + $0x11d0] sm:$0xff] }
 0x358   : > { %10070 = vmatprep.subr.bf16.mxu1 %v10069_v6  ;;  %9958 = vmatprep.subr.bf16.mxu0 %v9957_v41  ;;  %v4639_v6 = vld [vmem:[#allocation8 + $0x1000] sm:$0xff]  ;;  %v4676_v1 = vld [vmem:[#allocation8 + $0x1128] sm:$0xff] }
 0x359   : > { %9267 = vmatmul.mubr.msk.f32.gmra.mrb[80].mxu0 %vm700_vm3, %v13862_v9  ;;  %9281 = vmatmul.mubr.msk.f32.gmra.mrb[80].mxu1 %vm700_vm3, %v13732_v45  ;;  %v4662_v45 = vld [vmem:[#allocation8 + $0x10b8] sm:$0xff]  ;;  %v4679_v41 = vld [vmem:[#allocation8 + $0x1140] sm:$0xff] }
 0x35a   : > { %3434 = vmatprep.mubr.f32.mxu0 %v15273_v28  ;;  %3567 = vmatprep.mubr.f32.mxu1 %v15273_v28  ;;  %v9961_v2 = vpack.c.bf16 %v4662_v45, %v4656_v17  ;;  %v9971_v33 = vpack.c.bf16 %v4685_v37, %v4679_v41  ;;  %v4698_v17 = vld [vmem:[#allocation8 + $0x11d8] sm:$0xff] }
 0x35b   : > { %10072 = vmatpush1.bf16.msra.mxu1 %v10071_v23  ;;  %9960 = vmatpush1.bf16.msra.mxu0 %v9959_v0  ;;  %v10083_v23 = vpack.c.bf16 %v4639_v6, %v4633_v19  ;;  %v10087_v0 = vpack.c.bf16 %v4651_v25, %v4645_v24  ;;  %v4694_v24 = vld [vmem:[#allocation8 + $0x11b8] sm:$0xff]  ;;  %v4700_v25 = vld [vmem:[#allocation8 + $0x11e8] sm:$0xff] }
 0x35c   : > { %10074 = vmatprep.subr.bf16.mxu1 %v10073_v29  ;;  %9962 = vmatprep.subr.bf16.mxu0 %v9961_v2  ;;  %v10085_v29 = vpack.c.bf16 %v4652_v43, %v4646_v21  ;;  %v9973_v2 = vpack.c.bf16 %v4698_v17, %v4692_v10  ;;  %v4675_v21 = vld [vmem:[#allocation8 + $0x1120] sm:$0xff]  ;;  %v4710_v41 = vld [vmem:[#allocation8 + $0x1238] sm:$0xff] }
 0x35d   : > { %9268 = vmatmul.mubr.msk.f32.gmra.mrb[82].mxu0 %vm700_vm3, %v13871_v14  ;;  %9282 = vmatmul.mubr.msk.f32.gmra.mrb[82].mxu1 %vm700_vm3, %v13741_v46  ;;  %v4674_v46 = vld [vmem:[#allocation8 + $0x1118] sm:$0xff] }
 0x35e   : > { %3440 = vmatprep.mubr.f32.mxu0 %v15273_v28  ;;  %3573 = vmatprep.mubr.f32.mxu1 %v15273_v28  ;;  %v9965_v12 = vpack.c.bf16 %v4674_v46, %v4668_v34  ;;  %v4682_v34 = vld [vmem:[#allocation8 + $0x1158] sm:$0xff]  ;;  %v4688_v46 = vld [vmem:[#allocation8 + $0x1188] sm:$0xff] }
 0x35f   : > { %10076 = vmatpush1.bf16.msra.mxu1 %v10075_v52  ;;  %9964 = vmatpush1.bf16.msra.mxu0 %v9963_v39  ;;  %v4657_v52 = vld [vmem:[#allocation8 + $0x1090] sm:$0xff]  ;;  %v9975_v39 = vpack.c.bf16 %v4697_v3, %v4691_v42  ;;  %v10097_v13 = vpack.c.bf16 %v4688_v46, %v4682_v34  ;;  %v4706_v37 = vld [vmem:[#allocation8 + $0x1218] sm:$0xff] }
 0x360   : > { %10078 = vmatprep.subr.bf16.mxu1 %v10077_v62  ;;  %9966 = vmatprep.subr.bf16.mxu0 %v9965_v12  ;;  %v4670_v62 = vld [vmem:[#allocation8 + $0x10f8] sm:$0xff] }
 0x361   : > { %9269 = vmatmul.mubr.msk.f32.gmra.mrb[84].mxu0 %vm700_vm3, %v13880_v16  ;;  %9283 = vmatmul.mubr.msk.f32.gmra.mrb[84].mxu1 %vm700_vm3, %v13750_v47  ;;  %v4686_v47 = vld [vmem:[#allocation8 + $0x1178] sm:$0xff]  ;;  %v10093_v6 = vpack.c.bf16 %v4676_v1, %v4670_v62 }
 0x362   : > { %3579 = vmatprep.mubr.f32.mxu1 %v15273_v28  ;;  %3446 = vmatprep.mubr.f32.mxu0 %v15273_v28  ;;  %v9969_v32 = vpack.c.bf16 %v4686_v47, %v4680_v31  ;;  %v4693_v31 = vld [vmem:[#allocation8 + $0x11b0] sm:$0xff]  ;;  %v4699_v47 = vld [vmem:[#allocation8 + $0x11e0] sm:$0xff] }
 0x363   : > { %10080 = vmatpush1.bf16.msra.mxu1 %v10079_v4  ;;  %9968 = vmatpush1.bf16.msra.mxu0 %v9967_v40  ;;  %v10091_v4 = vpack.c.bf16 %v4663_v53, %v4657_v52  ;;  %v4687_v40 = vld [vmem:[#allocation8 + $0x1180] sm:$0xff]  ;;  %v4712_v52 = vld [vmem:[#allocation8 + $0x1248] sm:$0xff] }
 0x364   : > { %10082 = vmatprep.subr.bf16.mxu1 %v10081_v26  ;;  %9970 = vmatprep.subr.bf16.mxu0 %v9969_v32  ;;  %v4669_v26 = vld [vmem:[#allocation8 + $0x10f0] sm:$0xff]  ;;  %v4704_v32 = vld [vmem:[#allocation8 + $0x1208] sm:$0xff] }
 0x365   : > { %9284 = vmatmul.mubr.msk.f32.gmra.mrb[86].mxu1 %vm700_vm3, %v13759_v35  ;;  %9270 = vmatmul.mubr.msk.f32.gmra.mrb[112].mxu0 %vm700_vm3, %v13889_v18  ;;  %v10089_v35 = vpack.c.bf16 %v4664_v44, %v4658_v30  ;;  %v10095_v43 = vpack.c.bf16 %v4675_v21, %v4669_v26  ;;  %v10101_v30 = vpack.c.bf16 %v4700_v25, %v4694_v24 }
 0x366   : > { %3585 = vmatprep.mubr.f32.mxu1 %v15273_v28  ;;  %3450 = vmatprep.mubr.f32.mxu0 %v15273_v28 }
 0x367   : > { %10084 = vmatpush1.bf16.msra.mxu1 %v10083_v23  ;;  %9972 = vmatpush1.bf16.msra.mxu0 %v9971_v33 }
 0x368   : > { %v2418_v61 = vpop.f32.mrb[104].mxu0  ;;  %10086 = vmatprep.subr.bf16.mxu1 %v10085_v29  ;;  %9974 = vmatprep.subr.bf16.mxu0 %v9973_v2  ;;  %v4010_v2 = vlaneseq }
 0x369   : > { %v2419_v45 = vpop.f32.mrb[105].mxu0  ;;  %9285 = vmatmul.mubr.msk.f32.gmra.mrb[88].mxu1 %vm700_vm3, %v13768_v36  ;;  %9271 = vmatmul.mubr.msk.f32.gmra.mrb[114].mxu0 %vm700_vm3, %v13898_v20  ;;  %v10105_v61 = vpack.c.bf16 %v4712_v52, %v4706_v37 }
 0x36a   : > { %3591 = vmatprep.mubr.f32.mxu1 %v15273_v28  ;;  %v14129_v3 = vshrl.u32 %v4010_v2, 7 }
 0x36b   : > { %10088 = vmatpush1.bf16.msra.mxu1 %v10087_v0  ;;  %9976 = vmatpush1.bf16.msra.mxu0 %v9975_v39  ;;  %v9977_v0 = vpack.c.bf16 %v4710_v41, %v4704_v32 }
 0x36c   : > { %v2422_v19 = vpop.f32.mrb[106].mxu0  ;;  %10090 = vmatprep.subr.bf16.mxu1 %v10089_v35  ;;  %15359 = vst [vmem:[#allocation28_spill] sm:$0xff] %v14129_v3 }
 0x36d   : > { %v2423_v36 = vpop.f32.mrb[107].mxu0  ;;  %9286 = vmatmul.mubr.msk.f32.gmra.mrb[90].mxu1 %vm700_vm3, %v13777_v48  ;;  %v10099_v48 = vpack.c.bf16 %v4687_v40, %v4681_v22  ;;  %9978 = vmatprep.subr.bf16.mxu0 %v9977_v0 }
 0x36e   : > { %3597 = vmatprep.mubr.f32.mxu1 %v15273_v28 }
 0x36f   : > { %10092 = vmatpush1.bf16.msra.mxu1 %v10091_v4  ;;  %v14137_v4 = vld [vmem:[#allocation6] sm:$0xf] }
 0x370   : > { %v14064_v12 = vpop.f32.mrb[0].mxu0  ;;  %10094 = vmatprep.subr.bf16.mxu1 %v10093_v6 }
 0x371   : > { %v14066_v23 = vpop.f32.mrb[1].mxu0  ;;  %9287 = vmatmul.mubr.msk.f32.gmra.mrb[92].mxu1 %vm700_vm3, %v13786_v63  ;;  %v10103_v63 = vpack.c.bf16 %v4699_v47, %v4693_v31 }
 0x372   : > { %3603 = vmatprep.mubr.f32.mxu1 %v15273_v28 }
 0x373   : > { %10096 = vmatpush1.bf16.msra.mxu1 %v10095_v43 }
 0x374   : > { %v14071_v29 = vpop.f32.mrb[2].mxu0  ;;  %10098 = vmatprep.subr.bf16.mxu1 %v10097_v13 }
 0x375   : > { %v14073_v44 = vpop.f32.mrb[3].mxu0  ;;  %9288 = vmatmul.mubr.msk.f32.gmra.mrb[94].mxu1 %vm700_vm3, %v13795_v15 }
 0x376   : > { %3609 = vmatprep.mubr.f32.mxu1 %v15273_v28 }
 0x377   : > { %10100 = vmatpush1.bf16.msra.mxu1 %v10099_v48 }
 0x378   : > { %v14078_v33 = vpop.f32.mrb[4].mxu0  ;;  %10102 = vmatprep.subr.bf16.mxu1 %v10101_v30 }
 0x379   : > { %v14080_v53 = vpop.f32.mrb[5].mxu0  ;;  %9289 = vmatmul.mubr.msk.f32.gmra.mrb[96].mxu1 %vm700_vm3, %v13804_v5 }
 0x37a   : > { %3615 = vmatprep.mubr.f32.mxu1 %v15273_v28 }
 0x37b   : > { %10104 = vmatpush1.bf16.msra.mxu1 %v10103_v63 }
 0x37c   : > { %v14085_v15 = vpop.f32.mrb[6].mxu0  ;;  %10106 = vmatprep.subr.bf16.mxu1 %v10105_v61 }
 0x37d   : > { %v14087_v35 = vpop.f32.mrb[7].mxu0  ;;  %9290 = vmatmul.mubr.msk.f32.gmra.mrb[98].mxu1 %vm700_vm3, %v13815_v7 }
 0x37e   : > { %3621 = vmatprep.mubr.f32.mxu1 %v15273_v28 }
 0x380   : > { %v14092_v62 = vpop.f32.mrb[8].mxu0 }
 0x381   : > { %v14094_v10 = vpop.f32.mrb[9].mxu0  ;;  %9291 = vmatmul.mubr.msk.f32.gmra.mrb[100].mxu1 %vm700_vm3, %v13826_v8 }
 0x382   : > { %3627 = vmatprep.mubr.f32.mxu1 %v15273_v28 }
 0x384   : > { %v14099_v5 = vpop.f32.mrb[10].mxu0 }
 0x385   : > { %v14101_v17 = vpop.f32.mrb[11].mxu0  ;;  %9292 = vmatmul.mubr.msk.f32.gmra.mrb[102].mxu1 %vm700_vm3, %v13835_v38 }
 0x386   : > { %3633 = vmatprep.mubr.f32.mxu1 %v15273_v28 }
 0x388   : > { %v14106_v7 = vpop.f32.mrb[12].mxu0 }
 0x389   : > { %v14108_v45 = vpop.f32.mrb[13].mxu0  ;;  %9293 = vmatmul.mubr.msk.f32.gmra.mrb[104].mxu1 %vm700_vm3, %v13844_v11 }
 0x38a   : > { %3639 = vmatprep.mubr.f32.mxu1 %v15273_v28 }
 0x38c   : > { %v14113_v8 = vpop.f32.mrb[14].mxu0 }
 0x38d   : > { %v14115_v1 = vpop.f32.mrb[15].mxu0  ;;  %9294 = vmatmul.mubr.msk.f32.gmra.mrb[106].mxu1 %vm700_vm3, %v13853_v27  ;;  %v4024_v27 = vsub.s32 3, %v14129_v3 }
 0x38e   : > { %3645 = vmatprep.mubr.f32.mxu1 %v15273_v28 }
 0x390   : > { %v14120_v38 = vpop.f32.mrb[16].mxu0 }
 0x391   : > { %v14122_v42 = vpop.f32.mrb[17].mxu0  ;;  %9295 = vmatmul.mubr.msk.f32.gmra.mrb[108].mxu1 %vm700_vm3, %v13862_v9  ;;  %v14142_v9 = vrot.slane %v14137_v4, %v4024_v27 }
 0x392   : > { %3651 = vmatprep.mubr.f32.mxu1 %v15273_v28 }
 0x393   : > { %15360 = vst [vmem:[#allocation29_spill] sm:$0xff] %v14142_v9 }
 0x394   : > { %v14127_v11 = vpop.f32.mrb[18].mxu0 }
 0x395   : > { %v14131_v39 = vpop.f32.mrb[19].mxu0  ;;  %9296 = vmatmul.mubr.msk.f32.gmra.mrb[110].mxu1 %vm700_vm3, %v13871_v14 }
 0x396   : > { %3657 = vmatprep.mubr.f32.mxu1 %v15273_v28 }
 0x398   : > { %v14139_v19 = vpop.f32.mrb[20].mxu0 }
 0x399   : > { %v14144_v6 = vpop.f32.mrb[21].mxu0  ;;  %9297 = vmatmul.mubr.msk.f32.gmra.mrb[112].mxu1 %vm700_vm3, %v13880_v16 }
 0x39a   : > { %3663 = vmatprep.mubr.f32.mxu1 %v15273_v28 }
 0x39c   : > { %v14149_v26 = vpop.f32.mrb[22].mxu0 }
 0x39d   : > { %v14151_v14 = vpop.f32.mrb[23].mxu0  ;;  %9298 = vmatmul.mubr.msk.f32.gmra.mrb[130].mxu1 %vm700_vm3, %v13889_v18 }
 0x39e   : > { %3667 = vmatprep.mubr.f32.mxu1 %v15273_v28 }
 0x3a0   : > { %v14156_v21 = vpop.f32.mrb[24].mxu0  ;;  %v2635_v36 = vpop.f32.mrb[122].mxu1 }
 0x3a1   : > { %v14158_v34 = vpop.f32.mrb[25].mxu0  ;;  %v2636_v46 = vpop.f32.mrb[123].mxu1  ;;  %9299 = vmatmul.mubr.msk.f32.gmra.mrb[132].mxu1 %vm700_vm3, %v13898_v20 }
 0x3a4   : > { %v14162_v16 = vpop.f32.mrb[26].mxu0  ;;  %v2639_v43 = vpop.f32.mrb[124].mxu1 }
 0x3a5   : > { %v14164_v13 = vpop.f32.mrb[27].mxu0  ;;  %v2640_v22 = vpop.f32.mrb[125].mxu1 }
 0x3a8   : > { %v14166_v40 = vpop.f32.mrb[28].mxu0  ;;  %v14168_v18 = vpop.f32.mrb[14].mxu1 }
 0x3a9   : > { %v14170_v24 = vpop.f32.mrb[29].mxu0  ;;  %v14172_v25 = vpop.f32.mrb[15].mxu1 }
 0x3ac   : > { %v14174_v48 = vpop.f32.mrb[30].mxu0  ;;  %v14176_v30 = vpop.f32.mrb[16].mxu1 }
 0x3ad   : > { %v14178_v31 = vpop.f32.mrb[31].mxu0  ;;  %v14180_v20 = vpop.f32.mrb[17].mxu1 }
 0x3b0   : > { %v14182_v47 = vpop.f32.mrb[32].mxu0  ;;  %v14184_v63 = vpop.f32.mrb[18].mxu1 }
 0x3b1   : > { %v14186_v32 = vpop.f32.mrb[33].mxu0  ;;  %v14188_v41 = vpop.f32.mrb[19].mxu1 }
 0x3b4   : > { %v14190_v37 = vpop.f32.mrb[34].mxu0  ;;  %v14192_v0 = vpop.f32.mrb[20].mxu1 }
 0x3b5   : > { %15361 = vst [vmem:[#allocation30_spill] sm:$0xff] %v14192_v0  ;;  %v14194_v52 = vpop.f32.mrb[35].mxu0  ;;  %v14196_v61 = vpop.f32.mrb[21].mxu1 }
 0x3b6   : > { %15362 = vst [vmem:[#allocation31_spill] sm:$0xff] %v14194_v52  ;;  %15363 = vst [vmem:[#allocation32_spill] sm:$0xff] %v14196_v61 }
 0x3b8   : > { %v14198_v2 = vpop.f32.mrb[36].mxu0  ;;  %v14200_v27 = vpop.f32.mrb[22].mxu1 }
 0x3b9   : > { %15364 = vst [vmem:[#allocation33_spill] sm:$0xff] %v14198_v2  ;;  %15365 = vst [vmem:[#allocation34_spill] sm:$0xff] %v14200_v27  ;;  %v14202_v36 = vpop.f32.mrb[37].mxu0  ;;  %v14204_v46 = vpop.f32.mrb[23].mxu1 }
 0x3ba   : > { %15366 = vst [vmem:[#allocation35_spill] sm:$0xff] %v14202_v36  ;;  %15367 = vst [vmem:[#allocation36_spill] sm:$0xff] %v14204_v46 }
 0x3bc   : > { %v2984_v43 = vpop.f32.mrb[90].mxu0  ;;  %v14206_v22 = vpop.f32.mrb[24].mxu1 }
 0x3bd   : > { %15368 = vst [vmem:[#allocation37_spill] sm:$0xff] %v14206_v22  ;;  %v14209_v28 = vadd.f32 %v2984_v43, %v13350_v49  ;;  %v2986_v9 = vpop.f32.mrb[91].mxu0  ;;  %v14211_v0 = vpop.f32.mrb[25].mxu1 }
 0x3be   : > { %15369 = vst [vmem:[#allocation38_spill] sm:$0xff] %v14211_v0  ;;  %v14214_v52 = vadd.f32 %v2986_v9, %v13356_v50 }
 0x3c0   : > { %v2990_v61 = vpop.f32.mrb[92].mxu0  ;;  %v14216_v2 = vpop.f32.mrb[26].mxu1 }
 0x3c1   : > { %15370 = vst [vmem:[#allocation39_spill] sm:$0xff] %v14216_v2  ;;  %v14219_v27 = vadd.f32 %v2990_v61, %v13360_v51  ;;  %v2992_v36 = vpop.f32.mrb[93].mxu0  ;;  %v14221_v46 = vpop.f32.mrb[27].mxu1 }
 0x3c2   : > { %15371 = vst [vmem:[#allocation40_spill] sm:$0xff] %v14221_v46  ;;  %v14224_v22 = vadd.f32 %v2992_v36, %v13366_v54 }
 0x3c4   : > { %15372 = vst [vmem:[#allocation41_spill] sm:$0xff] %v14224_v22  ;;  %v2996_v49 = vpop.f32.mrb[94].mxu0  ;;  %v14226_v43 = vpop.f32.mrb[28].mxu1  ;;  %v4734_v22 = vld [vmem:[#allocation8 + $0x12f8] sm:$0xff] }
 0x3c5   : > { %15373 = vst [vmem:[#allocation42_spill] sm:$0xff] %v14226_v43  ;;  %v14229_v0 = vadd.f32 %v2996_v49, %v13370_v55  ;;  %v2998_v50 = vpop.f32.mrb[95].mxu0  ;;  %v14231_v9 = vpop.f32.mrb[29].mxu1 }
 0x3c6   : > { %15375 = vst [vmem:[#allocation44_spill] sm:$0xff] %v14231_v9  ;;  %v14234_v2 = vadd.f32 %v2998_v50, %v13376_v56 }
 0x3c7   : > { %15374 = vst [vmem:[#allocation43_spill] sm:$0xff] %v14229_v0  ;;  %v4723_v0 = vld [vmem:[#allocation8 + $0x12a0] sm:$0xff] }
 0x3c8   : > { %15376 = vst [vmem:[#allocation45_spill] sm:$0xff] %v14234_v2  ;;  %v3002_v51 = vpop.f32.mrb[96].mxu0  ;;  %v14236_v61 = vpop.f32.mrb[30].mxu1 }
 0x3c9   : > { %15377 = vst [vmem:[#allocation46_spill] sm:$0xff] %v14236_v61  ;;  %v14239_v46 = vadd.f32 %v3002_v51, %v13380_v57  ;;  %v3004_v54 = vpop.f32.mrb[97].mxu0  ;;  %v14241_v36 = vpop.f32.mrb[31].mxu1 }
 0x3ca   : > { %15379 = vst [vmem:[#allocation48_spill] sm:$0xff] %v14241_v36  ;;  %v14244_v43 = vadd.f32 %v3004_v54, %v13386_v58 }
 0x3cb   : > { %15378 = vst [vmem:[#allocation47_spill] sm:$0xff] %v14239_v46 }
 0x3cc   : > { %15380 = vst [vmem:[#allocation49_spill] sm:$0xff] %v14244_v43  ;;  %v3008_v55 = vpop.f32.mrb[98].mxu0  ;;  %v14246_v49 = vpop.f32.mrb[32].mxu1 }
 0x3cd   : > { %15381 = vst [vmem:[#allocation50_spill] sm:$0xff] %v14246_v49  ;;  %v14249_v9 = vadd.f32 %v3008_v55, %v13390_v59  ;;  %v3010_v56 = vpop.f32.mrb[99].mxu0  ;;  %v14251_v50 = vpop.f32.mrb[33].mxu1 }
 0x3ce   : > { %15383 = vst [vmem:[#allocation52_spill] sm:$0xff] %v14251_v50  ;;  %v14254_v61 = vadd.f32 %v3010_v56, %v13396_v60 }
 0x3cf   : > { %15382 = vst [vmem:[#allocation51_spill] sm:$0xff] %v14249_v9 }
 0x3d0   : > { %15384 = vst [vmem:[#allocation53_spill] sm:$0xff] %v14254_v61  ;;  %v3014_v57 = vpop.f32.mrb[108].mxu0  ;;  %v14256_v51 = vpop.f32.mrb[34].mxu1 }
 0x3d1   : > { %15385 = vst [vmem:[#allocation54_spill] sm:$0xff] %v14256_v51  ;;  %v3015_v46 = vpop.f32.mrb[109].mxu0  ;;  %v14258_v36 = vpop.f32.mrb[35].mxu1  ;;  %v4717_v51 = vld [vmem:[#allocation8 + $0x1270] sm:$0xff] }
 0x3d2   : > { %15386 = vst [vmem:[#allocation55_spill] sm:$0xff] %v14258_v36 }
 0x3d4   : > { %v3018_v58 = vpop.f32.mrb[110].mxu0  ;;  %v14260_v54 = vpop.f32.mrb[36].mxu1 }
 0x3d5   : > { %15387 = vst [vmem:[#allocation56_spill] sm:$0xff] %v14260_v54  ;;  %v3019_v43 = vpop.f32.mrb[111].mxu0  ;;  %v14262_v49 = vpop.f32.mrb[37].mxu1 }
 0x3d6   : > { %15388 = vst [vmem:[#allocation57_spill] sm:$0xff] %v14262_v49 }
 0x3d8   : > { %v14264_v59 = vpop.f32.mrb[38].mxu1  ;;  %v3304_v55 = vpop.f32.mrb[38].mxu0 }
 0x3d9   : > { %15389 = vst [vmem:[#allocation58_spill] sm:$0xff] %v14264_v59  ;;  %v3864_v50 = vmax.f32 %v14064_v12, %v3304_v55  ;;  %v14267_v9 = vpop.f32.mrb[39].mxu1  ;;  %v3306_v60 = vpop.f32.mrb[39].mxu0 }
 0x3da   : > { %15390 = vst [vmem:[#allocation59_spill] sm:$0xff] %v14267_v9  ;;  %v3865_v56 = vmax.f32 %v14066_v23, %v3306_v60 }
 0x3dc   : > { %v14270_v57 = vpop.f32.mrb[40].mxu1  ;;  %v3310_v46 = vpop.f32.mrb[40].mxu0 }
 0x3dd   : > { %15391 = vst [vmem:[#allocation60_spill] sm:$0xff] %v14270_v57  ;;  %v3868_v58 = vmax.f32 %v14071_v29, %v3310_v46  ;;  %v14273_v36 = vpop.f32.mrb[41].mxu1  ;;  %v3312_v43 = vpop.f32.mrb[41].mxu0  ;;  %v15276_v29 = vsub.s32 0, %v14129_v3 }
 0x3de   : > { %15392 = vst [vmem:[#allocation61_spill] sm:$0xff] %v14273_v36  ;;  %v3869_v49 = vmax.f32 %v14073_v44, %v3312_v43  ;;  %v15277_v44 = vsub.s32 1, %v14129_v3 }
 0x3df   : > { %v14276_v54 = vmax.f32 %v3864_v50, %v3868_v58 }
 0x3e0   : > { %v14278_v59 = vmax.f32 %v3865_v56, %v3869_v49  ;;  %v14280_v12 = vpop.f32.mrb[42].mxu1  ;;  %v3316_v55 = vpop.f32.mrb[42].mxu0 }
 0x3e1   : > { %15393 = vst [vmem:[#allocation62_spill] sm:$0xff] %v14276_v54  ;;  %15395 = vst [vmem:[#allocation64_spill] sm:$0xff] %v14280_v12  ;;  %v3872_v9 = vmax.f32 %v14078_v33, %v3316_v55  ;;  %v14283_v23 = vpop.f32.mrb[43].mxu1  ;;  %v3318_v60 = vpop.f32.mrb[43].mxu0  ;;  %v14297_v33 = vrot.slane %v14137_v4, %v15276_v29  ;;  %v14302_v55 = vrot.slane %v14137_v4, %v15277_v44  ;;  %v4709_v54 = vld [vmem:[#allocation8 + $0x1230] sm:$0xff]  ;;  %v4718_v44 = vld [vmem:[#allocation8 + $0x1278] sm:$0xff] }
 0x3e2   : > { %15394 = vst [vmem:[#allocation63_spill] sm:$0xff] %v14278_v59  ;;  %15396 = vst [vmem:[#allocation65_spill] sm:$0xff] %v14283_v23  ;;  %v3873_v57 = vmax.f32 %v14080_v53, %v3318_v60 }
 0x3e4   : > { %v14287_v46 = vpop.f32.mrb[44].mxu1  ;;  %v3322_v36 = vpop.f32.mrb[44].mxu0 }
 0x3e5   : > { %15397 = vst [vmem:[#allocation66_spill] sm:$0xff] %v14287_v46  ;;  %v3876_v49 = vmax.f32 %v14085_v15, %v3322_v36  ;;  %v14291_v50 = vpop.f32.mrb[45].mxu1  ;;  %v3324_v56 = vpop.f32.mrb[45].mxu0  ;;  %v4703_v36 = vld [vmem:[#allocation8 + $0x1200] sm:$0xff] }
 0x3e6   : > { %15398 = vst [vmem:[#allocation67_spill] sm:$0xff] %v14291_v50  ;;  %v3877_v58 = vmax.f32 %v14087_v35, %v3324_v56  ;;  %v4705_v50 = vld [vmem:[#allocation8 + $0x1210] sm:$0xff]  ;;  %v9979_v12 = vpack.c.bf16 %v4709_v54, %v4703_v36  ;;  %v4730_v54 = vld [vmem:[#allocation8 + $0x12d8] sm:$0xff] }
 0x3e7   : > { %v3964_v53 = vmax.f32 %v3872_v9, %v3876_v49  ;;  %v4711_v9 = vld [vmem:[#allocation8 + $0x1240] sm:$0xff] }
 0x3e8   : > { %v3965_v43 = vmax.f32 %v3873_v57, %v3877_v58  ;;  %v14304_v60 = vpop.f32.mrb[46].mxu1  ;;  %v3328_v15 = vpop.f32.mrb[46].mxu0  ;;  %v4716_v57 = vld [vmem:[#allocation8 + $0x1268] sm:$0xff]  ;;  %v4722_v58 = vld [vmem:[#allocation8 + $0x1298] sm:$0xff] }
 0x3e9   : > { %15399 = vst [vmem:[#allocation68_spill] sm:$0xff] %v14304_v60  ;;  %v4034_v59 = vadd.f32 %v14297_v33, %v3964_v53  ;;  %v3880_v35 = vmax.f32 %v14092_v62, %v3328_v15  ;;  %v14308_v56 = vpop.f32.mrb[47].mxu1  ;;  %v3330_v29 = vpop.f32.mrb[47].mxu0  ;;  %v4724_v60 = vld [vmem:[#allocation8 + $0x12a8] sm:$0xff]  ;;  %v10107_v62 = vpack.c.bf16 %v4711_v9, %v4705_v50  ;;  %v4715_v15 = vld [vmem:[#allocation8 + $0x1260] sm:$0xff] }
 0x3ea   : > { %15400 = vst [vmem:[#allocation69_spill] sm:$0xff] %v14308_v56  ;;  %v4035_v49 = vadd.f32 %v14302_v55, %v3965_v43  ;;  %v3881_v4 = vmax.f32 %v14094_v10, %v3330_v29  ;;  %v4721_v56 = vld [vmem:[#allocation8 + $0x1290] sm:$0xff]  ;;  %v9981_v29 = vpack.c.bf16 %v4722_v58, %v4716_v57  ;;  %v10109_v2 = vpack.c.bf16 %v4724_v60, %v4718_v44  ;;  %v4736_v50 = vld [vmem:[#allocation8 + $0x1308] sm:$0xff]  ;;  %v4727_v57 = vld [vmem:[#allocation8 + $0x12c0] sm:$0xff] }
 0x3eb   : > { %v14316_v61 = vmax.f32 %v4034_v59, 0.0  ;;  %v10111_v60 = vpack.c.bf16 %v4723_v0, %v4717_v51  ;;  %v4733_v58 = vld [vmem:[#allocation8 + $0x12f0] sm:$0xff]  ;;  %v4742_v51 = vld [vmem:[#allocation8 + $0x1338] sm:$0xff] }
 0x3ec   : > { %v14312_v46 = vmax.f32 %v4035_v49, 0.0  ;;  %v14314_v23 = vpop.f32.mrb[48].mxu1  ;;  %v3334_v53 = vpop.f32.mrb[48].mxu0  ;;  %v4728_v49 = vld [vmem:[#allocation8 + $0x12c8] sm:$0xff] }
 0x3ed   : > { %15402 = vst [vmem:[#allocation71_spill] sm:$0xff] %v14314_v23  ;;  %15403 = vst [vmem:[#allocation72_spill] sm:$0xff] %v14316_v61  ;;  %v3884_v3 = vmax.f32 %v14099_v5, %v3334_v53  ;;  %v14319_v43 = vpop.f32.mrb[49].mxu1  ;;  %v3336_v10 = vpop.f32.mrb[49].mxu0  ;;  %v9983_v5 = vpack.c.bf16 %v4721_v56, %v4715_v15  ;;  %v10113_v56 = vpack.c.bf16 %v4736_v50, %v4730_v54  ;;  %v4740_v15 = vld [vmem:[#allocation8 + $0x1328] sm:$0xff]  ;;  %v4739_v54 = vld [vmem:[#allocation8 + $0x1320] sm:$0xff] }
 0x3ee   : > { %15401 = vst [vmem:[#allocation70_spill] sm:$0xff] %v14312_v46  ;;  %v3885_v23 = vmax.f32 %v14101_v17, %v3336_v10  ;;  %4959 = vmatprep.mubr.f32.mxu0 %v14312_v46  ;;  %5209 = vmatprep.mubr.f32.mxu1 %v14312_v46  ;;  %v9985_v17 = vpack.c.bf16 %v4734_v22, %v4728_v49  ;;  %v4746_v22 = vld [vmem:[#allocation8 + $0x1358] sm:$0xff]  ;;  %v4745_v50 = vld [vmem:[#allocation8 + $0x1350] sm:$0xff] }
 0x3ef   : > { %v3968_v59 = vmax.f32 %v3880_v35, %v3884_v3  ;;  %4960 = vmatmul.mubr.f32.vlgmr.msra.gmra.mrb[116].mxu0 %v14316_v61  ;;  %5210 = vmatmul.mubr.f32.vlgmr.msra.gmra.mrb[134].mxu1 %v14316_v61 }
 0x3f0   : > { %v3969_v36 = vmax.f32 %v3881_v4, %v3885_v23  ;;  %v14326_v9 = vpop.f32.mrb[50].mxu1  ;;  %v3340_v44 = vpop.f32.mrb[50].mxu0  ;;  %9980 = vmatpush1.bf16.msra.mxu0 %v9979_v12  ;;  %10108 = vmatpush1.bf16.msra.mxu1 %v10107_v62  ;;  %v4729_v23 = vld [vmem:[#allocation8 + $0x12d0] sm:$0xff]  ;;  %v4735_v4 = vld [vmem:[#allocation8 + $0x1300] sm:$0xff]  ;;  %v4748_v62 = vld [vmem:[#allocation8 + $0x1368] sm:$0xff] }
 0x3f1   : > { %v4038_v53 = vadd.f32 %v14297_v33, %v3968_v59  ;;  %v3888_v10 = vmax.f32 %v14106_v7, %v3340_v44  ;;  %v14330_v3 = vpop.f32.mrb[51].mxu1  ;;  %v3342_v35 = vpop.f32.mrb[51].mxu0  ;;  %9982 = vmatprep.subr.bf16.mxu0 %v9981_v29  ;;  %10110 = vmatprep.subr.bf16.mxu1 %v10109_v2  ;;  %v9987_v29 = vpack.c.bf16 %v4733_v58, %v4727_v57  ;;  %v4741_v44 = vld [vmem:[#allocation8 + $0x1330] sm:$0xff]  ;;  %v4754_v57 = vld [vmem:[#allocation8 + $0x1398] sm:$0xff]  ;;  %v4760_v58 = vld [vmem:[#allocation8 + $0x13c8] sm:$0xff] }
 0x3f2   : > { %15404 = vst [vmem:[#allocation73_spill] sm:$0xff] %v14330_v3  ;;  %v4039_v12 = vadd.f32 %v14302_v55, %v3969_v36  ;;  %v3889_v0 = vmax.f32 %v14108_v45, %v3342_v35  ;;  %v10115_v2 = vpack.c.bf16 %v4735_v4, %v4729_v23  ;;  %v10117_v46 = vpack.c.bf16 %v4748_v62, %v4742_v51  ;;  %v4752_v3 = vld [vmem:[#allocation8 + $0x1388] sm:$0xff] }
 0x3f3   : > { %v14338_v61 = vmax.f32 %v4038_v53, 0.0 }
 0x3f4   : > { %v14334_v49 = vmax.f32 %v4039_v12, 0.0  ;;  %v14336_v59 = vpop.f32.mrb[52].mxu1  ;;  %v3346_v7 = vpop.f32.mrb[52].mxu0  ;;  %9984 = vmatpush1.bf16.msra.mxu0 %v9983_v5  ;;  %10112 = vmatpush1.bf16.msra.mxu1 %v10111_v60  ;;  %v9989_v12 = vpack.c.bf16 %v4746_v22, %v4740_v15  ;;  %v4758_v5 = vld [vmem:[#allocation8 + $0x13b8] sm:$0xff]  ;;  %v4751_v15 = vld [vmem:[#allocation8 + $0x1380] sm:$0xff]  ;;  %v4757_v22 = vld [vmem:[#allocation8 + $0x13b0] sm:$0xff] }
 0x3f5   : > { %15406 = vst [vmem:[#allocation75_spill] sm:$0xff] %v14336_v59  ;;  %15407 = vst [vmem:[#allocation76_spill] sm:$0xff] %v14338_v61  ;;  %v3892_v36 = vmax.f32 %v14113_v8, %v3346_v7  ;;  %v14341_v45 = vpop.f32.mrb[53].mxu1  ;;  %v3348_v35 = vpop.f32.mrb[53].mxu0  ;;  %9986 = vmatprep.subr.bf16.mxu0 %v9985_v17  ;;  %10114 = vmatprep.subr.bf16.mxu1 %v10113_v56  ;;  %v4747_v59 = vld [vmem:[#allocation8 + $0x1360] sm:$0xff]  ;;  %v9991_v8 = vpack.c.bf16 %v4745_v50, %v4739_v54 }
 0x3f6   : > { %15405 = vst [vmem:[#allocation74_spill] sm:$0xff] %v14334_v49  ;;  %v3893_v60 = vmax.f32 %v14115_v1, %v3348_v35  ;;  %4965 = vmatprep.mubr.f32.mxu0 %v14334_v49  ;;  %5215 = vmatprep.mubr.f32.mxu1 %v14334_v49  ;;  %v10119_v4 = vpack.c.bf16 %v4747_v59, %v4741_v44  ;;  %v4759_v50 = vld [vmem:[#allocation8 + $0x13c0] sm:$0xff]  ;;  %v4772_v44 = vld [vmem:[#allocation8 + $0x1428] sm:$0xff] }
 0x3f7   : > { %v3972_v53 = vmax.f32 %v3888_v10, %v3892_v36  ;;  %4966 = vmatmul.mubr.f32.gmra.mrb[118].mxu0 %v14338_v61  ;;  %5216 = vmatmul.mubr.f32.gmra.mrb[136].mxu1 %v14338_v61  ;;  %v9993_v1 = vpack.c.bf16 %v4758_v5, %v4752_v3  ;;  %v10121_v54 = vpack.c.bf16 %v4760_v58, %v4754_v57  ;;  %v4764_v36 = vld [vmem:[#allocation8 + $0x13e8] sm:$0xff]  ;;  %v4770_v3 = vld [vmem:[#allocation8 + $0x1418] sm:$0xff]  ;;  %v4769_v57 = vld [vmem:[#allocation8 + $0x1410] sm:$0xff] }
 0x3f8   : > { %v3973_v17 = vmax.f32 %v3889_v0, %v3893_v60  ;;  %v14348_v56 = vpop.f32.mrb[54].mxu1  ;;  %v3352_v23 = vpop.f32.mrb[54].mxu0  ;;  %9988 = vmatpush1.bf16.msra.mxu0 %v9987_v29  ;;  %10116 = vmatpush1.bf16.msra.mxu1 %v10115_v2  ;;  %v4753_v0 = vld [vmem:[#allocation8 + $0x1390] sm:$0xff]  ;;  %v4766_v2 = vld [vmem:[#allocation8 + $0x13f8] sm:$0xff]  ;;  %v4763_v60 = vld [vmem:[#allocation8 + $0x13e0] sm:$0xff] }
 0x3f9   : > { %v4042_v51 = vadd.f32 %v14297_v33, %v3972_v53  ;;  %v3896_v62 = vmax.f32 %v14120_v38, %v3352_v23  ;;  %v14352_v10 = vpop.f32.mrb[55].mxu1  ;;  %v3354_v7 = vpop.f32.mrb[55].mxu0  ;;  %9990 = vmatprep.subr.bf16.mxu0 %v9989_v12  ;;  %10118 = vmatprep.subr.bf16.mxu1 %v10117_v46  ;;  %v9995_v12 = vpack.c.bf16 %v4757_v22, %v4751_v15  ;;  %v4765_v58 = vld [vmem:[#allocation8 + $0x13f0] sm:$0xff]  ;;  %v4771_v61 = vld [vmem:[#allocation8 + $0x1420] sm:$0xff]  ;;  %v4776_v49 = vld [vmem:[#allocation8 + $0x1448] sm:$0xff] }
 0x3fa   : > { %v4043_v29 = vadd.f32 %v14302_v55, %v3973_v17  ;;  %v3897_v59 = vmax.f32 %v14122_v42, %v3354_v7  ;;  %v10123_v46 = vpack.c.bf16 %v4759_v50, %v4753_v0  ;;  %v9997_v7 = vpack.c.bf16 %v4770_v3, %v4764_v36  ;;  %v4778_v15 = vld [vmem:[#allocation8 + $0x1458] sm:$0xff]  ;;  %v4784_v22 = vld [vmem:[#allocation8 + $0x1488] sm:$0xff]  ;;  %v4775_v36 = vld [vmem:[#allocation8 + $0x1440] sm:$0xff] }
 0x3fb   : > { %v14360_v53 = vmax.f32 %v4042_v51, 0.0  ;;  %v10127_v50 = vpack.c.bf16 %v4771_v61, %v4765_v58  ;;  %v4781_v3 = vld [vmem:[#allocation8 + $0x1470] sm:$0xff]  ;;  %v4796_v58 = vld [vmem:[#allocation8 + $0x14e8] sm:$0xff] }
 0x3fc   : > { %v14356_v35 = vmax.f32 %v4043_v29, 0.0  ;;  %v14358_v5 = vpop.f32.mrb[56].mxu1  ;;  %v3358_v38 = vpop.f32.mrb[56].mxu0  ;;  %9992 = vmatpush1.bf16.msra.mxu0 %v9991_v8  ;;  %10120 = vmatpush1.bf16.msra.mxu1 %v10119_v4  ;;  %v10125_v29 = vpack.c.bf16 %v4772_v44, %v4766_v2  ;;  %v4782_v8 = vld [vmem:[#allocation8 + $0x1478] sm:$0xff] }
 0x3fd   : > { %15409 = vst [vmem:[#allocation78_spill] sm:$0xff] %v14360_v53  ;;  %v3900_v17 = vmax.f32 %v14127_v11, %v3358_v38  ;;  %v14363_v42 = vpop.f32.mrb[57].mxu1  ;;  %v3360_v23 = vpop.f32.mrb[57].mxu0  ;;  %9994 = vmatprep.subr.bf16.mxu0 %v9993_v1  ;;  %10122 = vmatprep.subr.bf16.mxu1 %v10121_v54  ;;  %v9999_v11 = vpack.c.bf16 %v4769_v57, %v4763_v60  ;;  %v4783_v57 = vld [vmem:[#allocation8 + $0x1480] sm:$0xff] }
 0x3fe   : > { %15408 = vst [vmem:[#allocation77_spill] sm:$0xff] %v14356_v35  ;;  %v3901_v4 = vmax.f32 %v14131_v39, %v3360_v23  ;;  %4971 = vmatprep.mubr.f32.mxu0 %v14356_v35  ;;  %5221 = vmatprep.mubr.f32.mxu1 %v14356_v35  ;;  %v10001_v39 = vpack.c.bf16 %v4782_v8, %v4776_v49  ;;  %v4794_v49 = vld [vmem:[#allocation8 + $0x14d8] sm:$0xff]  ;;  %v4800_v35 = vld [vmem:[#allocation8 + $0x1508] sm:$0xff] }
 0x3ff   : > { %v3976_v51 = vmax.f32 %v3896_v62, %v3900_v17  ;;  %4972 = vmatmul.mubr.f32.gmra.mrb[120].mxu0 %v14360_v53  ;;  %5222 = vmatmul.mubr.f32.gmra.mrb[138].mxu1 %v14360_v53  ;;  %v10129_v60 = vpack.c.bf16 %v4784_v22, %v4778_v15  ;;  %v4788_v17 = vld [vmem:[#allocation8 + $0x14a8] sm:$0xff]  ;;  %v4793_v15 = vld [vmem:[#allocation8 + $0x14d0] sm:$0xff]  ;;  %v4795_v53 = vld [vmem:[#allocation8 + $0x14e0] sm:$0xff] }
 0x400   : > { %v3977_v1 = vmax.f32 %v3897_v59, %v3901_v4  ;;  %v14370_v54 = vpop.f32.mrb[58].mxu1  ;;  %v3364_v0 = vpop.f32.mrb[58].mxu0  ;;  %9996 = vmatpush1.bf16.msra.mxu0 %v9995_v12  ;;  %10124 = vmatpush1.bf16.msra.mxu1 %v10123_v46  ;;  %v4777_v59 = vld [vmem:[#allocation8 + $0x1450] sm:$0xff]  ;;  %v4790_v46 = vld [vmem:[#allocation8 + $0x14b8] sm:$0xff]  ;;  %v4787_v4 = vld [vmem:[#allocation8 + $0x14a0] sm:$0xff] }
 0x401   : > { %v4046_v2 = vadd.f32 %v14297_v33, %v3976_v51  ;;  %v3904_v44 = vmax.f32 %v14139_v19, %v3364_v0  ;;  %v14374_v62 = vpop.f32.mrb[59].mxu1  ;;  %v3366_v38 = vpop.f32.mrb[59].mxu0  ;;  %9998 = vmatprep.subr.bf16.mxu0 %v9997_v7  ;;  %10126 = vmatprep.subr.bf16.mxu1 %v10125_v29  ;;  %v10003_v7 = vpack.c.bf16 %v4781_v3, %v4775_v36  ;;  %v4789_v22 = vld [vmem:[#allocation8 + $0x14b0] sm:$0xff]  ;;  %v4802_v36 = vld [vmem:[#allocation8 + $0x1518] sm:$0xff]  ;;  %v4808_v3 = vld [vmem:[#allocation8 + $0x1548] sm:$0xff] }
 0x402   : > { %v4047_v12 = vadd.f32 %v14302_v55, %v3977_v1  ;;  %v3905_v61 = vmax.f32 %v14144_v6, %v3366_v38  ;;  %v10131_v29 = vpack.c.bf16 %v4783_v57, %v4777_v59  ;;  %v10005_v38 = vpack.c.bf16 %v4794_v49, %v4788_v17  ;;  %v4805_v49 = vld [vmem:[#allocation8 + $0x1530] sm:$0xff] }
 0x403   : > { %v14382_v51 = vmax.f32 %v4046_v2, 0.0  ;;  %v10135_v57 = vpack.c.bf16 %v4795_v53, %v4789_v22  ;;  %v4818_v53 = vld [vmem:[#allocation8 + $0x1598] sm:$0xff]  ;;  %v4811_v22 = vld [vmem:[#allocation8 + $0x1560] sm:$0xff] }
 0x404   : > { %v14378_v23 = vmax.f32 %v4047_v12, 0.0  ;;  %v14380_v8 = vpop.f32.mrb[60].mxu1  ;;  %v3370_v19 = vpop.f32.mrb[60].mxu0  ;;  %10000 = vmatpush1.bf16.msra.mxu0 %v9999_v11  ;;  %10128 = vmatpush1.bf16.msra.mxu1 %v10127_v50  ;;  %v10133_v12 = vpack.c.bf16 %v4796_v58, %v4790_v46  ;;  %v4806_v11 = vld [vmem:[#allocation8 + $0x1538] sm:$0xff] }
 0x405   : > { %15411 = vst [vmem:[#allocation80_spill] sm:$0xff] %v14382_v51  ;;  %v3908_v1 = vmax.f32 %v14149_v26, %v3370_v19  ;;  %v14385_v6 = vpop.f32.mrb[61].mxu1  ;;  %v3372_v0 = vpop.f32.mrb[61].mxu0  ;;  %10002 = vmatprep.subr.bf16.mxu0 %v10001_v39  ;;  %10130 = vmatprep.subr.bf16.mxu1 %v10129_v60  ;;  %v10007_v26 = vpack.c.bf16 %v4793_v15, %v4787_v4  ;;  %v4807_v4 = vld [vmem:[#allocation8 + $0x1540] sm:$0xff] }
 0x406   : > { %15410 = vst [vmem:[#allocation79_spill] sm:$0xff] %v14378_v23  ;;  %v3909_v50 = vmax.f32 %v14151_v14, %v3372_v0  ;;  %4977 = vmatprep.mubr.f32.mxu0 %v14378_v23  ;;  %5227 = vmatprep.mubr.f32.mxu1 %v14378_v23  ;;  %v10009_v17 = vpack.c.bf16 %v4806_v11, %v4800_v35  ;;  %v4799_v14 = vld [vmem:[#allocation8 + $0x1500] sm:$0xff]  ;;  %v4801_v0 = vld [vmem:[#allocation8 + $0x1510] sm:$0xff]  ;;  %v4814_v35 = vld [vmem:[#allocation8 + $0x1578] sm:$0xff] }
 0x407   : > { %v3980_v2 = vmax.f32 %v3904_v44, %v3908_v1  ;;  %4978 = vmatmul.mubr.f32.gmra.mrb[122].mxu0 %v14382_v51  ;;  %5228 = vmatmul.mubr.f32.gmra.mrb[140].mxu1 %v14382_v51  ;;  %v10137_v1 = vpack.c.bf16 %v4808_v3, %v4802_v36  ;;  %v4817_v11 = vld [vmem:[#allocation8 + $0x1590] sm:$0xff]  ;;  %v4819_v3 = vld [vmem:[#allocation8 + $0x15a0] sm:$0xff]  ;;  %v4830_v51 = vld [vmem:[#allocation8 + $0x15f8] sm:$0xff] }
 0x408   : > { %v3981_v39 = vmax.f32 %v3905_v61, %v3909_v50  ;;  %v3376_v60 = vpop.f32.mrb[62].mxu0  ;;  %v3231_v59 = vpop.f32.mrb[126].mxu1  ;;  %10004 = vmatpush1.bf16.msra.mxu0 %v10003_v7  ;;  %10132 = vmatpush1.bf16.msra.mxu1 %v10131_v29  ;;  %v4812_v61 = vld [vmem:[#allocation8 + $0x1568] sm:$0xff]  ;;  %v4813_v36 = vld [vmem:[#allocation8 + $0x1570] sm:$0xff]  ;;  %v4826_v23 = vld [vmem:[#allocation8 + $0x15d8] sm:$0xff] }
 0x409   : > { %v4050_v46 = vadd.f32 %v14297_v33, %v3980_v2  ;;  %v3912_v58 = vmax.f32 %v14156_v21, %v3376_v60  ;;  %v3378_v19 = vpop.f32.mrb[63].mxu0  ;;  %v3232_v44 = vpop.f32.mrb[127].mxu1  ;;  %10006 = vmatprep.subr.bf16.mxu0 %v10005_v38  ;;  %10134 = vmatprep.subr.bf16.mxu1 %v10133_v12  ;;  %v4820_v29 = vld [vmem:[#allocation8 + $0x15a8] sm:$0xff]  ;;  %v10011_v38 = vpack.c.bf16 %v4805_v49, %v4799_v14 }
 0x40a   : > { %v4051_v15 = vadd.f32 %v14302_v55, %v3981_v39  ;;  %v3913_v7 = vmax.f32 %v14158_v34, %v3378_v19  ;;  %v10139_v12 = vpack.c.bf16 %v4807_v4, %v4801_v0  ;;  %v4824_v60 = vld [vmem:[#allocation8 + $0x15c8] sm:$0xff]  ;;  %v10013_v44 = vpack.c.bf16 %v4818_v53, %v4812_v61  ;;  %v4823_v4 = vld [vmem:[#allocation8 + $0x15c0] sm:$0xff]  ;;  %v4825_v61 = vld [vmem:[#allocation8 + $0x15d0] sm:$0xff] }
 0x40b   : > { %v14398_v59 = vmax.f32 %v4050_v46, 0.0  ;;  %v10143_v14 = vpack.c.bf16 %v4819_v3, %v4813_v36  ;;  %v4844_v36 = vld [vmem:[#allocation8 + $0x1668] sm:$0xff]  ;;  %v14412_v3 = vld [vmem:[#allocation8 + $0x1620] sm:$0xff] }
 0x40c   : > { %v14396_v50 = vmax.f32 %v4051_v15, 0.0  ;;  %v3382_v21 = vpop.f32.mrb[64].mxu0  ;;  %v3235_v2 = vpop.f32.mrb[128].mxu1  ;;  %10008 = vmatpush1.bf16.msra.mxu0 %v10007_v26  ;;  %10136 = vmatpush1.bf16.msra.mxu1 %v10135_v57  ;;  %v10141_v15 = vpack.c.bf16 %v4820_v29, %v4814_v35 }
 0x40d   : > { %v3916_v34 = vmax.f32 %v14162_v16, %v3382_v21  ;;  %v3384_v39 = vpop.f32.mrb[65].mxu0  ;;  %v3236_v19 = vpop.f32.mrb[129].mxu1  ;;  %10010 = vmatprep.subr.bf16.mxu0 %v10009_v17  ;;  %10138 = vmatprep.subr.bf16.mxu1 %v10137_v1  ;;  %v4832_v2 = vld [vmem:[#allocation8 + $0x1608] sm:$0xff]  ;;  %v10015_v16 = vpack.c.bf16 %v4817_v11, %v4811_v22  ;;  %v10017_v1 = vpack.c.bf16 %v4830_v51, %v4824_v60  ;;  %v4842_v11 = vld [vmem:[#allocation8 + $0x1658] sm:$0xff] }
 0x40e   : > { %v3917_v26 = vmax.f32 %v14164_v13, %v3384_v39  ;;  %4983 = vmatprep.mubr.f32.mxu0 %v14396_v50  ;;  %5233 = vmatprep.mubr.f32.mxu1 %v14396_v50  ;;  %v10145_v0 = vpack.c.bf16 %v4832_v2, %v4826_v23  ;;  %v4829_v13 = vld [vmem:[#allocation8 + $0x15f0] sm:$0xff]  ;;  %v4836_v22 = vld [vmem:[#allocation8 + $0x1628] sm:$0xff]  ;;  %v4843_v2 = vld [vmem:[#allocation8 + $0x1660] sm:$0xff] }
 0x40f   : > { %v3984_v57 = vmax.f32 %v3912_v58, %v3916_v34  ;;  %4984 = vmatmul.mubr.f32.gmra.mrb[124].mxu0 %v14398_v59  ;;  %5234 = vmatmul.mubr.f32.gmra.mrb[142].mxu1 %v14398_v59  ;;  %v10019_v39 = vpack.c.bf16 %v4829_v13, %v4823_v4  ;;  %v4850_v4 = vld [vmem:[#allocation8 + $0x1698] sm:$0xff] }
 0x410   : > { %v3985_v17 = vmax.f32 %v3913_v7, %v3917_v26  ;;  %v3388_v49 = vpop.f32.mrb[66].mxu0  ;;  %v3521_v46 = vpop.f32.mrb[66].mxu1  ;;  %10012 = vmatpush1.bf16.msra.mxu0 %v10011_v38  ;;  %10140 = vmatpush1.bf16.msra.mxu1 %v10139_v12  ;;  %v4831_v7 = vld [vmem:[#allocation8 + $0x1600] sm:$0xff]  ;;  %v4838_v12 = vld [vmem:[#allocation8 + $0x1638] sm:$0xff] }
 0x411   : > { %v4054_v53 = vadd.f32 %v14297_v33, %v3984_v57  ;;  %v3920_v58 = vmax.f32 %v14166_v40, %v3388_v49  ;;  %v3866_v35 = vmax.f32 %v14168_v18, %v3521_v46  ;;  %v3390_v29 = vpop.f32.mrb[67].mxu0  ;;  %v3523_v21 = vpop.f32.mrb[67].mxu1  ;;  %10014 = vmatprep.subr.bf16.mxu0 %v10013_v44  ;;  %10142 = vmatprep.subr.bf16.mxu1 %v10141_v15  ;;  %v14414_v40 = vld [vmem:[#allocation8 + $0x1650] sm:$0xff]  ;;  %v4848_v46 = vld [vmem:[#allocation8 + $0x1688] sm:$0xff] }
 0x412   : > { %v4055_v38 = vadd.f32 %v14302_v55, %v3985_v17  ;;  %v3921_v23 = vmax.f32 %v14170_v24, %v3390_v29  ;;  %v3867_v51 = vmax.f32 %v14172_v25, %v3523_v21  ;;  %v10147_v19 = vpack.c.bf16 %v4831_v7, %v4825_v61  ;;  %v4837_v15 = vld [vmem:[#allocation8 + $0x1630] sm:$0xff]  ;;  %v4854_v29 = vld [vmem:[#allocation8 + $0x16b8] sm:$0xff]  ;;  %v4847_v7 = vld [vmem:[#allocation8 + $0x1680] sm:$0xff] }
 0x413   : > { %v10021_v44 = vpack.c.bf16 %v4842_v11, %v4836_v22  ;;  %v14418_v24 = vmax.f32 %v4054_v53, 0.0  ;;  %v10149_v49 = vpack.c.bf16 %v4844_v36, %v4838_v12  ;;  %v10025_v21 = vpack.c.bf16 %v4854_v29, %v4848_v46  ;;  %v4853_v22 = vld [vmem:[#allocation8 + $0x16b0] sm:$0xff] }
 0x414   : > { %v14416_v18 = vmax.f32 %v4055_v38, 0.0  ;;  %v3394_v60 = vpop.f32.mrb[68].mxu0  ;;  %v3527_v34 = vpop.f32.mrb[68].mxu1  ;;  %10016 = vmatpush1.bf16.msra.mxu0 %v10015_v16  ;;  %10144 = vmatpush1.bf16.msra.mxu1 %v10143_v14  ;;  %v4849_v11 = vld [vmem:[#allocation8 + $0x1690] sm:$0xff] }
 0x415   : > { %v3924_v25 = vmax.f32 %v14174_v48, %v3394_v60  ;;  %v3870_v26 = vmax.f32 %v14176_v30, %v3527_v34  ;;  %v3396_v57 = vpop.f32.mrb[69].mxu0  ;;  %v3529_v17 = vpop.f32.mrb[69].mxu1  ;;  %10018 = vmatprep.subr.bf16.mxu0 %v10017_v1  ;;  %10146 = vmatprep.subr.bf16.mxu1 %v10145_v0  ;;  %v10023_v48 = vpack.c.bf16 %v14414_v40, %v14412_v3  ;;  %v4856_v30 = vld [vmem:[#allocation8 + $0x16c8] sm:$0xff]  ;;  %v4866_v40 = vld [vmem:[#allocation8 + $0x1718] sm:$0xff]  ;;  %v4861_v46 = vld [vmem:[#allocation8 + $0x16f0] sm:$0xff] }
 0x416   : > { %v3925_v16 = vmax.f32 %v14178_v31, %v3396_v57  ;;  %v3871_v14 = vmax.f32 %v14180_v20, %v3529_v17  ;;  %4989 = vmatprep.mubr.f32.mxu0 %v14416_v18  ;;  %5239 = vmatprep.mubr.f32.mxu1 %v14416_v18  ;;  %v10151_v1 = vpack.c.bf16 %v4843_v2, %v4837_v15  ;;  %v4860_v3 = vld [vmem:[#allocation8 + $0x16e8] sm:$0xff]  ;;  %v14440_v2 = vld [vmem:[#allocation8 + $0x16e0] sm:$0xff] }
 0x417   : > { %v3988_v13 = vmax.f32 %v3920_v58, %v3924_v25  ;;  %v14428_v61 = vmax.f32 %v3866_v35, %v3870_v26  ;;  %4990 = vmatmul.mubr.f32.gmra.mrb[126].mxu0 %v14418_v24  ;;  %5240 = vmatmul.mubr.f32.gmra.mrb[144].mxu1 %v14418_v24  ;;  %v4868_v15 = vld [vmem:[#allocation8 + $0x1728] sm:$0xff]  ;;  %v10027_v26 = vpack.c.bf16 %v4853_v22, %v4847_v7  ;;  %v4874_v7 = vld [vmem:[#allocation8 + $0x1758] sm:$0xff] }
 0x418   : > { %v3989_v31 = vmax.f32 %v3921_v23, %v3925_v16  ;;  %v14432_v0 = vmax.f32 %v3867_v51, %v3871_v14  ;;  %v3400_v20 = vpop.f32.mrb[70].mxu0  ;;  %v3533_v53 = vpop.f32.mrb[70].mxu1  ;;  %10020 = vmatpush1.bf16.msra.mxu0 %v10019_v39  ;;  %10148 = vmatpush1.bf16.msra.mxu1 %v10147_v19  ;;  %v10153_v23 = vpack.c.bf16 %v4856_v30, %v4850_v4  ;;  %v4855_v51 = vld [vmem:[#allocation8 + $0x16c0] sm:$0xff]  ;;  %v4862_v19 = vld [vmem:[#allocation8 + $0x16f8] sm:$0xff]  ;;  %v4880_v22 = vld [vmem:[#allocation8 + $0x1788] sm:$0xff] }
 0x419   : > { %v4058_v58 = vadd.f32 %v14297_v33, %v3988_v13  ;;  %v3928_v35 = vmax.f32 %v14182_v47, %v3400_v20  ;;  %v3874_v38 = vmax.f32 %v14184_v63, %v3533_v53  ;;  %v3402_v12 = vpop.f32.mrb[71].mxu0  ;;  %v3535_v36 = vpop.f32.mrb[71].mxu1  ;;  %10022 = vmatprep.subr.bf16.mxu0 %v10021_v44  ;;  %10150 = vmatprep.subr.bf16.mxu1 %v10149_v49  ;;  %v14442_v47 = vld [vmem:[#allocation8 + $0x1710] sm:$0xff]  ;;  %v15412_v49 = vld [vmem:[#allocation30_spill] sm:$0xff]  ;;  %v15414_v20 = vld [vmem:[#allocation32_spill] sm:$0xff] }
 0x41a   : > { %v4059_v60 = vadd.f32 %v14302_v55, %v3989_v31  ;;  %v3929_v34 = vmax.f32 %v14186_v32, %v3402_v12  ;;  %v3875_v39 = vmax.f32 %v14188_v41, %v3535_v36  ;;  %v10155_v57 = vpack.c.bf16 %v4855_v51, %v4849_v11  ;;  %v4867_v32 = vld [vmem:[#allocation8 + $0x1720] sm:$0xff]  ;;  %v4872_v13 = vld [vmem:[#allocation8 + $0x1748] sm:$0xff]  ;;  %v4878_v31 = vld [vmem:[#allocation8 + $0x1778] sm:$0xff] }
 0x41b   : > { %v10029_v17 = vpack.c.bf16 %v4866_v40, %v4860_v3  ;;  %v14446_v29 = vmax.f32 %v4058_v58, 0.0  ;;  %v10157_v30 = vpack.c.bf16 %v4868_v15, %v4862_v19  ;;  %v10033_v3 = vpack.c.bf16 %v4878_v31, %v4872_v13  ;;  %v4871_v40 = vld [vmem:[#allocation8 + $0x1740] sm:$0xff]  ;;  %v4873_v19 = vld [vmem:[#allocation8 + $0x1750] sm:$0xff] }
 0x41c   : > { %v14444_v63 = vmax.f32 %v4059_v60, 0.0  ;;  %v3406_v44 = vpop.f32.mrb[72].mxu0  ;;  %v3539_v25 = vpop.f32.mrb[72].mxu1  ;;  %10024 = vmatpush1.bf16.msra.mxu0 %v10023_v48  ;;  %10152 = vmatpush1.bf16.msra.mxu1 %v10151_v1  ;;  %v15413_v48 = vld [vmem:[#allocation31_spill] sm:$0xff]  ;;  %v4883_v13 = vld [vmem:[#allocation8 + $0x17a0] sm:$0xff] }
 0x41d   : > { %v3932_v41 = vmax.f32 %v14190_v37, %v3406_v44  ;;  %v3878_v16 = vmax.f32 %v15412_v49, %v3539_v25  ;;  %v3408_v14 = vpop.f32.mrb[73].mxu0  ;;  %v3541_v4 = vpop.f32.mrb[73].mxu1  ;;  %10026 = vmatprep.subr.bf16.mxu0 %v10025_v21  ;;  %10154 = vmatprep.subr.bf16.mxu1 %v10153_v23  ;;  %v10031_v37 = vpack.c.bf16 %v14442_v47, %v14440_v2  ;;  %v4877_v60 = vld [vmem:[#allocation8 + $0x1770] sm:$0xff]  ;;  %v15416_v2 = vld [vmem:[#allocation34_spill] sm:$0xff]  ;;  %v15418_v49 = vld [vmem:[#allocation36_spill] sm:$0xff] }
 0x41e   : > { %v3933_v1 = vmax.f32 %v15413_v48, %v3408_v14  ;;  %v3879_v53 = vmax.f32 %v15414_v20, %v3541_v4  ;;  %4995 = vmatprep.mubr.f32.mxu0 %v14444_v63  ;;  %5245 = vmatprep.mubr.f32.mxu1 %v14444_v63  ;;  %v10159_v21 = vpack.c.bf16 %v4867_v32, %v4861_v46  ;;  %v4884_v46 = vld [vmem:[#allocation8 + $0x17a8] sm:$0xff]  ;;  %v4890_v32 = vld [vmem:[#allocation8 + $0x17d8] sm:$0xff]  ;;  %v4889_v31 = vld [vmem:[#allocation8 + $0x17d0] sm:$0xff] }
 0x41f   : > { %v3992_v11 = vmax.f32 %v3928_v35, %v3932_v41  ;;  %v14456_v58 = vmax.f32 %v3874_v38, %v3878_v16  ;;  %4996 = vmatmul.mubr.f32.gmra.mrb[128].mxu0 %v14446_v29  ;;  %5246 = vmatmul.mubr.f32.gmra.mrb[146].mxu1 %v14446_v29  ;;  %v15415_v38 = vld [vmem:[#allocation33_spill] sm:$0xff]  ;;  %v4886_v14 = vld [vmem:[#allocation8 + $0x17b8] sm:$0xff]  ;;  %v4892_v4 = vld [vmem:[#allocation8 + $0x17e8] sm:$0xff] }
 0x420   : > { %v3993_v12 = vmax.f32 %v3929_v34, %v3933_v1  ;;  %v14460_v36 = vmax.f32 %v3875_v39, %v3879_v53  ;;  %v3412_v23 = vpop.f32.mrb[74].mxu0  ;;  %v3545_v51 = vpop.f32.mrb[74].mxu1  ;;  %10028 = vmatpush1.bf16.msra.mxu0 %v10027_v26  ;;  %10156 = vmatpush1.bf16.msra.mxu1 %v10155_v57  ;;  %v10161_v34 = vpack.c.bf16 %v4880_v22, %v4874_v7  ;;  %v4879_v39 = vld [vmem:[#allocation8 + $0x1780] sm:$0xff]  ;;  %v15417_v57 = vld [vmem:[#allocation35_spill] sm:$0xff] }
 0x421   : > { %v4062_v35 = vadd.f32 %v14297_v33, %v3992_v11  ;;  %v3936_v15 = vmax.f32 %v15415_v38, %v3412_v23  ;;  %v3882_v47 = vmax.f32 %v15416_v2, %v3545_v51  ;;  %v3414_v44 = vpop.f32.mrb[75].mxu0  ;;  %v3547_v25 = vpop.f32.mrb[75].mxu1  ;;  %10030 = vmatprep.subr.bf16.mxu0 %v10029_v17  ;;  %10158 = vmatprep.subr.bf16.mxu1 %v10157_v30  ;;  %v4885_v22 = vld [vmem:[#allocation8 + $0x17b0] sm:$0xff]  ;;  %v4891_v11 = vld [vmem:[#allocation8 + $0x17e0] sm:$0xff] }
 0x422   : > { %v4063_v26 = vadd.f32 %v14302_v55, %v3993_v12  ;;  %v3937_v41 = vmax.f32 %v15417_v57, %v3414_v44  ;;  %v3883_v16 = vmax.f32 %v15418_v49, %v3547_v25  ;;  %v10035_v17 = vpack.c.bf16 %v4877_v60, %v4871_v40  ;;  %v15419_v30 = vld [vmem:[#allocation37_spill] sm:$0xff]  ;;  %v4516_v25 = vld [vmem:[#allocation8 + $0xc28] sm:$0xff] }
 0x423   : > { %v10163_v53 = vpack.c.bf16 %v4879_v39, %v4873_v19  ;;  %v10037_v7 = vpack.c.bf16 %v4890_v32, %v4884_v46  ;;  %v14470_v12 = vmax.f32 %v4062_v35, 0.0  ;;  %v10165_v44 = vpack.c.bf16 %v4892_v4, %v4886_v14  ;;  %v4129_v19 = vld [vmem:[#allocation8 + $0x18] sm:$0xff] }
 0x424   : > { %v14468_v48 = vmax.f32 %v4063_v26, 0.0  ;;  %v3418_v1 = vpop.f32.mrb[76].mxu0  ;;  %v3551_v20 = vpop.f32.mrb[76].mxu1  ;;  %10032 = vmatpush1.bf16.msra.mxu0 %v10031_v37  ;;  %10160 = vmatpush1.bf16.msra.mxu1 %v10159_v21  ;;  %v4522_v26 = vld [vmem:[#allocation8 + $0xc58] sm:$0xff]  ;;  %v15420_v21 = vld [vmem:[#allocation38_spill] sm:$0xff]  ;;  %v10039_v60 = vpack.c.bf16 %v4889_v31, %v4883_v13 }
 0x425   : > { %v3940_v23 = vmax.f32 %v14209_v28, %v3418_v1  ;;  %v3886_v51 = vmax.f32 %v15419_v30, %v3551_v20  ;;  %v3420_v38 = vpop.f32.mrb[77].mxu0  ;;  %v3553_v2 = vpop.f32.mrb[77].mxu1  ;;  %10034 = vmatprep.subr.bf16.mxu0 %v10033_v3  ;;  %10162 = vmatprep.subr.bf16.mxu1 %v10161_v34  ;;  %v4135_v28 = vld [vmem:[#allocation8 + $0x48] sm:$0xff]  ;;  %v10167_v3 = vpack.c.bf16 %v4891_v11, %v4885_v22  ;;  %v15423_v20 = vld [vmem:[#allocation40_spill] sm:$0xff] }
 0x426   : > { %v3941_v37 = vmax.f32 %v14214_v52, %v3420_v38  ;;  %v3887_v40 = vmax.f32 %v15420_v21, %v3553_v2  ;;  %5001 = vmatprep.mubr.f32.mxu0 %v14468_v48  ;;  %5251 = vmatprep.mubr.f32.mxu1 %v14468_v48  ;;  %v10169_v57 = vpack.c.bf16 %v4522_v26, %v4516_v25  ;;  %v15426_v25 = vld [vmem:[#allocation45_spill] sm:$0xff]  ;;  %v15428_v21 = vld [vmem:[#allocation28_spill] sm:$0xff] }
 0x427   : > { %v3996_v35 = vmax.f32 %v3936_v15, %v3940_v23  ;;  %v14478_v39 = vmax.f32 %v3882_v47, %v3886_v51  ;;  %5002 = vmatmul.mubr.f32.gmra.mrb[130].mxu0 %v14470_v12  ;;  %5252 = vmatmul.mubr.f32.gmra.mrb[148].mxu1 %v14470_v12  ;;  %v15421_v15 = vld [vmem:[#allocation39_spill] sm:$0xff]  ;;  %v10425_v31 = vpack.c.bf16 %v4135_v28, %v4129_v19  ;;  %v15425_v51 = vld [vmem:[#allocation42_spill] sm:$0xff] }
 0x428   : > { %v3997_v34 = vmax.f32 %v3937_v41, %v3941_v37  ;;  %v14482_v46 = vmax.f32 %v3883_v16, %v3887_v40  ;;  %v3424_v52 = vpop.f32.mrb[78].mxu0  ;;  %v3557_v32 = vpop.f32.mrb[78].mxu1  ;;  %10036 = vmatpush1.bf16.msra.mxu0 %v10035_v17  ;;  %10164 = vmatpush1.bf16.msra.mxu1 %v10163_v53  ;;  %v15422_v41 = vld [vmem:[#allocation41_spill] sm:$0xff]  ;;  %v15424_v23 = vld [vmem:[#allocation43_spill] sm:$0xff]  ;;  %v15427_v37 = vld [vmem:[#allocation44_spill] sm:$0xff]  ;;  %v15296_v40 = vsub.s32 2, %v15428_v21 }
 0x429   : > { %v4066_v49 = vadd.f32 %v14297_v33, %v3996_v35  ;;  %v3944_v14 = vmax.f32 %v14219_v27, %v3424_v52  ;;  %v3890_v47 = vmax.f32 %v15421_v15, %v3557_v32  ;;  %v3426_v4 = vpop.f32.mrb[79].mxu0  ;;  %v3559_v13 = vpop.f32.mrb[79].mxu1  ;;  %10038 = vmatprep.subr.bf16.mxu0 %v10037_v7  ;;  %10166 = vmatprep.subr.bf16.mxu1 %v10165_v44  ;;  %v15429_v32 = vld [vmem:[#allocation47_spill] sm:$0xff]  ;;  %v4540_v21 = vld [vmem:[#allocation8 + $0xce8] sm:$0xff] }
 0x42a   : > { %v4067_v1 = vadd.f32 %v14302_v55, %v3997_v34  ;;  %v3945_v16 = vmax.f32 %v15422_v41, %v3426_v4  ;;  %v3891_v22 = vmax.f32 %v15423_v20, %v3559_v13 }
 0x42b   : > { %v14492_v27 = vmax.f32 %v4066_v49, 0.0  ;;  %v15430_v49 = vld [vmem:[#allocation46_spill] sm:$0xff] }
 0x42c   : > { %v14490_v17 = vmax.f32 %v4067_v1, 0.0  ;;  %v3430_v53 = vpop.f32.mrb[80].mxu0  ;;  %v3563_v11 = vpop.f32.mrb[80].mxu1  ;;  %10040 = vmatpush1.bf16.msra.mxu0 %v10039_v60  ;;  %10168 = vmatpush1.bf16.msra.mxu1 %v10167_v3  ;;  %v15432_v1 = vld [vmem:[#allocation49_spill] sm:$0xff] }
 0x42d   : > { %v3948_v30 = vmax.f32 %v15424_v23, %v3430_v53  ;;  %v3894_v7 = vmax.f32 %v15425_v51, %v3563_v11  ;;  %v3432_v38 = vpop.f32.mrb[81].mxu0  ;;  %v3565_v2 = vpop.f32.mrb[81].mxu1  ;;  %10170 = vmatprep.subr.bf16.mxu0 %v10169_v57  ;;  %10426 = vmatprep.subr.bf16.mxu1 %v10425_v31  ;;  %v4515_v11 = vld [vmem:[#allocation8 + $0xc20] sm:$0xff]  ;;  %v4521_v23 = vld [vmem:[#allocation8 + $0xc50] sm:$0xff] }
 0x42e   : > { %v3949_v26 = vmax.f32 %v15426_v25, %v3432_v38  ;;  %v3895_v44 = vmax.f32 %v15427_v37, %v3565_v2  ;;  %5007 = vmatprep.mubr.f32.mxu0 %v14490_v17  ;;  %5257 = vmatprep.mubr.f32.mxu1 %v14490_v17  ;;  %v15435_v2 = vld [vmem:[#allocation51_spill] sm:$0xff] }
 0x42f   : > { %v4000_v60 = vmax.f32 %v3944_v14, %v3948_v30  ;;  %v14501_v19 = vmax.f32 %v3890_v47, %v3894_v7  ;;  %5008 = vmatmul.mubr.f32.gmra.mrb[132].mxu0 %v14492_v27  ;;  %5258 = vmatmul.mubr.f32.gmra.mrb[150].mxu1 %v14492_v27  ;;  %v15431_v14 = vld [vmem:[#allocation29_spill] sm:$0xff] }
 0x430   : > { %v4001_v28 = vmax.f32 %v3945_v16, %v3949_v26  ;;  %v14505_v35 = vmax.f32 %v3891_v22, %v3895_v44  ;;  %v3436_v3 = vpop.f32.mrb[82].mxu0  ;;  %v3569_v34 = vpop.f32.mrb[82].mxu1  ;;  %v4037_v47 = vadd.f32 %v15431_v14, %v14460_v36  ;;  %v15433_v16 = vld [vmem:[#allocation48_spill] sm:$0xff]  ;;  %v15436_v26 = vld [vmem:[#allocation50_spill] sm:$0xff] }
 0x431   : > { %v4070_v52 = vadd.f32 %v14297_v33, %v4000_v60  ;;  %v3952_v57 = vmax.f32 %v15429_v32, %v3436_v3  ;;  %v3898_v15 = vmax.f32 %v15430_v49, %v3569_v34  ;;  %v3438_v4 = vpop.f32.mrb[83].mxu0  ;;  %v3571_v13 = vpop.f32.mrb[83].mxu1  ;;  %v12197_v22 = vld [vmem:[#allocation6] sm:$0xf]  ;;  %v4134_v3 = vld [vmem:[#allocation8 + $0x40] sm:$0xff] }
 0x432   : > { %v4071_v31 = vadd.f32 %v14302_v55, %v4001_v28  ;;  %v3953_v41 = vmax.f32 %v15432_v1, %v3438_v4  ;;  %v3899_v20 = vmax.f32 %v15433_v16, %v3571_v13  ;;  %v14517_v53 = vrot.slane %v12197_v22, %v15296_v40  ;;  %v4128_v28 = vld [vmem:[#allocation8 + $0x10] sm:$0xff]  ;;  %v15437_v32 = vld [vmem:[#allocation53_spill] sm:$0xff]  ;;  %v15438_v4 = vld [vmem:[#allocation52_spill] sm:$0xff] }
 0x433   : > { %v14523_v38 = vmax.f32 %v4070_v52, 0.0  ;;  %v14527_v34 = vmax.f32 %v4037_v47, 0.0  ;;  %v4528_v52 = vld [vmem:[#allocation8 + $0xc88] sm:$0xff]  ;;  %v4534_v47 = vld [vmem:[#allocation8 + $0xcb8] sm:$0xff] }
 0x434   : > { %15434 = vst [vmem:[#allocation30_spill] sm:$0xff] %v14517_v53  ;;  %v14519_v30 = vmax.f32 %v4071_v31, 0.0  ;;  %v3442_v51 = vpop.f32.mrb[84].mxu0  ;;  %v3575_v7 = vpop.f32.mrb[84].mxu1  ;;  %v4036_v36 = vadd.f32 %v14517_v53, %v14456_v58  ;;  %v10171_v58 = vpack.c.bf16 %v4521_v23, %v4515_v11  ;;  %v4041_v31 = vadd.f32 %v15431_v14, %v14482_v46  ;;  %v4141_v22 = vld [vmem:[#allocation8 + $0x78] sm:$0xff] }
 0x435   : > { %v3956_v25 = vmax.f32 %v15435_v2, %v3442_v51  ;;  %v3902_v37 = vmax.f32 %v15436_v26, %v3575_v7  ;;  %v3444_v44 = vpop.f32.mrb[85].mxu0  ;;  %v3577_v60 = vpop.f32.mrb[85].mxu1  ;;  %v4147_v51 = vld [vmem:[#allocation8 + $0xa8] sm:$0xff]  ;;  %v10427_v46 = vpack.c.bf16 %v4134_v3, %v4128_v28  ;;  %v4040_v23 = vadd.f32 %v14517_v53, %v14478_v39  ;;  %v4546_v39 = vld [vmem:[#allocation8 + $0xd18] sm:$0xff] }
 0x436   : > { %v3957_v49 = vmax.f32 %v15437_v32, %v3444_v44  ;;  %v3903_v13 = vmax.f32 %v15438_v4, %v3577_v60  ;;  %5013 = vmatprep.mubr.f32.mxu0 %v14519_v30  ;;  %5263 = vmatprep.mubr.f32.mxu1 %v14519_v30  ;;  %v4533_v60 = vld [vmem:[#allocation8 + $0xcb0] sm:$0xff]  ;;  %v4146_v32 = vld [vmem:[#allocation8 + $0xa0] sm:$0xff]  ;;  %v10429_v40 = vpack.c.bf16 %v4147_v51, %v4141_v22  ;;  %v14551_v28 = vmax.f32 %v4041_v31, 0.0  ;;  %v4153_v3 = vld [vmem:[#allocation8 + $0xd8] sm:$0xff] }
 0x437   : > { %v14535_v1 = vmax.f32 %v3952_v57, %v3956_v25  ;;  %v14537_v16 = vmax.f32 %v3898_v15, %v3902_v37  ;;  %5014 = vmatmul.mubr.f32.gmra.mrb[134].mxu0 %v14523_v38  ;;  %5264 = vmatmul.mubr.f32.gmra.mrb[152].mxu1 %v14523_v38  ;;  %v4527_v57 = vld [vmem:[#allocation8 + $0xc80] sm:$0xff]  ;;  %v14545_v15 = vmax.f32 %v4036_v36, 0.0  ;;  %v15442_v25 = vld [vmem:[#allocation54_spill] sm:$0xff]  ;;  %v4045_v36 = vadd.f32 %v15431_v14, %v14505_v35  ;;  %v15446_v35 = vld [vmem:[#allocation56_spill] sm:$0xff] }
 0x438   : > { %v14541_v7 = vmax.f32 %v3953_v41, %v3957_v49  ;;  %v3979_v2 = vmax.f32 %v3899_v20, %v3903_v13  ;;  %v3581_v26 = vpop.f32.mrb[86].mxu1  ;;  %5084 = vmatprep.mubr.f32.mxu0 %v14527_v34  ;;  %5334 = vmatprep.mubr.f32.mxu1 %v14527_v34  ;;  %v3448_v11 = vpop.f32.mrb[112].mxu0  ;;  %v4140_v41 = vld [vmem:[#allocation8 + $0x70] sm:$0xff]  ;;  %v10173_v13 = vpack.c.bf16 %v4534_v47, %v4528_v52  ;;  %v4539_v52 = vld [vmem:[#allocation8 + $0xce0] sm:$0xff]  ;;  %v14557_v22 = vmax.f32 %v4040_v23, 0.0 }
 0x439   : > { %15439 = vst [vmem:[#allocation31_spill] sm:$0xff] %v14535_v1  ;;  %15441 = vst [vmem:[#allocation33_spill] sm:$0xff] %v14545_v15  ;;  %v3906_v37 = vmax.f32 %v15442_v25, %v3581_v26  ;;  %v3583_v44 = vpop.f32.mrb[87].mxu1  ;;  %v3449_v20 = vpop.f32.mrb[113].mxu0  ;;  %v15443_v49 = vld [vmem:[#allocation55_spill] sm:$0xff]  ;;  %v4159_v26 = vld [vmem:[#allocation8 + $0x108] sm:$0xff]  ;;  %v10175_v25 = vpack.c.bf16 %v4533_v60, %v4527_v57  ;;  %v4044_v31 = vadd.f32 %v14517_v53, %v14501_v19 }
 0x43a   : > { %15440 = vst [vmem:[#allocation32_spill] sm:$0xff] %v14541_v7  ;;  %v3907_v4 = vmax.f32 %v15443_v49, %v3583_v44  ;;  %15444 = vst [vmem:[#allocation34_spill] sm:$0xff] %v14551_v28  ;;  %v10431_v44 = vpack.c.bf16 %v4146_v32, %v4140_v41  ;;  %v4545_v49 = vld [vmem:[#allocation8 + $0xd10] sm:$0xff]  ;;  %v15447_v57 = vld [vmem:[#allocation57_spill] sm:$0xff]  ;;  %v10177_v23 = vpack.c.bf16 %v4546_v39, %v4540_v21 }
 0x43b   : > { %5085 = vmatmul.mubr.f32.vlgmr.msra.gmra.mrb[116].mxu0 %v14545_v15  ;;  %5335 = vmatmul.mubr.f32.vlgmr.msra.gmra.mrb[134].mxu1 %v14545_v15  ;;  %15445 = vst [vmem:[#allocation35_spill] sm:$0xff] %v14557_v22  ;;  %v10433_v41 = vpack.c.bf16 %v4159_v26, %v4153_v3  ;;  %v4552_v32 = vld [vmem:[#allocation8 + $0xd48] sm:$0xff]  ;;  %v4049_v19 = vadd.f32 %v15431_v14, %v3979_v2  ;;  %v4165_v7 = vld [vmem:[#allocation8 + $0x138] sm:$0xff]  ;;  %v4551_v39 = vld [vmem:[#allocation8 + $0xd40] sm:$0xff]  ;;  %v14570_v3 = vmax.f32 %v4044_v31, 0.0 }
 0x43c   : > { %10172 = vmatpush1.bf16.msra.mxu0 %v10171_v58  ;;  %10428 = vmatpush1.bf16.msra.mxu1 %v10427_v46  ;;  %v3587_v11 = vpop.f32.mrb[88].mxu1  ;;  %v3452_v47 = vpop.f32.mrb[114].mxu0  ;;  %v4152_v58 = vld [vmem:[#allocation8 + $0xd0] sm:$0xff]  ;;  %v4158_v46 = vld [vmem:[#allocation8 + $0x100] sm:$0xff]  ;;  %v4048_v2 = vadd.f32 %v14517_v53, %v14537_v16 }
 0x43d   : > { %v3910_v51 = vmax.f32 %v15446_v35, %v3587_v11  ;;  %5090 = vmatprep.mubr.f32.mxu0 %v14551_v28  ;;  %5340 = vmatprep.mubr.f32.mxu1 %v14551_v28  ;;  %v3589_v20 = vpop.f32.mrb[89].mxu1  ;;  %v3453_v1 = vpop.f32.mrb[115].mxu0  ;;  %v14565_v47 = vmax.f32 %v4045_v36, 0.0  ;;  %v4558_v35 = vld [vmem:[#allocation8 + $0xd78] sm:$0xff]  ;;  %v4171_v28 = vld [vmem:[#allocation8 + $0x168] sm:$0xff]  ;;  %v10435_v21 = vpack.c.bf16 %v4158_v46, %v4152_v58  ;;  %15449 = vst [vmem:[#allocation37_spill] sm:$0xff] %v14570_v3 }
 0x43e   : > { %v3911_v60 = vmax.f32 %v15447_v57, %v3589_v20  ;;  %10174 = vmatprep.subr.bf16.mxu0 %v10173_v13  ;;  %10430 = vmatprep.subr.bf16.mxu1 %v10429_v40  ;;  %v10179_v40 = vpack.c.bf16 %v4545_v49, %v4539_v52  ;;  %v10181_v52 = vpack.c.bf16 %v4558_v35, %v4552_v32  ;;  %v4564_v49 = vld [vmem:[#allocation8 + $0xda8] sm:$0xff]  ;;  %v14578_v58 = vmax.f32 %v4049_v19, 0.0  ;;  %v4570_v46 = vld [vmem:[#allocation8 + $0xdd8] sm:$0xff]  ;;  %v4569_v32 = vld [vmem:[#allocation8 + $0xdd0] sm:$0xff] }
 0x43f   : > { %15448 = vst [vmem:[#allocation36_spill] sm:$0xff] %v14565_v47  ;;  %v3982_v11 = vmax.f32 %v3906_v37, %v3910_v51  ;;  %5091 = vmatmul.mubr.f32.gmra.mrb[118].mxu0 %v14557_v22  ;;  %5341 = vmatmul.mubr.f32.gmra.mrb[136].mxu1 %v14557_v22  ;;  %v15450_v37 = vld [vmem:[#allocation58_spill] sm:$0xff]  ;;  %v4557_v51 = vld [vmem:[#allocation8 + $0xd70] sm:$0xff]  ;;  %v10437_v31 = vpack.c.bf16 %v4171_v28, %v4165_v7  ;;  %v4177_v57 = vld [vmem:[#allocation8 + $0x198] sm:$0xff]  ;;  %v14583_v28 = vmax.f32 %v4048_v2, 0.0 }
 0x440   : > { %v3983_v1 = vmax.f32 %v3907_v4, %v3911_v60  ;;  %10176 = vmatpush1.bf16.msra.mxu0 %v10175_v25  ;;  %10432 = vmatpush1.bf16.msra.mxu1 %v10431_v44  ;;  %v3593_v13 = vpop.f32.mrb[90].mxu1  ;;  %v4164_v4 = vld [vmem:[#allocation8 + $0x130] sm:$0xff]  ;;  %v4170_v25 = vld [vmem:[#allocation8 + $0x160] sm:$0xff]  ;;  %15452 = vst [vmem:[#allocation38_spill] sm:$0xff] %v14578_v58  ;;  %v4183_v60 = vld [vmem:[#allocation8 + $0x1c8] sm:$0xff] }
 0x441   : > { %v3914_v36 = vmax.f32 %v15450_v37, %v3593_v13  ;;  %5096 = vmatprep.mubr.f32.mxu0 %v14565_v47  ;;  %5346 = vmatprep.mubr.f32.mxu1 %v14565_v47  ;;  %v3595_v26 = vpop.f32.mrb[91].mxu1  ;;  %v15451_v44 = vld [vmem:[#allocation59_spill] sm:$0xff]  ;;  %v10183_v37 = vpack.c.bf16 %v4557_v51, %v4551_v39  ;;  %15453 = vst [vmem:[#allocation39_spill] sm:$0xff] %v14583_v28  ;;  %v15454_v35 = vld [vmem:[#allocation60_spill] sm:$0xff] }
 0x442   : > { %v3915_v20 = vmax.f32 %v15451_v44, %v3595_v26  ;;  %10178 = vmatprep.subr.bf16.mxu0 %v10177_v23  ;;  %10434 = vmatprep.subr.bf16.mxu1 %v10433_v41  ;;  %v4053_v16 = vadd.f32 %v15431_v14, %v3983_v1  ;;  %v10439_v23 = vpack.c.bf16 %v4170_v25, %v4164_v4  ;;  %v4563_v41 = vld [vmem:[#allocation8 + $0xda0] sm:$0xff]  ;;  %v4176_v7 = vld [vmem:[#allocation8 + $0x190] sm:$0xff]  ;;  %v4189_v2 = vld [vmem:[#allocation8 + $0x1f8] sm:$0xff] }
 0x443   : > { %5097 = vmatmul.mubr.f32.gmra.mrb[120].mxu0 %v14570_v3  ;;  %5347 = vmatmul.mubr.f32.gmra.mrb[138].mxu1 %v14570_v3  ;;  %v4052_v19 = vadd.f32 %v14517_v53, %v3982_v11  ;;  %v4182_v44 = vld [vmem:[#allocation8 + $0x1c0] sm:$0xff]  ;;  %v10185_v51 = vpack.c.bf16 %v4570_v46, %v4564_v49  ;;  %v10441_v4 = vpack.c.bf16 %v4183_v60, %v4177_v57  ;;  %v4195_v25 = vld [vmem:[#allocation8 + $0x228] sm:$0xff] }
 0x444   : > { %10180 = vmatpush1.bf16.msra.mxu0 %v10179_v40  ;;  %10436 = vmatpush1.bf16.msra.mxu1 %v10435_v21  ;;  %v3599_v13 = vpop.f32.mrb[92].mxu1  ;;  %v4576_v40 = vld [vmem:[#allocation8 + $0xe08] sm:$0xff]  ;;  %v4582_v21 = vld [vmem:[#allocation8 + $0xe38] sm:$0xff]  ;;  %v15455_v3 = vld [vmem:[#allocation61_spill] sm:$0xff]  ;;  %v14590_v47 = vmax.f32 %v4053_v16, 0.0  ;;  %v10443_v22 = vpack.c.bf16 %v4182_v44, %v4176_v7  ;;  %v10445_v60 = vpack.c.bf16 %v4195_v25, %v4189_v2 }
 0x445   : > { %v3918_v1 = vmax.f32 %v15454_v35, %v3599_v13  ;;  %5102 = vmatprep.mubr.f32.mxu0 %v14578_v58  ;;  %5352 = vmatprep.mubr.f32.mxu1 %v14578_v58  ;;  %v3601_v26 = vpop.f32.mrb[93].mxu1  ;;  %v10187_v13 = vpack.c.bf16 %v4569_v32, %v4563_v41  ;;  %v14594_v49 = vmax.f32 %v4052_v19, 0.0  ;;  %v15457_v16 = vld [vmem:[#allocation64_spill] sm:$0xff]  ;;  %v15458_v32 = vld [vmem:[#allocation65_spill] sm:$0xff]  ;;  %v4593_v2 = vld [vmem:[#allocation8 + $0xe90] sm:$0xff] }
 0x446   : > { %v3919_v39 = vmax.f32 %v15455_v3, %v3601_v26  ;;  %10182 = vmatprep.subr.bf16.mxu0 %v10181_v52  ;;  %10438 = vmatprep.subr.bf16.mxu1 %v10437_v31  ;;  %v10189_v3 = vpack.c.bf16 %v4582_v21, %v4576_v40  ;;  %v4575_v52 = vld [vmem:[#allocation8 + $0xe00] sm:$0xff]  ;;  %v4581_v31 = vld [vmem:[#allocation8 + $0xe30] sm:$0xff]  ;;  %v4594_v19 = vld [vmem:[#allocation8 + $0xe98] sm:$0xff] }
 0x447   : > { %v3986_v11 = vmax.f32 %v3914_v36, %v3918_v1  ;;  %5103 = vmatmul.mubr.f32.gmra.mrb[122].mxu0 %v14583_v28  ;;  %5353 = vmatmul.mubr.f32.gmra.mrb[140].mxu1 %v14583_v28  ;;  %15456 = vst [vmem:[#allocation41_spill] sm:$0xff] %v14594_v49  ;;  %v4201_v1 = vld [vmem:[#allocation8 + $0x258] sm:$0xff]  ;;  %v4207_v26 = vld [vmem:[#allocation8 + $0x288] sm:$0xff]  ;;  %v10191_v40 = vpack.c.bf16 %v4581_v31, %v4575_v52  ;;  %v4200_v25 = vld [vmem:[#allocation8 + $0x250] sm:$0xff] }
 0x448   : > { %v3987_v35 = vmax.f32 %v3915_v20, %v3919_v39  ;;  %10184 = vmatpush1.bf16.msra.mxu0 %v10183_v37  ;;  %10440 = vmatpush1.bf16.msra.mxu1 %v10439_v23  ;;  %v3605_v58 = vpop.f32.mrb[94].mxu1  ;;  %v4188_v20 = vld [vmem:[#allocation8 + $0x1f0] sm:$0xff]  ;;  %v4194_v37 = vld [vmem:[#allocation8 + $0x220] sm:$0xff]  ;;  %v4588_v23 = vld [vmem:[#allocation8 + $0xe68] sm:$0xff] }
 0x449   : > { %v4056_v46 = vadd.f32 %v14517_v53, %v3986_v11  ;;  %v3922_v57 = vmax.f32 %v15457_v16, %v3605_v58  ;;  %5108 = vmatprep.mubr.f32.mxu0 %v14590_v47  ;;  %5358 = vmatprep.mubr.f32.mxu1 %v14590_v47  ;;  %v3607_v36 = vpop.f32.mrb[95].mxu1  ;;  %v10447_v21 = vpack.c.bf16 %v4194_v37, %v4188_v20  ;;  %v4587_v39 = vld [vmem:[#allocation8 + $0xe60] sm:$0xff]  ;;  %v4213_v52 = vld [vmem:[#allocation8 + $0x2b8] sm:$0xff]  ;;  %v4219_v31 = vld [vmem:[#allocation8 + $0x2e8] sm:$0xff] }
 0x44a   : > { %v4057_v41 = vadd.f32 %v15431_v14, %v3987_v35  ;;  %v3923_v7 = vmax.f32 %v15458_v32, %v3607_v36  ;;  %10186 = vmatprep.subr.bf16.mxu0 %v10185_v51  ;;  %10442 = vmatprep.subr.bf16.mxu1 %v10441_v4  ;;  %v15461_v51 = vld [vmem:[#allocation66_spill] sm:$0xff]  ;;  %v10193_v16 = vpack.c.bf16 %v4594_v19, %v4588_v23  ;;  %v4206_v32 = vld [vmem:[#allocation8 + $0x280] sm:$0xff] }
 0x44b   : > { %5109 = vmatmul.mubr.f32.gmra.mrb[124].mxu0 %v14594_v49  ;;  %5359 = vmatmul.mubr.f32.gmra.mrb[142].mxu1 %v14594_v49  ;;  %v14606_v11 = vmax.f32 %v4056_v46, 0.0  ;;  %v10449_v36 = vpack.c.bf16 %v4207_v26, %v4201_v1  ;;  %v4606_v49 = vld [vmem:[#allocation8 + $0xef8] sm:$0xff]  ;;  %v10451_v37 = vpack.c.bf16 %v4206_v32, %v4200_v25  ;;  %v4599_v19 = vld [vmem:[#allocation8 + $0xec0] sm:$0xff]  ;;  %v4605_v1 = vld [vmem:[#allocation8 + $0xef0] sm:$0xff] }
 0x44c   : > { %v14604_v58 = vmax.f32 %v4057_v41, 0.0  ;;  %10188 = vmatpush1.bf16.msra.mxu0 %v10187_v13  ;;  %10444 = vmatpush1.bf16.msra.mxu1 %v10443_v22  ;;  %v3611_v44 = vpop.f32.mrb[96].mxu1  ;;  %v4600_v41 = vld [vmem:[#allocation8 + $0xec8] sm:$0xff]  ;;  %v15462_v13 = vld [vmem:[#allocation67_spill] sm:$0xff] }
 0x44d   : > { %15460 = vst [vmem:[#allocation43_spill] sm:$0xff] %v14606_v11  ;;  %v3926_v4 = vmax.f32 %v15461_v51, %v3611_v44  ;;  %v3613_v35 = vpop.f32.mrb[97].mxu1  ;;  %10190 = vmatprep.subr.bf16.mxu0 %v10189_v3  ;;  %10446 = vmatprep.subr.bf16.mxu1 %v10445_v60  ;;  %v10195_v3 = vpack.c.bf16 %v4593_v2, %v4587_v39  ;;  %v15463_v44 = vld [vmem:[#allocation68_spill] sm:$0xff] }
 0x44e   : > { %15459 = vst [vmem:[#allocation40_spill] sm:$0xff] %v14604_v58  ;;  %v3927_v22 = vmax.f32 %v15462_v13, %v3613_v35  ;;  %5114 = vmatprep.mubr.f32.mxu0 %v14604_v58  ;;  %5364 = vmatprep.mubr.f32.mxu1 %v14604_v58  ;;  %v10197_v23 = vpack.c.bf16 %v4606_v49, %v4600_v41  ;;  %v4218_v13 = vld [vmem:[#allocation8 + $0x2e0] sm:$0xff]  ;;  %v4618_v39 = vld [vmem:[#allocation8 + $0xf58] sm:$0xff]  ;;  %v4231_v49 = vld [vmem:[#allocation8 + $0x348] sm:$0xff] }
 0x44f   : > { %v3990_v46 = vmax.f32 %v3922_v57, %v3926_v4  ;;  %5115 = vmatmul.mubr.f32.gmra.mrb[126].mxu0 %v14606_v11  ;;  %5365 = vmatmul.mubr.f32.gmra.mrb[144].mxu1 %v14606_v11  ;;  %v10453_v57 = vpack.c.bf16 %v4219_v31, %v4213_v52  ;;  %v4212_v4 = vld [vmem:[#allocation8 + $0x2b0] sm:$0xff]  ;;  %v4612_v11 = vld [vmem:[#allocation8 + $0xf28] sm:$0xff]  ;;  %v4225_v2 = vld [vmem:[#allocation8 + $0x318] sm:$0xff]  ;;  %v10199_v41 = vpack.c.bf16 %v4605_v1, %v4599_v19 }
 0x450   : > { %v3991_v60 = vmax.f32 %v3923_v7, %v3927_v22  ;;  %10192 = vmatpush1.bf16.msra.mxu0 %v10191_v40  ;;  %10448 = vmatpush1.bf16.msra.mxu1 %v10447_v21  ;;  %v3617_v20 = vpop.f32.mrb[98].mxu1  ;;  %v15464_v40 = vld [vmem:[#allocation69_spill] sm:$0xff]  ;;  %v10455_v22 = vpack.c.bf16 %v4218_v13, %v4212_v4  ;;  %v4224_v52 = vld [vmem:[#allocation8 + $0x310] sm:$0xff]  ;;  %v4630_v58 = vld [vmem:[#allocation8 + $0xfb8] sm:$0xff] }
 0x451   : > { %v4060_v26 = vadd.f32 %v14517_v53, %v3990_v46  ;;  %v3930_v51 = vmax.f32 %v15463_v44, %v3617_v20  ;;  %v3619_v35 = vpop.f32.mrb[99].mxu1  ;;  %10194 = vmatprep.subr.bf16.mxu0 %v10193_v16  ;;  %10450 = vmatprep.subr.bf16.mxu1 %v10449_v36  ;;  %v4611_v16 = vld [vmem:[#allocation8 + $0xf20] sm:$0xff]  ;;  %v4617_v36 = vld [vmem:[#allocation8 + $0xf50] sm:$0xff]  ;;  %v10201_v44 = vpack.c.bf16 %v4618_v39, %v4612_v11  ;;  %v4243_v19 = vld [vmem:[#allocation8 + $0x3a8] sm:$0xff] }
 0x452   : > { %v4061_v7 = vadd.f32 %v15431_v14, %v3991_v60  ;;  %v3931_v21 = vmax.f32 %v15464_v40, %v3619_v35  ;;  %v15465_v46 = vld [vmem:[#allocation71_spill] sm:$0xff]  ;;  %v10457_v35 = vpack.c.bf16 %v4231_v49, %v4225_v2  ;;  %v4230_v40 = vld [vmem:[#allocation8 + $0x340] sm:$0xff] }
 0x453   : > { %v14620_v31 = vmax.f32 %v4060_v26, 0.0  ;;  %v4623_v13 = vld [vmem:[#allocation8 + $0xf80] sm:$0xff] }
 0x454   : > { %v14618_v25 = vmax.f32 %v4061_v7, 0.0  ;;  %10196 = vmatpush1.bf16.msra.mxu0 %v10195_v3  ;;  %10452 = vmatpush1.bf16.msra.mxu1 %v10451_v37  ;;  %v3623_v32 = vpop.f32.mrb[100].mxu1  ;;  %v4624_v7 = vld [vmem:[#allocation8 + $0xf88] sm:$0xff]  ;;  %v4237_v37 = vld [vmem:[#allocation8 + $0x378] sm:$0xff] }
 0x455   : > { %v3934_v20 = vmax.f32 %v15465_v46, %v3623_v32  ;;  %v3625_v60 = vpop.f32.mrb[101].mxu1  ;;  %10198 = vmatprep.subr.bf16.mxu0 %v10197_v23  ;;  %10454 = vmatprep.subr.bf16.mxu1 %v10453_v57  ;;  %v10203_v23 = vpack.c.bf16 %v4617_v36, %v4611_v16  ;;  %v10459_v57 = vpack.c.bf16 %v4230_v40, %v4224_v52  ;;  %v4236_v32 = vld [vmem:[#allocation8 + $0x370] sm:$0xff]  ;;  %v4242_v46 = vld [vmem:[#allocation8 + $0x3a0] sm:$0xff]  ;;  %v4642_v16 = vld [vmem:[#allocation8 + $0x1018] sm:$0xff] }
 0x456   : > { %v3935_v3 = vmax.f32 %v14319_v43, %v3625_v60  ;;  %5120 = vmatprep.mubr.f32.mxu0 %v14618_v25  ;;  %5370 = vmatprep.mubr.f32.mxu1 %v14618_v25  ;;  %v10205_v4 = vpack.c.bf16 %v4630_v58, %v4624_v7  ;;  %v4629_v43 = vld [vmem:[#allocation8 + $0xfb0] sm:$0xff]  ;;  %v4249_v36 = vld [vmem:[#allocation8 + $0x3d8] sm:$0xff]  ;;  %v4255_v58 = vld [vmem:[#allocation8 + $0x408] sm:$0xff]  ;;  %v10463_v40 = vpack.c.bf16 %v4242_v46, %v4236_v32 }
 0x457   : > { %v3994_v1 = vmax.f32 %v3930_v51, %v3934_v20  ;;  %5121 = vmatmul.mubr.f32.gmra.mrb[128].mxu0 %v14620_v31  ;;  %5371 = vmatmul.mubr.f32.gmra.mrb[146].mxu1 %v14620_v31  ;;  %v10461_v51 = vpack.c.bf16 %v4243_v19, %v4237_v37  ;;  %v4636_v20 = vld [vmem:[#allocation8 + $0xfe8] sm:$0xff]  ;;  %v4248_v7 = vld [vmem:[#allocation8 + $0x3d0] sm:$0xff] }
 0x458   : > { %v3995_v26 = vmax.f32 %v3931_v21, %v3935_v3  ;;  %10200 = vmatpush1.bf16.msra.mxu0 %v10199_v41  ;;  %10456 = vmatpush1.bf16.msra.mxu1 %v10455_v22  ;;  %v3629_v11 = vpop.f32.mrb[102].mxu1  ;;  %v15466_v41 = vld [vmem:[#allocation73_spill] sm:$0xff]  ;;  %v15467_v37 = vld [vmem:[#allocation75_spill] sm:$0xff] }
 0x459   : > { %v4064_v39 = vadd.f32 %v14517_v53, %v3994_v1  ;;  %v3938_v2 = vmax.f32 %v14326_v9, %v3629_v11  ;;  %v3631_v49 = vpop.f32.mrb[103].mxu1  ;;  %10202 = vmatprep.subr.bf16.mxu0 %v10201_v44  ;;  %10458 = vmatprep.subr.bf16.mxu1 %v10457_v35  ;;  %v10207_v9 = vpack.c.bf16 %v4629_v43, %v4623_v13  ;;  %v4635_v44 = vld [vmem:[#allocation8 + $0xfe0] sm:$0xff]  ;;  %v4641_v35 = vld [vmem:[#allocation8 + $0x1010] sm:$0xff]  ;;  %v4267_v13 = vld [vmem:[#allocation8 + $0x468] sm:$0xff] }
 0x45a   : > { %v4065_v21 = vadd.f32 %v15431_v14, %v3995_v26  ;;  %v3939_v22 = vmax.f32 %v15466_v41, %v3631_v49  ;;  %v10209_v26 = vpack.c.bf16 %v4642_v16, %v4636_v20  ;;  %v10465_v11 = vpack.c.bf16 %v4255_v58, %v4249_v36  ;;  %v4254_v49 = vld [vmem:[#allocation8 + $0x400] sm:$0xff]  ;;  %v4654_v41 = vld [vmem:[#allocation8 + $0x1078] sm:$0xff] }
 0x45b   : > { %v14634_v3 = vmax.f32 %v4064_v39, 0.0  ;;  %v10467_v32 = vpack.c.bf16 %v4254_v49, %v4248_v7  ;;  %v4647_v20 = vld [vmem:[#allocation8 + $0x1040] sm:$0xff] }
 0x45c   : > { %v14632_v52 = vmax.f32 %v4065_v21, 0.0  ;;  %10204 = vmatpush1.bf16.msra.mxu0 %v10203_v23  ;;  %10460 = vmatpush1.bf16.msra.mxu1 %v10459_v57  ;;  %v3635_v60 = vpop.f32.mrb[104].mxu1  ;;  %v4648_v21 = vld [vmem:[#allocation8 + $0x1048] sm:$0xff]  ;;  %v4261_v57 = vld [vmem:[#allocation8 + $0x438] sm:$0xff] }
 0x45d   : > { %v3942_v19 = vmax.f32 %v15467_v37, %v3635_v60  ;;  %v3637_v1 = vpop.f32.mrb[105].mxu1  ;;  %10206 = vmatprep.subr.bf16.mxu0 %v10205_v4  ;;  %10462 = vmatprep.subr.bf16.mxu1 %v10461_v51  ;;  %v10211_v4 = vpack.c.bf16 %v4641_v35, %v4635_v44  ;;  %v10213_v46 = vpack.c.bf16 %v4654_v41, %v4648_v21  ;;  %v4260_v60 = vld [vmem:[#allocation8 + $0x430] sm:$0xff]  ;;  %v4266_v37 = vld [vmem:[#allocation8 + $0x460] sm:$0xff]  ;;  %v4273_v44 = vld [vmem:[#allocation8 + $0x498] sm:$0xff] }
 0x45e   : > { %v3943_v23 = vmax.f32 %v14341_v45, %v3637_v1  ;;  %5126 = vmatprep.mubr.f32.mxu0 %v14632_v52  ;;  %5376 = vmatprep.mubr.f32.mxu1 %v14632_v52  ;;  %v4653_v45 = vld [vmem:[#allocation8 + $0x1070] sm:$0xff]  ;;  %v4279_v35 = vld [vmem:[#allocation8 + $0x4c8] sm:$0xff]  ;;  %v10471_v49 = vpack.c.bf16 %v4266_v37, %v4260_v60  ;;  %v4671_v60 = vld [vmem:[#allocation8 + $0x1100] sm:$0xff] }
 0x45f   : > { %v3998_v43 = vmax.f32 %v3938_v2, %v3942_v19  ;;  %5127 = vmatmul.mubr.f32.gmra.mrb[130].mxu0 %v14634_v3  ;;  %5377 = vmatmul.mubr.f32.gmra.mrb[148].mxu1 %v14634_v3  ;;  %v10469_v2 = vpack.c.bf16 %v4267_v13, %v4261_v57  ;;  %v4660_v19 = vld [vmem:[#allocation8 + $0x10a8] sm:$0xff]  ;;  %v4272_v21 = vld [vmem:[#allocation8 + $0x490] sm:$0xff]  ;;  %v10473_v13 = vpack.c.bf16 %v4279_v35, %v4273_v44  ;;  %v4290_v44 = vld [vmem:[#allocation8 + $0x520] sm:$0xff] }
 0x460   : > { %v3999_v39 = vmax.f32 %v3939_v22, %v3943_v23  ;;  %10208 = vmatpush1.bf16.msra.mxu0 %v10207_v9  ;;  %10464 = vmatpush1.bf16.msra.mxu1 %v10463_v40  ;;  %v3641_v51 = vpop.f32.mrb[106].mxu1  ;;  %v4666_v40 = vld [vmem:[#allocation8 + $0x10d8] sm:$0xff] }
 0x461   : > { %v4068_v16 = vadd.f32 %v14517_v53, %v3998_v43  ;;  %v3946_v36 = vmax.f32 %v14348_v56, %v3641_v51  ;;  %v3643_v58 = vpop.f32.mrb[107].mxu1  ;;  %10210 = vmatprep.subr.bf16.mxu0 %v10209_v26  ;;  %10466 = vmatprep.subr.bf16.mxu1 %v10465_v11  ;;  %v10215_v56 = vpack.c.bf16 %v4653_v45, %v4647_v20  ;;  %v4659_v26 = vld [vmem:[#allocation8 + $0x10a0] sm:$0xff]  ;;  %v4665_v11 = vld [vmem:[#allocation8 + $0x10d0] sm:$0xff]  ;;  %v4678_v51 = vld [vmem:[#allocation8 + $0x1138] sm:$0xff] }
 0x462   : > { %v4069_v22 = vadd.f32 %v15431_v14, %v3999_v39  ;;  %v3947_v9 = vmax.f32 %v14352_v10, %v3643_v58  ;;  %v10217_v10 = vpack.c.bf16 %v4666_v40, %v4660_v19  ;;  %v4278_v43 = vld [vmem:[#allocation8 + $0x4c0] sm:$0xff]  ;;  %v4672_v39 = vld [vmem:[#allocation8 + $0x1108] sm:$0xff]  ;;  %v4284_v40 = vld [vmem:[#allocation8 + $0x4f0] sm:$0xff] }
 0x463   : > { %v14648_v41 = vmax.f32 %v4068_v16, 0.0  ;;  %v4291_v20 = vld [vmem:[#allocation8 + $0x528] sm:$0xff]  ;;  %v10475_v58 = vpack.c.bf16 %v4278_v43, %v4272_v21  ;;  %v4689_v43 = vld [vmem:[#allocation8 + $0x1190] sm:$0xff] }
 0x464   : > { %v14646_v7 = vmax.f32 %v4069_v22, 0.0  ;;  %10212 = vmatpush1.bf16.msra.mxu0 %v10211_v4  ;;  %10468 = vmatpush1.bf16.msra.mxu1 %v10467_v32  ;;  %v3647_v1 = vpop.f32.mrb[108].mxu1  ;;  %v4285_v32 = vld [vmem:[#allocation8 + $0x4f8] sm:$0xff]  ;;  %v4677_v22 = vld [vmem:[#allocation8 + $0x1130] sm:$0xff]  ;;  %v4303_v21 = vld [vmem:[#allocation8 + $0x588] sm:$0xff] }
 0x465   : > { %v3950_v23 = vmax.f32 %v14358_v5, %v3647_v1  ;;  %v3649_v57 = vpop.f32.mrb[109].mxu1  ;;  %10214 = vmatprep.subr.bf16.mxu0 %v10213_v46  ;;  %10470 = vmatprep.subr.bf16.mxu1 %v10469_v2  ;;  %v10219_v5 = vpack.c.bf16 %v4665_v11, %v4659_v26  ;;  %v10221_v2 = vpack.c.bf16 %v4678_v51, %v4672_v39  ;;  %v4684_v1 = vld [vmem:[#allocation8 + $0x1168] sm:$0xff]  ;;  %v4690_v26 = vld [vmem:[#allocation8 + $0x1198] sm:$0xff] }
 0x466   : > { %v3951_v4 = vmax.f32 %v14363_v42, %v3649_v57  ;;  %5132 = vmatprep.mubr.f32.mxu0 %v14646_v7  ;;  %5382 = vmatprep.mubr.f32.mxu1 %v14646_v7  ;;  %v4297_v11 = vld [vmem:[#allocation8 + $0x558] sm:$0xff]  ;;  %v10223_v57 = vpack.c.bf16 %v4677_v22, %v4671_v60  ;;  %v4315_v60 = vld [vmem:[#allocation8 + $0x5e8] sm:$0xff]  ;;  %v4701_v22 = vld [vmem:[#allocation8 + $0x11f0] sm:$0xff] }
 0x467   : > { %v4002_v45 = vmax.f32 %v3946_v36, %v3950_v23  ;;  %5133 = vmatmul.mubr.f32.gmra.mrb[132].mxu0 %v14648_v41  ;;  %5383 = vmatmul.mubr.f32.gmra.mrb[150].mxu1 %v14648_v41  ;;  %v10477_v36 = vpack.c.bf16 %v4291_v20, %v4285_v32  ;;  %v4302_v32 = vld [vmem:[#allocation8 + $0x580] sm:$0xff]  ;;  %v4696_v20 = vld [vmem:[#allocation8 + $0x11c8] sm:$0xff] }
 0x468   : > { %v4003_v46 = vmax.f32 %v3947_v9, %v3951_v4  ;;  %10216 = vmatpush1.bf16.msra.mxu0 %v10215_v56  ;;  %10472 = vmatpush1.bf16.msra.mxu1 %v10471_v49  ;;  %v3653_v16 = vpop.f32.mrb[110].mxu1  ;;  %v15468_v56 = vld [vmem:[#allocation63_spill] sm:$0xff] }
 0x469   : > { %v4072_v42 = vadd.f32 %v14517_v53, %v4002_v45  ;;  %v3954_v37 = vmax.f32 %v14370_v54, %v3653_v16  ;;  %v3655_v19 = vpop.f32.mrb[111].mxu1  ;;  %10218 = vmatprep.subr.bf16.mxu0 %v10217_v10  ;;  %10474 = vmatprep.subr.bf16.mxu1 %v10473_v13  ;;  %v4031_v49 = vadd.f32 %v14302_v55, %v15468_v56  ;;  %v4683_v13 = vld [vmem:[#allocation8 + $0x1160] sm:$0xff]  ;;  %v4296_v4 = vld [vmem:[#allocation8 + $0x550] sm:$0xff]  ;;  %v4702_v16 = vld [vmem:[#allocation8 + $0x11f8] sm:$0xff] }
 0x46a   : > { %v4073_v35 = vadd.f32 %v15431_v14, %v4003_v46  ;;  %v3955_v9 = vmax.f32 %v14374_v62, %v3655_v19  ;;  %v10479_v10 = vpack.c.bf16 %v4290_v44, %v4284_v40  ;;  %v10481_v46 = vpack.c.bf16 %v4303_v21, %v4297_v11  ;;  %v15474_v44 = vld [vmem:[#allocation70_spill] sm:$0xff]  ;;  %v4314_v56 = vld [vmem:[#allocation8 + $0x5e0] sm:$0xff]  ;;  %v4321_v11 = vld [vmem:[#allocation8 + $0x618] sm:$0xff] }
 0x46b   : > { %v14664_v39 = vmax.f32 %v4072_v42, 0.0  ;;  %v10483_v19 = vpack.c.bf16 %v4302_v32, %v4296_v4  ;;  %v4327_v21 = vld [vmem:[#allocation8 + $0x648] sm:$0xff]  ;;  %v4707_v4 = vld [vmem:[#allocation8 + $0x1220] sm:$0xff]  ;;  %v4713_v32 = vld [vmem:[#allocation8 + $0x1250] sm:$0xff] }
 0x46c   : > { %v14662_v23 = vmax.f32 %v4073_v35, 0.0  ;;  %10220 = vmatpush1.bf16.msra.mxu0 %v10219_v5  ;;  %10476 = vmatpush1.bf16.msra.mxu1 %v10475_v58  ;;  %v3659_v54 = vpop.f32.mrb[112].mxu1  ;;  %v10225_v5 = vpack.c.bf16 %v4690_v26, %v4684_v1  ;;  %v4309_v58 = vld [vmem:[#allocation8 + $0x5b8] sm:$0xff]  ;;  %v4308_v1 = vld [vmem:[#allocation8 + $0x5b0] sm:$0xff]  ;;  %v4708_v26 = vld [vmem:[#allocation8 + $0x1228] sm:$0xff] }
 0x46d   : > { %15470 = vst [vmem:[#allocation45_spill] sm:$0xff] %v14664_v39  ;;  %v3958_v62 = vmax.f32 %v14380_v8, %v3659_v54  ;;  %v3661_v51 = vpop.f32.mrb[113].mxu1  ;;  %10222 = vmatprep.subr.bf16.mxu0 %v10221_v2  ;;  %10478 = vmatprep.subr.bf16.mxu1 %v10477_v36  ;;  %v14674_v8 = vmax.f32 %v4031_v49, 0.0  ;;  %v4695_v36 = vld [vmem:[#allocation8 + $0x11c0] sm:$0xff]  ;;  %v10485_v35 = vpack.c.bf16 %v4315_v60, %v4309_v58  ;;  %v4333_v58 = vld [vmem:[#allocation8 + $0x678] sm:$0xff]  ;;  %v4339_v60 = vld [vmem:[#allocation8 + $0x6a8] sm:$0xff] }
 0x46e   : > { %15469 = vst [vmem:[#allocation42_spill] sm:$0xff] %v14662_v23  ;;  %v3959_v45 = vmax.f32 %v14385_v6, %v3661_v51  ;;  %5138 = vmatprep.mubr.f32.mxu0 %v14662_v23  ;;  %5388 = vmatprep.mubr.f32.mxu1 %v14662_v23  ;;  %v10227_v6 = vpack.c.bf16 %v4689_v43, %v4683_v13  ;;  %v15475_v13 = vld [vmem:[#allocation62_spill] sm:$0xff] }
 0x46f   : > { %v14670_v42 = vmax.f32 %v3954_v37, %v3958_v62  ;;  %5139 = vmatmul.mubr.f32.gmra.mrb[134].mxu0 %v14664_v39  ;;  %5389 = vmatmul.mubr.f32.gmra.mrb[152].mxu1 %v14664_v39  ;;  %15472 = vst [vmem:[#allocation47_spill] sm:$0xff] %v14674_v8  ;;  %v10229_v37 = vpack.c.bf16 %v4702_v16, %v4696_v20  ;;  %v4726_v16 = vld [vmem:[#allocation8 + $0x12b8] sm:$0xff] }
 0x470   : > { %v14676_v2 = vmax.f32 %v3955_v9, %v3959_v45  ;;  %10224 = vmatpush1.bf16.msra.mxu0 %v10223_v57  ;;  %10480 = vmatpush1.bf16.msra.mxu1 %v10479_v10  ;;  %v3665_v40 = vpop.f32.mrb[130].mxu1  ;;  %v4714_v9 = vld [vmem:[#allocation8 + $0x1258] sm:$0xff]  ;;  %v10231_v54 = vpack.c.bf16 %v4701_v22, %v4695_v36  ;;  %v10487_v57 = vpack.c.bf16 %v4314_v56, %v4308_v1  ;;  %v4320_v45 = vld [vmem:[#allocation8 + $0x610] sm:$0xff]  ;;  %v4719_v22 = vld [vmem:[#allocation8 + $0x1280] sm:$0xff] }
 0x471   : > { %15471 = vst [vmem:[#allocation44_spill] sm:$0xff] %v14670_v42  ;;  %5459 = vmatprep.mubr.f32.mxu0 %v15474_v44  ;;  %5959 = vmatprep.mubr.f32.mxu1 %v14674_v8  ;;  %v3666_v49 = vpop.f32.mrb[131].mxu1  ;;  %v4030_v43 = vadd.f32 %v14297_v33, %v15475_v13  ;;  %v10233_v62 = vpack.c.bf16 %v4714_v9, %v4708_v26  ;;  %v4725_v40 = vld [vmem:[#allocation8 + $0x12b0] sm:$0xff]  ;;  %v4338_v56 = vld [vmem:[#allocation8 + $0x6a0] sm:$0xff]  ;;  %v4732_v26 = vld [vmem:[#allocation8 + $0x12e8] sm:$0xff] }
 0x472   : > { %15473 = vst [vmem:[#allocation46_spill] sm:$0xff] %v14676_v2  ;;  %10226 = vmatprep.subr.bf16.mxu0 %v10225_v5  ;;  %10482 = vmatprep.subr.bf16.mxu1 %v10481_v46  ;;  %v10489_v51 = vpack.c.bf16 %v4327_v21, %v4321_v11  ;;  %v4326_v5 = vld [vmem:[#allocation8 + $0x640] sm:$0xff]  ;;  %v4720_v46 = vld [vmem:[#allocation8 + $0x1288] sm:$0xff]  ;;  %v4332_v1 = vld [vmem:[#allocation8 + $0x670] sm:$0xff] }
 0x473   : > { %v10491_v36 = vpack.c.bf16 %v4326_v5, %v4320_v45  ;;  %v15476_v49 = vld [vmem:[#allocation72_spill] sm:$0xff]  ;;  %v4351_v21 = vld [vmem:[#allocation8 + $0x708] sm:$0xff]  ;;  %v4731_v13 = vld [vmem:[#allocation8 + $0x12e0] sm:$0xff] }
 0x474   : > { %10228 = vmatpush1.bf16.msra.mxu0 %v10227_v6  ;;  %10484 = vmatpush1.bf16.msra.mxu1 %v10483_v19  ;;  %v3669_v10 = vpop.f32.mrb[132].mxu1  ;;  %v10235_v6 = vpack.c.bf16 %v4713_v32, %v4707_v4  ;;  %v14682_v19 = vmax.f32 %v4030_v43, 0.0  ;;  %v4738_v9 = vld [vmem:[#allocation8 + $0x1318] sm:$0xff]  ;;  %v4737_v43 = vld [vmem:[#allocation8 + $0x1310] sm:$0xff]  ;;  %v4350_v32 = vld [vmem:[#allocation8 + $0x700] sm:$0xff] }
 0x475   : > { %10230 = vmatprep.subr.bf16.mxu0 %v10229_v37  ;;  %10486 = vmatprep.subr.bf16.mxu1 %v10485_v35  ;;  %v3670_v20 = vpop.f32.mrb[133].mxu1  ;;  %v10237_v37 = vpack.c.bf16 %v4726_v16, %v4720_v46  ;;  %v10493_v35 = vpack.c.bf16 %v4339_v60, %v4333_v58  ;;  %v4345_v11 = vld [vmem:[#allocation8 + $0x6d8] sm:$0xff]  ;;  %v10495_v10 = vpack.c.bf16 %v4338_v56, %v4332_v1  ;;  %v4344_v4 = vld [vmem:[#allocation8 + $0x6d0] sm:$0xff]  ;;  %v4363_v16 = vld [vmem:[#allocation8 + $0x768] sm:$0xff] }
 0x476   : > { %v4744_v20 = vld [vmem:[#allocation8 + $0x1348] sm:$0xff]  ;;  %v15478_v45 = vld [vmem:[#allocation76_spill] sm:$0xff]  ;;  %v15479_v58 = vld [vmem:[#allocation77_spill] sm:$0xff]  ;;  %v10243_v60 = vpack.c.bf16 %v4737_v43, %v4731_v13 }
 0x477   : > { %v4750_v5 = vld [vmem:[#allocation8 + $0x1378] sm:$0xff]  ;;  %v4362_v1 = vld [vmem:[#allocation8 + $0x760] sm:$0xff]  ;;  %v4756_v56 = vld [vmem:[#allocation8 + $0x13a8] sm:$0xff] }
 0x478   : > { %10232 = vmatpush1.bf16.msra.mxu0 %v10231_v54  ;;  %10488 = vmatpush1.bf16.msra.mxu1 %v10487_v57  ;;  %v15477_v54 = vld [vmem:[#allocation74_spill] sm:$0xff]  ;;  %v10239_v57 = vpack.c.bf16 %v4725_v40, %v4719_v22  ;;  %v4357_v46 = vld [vmem:[#allocation8 + $0x738] sm:$0xff]  ;;  %v4749_v22 = vld [vmem:[#allocation8 + $0x1370] sm:$0xff]  ;;  %v10245_v40 = vpack.c.bf16 %v4750_v5, %v4744_v20 }
 0x479   : > { %10234 = vmatprep.subr.bf16.mxu0 %v10233_v62  ;;  %10490 = vmatprep.subr.bf16.mxu1 %v10489_v51  ;;  %v10241_v62 = vpack.c.bf16 %v4738_v9, %v4732_v26  ;;  %v10497_v51 = vpack.c.bf16 %v4351_v21, %v4345_v11  ;;  %v15480_v26 = vld [vmem:[#allocation78_spill] sm:$0xff]  ;;  %v4762_v9 = vld [vmem:[#allocation8 + $0x13d8] sm:$0xff]  ;;  %v4755_v43 = vld [vmem:[#allocation8 + $0x13a0] sm:$0xff] }
 0x47a   : > { %v4369_v11 = vld [vmem:[#allocation8 + $0x798] sm:$0xff]  ;;  %v4375_v21 = vld [vmem:[#allocation8 + $0x7c8] sm:$0xff]  ;;  %v4374_v20 = vld [vmem:[#allocation8 + $0x7c0] sm:$0xff] }
 0x47b   : > { %5460 = vmatmul.mubr.f32.vlgmr.msra.gmra.mrb[136].mxu0 %v15476_v49  ;;  %5960 = vmatmul.mubr.f32.vlgmr.msra.gmra.mrb[134].mxu1 %v14682_v19  ;;  %v4768_v5 = vld [vmem:[#allocation8 + $0x1408] sm:$0xff]  ;;  %v4465_v42 = vld [vmem:[#allocation8 + $0xa98] sm:$0xff] }
 0x47c   : > { %5465 = vmatprep.mubr.f32.mxu0 %v15477_v54  ;;  %10236 = vmatpush1.bf16.msra.mxu0 %v10235_v6  ;;  %v10499_v6 = vpack.c.bf16 %v4350_v32, %v4344_v4  ;;  %v10505_v4 = vpack.c.bf16 %v4375_v21, %v4369_v11  ;;  %v4368_v32 = vld [vmem:[#allocation8 + $0x790] sm:$0xff]  ;;  %v4780_v11 = vld [vmem:[#allocation8 + $0x1468] sm:$0xff]  ;;  %v4786_v21 = vld [vmem:[#allocation8 + $0x1498] sm:$0xff] }
 0x47d   : > { %5965 = vmatprep.mubr.f32.mxu1 %v15474_v44  ;;  %10492 = vmatpush1.bf16.msra.mxu1 %v10491_v36  ;;  %v4743_v36 = vld [vmem:[#allocation8 + $0x1340] sm:$0xff] }
 0x47e   : > { %10238 = vmatprep.subr.bf16.mxu0 %v10237_v37  ;;  %10494 = vmatprep.subr.bf16.mxu1 %v10493_v35  ;;  %v10501_v37 = vpack.c.bf16 %v4363_v16, %v4357_v46  ;;  %v4356_v35 = vld [vmem:[#allocation8 + $0x730] sm:$0xff]  ;;  %v15482_v46 = vld [vmem:[#allocation80_spill] sm:$0xff] }
 0x47f   : > { %5466 = vmatmul.mubr.f32.gmra.mrb[138].mxu0 %v15478_v45  ;;  %5966 = vmatmul.mubr.f32.gmra.mrb[136].mxu1 %v15476_v49  ;;  %v10503_v13 = vpack.c.bf16 %v4362_v1, %v4356_v35  ;;  %v4774_v16 = vld [vmem:[#allocation8 + $0x1438] sm:$0xff] }
 0x480   : > { %5471 = vmatprep.mubr.f32.mxu0 %v15479_v58  ;;  %10240 = vmatpush1.bf16.msra.mxu0 %v10239_v57  ;;  %v15481_v57 = vld [vmem:[#allocation79_spill] sm:$0xff]  ;;  %v10253_v35 = vpack.c.bf16 %v4774_v16, %v4768_v5  ;;  %v4398_v16 = vld [vmem:[#allocation8 + $0x880] sm:$0xff] }
 0x481   : > { %5971 = vmatprep.mubr.f32.mxu1 %v15477_v54  ;;  %10496 = vmatpush1.bf16.msra.mxu1 %v10495_v10  ;;  %v10247_v10 = vpack.c.bf16 %v4749_v22, %v4743_v36  ;;  %v4387_v36 = vld [vmem:[#allocation8 + $0x828] sm:$0xff]  ;;  %v10507_v22 = vpack.c.bf16 %v4374_v20, %v4368_v32  ;;  %v10257_v32 = vpack.c.bf16 %v4786_v21, %v4780_v11  ;;  %v4392_v5 = vld [vmem:[#allocation8 + $0x850] sm:$0xff]  ;;  %v4410_v21 = vld [vmem:[#allocation8 + $0x8e0] sm:$0xff] }
 0x482   : > { %10242 = vmatprep.subr.bf16.mxu0 %v10241_v62  ;;  %10498 = vmatprep.subr.bf16.mxu1 %v10497_v51  ;;  %v4761_v62 = vld [vmem:[#allocation8 + $0x13d0] sm:$0xff]  ;;  %v10249_v51 = vpack.c.bf16 %v4762_v9, %v4756_v56  ;;  %v4386_v9 = vld [vmem:[#allocation8 + $0x820] sm:$0xff] }
 0x483   : > { %5472 = vmatmul.mubr.f32.gmra.mrb[140].mxu0 %v15480_v26  ;;  %5972 = vmatmul.mubr.f32.gmra.mrb[138].mxu1 %v15478_v45  ;;  %v4380_v56 = vld [vmem:[#allocation8 + $0x7f0] sm:$0xff] }
 0x484   : > { %5477 = vmatprep.mubr.f32.mxu0 %v15481_v57  ;;  %10244 = vmatpush1.bf16.msra.mxu0 %v10243_v60  ;;  %v4381_v60 = vld [vmem:[#allocation8 + $0x7f8] sm:$0xff]  ;;  %v4404_v11 = vld [vmem:[#allocation8 + $0x8b0] sm:$0xff] }
 0x485   : > { %5977 = vmatprep.mubr.f32.mxu1 %v15479_v58  ;;  %10500 = vmatpush1.bf16.msra.mxu1 %v10499_v6  ;;  %v10251_v6 = vpack.c.bf16 %v4761_v62, %v4755_v43  ;;  %v10509_v1 = vpack.c.bf16 %v4387_v36, %v4381_v60  ;;  %v4399_v43 = vld [vmem:[#allocation8 + $0x888] sm:$0xff]  ;;  %v10511_v62 = vpack.c.bf16 %v4386_v9, %v4380_v56  ;;  %v4798_v36 = vld [vmem:[#allocation8 + $0x14f8] sm:$0xff] }
 0x486   : > { %10246 = vmatprep.subr.bf16.mxu0 %v10245_v40  ;;  %10502 = vmatprep.subr.bf16.mxu1 %v10501_v37  ;;  %v4767_v40 = vld [vmem:[#allocation8 + $0x1400] sm:$0xff]  ;;  %v4773_v37 = vld [vmem:[#allocation8 + $0x1430] sm:$0xff]  ;;  %v4792_v60 = vld [vmem:[#allocation8 + $0x14c8] sm:$0xff] }
 0x487   : > { %5478 = vmatmul.mubr.f32.gmra.mrb[142].mxu0 %v15482_v46  ;;  %5978 = vmatmul.mubr.f32.gmra.mrb[140].mxu1 %v15480_v26  ;;  %v10261_v56 = vpack.c.bf16 %v4798_v36, %v4792_v60  ;;  %v4416_v60 = vld [vmem:[#allocation8 + $0x910] sm:$0xff]  ;;  %v4422_v36 = vld [vmem:[#allocation8 + $0x940] sm:$0xff] }
 0x488   : > { %5483 = vmatprep.mubr.f32.mxu0 %v14396_v50  ;;  %10248 = vmatpush1.bf16.msra.mxu0 %v10247_v10  ;;  %v4393_v10 = vld [vmem:[#allocation8 + $0x858] sm:$0xff] }
 0x489   : > { %5983 = vmatprep.mubr.f32.mxu1 %v15481_v57  ;;  %10504 = vmatpush1.bf16.msra.mxu1 %v10503_v13  ;;  %v10255_v13 = vpack.c.bf16 %v4773_v37, %v4767_v40  ;;  %v10513_v20 = vpack.c.bf16 %v4399_v43, %v4393_v10  ;;  %v4411_v40 = vld [vmem:[#allocation8 + $0x8e8] sm:$0xff]  ;;  %v10515_v37 = vpack.c.bf16 %v4398_v16, %v4392_v5  ;;  %v4810_v43 = vld [vmem:[#allocation8 + $0x1558] sm:$0xff] }
 0x48a   : > { %10250 = vmatprep.subr.bf16.mxu0 %v10249_v51  ;;  %10506 = vmatprep.subr.bf16.mxu1 %v10505_v4  ;;  %v4779_v51 = vld [vmem:[#allocation8 + $0x1460] sm:$0xff]  ;;  %v4785_v4 = vld [vmem:[#allocation8 + $0x1490] sm:$0xff]  ;;  %v4804_v10 = vld [vmem:[#allocation8 + $0x1528] sm:$0xff] }
 0x48b   : > { %5484 = vmatmul.mubr.f32.gmra.mrb[144].mxu0 %v14398_v59  ;;  %5984 = vmatmul.mubr.f32.gmra.mrb[142].mxu1 %v15482_v46  ;;  %v10265_v5 = vpack.c.bf16 %v4810_v43, %v4804_v10  ;;  %v4428_v10 = vld [vmem:[#allocation8 + $0x970] sm:$0xff]  ;;  %v4434_v43 = vld [vmem:[#allocation8 + $0x9a0] sm:$0xff] }
 0x48c   : > { %5489 = vmatprep.mubr.f32.mxu0 %v14416_v18  ;;  %10252 = vmatpush1.bf16.msra.mxu0 %v10251_v6  ;;  %v4405_v6 = vld [vmem:[#allocation8 + $0x8b8] sm:$0xff] }
 0x48d   : > { %5989 = vmatprep.mubr.f32.mxu1 %v14396_v50  ;;  %10508 = vmatpush1.bf16.msra.mxu1 %v10507_v22  ;;  %v10259_v22 = vpack.c.bf16 %v4785_v4, %v4779_v51  ;;  %v10517_v9 = vpack.c.bf16 %v4411_v40, %v4405_v6  ;;  %v4423_v51 = vld [vmem:[#allocation8 + $0x948] sm:$0xff]  ;;  %v10519_v4 = vpack.c.bf16 %v4410_v21, %v4404_v11  ;;  %v4822_v40 = vld [vmem:[#allocation8 + $0x15b8] sm:$0xff] }
 0x48e   : > { %10254 = vmatprep.subr.bf16.mxu0 %v10253_v35  ;;  %10510 = vmatprep.subr.bf16.mxu1 %v10509_v1  ;;  %v4791_v35 = vld [vmem:[#allocation8 + $0x14c0] sm:$0xff]  ;;  %v4797_v1 = vld [vmem:[#allocation8 + $0x14f0] sm:$0xff]  ;;  %v4816_v6 = vld [vmem:[#allocation8 + $0x1588] sm:$0xff] }
 0x48f   : > { %5490 = vmatmul.mubr.f32.gmra.mrb[146].mxu0 %v14418_v24  ;;  %5990 = vmatmul.mubr.f32.gmra.mrb[144].mxu1 %v14398_v59  ;;  %v10269_v11 = vpack.c.bf16 %v4822_v40, %v4816_v6 }
 0x490   : > { %5495 = vmatprep.mubr.f32.mxu0 %v14444_v63  ;;  %10256 = vmatpush1.bf16.msra.mxu0 %v10255_v13  ;;  %v4417_v13 = vld [vmem:[#allocation8 + $0x918] sm:$0xff] }
 0x491   : > { %5995 = vmatprep.mubr.f32.mxu1 %v14416_v18  ;;  %10512 = vmatpush1.bf16.msra.mxu1 %v10511_v62  ;;  %v10263_v62 = vpack.c.bf16 %v4797_v1, %v4791_v35  ;;  %v10521_v16 = vpack.c.bf16 %v4423_v51, %v4417_v13  ;;  %v4435_v35 = vld [vmem:[#allocation8 + $0x9a8] sm:$0xff]  ;;  %v10523_v1 = vpack.c.bf16 %v4422_v36, %v4416_v60  ;;  %v4833_v60 = vld [vmem:[#allocation8 + $0x1610] sm:$0xff] }
 0x492   : > { %10258 = vmatprep.subr.bf16.mxu0 %v10257_v32  ;;  %10514 = vmatprep.subr.bf16.mxu1 %v10513_v20  ;;  %v4803_v32 = vld [vmem:[#allocation8 + $0x1520] sm:$0xff]  ;;  %v4809_v20 = vld [vmem:[#allocation8 + $0x1550] sm:$0xff]  ;;  %v4828_v13 = vld [vmem:[#allocation8 + $0x15e8] sm:$0xff]  ;;  %v4033_v51 = vadd.f32 %v15431_v14, %v14432_v0 }
 0x493   : > { %5496 = vmatmul.mubr.f32.gmra.mrb[148].mxu0 %v14446_v29  ;;  %5996 = vmatmul.mubr.f32.gmra.mrb[146].mxu1 %v14418_v24  ;;  %v4440_v36 = vld [vmem:[#allocation8 + $0x9d0] sm:$0xff]  ;;  %v4840_v0 = vld [vmem:[#allocation8 + $0x1648] sm:$0xff] }
 0x494   : > { %5501 = vmatprep.mubr.f32.mxu0 %v14468_v48  ;;  %10260 = vmatpush1.bf16.msra.mxu0 %v10259_v22  ;;  %v4429_v22 = vld [vmem:[#allocation8 + $0x978] sm:$0xff]  ;;  %v4471_v14 = vld [vmem:[#allocation8 + $0xac8] sm:$0xff] }
 0x495   : > { %6001 = vmatprep.mubr.f32.mxu1 %v14444_v63  ;;  %10516 = vmatpush1.bf16.msra.mxu1 %v10515_v37  ;;  %v10267_v37 = vpack.c.bf16 %v4809_v20, %v4803_v32  ;;  %v10525_v21 = vpack.c.bf16 %v4435_v35, %v4429_v22  ;;  %v4441_v32 = vld [vmem:[#allocation8 + $0x9d8] sm:$0xff]  ;;  %v4446_v22 = vld [vmem:[#allocation8 + $0xa00] sm:$0xff] }
 0x496   : > { %10262 = vmatprep.subr.bf16.mxu0 %v10261_v56  ;;  %10518 = vmatprep.subr.bf16.mxu1 %v10517_v9  ;;  %v4815_v56 = vld [vmem:[#allocation8 + $0x1580] sm:$0xff]  ;;  %v4821_v9 = vld [vmem:[#allocation8 + $0x15b0] sm:$0xff]  ;;  %v4846_v35 = vld [vmem:[#allocation8 + $0x1678] sm:$0xff] }
 0x497   : > { %5502 = vmatmul.mubr.f32.gmra.mrb[150].mxu0 %v14470_v12  ;;  %6002 = vmatmul.mubr.f32.gmra.mrb[148].mxu1 %v14446_v29  ;;  %v10271_v20 = vpack.c.bf16 %v4821_v9, %v4815_v56  ;;  %v4453_v56 = vld [vmem:[#allocation8 + $0xa38] sm:$0xff]  ;;  %v4459_v9 = vld [vmem:[#allocation8 + $0xa68] sm:$0xff] }
 0x498   : > { %5507 = vmatprep.mubr.f32.mxu0 %v14490_v17  ;;  %10264 = vmatpush1.bf16.msra.mxu0 %v10263_v62  ;;  %v4834_v62 = vld [vmem:[#allocation8 + $0x1618] sm:$0xff] }
 0x499   : > { %6007 = vmatprep.mubr.f32.mxu1 %v14468_v48  ;;  %10520 = vmatpush1.bf16.msra.mxu1 %v10519_v4  ;;  %v4447_v4 = vld [vmem:[#allocation8 + $0xa08] sm:$0xff]  ;;  %v10273_v6 = vpack.c.bf16 %v4834_v62, %v4828_v13  ;;  %v4452_v13 = vld [vmem:[#allocation8 + $0xa30] sm:$0xff]  ;;  %v10533_v62 = vpack.c.bf16 %v4459_v9, %v4453_v56  ;;  %v4477_v56 = vld [vmem:[#allocation8 + $0xaf8] sm:$0xff] }
 0x49a   : > { %10266 = vmatprep.subr.bf16.mxu0 %v10265_v5  ;;  %10522 = vmatprep.subr.bf16.mxu1 %v10521_v16  ;;  %v10527_v5 = vpack.c.bf16 %v4434_v43, %v4428_v10  ;;  %v4827_v16 = vld [vmem:[#allocation8 + $0x15e0] sm:$0xff]  ;;  %v10529_v40 = vpack.c.bf16 %v4447_v4, %v4441_v32  ;;  %v4845_v43 = vld [vmem:[#allocation8 + $0x1670] sm:$0xff]  ;;  %v4858_v4 = vld [vmem:[#allocation8 + $0x16d8] sm:$0xff] }
 0x49b   : > { %5508 = vmatmul.mubr.f32.gmra.mrb[152].mxu0 %v14492_v27  ;;  %6008 = vmatmul.mubr.f32.gmra.mrb[150].mxu1 %v14470_v12  ;;  %v4839_v10 = vld [vmem:[#allocation8 + $0x1640] sm:$0xff]  ;;  %v4483_v9 = vld [vmem:[#allocation8 + $0xb28] sm:$0xff] }
 0x49c   : > { %5513 = vmatprep.mubr.f32.mxu0 %v14519_v30  ;;  %10268 = vmatpush1.bf16.msra.mxu0 %v10267_v37  ;;  %v14724_v37 = vmax.f32 %v4033_v51, 0.0  ;;  %v4458_v32 = vld [vmem:[#allocation8 + $0xa60] sm:$0xff]  ;;  %v4852_v51 = vld [vmem:[#allocation8 + $0x16a8] sm:$0xff] }
 0x49d   : > { %6013 = vmatprep.mubr.f32.mxu1 %v14490_v17  ;;  %10524 = vmatpush1.bf16.msra.mxu1 %v10523_v1  ;;  %v10275_v1 = vpack.c.bf16 %v4833_v60, %v4827_v16  ;;  %v10281_v16 = vpack.c.bf16 %v4858_v4, %v4852_v51  ;;  %v4851_v60 = vld [vmem:[#allocation8 + $0x16a0] sm:$0xff]  ;;  %v4876_v51 = vld [vmem:[#allocation8 + $0x1768] sm:$0xff] }
 0x49e   : > { %10270 = vmatprep.subr.bf16.mxu0 %v10269_v11  ;;  %10526 = vmatprep.subr.bf16.mxu1 %v10525_v21  ;;  %v10531_v11 = vpack.c.bf16 %v4446_v22, %v4440_v36  ;;  %v10277_v21 = vpack.c.bf16 %v4846_v35, %v4840_v0  ;;  %v4857_v36 = vld [vmem:[#allocation8 + $0x16d0] sm:$0xff]  ;;  %v10537_v0 = vpack.c.bf16 %v4471_v14, %v4465_v42  ;;  %v4470_v35 = vld [vmem:[#allocation8 + $0xac0] sm:$0xff]  ;;  %v4489_v14 = vld [vmem:[#allocation8 + $0xb58] sm:$0xff] }
 0x49f   : > { %5514 = vmatmul.mubr.f32.gmra.mrb[154].mxu0 %v14523_v38  ;;  %6014 = vmatmul.mubr.f32.gmra.mrb[152].mxu1 %v14492_v27  ;;  %v4464_v22 = vld [vmem:[#allocation8 + $0xa90] sm:$0xff]  ;;  %v10283_v2 = vpack.c.bf16 %v4857_v36, %v4851_v60  ;;  %v4495_v42 = vld [vmem:[#allocation8 + $0xb88] sm:$0xff] }
 0x4a0   : > { %10272 = vmatpush1.bf16.msra.mxu0 %v10271_v20  ;;  %5584 = vmatprep.mubr.f32.mxu0 %v14527_v34  ;;  %v10279_v20 = vpack.c.bf16 %v4845_v43, %v4839_v10  ;;  %v4476_v43 = vld [vmem:[#allocation8 + $0xaf0] sm:$0xff] }
 0x4a1   : > { %10528 = vmatpush1.bf16.msra.mxu1 %v10527_v5  ;;  %6084 = vmatprep.mubr.f32.mxu1 %v14724_v37  ;;  %v10535_v5 = vpack.c.bf16 %v4458_v32, %v4452_v13  ;;  %v10541_v13 = vpack.c.bf16 %v4483_v9, %v4477_v56  ;;  %v4482_v32 = vld [vmem:[#allocation8 + $0xb20] sm:$0xff]  ;;  %v4488_v36 = vld [vmem:[#allocation8 + $0xb50] sm:$0xff]  ;;  %v4507_v56 = vld [vmem:[#allocation8 + $0xbe8] sm:$0xff] }
 0x4a2   : > { %10274 = vmatprep.subr.bf16.mxu0 %v10273_v6  ;;  %10530 = vmatprep.subr.bf16.mxu1 %v10529_v40  ;;  %v4864_v6 = vld [vmem:[#allocation8 + $0x1708] sm:$0xff]  ;;  %v4870_v40 = vld [vmem:[#allocation8 + $0x1738] sm:$0xff] }
 0x4a3   : > { %v10285_v10 = vpack.c.bf16 %v4870_v40, %v4864_v6  ;;  %v4888_v6 = vld [vmem:[#allocation8 + $0x17c8] sm:$0xff]  ;;  %v4501_v40 = vld [vmem:[#allocation8 + $0xbb8] sm:$0xff] }
 0x4a4   : > { %10276 = vmatpush1.bf16.msra.mxu0 %v10275_v1  ;;  %v10539_v1 = vpack.c.bf16 %v4470_v35, %v4464_v22  ;;  %v10545_v22 = vpack.c.bf16 %v4495_v42, %v4489_v14  ;;  %v4494_v35 = vld [vmem:[#allocation8 + $0xb80] sm:$0xff]  ;;  %v6405_v14 = vld [vmem:[#allocation8 + $0x1848] sm:$0xff] }
 0x4a5   : > { %10532 = vmatpush1.bf16.msra.mxu1 %v10531_v11  ;;  %10278 = vmatprep.subr.bf16.mxu0 %v10277_v21  ;;  %v4863_v11 = vld [vmem:[#allocation8 + $0x1700] sm:$0xff]  ;;  %v4869_v21 = vld [vmem:[#allocation8 + $0x1730] sm:$0xff] }
 0x4a6   : > { %10534 = vmatprep.subr.bf16.mxu1 %v10533_v62  ;;  %v4882_v62 = vld [vmem:[#allocation8 + $0x1798] sm:$0xff]  ;;  %v10287_v4 = vpack.c.bf16 %v4869_v21, %v4863_v11  ;;  %v4500_v21 = vld [vmem:[#allocation8 + $0xbb0] sm:$0xff] }
 0x4a7   : > { %v10289_v60 = vpack.c.bf16 %v4882_v62, %v4876_v51  ;;  %v4127_v51 = vld [vmem:[#allocation8 + $0x8] sm:$0xff]  ;;  %v6399_v62 = vld [vmem:[#allocation8 + $0x1818] sm:$0xff] }
 0x4a8   : > { %10280 = vmatpush1.bf16.msra.mxu0 %v10279_v20  ;;  %v10543_v20 = vpack.c.bf16 %v4482_v32, %v4476_v43  ;;  %v10549_v43 = vpack.c.bf16 %v4507_v56, %v4501_v40  ;;  %v4506_v32 = vld [vmem:[#allocation8 + $0xbe0] sm:$0xff]  ;;  %v6411_v40 = vld [vmem:[#allocation8 + $0x1878] sm:$0xff]  ;;  %v6417_v56 = vld [vmem:[#allocation8 + $0x18a8] sm:$0xff] }
 0x4a9   : > { %10536 = vmatpush1.bf16.msra.mxu1 %v10535_v5  ;;  %10282 = vmatprep.subr.bf16.mxu0 %v10281_v16  ;;  %v4875_v5 = vld [vmem:[#allocation8 + $0x1760] sm:$0xff]  ;;  %v4881_v16 = vld [vmem:[#allocation8 + $0x1790] sm:$0xff] }
 0x4aa   : > { %10538 = vmatprep.subr.bf16.mxu1 %v10537_v0  ;;  %v4894_v0 = vld [vmem:[#allocation8 + $0x17f8] sm:$0xff]  ;;  %v10291_v9 = vpack.c.bf16 %v4881_v16, %v4875_v5  ;;  %v4126_v16 = vld [vmem:[#allocation8] sm:$0xff] }
 0x4ab   : > { %v10293_v11 = vpack.c.bf16 %v4894_v0, %v4888_v6  ;;  %v4139_v6 = vld [vmem:[#allocation8 + $0x68] sm:$0xff]  ;;  %v4145_v0 = vld [vmem:[#allocation8 + $0x98] sm:$0xff] }
 0x4ac   : > { %10284 = vmatpush1.bf16.msra.mxu0 %v10283_v2  ;;  %v10547_v2 = vpack.c.bf16 %v4494_v35, %v4488_v36  ;;  %v4132_v36 = vld [vmem:[#allocation8 + $0x30] sm:$0xff]  ;;  %v6404_v35 = vld [vmem:[#allocation8 + $0x1840] sm:$0xff] }
 0x4ad   : > { %10540 = vmatpush1.bf16.msra.mxu1 %v10539_v1  ;;  %10286 = vmatprep.subr.bf16.mxu0 %v10285_v10  ;;  %v4887_v1 = vld [vmem:[#allocation8 + $0x17c0] sm:$0xff]  ;;  %v4893_v10 = vld [vmem:[#allocation8 + $0x17f0] sm:$0xff] }
 0x4ae   : > { %10542 = vmatprep.subr.bf16.mxu1 %v10541_v13  ;;  %v4133_v13 = vld [vmem:[#allocation8 + $0x38] sm:$0xff]  ;;  %v10295_v42 = vpack.c.bf16 %v4893_v10, %v4887_v1  ;;  %v10301_v1 = vpack.c.bf16 %v4145_v0, %v4139_v6  ;;  %v4144_v10 = vld [vmem:[#allocation8 + $0x90] sm:$0xff]  ;;  %v6428_v6 = vld [vmem:[#allocation8 + $0x1900] sm:$0xff] }
 0x4af   : > { %v10297_v5 = vpack.c.bf16 %v4133_v13, %v4127_v51  ;;  %v4151_v51 = vld [vmem:[#allocation8 + $0xc8] sm:$0xff]  ;;  %v4157_v13 = vld [vmem:[#allocation8 + $0xf8] sm:$0xff] }
 0x4b0   : > { %10288 = vmatpush1.bf16.msra.mxu0 %v10287_v4  ;;  %v10551_v4 = vpack.c.bf16 %v4506_v32, %v4500_v21  ;;  %v6410_v21 = vld [vmem:[#allocation8 + $0x1870] sm:$0xff]  ;;  %v6416_v32 = vld [vmem:[#allocation8 + $0x18a0] sm:$0xff]  ;;  %v4163_v0 = vld [vmem:[#allocation8 + $0x128] sm:$0xff] }
 0x4b1   : > { %10544 = vmatpush1.bf16.msra.mxu1 %v10543_v20  ;;  %10290 = vmatprep.subr.bf16.mxu0 %v10289_v60  ;;  %v4032_v20 = vadd.f32 %v14517_v53, %v14428_v61  ;;  %v10809_v60 = vpack.c.bf16 %v6405_v14, %v6399_v62  ;;  %v4138_v61 = vld [vmem:[#allocation8 + $0x60] sm:$0xff]  ;;  %v15483_v62 = vld [vmem:[#allocation34_spill] sm:$0xff]  ;;  %v6423_v14 = vld [vmem:[#allocation8 + $0x18d8] sm:$0xff] }
 0x4b2   : > { %10546 = vmatprep.subr.bf16.mxu1 %v10545_v22  ;;  %v6398_v22 = vld [vmem:[#allocation8 + $0x1810] sm:$0xff]  ;;  %v4181_v53 = vld [vmem:[#allocation8 + $0x1b8] sm:$0xff] }
 0x4b4   : > { %10292 = vmatpush1.bf16.msra.mxu0 %v10291_v9  ;;  %v10299_v9 = vpack.c.bf16 %v4132_v36, %v4126_v16  ;;  %v4156_v16 = vld [vmem:[#allocation8 + $0xf0] sm:$0xff] }
 0x4b5   : > { %10548 = vmatpush1.bf16.msra.mxu1 %v10547_v2  ;;  %10294 = vmatprep.subr.bf16.mxu0 %v10293_v11  ;;  %v14730_v2 = vmax.f32 %v4032_v20, 0.0  ;;  %v10811_v11 = vpack.c.bf16 %v6404_v35, %v6398_v22  ;;  %v10305_v20 = vpack.c.bf16 %v4157_v13, %v4151_v51  ;;  %v6422_v36 = vld [vmem:[#allocation8 + $0x18d0] sm:$0xff]  ;;  %v15486_v51 = vld [vmem:[#allocation37_spill] sm:$0xff] }
 0x4b6   : > { %10550 = vmatprep.subr.bf16.mxu1 %v10549_v43  ;;  %v10813_v43 = vpack.c.bf16 %v6417_v56, %v6411_v40  ;;  %v15484_v22 = vld [vmem:[#allocation35_spill] sm:$0xff]  ;;  %v4169_v40 = vld [vmem:[#allocation8 + $0x158] sm:$0xff] }
 0x4b7   : > { %v15485_v56 = vld [vmem:[#allocation36_spill] sm:$0xff] }
 0x4b8   : > { %10296 = vmatpush1.bf16.msra.mxu0 %v10295_v42  ;;  %v6429_v42 = vld [vmem:[#allocation8 + $0x1908] sm:$0xff] }
 0x4b9   : > { %10552 = vmatpush1.bf16.msra.mxu1 %v10551_v4  ;;  %10298 = vmatprep.subr.bf16.mxu0 %v10297_v5  ;;  %v10303_v4 = vpack.c.bf16 %v4144_v10, %v4138_v61  ;;  %v10815_v5 = vpack.c.bf16 %v6416_v32, %v6410_v21  ;;  %v10817_v35 = vpack.c.bf16 %v6429_v42, %v6423_v14  ;;  %v6441_v61 = vld [vmem:[#allocation8 + $0x1968] sm:$0xff]  ;;  %v4162_v21 = vld [vmem:[#allocation8 + $0x120] sm:$0xff]  ;;  %v6434_v32 = vld [vmem:[#allocation8 + $0x1930] sm:$0xff] }
 0x4ba   : > { %10810 = vmatprep.subr.bf16.mxu1 %v10809_v60  ;;  %v4150_v60 = vld [vmem:[#allocation8 + $0xc0] sm:$0xff]  ;;  %v10309_v10 = vpack.c.bf16 %v4169_v40, %v4163_v0  ;;  %v4175_v42 = vld [vmem:[#allocation8 + $0x188] sm:$0xff] }
 0x4bb   : > { %5585 = vmatmul.mubr.f32.vlgmr.msra.gmra.mrb[136].mxu0 %v14545_v15  ;;  %v6440_v14 = vld [vmem:[#allocation8 + $0x1960] sm:$0xff] }
 0x4bc   : > { %6085 = vmatmul.mubr.f32.vlgmr.msra.gmra.mrb[134].mxu1 %v14730_v2  ;;  %5590 = vmatprep.mubr.f32.mxu0 %v15483_v62  ;;  %v6452_v40 = vld [vmem:[#allocation8 + $0x19c0] sm:$0xff] }
 0x4bd   : > { %10300 = vmatpush1.bf16.msra.mxu0 %v10299_v9  ;;  %6090 = vmatprep.mubr.f32.mxu1 %v14527_v34  ;;  %v6435_v9 = vld [vmem:[#allocation8 + $0x1938] sm:$0xff] }
 0x4be   : > { %10812 = vmatpush1.bf16.msra.mxu1 %v10811_v11  ;;  %10302 = vmatprep.subr.bf16.mxu0 %v10301_v1  ;;  %v10307_v11 = vpack.c.bf16 %v4156_v16, %v4150_v60  ;;  %v10819_v1 = vpack.c.bf16 %v6428_v6, %v6422_v36  ;;  %v10821_v13 = vpack.c.bf16 %v6441_v61, %v6435_v9  ;;  %v6453_v60 = vld [vmem:[#allocation8 + $0x19c8] sm:$0xff]  ;;  %v4174_v36 = vld [vmem:[#allocation8 + $0x180] sm:$0xff]  ;;  %v6446_v6 = vld [vmem:[#allocation8 + $0x1990] sm:$0xff] }
 0x4bf   : > { %5591 = vmatmul.mubr.f32.gmra.mrb[138].mxu0 %v15484_v22  ;;  %10814 = vmatprep.subr.bf16.mxu1 %v10813_v43  ;;  %v4168_v43 = vld [vmem:[#allocation8 + $0x150] sm:$0xff]  ;;  %v10313_v16 = vpack.c.bf16 %v4181_v53, %v4175_v42  ;;  %v4187_v9 = vld [vmem:[#allocation8 + $0x1e8] sm:$0xff]  ;;  %v4193_v61 = vld [vmem:[#allocation8 + $0x218] sm:$0xff] }
 0x4c0   : > { %6091 = vmatmul.mubr.f32.gmra.mrb[136].mxu1 %v14545_v15  ;;  %5596 = vmatprep.mubr.f32.mxu0 %v15485_v56  ;;  %v6447_v15 = vld [vmem:[#allocation8 + $0x1998] sm:$0xff]  ;;  %v6464_v42 = vld [vmem:[#allocation8 + $0x1a20] sm:$0xff] }
 0x4c1   : > { %10304 = vmatpush1.bf16.msra.mxu0 %v10303_v4  ;;  %6096 = vmatprep.mubr.f32.mxu1 %v15483_v62  ;;  %v15487_v4 = vld [vmem:[#allocation38_spill] sm:$0xff]  ;;  %v10825_v0 = vpack.c.bf16 %v6453_v60, %v6447_v15  ;;  %v6458_v15 = vld [vmem:[#allocation8 + $0x19f0] sm:$0xff] }
 0x4c2   : > { %10816 = vmatpush1.bf16.msra.mxu1 %v10815_v5  ;;  %10306 = vmatprep.subr.bf16.mxu0 %v10305_v20  ;;  %v10311_v5 = vpack.c.bf16 %v4168_v43, %v4162_v21  ;;  %v10823_v20 = vpack.c.bf16 %v6440_v14, %v6434_v32  ;;  %v6465_v21 = vld [vmem:[#allocation8 + $0x1a28] sm:$0xff]  ;;  %v4186_v43 = vld [vmem:[#allocation8 + $0x1e0] sm:$0xff]  ;;  %v4192_v32 = vld [vmem:[#allocation8 + $0x210] sm:$0xff] }
 0x4c3   : > { %5597 = vmatmul.mubr.f32.gmra.mrb[140].mxu0 %v15486_v51  ;;  %10818 = vmatprep.subr.bf16.mxu1 %v10817_v35  ;;  %v4180_v35 = vld [vmem:[#allocation8 + $0x1b0] sm:$0xff]  ;;  %v4199_v60 = vld [vmem:[#allocation8 + $0x248] sm:$0xff] }
 0x4c4   : > { %6097 = vmatmul.mubr.f32.gmra.mrb[138].mxu1 %v15484_v22  ;;  %5602 = vmatprep.mubr.f32.mxu0 %v15487_v4  ;;  %v10315_v53 = vpack.c.bf16 %v4180_v35, %v4174_v36  ;;  %v6477_v36 = vld [vmem:[#allocation8 + $0x1a88] sm:$0xff] }
 0x4c5   : > { %10308 = vmatpush1.bf16.msra.mxu0 %v10307_v11  ;;  %6102 = vmatprep.mubr.f32.mxu1 %v15485_v56  ;;  %v6459_v11 = vld [vmem:[#allocation8 + $0x19f8] sm:$0xff] }
 0x4c6   : > { %10820 = vmatpush1.bf16.msra.mxu1 %v10819_v1  ;;  %10310 = vmatprep.subr.bf16.mxu0 %v10309_v10  ;;  %v10827_v1 = vpack.c.bf16 %v6452_v40, %v6446_v6  ;;  %v10317_v10 = vpack.c.bf16 %v4193_v61, %v4187_v9  ;;  %v10829_v14 = vpack.c.bf16 %v6465_v21, %v6459_v11  ;;  %v4198_v6 = vld [vmem:[#allocation8 + $0x240] sm:$0xff]  ;;  %v6470_v40 = vld [vmem:[#allocation8 + $0x1a50] sm:$0xff]  ;;  %v4211_v21 = vld [vmem:[#allocation8 + $0x2a8] sm:$0xff] }
 0x4c7   : > { %5603 = vmatmul.mubr.f32.gmra.mrb[142].mxu0 %v14583_v28  ;;  %10822 = vmatprep.subr.bf16.mxu1 %v10821_v13  ;;  %v15488_v13 = vld [vmem:[#allocation41_spill] sm:$0xff]  ;;  %v15490_v9 = vld [vmem:[#allocation43_spill] sm:$0xff] }
 0x4c8   : > { %6103 = vmatmul.mubr.f32.gmra.mrb[140].mxu1 %v15486_v51  ;;  %5608 = vmatprep.mubr.f32.mxu0 %v14590_v47  ;;  %v4205_v51 = vld [vmem:[#allocation8 + $0x278] sm:$0xff]  ;;  %v6476_v11 = vld [vmem:[#allocation8 + $0x1a80] sm:$0xff] }
 0x4c9   : > { %10312 = vmatpush1.bf16.msra.mxu0 %v10311_v5  ;;  %6108 = vmatprep.mubr.f32.mxu1 %v15487_v4  ;;  %v15489_v5 = vld [vmem:[#allocation40_spill] sm:$0xff]  ;;  %v10321_v35 = vpack.c.bf16 %v4205_v51, %v4199_v60  ;;  %v4223_v60 = vld [vmem:[#allocation8 + $0x308] sm:$0xff] }
 0x4ca   : > { %10824 = vmatpush1.bf16.msra.mxu1 %v10823_v20  ;;  %10314 = vmatprep.subr.bf16.mxu0 %v10313_v16  ;;  %v6471_v4 = vld [vmem:[#allocation8 + $0x1a58] sm:$0xff]  ;;  %v10319_v20 = vpack.c.bf16 %v4192_v32, %v4186_v43  ;;  %v10831_v16 = vpack.c.bf16 %v6464_v42, %v6458_v15  ;;  %v6489_v43 = vld [vmem:[#allocation8 + $0x1ae8] sm:$0xff]  ;;  %v4210_v32 = vld [vmem:[#allocation8 + $0x2a0] sm:$0xff] }
 0x4cb   : > { %5609 = vmatmul.mubr.f32.gmra.mrb[144].mxu0 %v15488_v13  ;;  %10826 = vmatprep.subr.bf16.mxu1 %v10825_v0  ;;  %v4204_v0 = vld [vmem:[#allocation8 + $0x270] sm:$0xff]  ;;  %v10833_v61 = vpack.c.bf16 %v6477_v36, %v6471_v4  ;;  %v6488_v42 = vld [vmem:[#allocation8 + $0x1ae0] sm:$0xff]  ;;  %v4229_v36 = vld [vmem:[#allocation8 + $0x338] sm:$0xff] }
 0x4cc   : > { %6109 = vmatmul.mubr.f32.gmra.mrb[142].mxu1 %v14583_v28  ;;  %5614 = vmatprep.mubr.f32.mxu0 %v15489_v5  ;;  %v4217_v28 = vld [vmem:[#allocation8 + $0x2d8] sm:$0xff]  ;;  %v10323_v51 = vpack.c.bf16 %v4204_v0, %v4198_v6  ;;  %v4216_v15 = vld [vmem:[#allocation8 + $0x2d0] sm:$0xff]  ;;  %v6501_v6 = vld [vmem:[#allocation8 + $0x1b48] sm:$0xff] }
 0x4cd   : > { %10316 = vmatpush1.bf16.msra.mxu0 %v10315_v53  ;;  %6114 = vmatprep.mubr.f32.mxu1 %v14590_v47  ;;  %v6483_v53 = vld [vmem:[#allocation8 + $0x1ab8] sm:$0xff]  ;;  %v6482_v4 = vld [vmem:[#allocation8 + $0x1ab0] sm:$0xff]  ;;  %v4222_v0 = vld [vmem:[#allocation8 + $0x300] sm:$0xff] }
 0x4ce   : > { %10828 = vmatpush1.bf16.msra.mxu1 %v10827_v1  ;;  %10318 = vmatprep.subr.bf16.mxu0 %v10317_v10  ;;  %v10835_v1 = vpack.c.bf16 %v6476_v11, %v6470_v40  ;;  %v10325_v10 = vpack.c.bf16 %v4217_v28, %v4211_v21  ;;  %v10327_v28 = vpack.c.bf16 %v4216_v15, %v4210_v32  ;;  %v4228_v40 = vld [vmem:[#allocation8 + $0x330] sm:$0xff]  ;;  %v6500_v21 = vld [vmem:[#allocation8 + $0x1b40] sm:$0xff]  ;;  %v6513_v32 = vld [vmem:[#allocation8 + $0x1ba8] sm:$0xff] }
 0x4cf   : > { %5615 = vmatmul.mubr.f32.gmra.mrb[146].mxu0 %v15490_v9  ;;  %10830 = vmatprep.subr.bf16.mxu1 %v10829_v14  ;;  %v10837_v14 = vpack.c.bf16 %v6489_v43, %v6483_v53  ;;  %v4235_v53 = vld [vmem:[#allocation8 + $0x368] sm:$0xff]  ;;  %v4241_v43 = vld [vmem:[#allocation8 + $0x398] sm:$0xff] }
 0x4d0   : > { %6115 = vmatmul.mubr.f32.gmra.mrb[144].mxu1 %v15488_v13  ;;  %5620 = vmatprep.mubr.f32.mxu0 %v14618_v25  ;;  %v10333_v15 = vpack.c.bf16 %v4241_v43, %v4235_v53  ;;  %v6524_v43 = vld [vmem:[#allocation8 + $0x1c00] sm:$0xff] }
 0x4d1   : > { %10320 = vmatpush1.bf16.msra.mxu0 %v10319_v20  ;;  %6120 = vmatprep.mubr.f32.mxu1 %v15489_v5  ;;  %v6495_v20 = vld [vmem:[#allocation8 + $0x1b18] sm:$0xff] }
 0x4d2   : > { %10832 = vmatpush1.bf16.msra.mxu1 %v10831_v16  ;;  %10322 = vmatprep.subr.bf16.mxu0 %v10321_v35  ;;  %v10839_v16 = vpack.c.bf16 %v6488_v42, %v6482_v4  ;;  %v10329_v35 = vpack.c.bf16 %v4229_v36, %v4223_v60  ;;  %v10841_v11 = vpack.c.bf16 %v6501_v6, %v6495_v20  ;;  %v4234_v4 = vld [vmem:[#allocation8 + $0x360] sm:$0xff]  ;;  %v6506_v42 = vld [vmem:[#allocation8 + $0x1b70] sm:$0xff]  ;;  %v4247_v20 = vld [vmem:[#allocation8 + $0x3c8] sm:$0xff] }
 0x4d3   : > { %5621 = vmatmul.mubr.f32.gmra.mrb[148].mxu0 %v14620_v31  ;;  %10834 = vmatprep.subr.bf16.mxu1 %v10833_v61  ;;  %v6494_v61 = vld [vmem:[#allocation8 + $0x1b10] sm:$0xff]  ;;  %v6512_v36 = vld [vmem:[#allocation8 + $0x1ba0] sm:$0xff]  ;;  %v4253_v6 = vld [vmem:[#allocation8 + $0x3f8] sm:$0xff] }
 0x4d4   : > { %6121 = vmatmul.mubr.f32.gmra.mrb[146].mxu1 %v15490_v9  ;;  %5626 = vmatprep.mubr.f32.mxu0 %v14632_v52 }
 0x4d5   : > { %10324 = vmatpush1.bf16.msra.mxu0 %v10323_v51  ;;  %6126 = vmatprep.mubr.f32.mxu1 %v14618_v25  ;;  %v6507_v51 = vld [vmem:[#allocation8 + $0x1b78] sm:$0xff] }
 0x4d6   : > { %10836 = vmatpush1.bf16.msra.mxu1 %v10835_v1  ;;  %10326 = vmatprep.subr.bf16.mxu0 %v10325_v10  ;;  %v10331_v1 = vpack.c.bf16 %v4228_v40, %v4222_v0  ;;  %v10843_v10 = vpack.c.bf16 %v6500_v21, %v6494_v61  ;;  %v10845_v60 = vpack.c.bf16 %v6513_v32, %v6507_v51  ;;  %v6525_v0 = vld [vmem:[#allocation8 + $0x1c08] sm:$0xff]  ;;  %v4246_v61 = vld [vmem:[#allocation8 + $0x3c0] sm:$0xff]  ;;  %v6518_v21 = vld [vmem:[#allocation8 + $0x1bd0] sm:$0xff] }
 0x4d7   : > { %5627 = vmatmul.mubr.f32.gmra.mrb[150].mxu0 %v14634_v3  ;;  %10838 = vmatprep.subr.bf16.mxu1 %v10837_v14  ;;  %v4240_v14 = vld [vmem:[#allocation8 + $0x390] sm:$0xff]  ;;  %v10337_v40 = vpack.c.bf16 %v4253_v6, %v4247_v20  ;;  %v4259_v51 = vld [vmem:[#allocation8 + $0x428] sm:$0xff]  ;;  %v4265_v32 = vld [vmem:[#allocation8 + $0x458] sm:$0xff] }
 0x4d8   : > { %6127 = vmatmul.mubr.f32.gmra.mrb[148].mxu1 %v14620_v31  ;;  %5632 = vmatprep.mubr.f32.mxu0 %v14646_v7  ;;  %v6536_v6 = vld [vmem:[#allocation8 + $0x1c60] sm:$0xff] }
 0x4d9   : > { %10328 = vmatpush1.bf16.msra.mxu0 %v10327_v28  ;;  %6132 = vmatprep.mubr.f32.mxu1 %v14632_v52  ;;  %v6519_v28 = vld [vmem:[#allocation8 + $0x1bd8] sm:$0xff] }
 0x4da   : > { %10840 = vmatpush1.bf16.msra.mxu1 %v10839_v16  ;;  %10330 = vmatprep.subr.bf16.mxu0 %v10329_v35  ;;  %v10335_v16 = vpack.c.bf16 %v4240_v14, %v4234_v4  ;;  %v10847_v35 = vpack.c.bf16 %v6512_v36, %v6506_v42  ;;  %v10849_v53 = vpack.c.bf16 %v6525_v0, %v6519_v28  ;;  %v6537_v4 = vld [vmem:[#allocation8 + $0x1c68] sm:$0xff]  ;;  %v4258_v42 = vld [vmem:[#allocation8 + $0x420] sm:$0xff]  ;;  %v6530_v36 = vld [vmem:[#allocation8 + $0x1c30] sm:$0xff] }
 0x4db   : > { %5633 = vmatmul.mubr.f32.gmra.mrb[152].mxu0 %v14648_v41  ;;  %10842 = vmatprep.subr.bf16.mxu1 %v10841_v11  ;;  %v4252_v11 = vld [vmem:[#allocation8 + $0x3f0] sm:$0xff]  ;;  %v10341_v14 = vpack.c.bf16 %v4265_v32, %v4259_v51  ;;  %v4271_v28 = vld [vmem:[#allocation8 + $0x488] sm:$0xff]  ;;  %v4277_v0 = vld [vmem:[#allocation8 + $0x4b8] sm:$0xff] }
 0x4dc   : > { %6133 = vmatmul.mubr.f32.gmra.mrb[150].mxu1 %v14634_v3  ;;  %5638 = vmatprep.mubr.f32.mxu0 %v14662_v23  ;;  %v4283_v51 = vld [vmem:[#allocation8 + $0x4e8] sm:$0xff]  ;;  %v6555_v32 = vld [vmem:[#allocation8 + $0x1cf8] sm:$0xff] }
 0x4dd   : > { %10332 = vmatpush1.bf16.msra.mxu0 %v10331_v1  ;;  %6138 = vmatprep.mubr.f32.mxu1 %v14646_v7  ;;  %v6531_v1 = vld [vmem:[#allocation8 + $0x1c38] sm:$0xff] }
 0x4de   : > { %10844 = vmatpush1.bf16.msra.mxu1 %v10843_v10  ;;  %10334 = vmatprep.subr.bf16.mxu0 %v10333_v15  ;;  %v10339_v10 = vpack.c.bf16 %v4252_v11, %v4246_v61  ;;  %v10851_v15 = vpack.c.bf16 %v6524_v43, %v6518_v21  ;;  %v10853_v20 = vpack.c.bf16 %v6537_v4, %v6531_v1  ;;  %v6542_v11 = vld [vmem:[#allocation8 + $0x1c90] sm:$0xff]  ;;  %v6548_v43 = vld [vmem:[#allocation8 + $0x1cc0] sm:$0xff]  ;;  %v6561_v1 = vld [vmem:[#allocation8 + $0x1d28] sm:$0xff] }
 0x4df   : > { %5639 = vmatmul.mubr.f32.gmra.mrb[154].mxu0 %v14664_v39  ;;  %10846 = vmatprep.subr.bf16.mxu1 %v10845_v60  ;;  %v4264_v60 = vld [vmem:[#allocation8 + $0x450] sm:$0xff]  ;;  %v6543_v39 = vld [vmem:[#allocation8 + $0x1c98] sm:$0xff]  ;;  %v10345_v61 = vpack.c.bf16 %v4277_v0, %v4271_v28  ;;  %v4295_v28 = vld [vmem:[#allocation8 + $0x548] sm:$0xff] }
 0x4e0   : > { %6139 = vmatmul.mubr.f32.gmra.mrb[152].mxu1 %v14648_v41  ;;  %5709 = vmatprep.mubr.f32.mxu0 %v14674_v8  ;;  %v6549_v8 = vld [vmem:[#allocation8 + $0x1cc8] sm:$0xff]  ;;  %v10343_v23 = vpack.c.bf16 %v4264_v60, %v4258_v42  ;;  %v6554_v60 = vld [vmem:[#allocation8 + $0x1cf0] sm:$0xff] }
 0x4e1   : > { %10336 = vmatpush1.bf16.msra.mxu0 %v10335_v16  ;;  %7094 = vmatprep.mubr.f32.mxu1 %v15477_v54  ;;  %v10855_v16 = vpack.c.bf16 %v6536_v6, %v6530_v36  ;;  %v10857_v21 = vpack.c.bf16 %v6549_v8, %v6543_v39  ;;  %v10861_v36 = vpack.c.bf16 %v6561_v1, %v6555_v32  ;;  %v6560_v6 = vld [vmem:[#allocation8 + $0x1d20] sm:$0xff]  ;;  %v6567_v39 = vld [vmem:[#allocation8 + $0x1d58] sm:$0xff]  ;;  %v6573_v8 = vld [vmem:[#allocation8 + $0x1d88] sm:$0xff] }
 0x4e2   : > { %10848 = vmatpush1.bf16.msra.mxu1 %v10847_v35  ;;  %10338 = vmatprep.subr.bf16.mxu0 %v10337_v40  ;;  %v4270_v35 = vld [vmem:[#allocation8 + $0x480] sm:$0xff]  ;;  %v4276_v40 = vld [vmem:[#allocation8 + $0x4b0] sm:$0xff]  ;;  %v6585_v32 = vld [vmem:[#allocation8 + $0x1de8] sm:$0xff] }
 0x4e3   : > { %10850 = vmatprep.subr.bf16.mxu1 %v10849_v53  ;;  %v4289_v53 = vld [vmem:[#allocation8 + $0x518] sm:$0xff]  ;;  %v10347_v4 = vpack.c.bf16 %v4276_v40, %v4270_v35  ;;  %v6566_v40 = vld [vmem:[#allocation8 + $0x1d50] sm:$0xff] }
 0x4e4   : > { %v10349_v42 = vpack.c.bf16 %v4289_v53, %v4283_v51  ;;  %v4307_v51 = vld [vmem:[#allocation8 + $0x5a8] sm:$0xff]  ;;  %v6579_v53 = vld [vmem:[#allocation8 + $0x1db8] sm:$0xff] }
 0x4e5   : > { %10340 = vmatpush1.bf16.msra.mxu0 %v10339_v10  ;;  %v10859_v10 = vpack.c.bf16 %v6548_v43, %v6542_v11  ;;  %v10865_v11 = vpack.c.bf16 %v6573_v8, %v6567_v39  ;;  %v6572_v43 = vld [vmem:[#allocation8 + $0x1d80] sm:$0xff]  ;;  %v6597_v39 = vld [vmem:[#allocation8 + $0x1e48] sm:$0xff] }
 0x4e6   : > { %10852 = vmatpush1.bf16.msra.mxu1 %v10851_v15  ;;  %10342 = vmatprep.subr.bf16.mxu0 %v10341_v14  ;;  %v4282_v15 = vld [vmem:[#allocation8 + $0x4e0] sm:$0xff]  ;;  %v4288_v14 = vld [vmem:[#allocation8 + $0x510] sm:$0xff] }
 0x4e7   : > { %10854 = vmatprep.subr.bf16.mxu1 %v10853_v20  ;;  %v4301_v20 = vld [vmem:[#allocation8 + $0x578] sm:$0xff]  ;;  %v10351_v0 = vpack.c.bf16 %v4288_v14, %v4282_v15  ;;  %v6578_v14 = vld [vmem:[#allocation8 + $0x1db0] sm:$0xff] }
 0x4e8   : > { %v10353_v35 = vpack.c.bf16 %v4301_v20, %v4295_v28  ;;  %v4319_v28 = vld [vmem:[#allocation8 + $0x608] sm:$0xff]  ;;  %v6591_v20 = vld [vmem:[#allocation8 + $0x1e18] sm:$0xff] }
 0x4e9   : > { %10344 = vmatpush1.bf16.msra.mxu0 %v10343_v23  ;;  %v10863_v23 = vpack.c.bf16 %v6560_v6, %v6554_v60  ;;  %v10869_v60 = vpack.c.bf16 %v6585_v32, %v6579_v53  ;;  %v6584_v6 = vld [vmem:[#allocation8 + $0x1de0] sm:$0xff]  ;;  %v6609_v53 = vld [vmem:[#allocation8 + $0x1ea8] sm:$0xff] }
 0x4ea   : > { %10856 = vmatpush1.bf16.msra.mxu1 %v10855_v16  ;;  %10346 = vmatprep.subr.bf16.mxu0 %v10345_v61  ;;  %v4294_v16 = vld [vmem:[#allocation8 + $0x540] sm:$0xff]  ;;  %v4300_v61 = vld [vmem:[#allocation8 + $0x570] sm:$0xff] }
 0x4eb   : > { %10858 = vmatprep.subr.bf16.mxu1 %v10857_v21  ;;  %v4313_v21 = vld [vmem:[#allocation8 + $0x5d8] sm:$0xff]  ;;  %v10355_v1 = vpack.c.bf16 %v4300_v61, %v4294_v16  ;;  %v4324_v61 = vld [vmem:[#allocation8 + $0x630] sm:$0xff] }
 0x4ec   : > { %v10357_v15 = vpack.c.bf16 %v4313_v21, %v4307_v51  ;;  %v4331_v51 = vld [vmem:[#allocation8 + $0x668] sm:$0xff]  ;;  %v6603_v21 = vld [vmem:[#allocation8 + $0x1e78] sm:$0xff] }
 0x4ed   : > { %10348 = vmatpush1.bf16.msra.mxu0 %v10347_v4  ;;  %v10867_v4 = vpack.c.bf16 %v6572_v43, %v6566_v40  ;;  %v6590_v40 = vld [vmem:[#allocation8 + $0x1e10] sm:$0xff]  ;;  %v6596_v43 = vld [vmem:[#allocation8 + $0x1e40] sm:$0xff] }
 0x4ee   : > { %10860 = vmatpush1.bf16.msra.mxu1 %v10859_v10  ;;  %10350 = vmatprep.subr.bf16.mxu0 %v10349_v42  ;;  %v4306_v10 = vld [vmem:[#allocation8 + $0x5a0] sm:$0xff]  ;;  %v4312_v42 = vld [vmem:[#allocation8 + $0x5d0] sm:$0xff] }
 0x4ef   : > { %10862 = vmatprep.subr.bf16.mxu1 %v10861_v36  ;;  %v4325_v36 = vld [vmem:[#allocation8 + $0x638] sm:$0xff]  ;;  %v10359_v8 = vpack.c.bf16 %v4312_v42, %v4306_v10  ;;  %v4336_v10 = vld [vmem:[#allocation8 + $0x690] sm:$0xff] }
 0x4f0   : > { %v10361_v16 = vpack.c.bf16 %v4325_v36, %v4319_v28  ;;  %v6602_v42 = vld [vmem:[#allocation8 + $0x1e70] sm:$0xff]  ;;  %v4349_v28 = vld [vmem:[#allocation8 + $0x6f8] sm:$0xff] }
 0x4f1   : > { %10352 = vmatpush1.bf16.msra.mxu0 %v10351_v0  ;;  %v10871_v0 = vpack.c.bf16 %v6584_v6, %v6578_v14  ;;  %v10877_v14 = vpack.c.bf16 %v6609_v53, %v6603_v21  ;;  %v4343_v6 = vld [vmem:[#allocation8 + $0x6c8] sm:$0xff]  ;;  %v6615_v36 = vld [vmem:[#allocation8 + $0x1ed8] sm:$0xff] }
 0x4f2   : > { %10864 = vmatpush1.bf16.msra.mxu1 %v10863_v23  ;;  %10354 = vmatprep.subr.bf16.mxu0 %v10353_v35  ;;  %v10873_v23 = vpack.c.bf16 %v6597_v39, %v6591_v20  ;;  %v4318_v35 = vld [vmem:[#allocation8 + $0x600] sm:$0xff]  ;;  %v6621_v20 = vld [vmem:[#allocation8 + $0x1f08] sm:$0xff] }
 0x4f3   : > { %10866 = vmatprep.subr.bf16.mxu1 %v10865_v11  ;;  %v4337_v11 = vld [vmem:[#allocation8 + $0x698] sm:$0xff]  ;;  %v10363_v32 = vpack.c.bf16 %v4324_v61, %v4318_v35  ;;  %v6614_v35 = vld [vmem:[#allocation8 + $0x1ed0] sm:$0xff]  ;;  %v10881_v61 = vpack.c.bf16 %v6621_v20, %v6615_v36  ;;  %v6633_v21 = vld [vmem:[#allocation8 + $0x1f68] sm:$0xff] }
 0x4f4   : > { %v6645_v36 = vld [vmem:[#allocation8 + $0x1fc8] sm:$0xff] }
 0x4f5   : > { %10356 = vmatpush1.bf16.msra.mxu0 %v10355_v1  ;;  %v10875_v1 = vpack.c.bf16 %v6596_v43, %v6590_v40  ;;  %v6620_v40 = vld [vmem:[#allocation8 + $0x1f00] sm:$0xff]  ;;  %v4355_v43 = vld [vmem:[#allocation8 + $0x728] sm:$0xff] }
 0x4f6   : > { %10868 = vmatpush1.bf16.msra.mxu1 %v10867_v4  ;;  %10358 = vmatprep.subr.bf16.mxu0 %v10357_v15  ;;  %v10365_v4 = vpack.c.bf16 %v4337_v11, %v4331_v51  ;;  %v4330_v15 = vld [vmem:[#allocation8 + $0x660] sm:$0xff]  ;;  %v4361_v51 = vld [vmem:[#allocation8 + $0x758] sm:$0xff] }
 0x4f7   : > { %10870 = vmatprep.subr.bf16.mxu1 %v10869_v60  ;;  %v6608_v60 = vld [vmem:[#allocation8 + $0x1ea0] sm:$0xff]  ;;  %v10367_v39 = vpack.c.bf16 %v4336_v10, %v4330_v15  ;;  %v6627_v11 = vld [vmem:[#allocation8 + $0x1f38] sm:$0xff]  ;;  %v4360_v15 = vld [vmem:[#allocation8 + $0x750] sm:$0xff] }
 0x4f8   : > { %v6626_v10 = vld [vmem:[#allocation8 + $0x1f30] sm:$0xff] }
 0x4f9   : > { %10360 = vmatpush1.bf16.msra.mxu0 %v10359_v8  ;;  %v10879_v8 = vpack.c.bf16 %v6608_v60, %v6602_v42  ;;  %v10885_v42 = vpack.c.bf16 %v6633_v21, %v6627_v11  ;;  %v4367_v60 = vld [vmem:[#allocation8 + $0x788] sm:$0xff] }
 0x4fa   : > { %10872 = vmatpush1.bf16.msra.mxu1 %v10871_v0  ;;  %10362 = vmatprep.subr.bf16.mxu0 %v10361_v16  ;;  %v10369_v0 = vpack.c.bf16 %v4349_v28, %v4343_v6  ;;  %v4342_v16 = vld [vmem:[#allocation8 + $0x6c0] sm:$0xff]  ;;  %v4373_v6 = vld [vmem:[#allocation8 + $0x7b8] sm:$0xff]  ;;  %v6657_v11 = vld [vmem:[#allocation8 + $0x2028] sm:$0xff] }
 0x4fb   : > { %10874 = vmatprep.subr.bf16.mxu1 %v10873_v23  ;;  %v4348_v23 = vld [vmem:[#allocation8 + $0x6f0] sm:$0xff]  ;;  %v6639_v28 = vld [vmem:[#allocation8 + $0x1f98] sm:$0xff] }
 0x4fc   : > { %5710 = vmatmul.mubr.f32.vlgmr.msra.gmra.mrb[116].mxu0 %v14682_v19  ;;  %v10371_v53 = vpack.c.bf16 %v4348_v23, %v4342_v16  ;;  %v4372_v16 = vld [vmem:[#allocation8 + $0x7b0] sm:$0xff] }
 0x4fd   : > { %7095 = vmatmul.mubr.f32.vlgmr.msra.gmra.mrb[134].mxu1 %v15478_v45  ;;  %5715 = vmatprep.mubr.f32.mxu0 %v15474_v44  ;;  %v6638_v23 = vld [vmem:[#allocation8 + $0x1f90] sm:$0xff] }
 0x4fe   : > { %10364 = vmatpush1.bf16.msra.mxu0 %v10363_v32  ;;  %7100 = vmatprep.mubr.f32.mxu1 %v15479_v58  ;;  %v10883_v32 = vpack.c.bf16 %v6620_v40, %v6614_v35  ;;  %v10889_v35 = vpack.c.bf16 %v6645_v36, %v6639_v28  ;;  %v4379_v40 = vld [vmem:[#allocation8 + $0x7e8] sm:$0xff] }
 0x4ff   : > { %10876 = vmatpush1.bf16.msra.mxu1 %v10875_v1  ;;  %10366 = vmatprep.subr.bf16.mxu0 %v10365_v4  ;;  %v10373_v1 = vpack.c.bf16 %v4361_v51, %v4355_v43  ;;  %v4354_v4 = vld [vmem:[#allocation8 + $0x720] sm:$0xff]  ;;  %v4385_v43 = vld [vmem:[#allocation8 + $0x818] sm:$0xff]  ;;  %v6669_v28 = vld [vmem:[#allocation8 + $0x2088] sm:$0xff] }
 0x500   : > { %5716 = vmatmul.mubr.f32.gmra.mrb[118].mxu0 %v15476_v49  ;;  %10878 = vmatprep.subr.bf16.mxu1 %v10877_v14  ;;  %v6632_v14 = vld [vmem:[#allocation8 + $0x1f60] sm:$0xff]  ;;  %v10375_v20 = vpack.c.bf16 %v4360_v15, %v4354_v4  ;;  %v6651_v51 = vld [vmem:[#allocation8 + $0x1ff8] sm:$0xff]  ;;  %v4384_v4 = vld [vmem:[#allocation8 + $0x810] sm:$0xff] }
 0x501   : > { %7101 = vmatmul.mubr.f32.gmra.mrb[136].mxu1 %v15480_v26  ;;  %5721 = vmatprep.mubr.f32.mxu0 %v15477_v54  ;;  %v6650_v15 = vld [vmem:[#allocation8 + $0x1ff0] sm:$0xff] }
 0x502   : > { %10368 = vmatpush1.bf16.msra.mxu0 %v10367_v39  ;;  %7106 = vmatprep.mubr.f32.mxu1 %v15481_v57  ;;  %v10887_v39 = vpack.c.bf16 %v6632_v14, %v6626_v10  ;;  %v10893_v10 = vpack.c.bf16 %v6657_v11, %v6651_v51  ;;  %v4391_v14 = vld [vmem:[#allocation8 + $0x848] sm:$0xff] }
 0x503   : > { %10880 = vmatpush1.bf16.msra.mxu1 %v10879_v8  ;;  %10370 = vmatprep.subr.bf16.mxu0 %v10369_v0  ;;  %v10377_v8 = vpack.c.bf16 %v4373_v6, %v4367_v60  ;;  %v4366_v0 = vld [vmem:[#allocation8 + $0x780] sm:$0xff]  ;;  %v4397_v60 = vld [vmem:[#allocation8 + $0x878] sm:$0xff]  ;;  %v6681_v51 = vld [vmem:[#allocation8 + $0x20e8] sm:$0xff] }
 0x504   : > { %5722 = vmatmul.mubr.f32.gmra.mrb[120].mxu0 %v15478_v45  ;;  %10882 = vmatprep.subr.bf16.mxu1 %v10881_v61  ;;  %v6644_v61 = vld [vmem:[#allocation8 + $0x1fc0] sm:$0xff]  ;;  %v10379_v21 = vpack.c.bf16 %v4372_v16, %v4366_v0  ;;  %v6663_v6 = vld [vmem:[#allocation8 + $0x2058] sm:$0xff]  ;;  %v4396_v0 = vld [vmem:[#allocation8 + $0x870] sm:$0xff] }
 0x505   : > { %7107 = vmatmul.mubr.f32.gmra.mrb[138].mxu1 %v15482_v46  ;;  %5727 = vmatprep.mubr.f32.mxu0 %v15479_v58  ;;  %v6662_v16 = vld [vmem:[#allocation8 + $0x2050] sm:$0xff] }
 0x506   : > { %10372 = vmatpush1.bf16.msra.mxu0 %v10371_v53  ;;  %7112 = vmatprep.mubr.f32.mxu1 %v14396_v50  ;;  %v10891_v53 = vpack.c.bf16 %v6644_v61, %v6638_v23  ;;  %v10897_v23 = vpack.c.bf16 %v6669_v28, %v6663_v6  ;;  %v4403_v61 = vld [vmem:[#allocation8 + $0x8a8] sm:$0xff] }
 0x507   : > { %10884 = vmatpush1.bf16.msra.mxu1 %v10883_v32  ;;  %10374 = vmatprep.subr.bf16.mxu0 %v10373_v1  ;;  %v10381_v32 = vpack.c.bf16 %v4385_v43, %v4379_v40  ;;  %v4378_v1 = vld [vmem:[#allocation8 + $0x7e0] sm:$0xff]  ;;  %v4409_v40 = vld [vmem:[#allocation8 + $0x8d8] sm:$0xff]  ;;  %v6693_v6 = vld [vmem:[#allocation8 + $0x2148] sm:$0xff] }
 0x508   : > { %5728 = vmatmul.mubr.f32.gmra.mrb[122].mxu0 %v15480_v26  ;;  %10886 = vmatprep.subr.bf16.mxu1 %v10885_v42  ;;  %v6656_v42 = vld [vmem:[#allocation8 + $0x2020] sm:$0xff]  ;;  %v10383_v36 = vpack.c.bf16 %v4384_v4, %v4378_v1  ;;  %v6675_v43 = vld [vmem:[#allocation8 + $0x20b8] sm:$0xff]  ;;  %v4408_v1 = vld [vmem:[#allocation8 + $0x8d0] sm:$0xff] }
 0x509   : > { %7113 = vmatmul.mubr.f32.gmra.mrb[140].mxu1 %v14398_v59  ;;  %5733 = vmatprep.mubr.f32.mxu0 %v15481_v57  ;;  %v6674_v4 = vld [vmem:[#allocation8 + $0x20b0] sm:$0xff] }
 0x50a   : > { %10376 = vmatpush1.bf16.msra.mxu0 %v10375_v20  ;;  %7118 = vmatprep.mubr.f32.mxu1 %v14416_v18  ;;  %v10895_v20 = vpack.c.bf16 %v6656_v42, %v6650_v15  ;;  %v10901_v15 = vpack.c.bf16 %v6681_v51, %v6675_v43  ;;  %v4415_v42 = vld [vmem:[#allocation8 + $0x908] sm:$0xff]  ;;  %v4433_v43 = vld [vmem:[#allocation8 + $0x998] sm:$0xff] }
 0x50b   : > { %10888 = vmatpush1.bf16.msra.mxu1 %v10887_v39  ;;  %10378 = vmatprep.subr.bf16.mxu0 %v10377_v8  ;;  %v10385_v39 = vpack.c.bf16 %v4397_v60, %v4391_v14  ;;  %v4390_v8 = vld [vmem:[#allocation8 + $0x840] sm:$0xff]  ;;  %v4421_v14 = vld [vmem:[#allocation8 + $0x938] sm:$0xff] }
 0x50c   : > { %5734 = vmatmul.mubr.f32.gmra.mrb[124].mxu0 %v15482_v46  ;;  %10890 = vmatprep.subr.bf16.mxu1 %v10889_v35  ;;  %v6668_v35 = vld [vmem:[#allocation8 + $0x2080] sm:$0xff]  ;;  %v10387_v11 = vpack.c.bf16 %v4396_v0, %v4390_v8  ;;  %v6687_v60 = vld [vmem:[#allocation8 + $0x2118] sm:$0xff]  ;;  %v4420_v8 = vld [vmem:[#allocation8 + $0x930] sm:$0xff] }
 0x50d   : > { %7119 = vmatmul.mubr.f32.gmra.mrb[142].mxu1 %v14418_v24  ;;  %5739 = vmatprep.mubr.f32.mxu0 %v14396_v50  ;;  %v6686_v0 = vld [vmem:[#allocation8 + $0x2110] sm:$0xff]  ;;  %v6699_v51 = vld [vmem:[#allocation8 + $0x2178] sm:$0xff] }
 0x50e   : > { %10380 = vmatpush1.bf16.msra.mxu0 %v10379_v21  ;;  %7124 = vmatprep.mubr.f32.mxu1 %v14444_v63  ;;  %v10899_v21 = vpack.c.bf16 %v6668_v35, %v6662_v16  ;;  %v10905_v16 = vpack.c.bf16 %v6693_v6, %v6687_v60  ;;  %v6704_v60 = vld [vmem:[#allocation8 + $0x21a0] sm:$0xff]  ;;  %v4439_v6 = vld [vmem:[#allocation8 + $0x9c8] sm:$0xff] }
 0x50f   : > { %10892 = vmatpush1.bf16.msra.mxu1 %v10891_v53  ;;  %10382 = vmatprep.subr.bf16.mxu0 %v10381_v32  ;;  %v10389_v53 = vpack.c.bf16 %v4409_v40, %v4403_v61  ;;  %v4402_v32 = vld [vmem:[#allocation8 + $0x8a0] sm:$0xff]  ;;  %v4427_v40 = vld [vmem:[#allocation8 + $0x968] sm:$0xff] }
 0x510   : > { %5740 = vmatmul.mubr.f32.gmra.mrb[126].mxu0 %v14398_v59  ;;  %10894 = vmatprep.subr.bf16.mxu1 %v10893_v10  ;;  %v6680_v10 = vld [vmem:[#allocation8 + $0x20e0] sm:$0xff]  ;;  %v10391_v28 = vpack.c.bf16 %v4408_v1, %v4402_v32  ;;  %v10397_v32 = vpack.c.bf16 %v4433_v43, %v4427_v40  ;;  %v15492_v1 = vld [vmem:[#allocation31_spill] sm:$0xff]  ;;  %v4451_v43 = vld [vmem:[#allocation8 + $0xa28] sm:$0xff] }
 0x511   : > { %7125 = vmatmul.mubr.f32.gmra.mrb[144].mxu1 %v14446_v29  ;;  %5745 = vmatprep.mubr.f32.mxu0 %v14416_v18  ;;  %v6692_v61 = vld [vmem:[#allocation8 + $0x2140] sm:$0xff] }
 0x512   : > { %10384 = vmatpush1.bf16.msra.mxu0 %v10383_v36  ;;  %7130 = vmatprep.mubr.f32.mxu1 %v14468_v48  ;;  %v10903_v36 = vpack.c.bf16 %v6680_v10, %v6674_v4  ;;  %v4426_v4 = vld [vmem:[#allocation8 + $0x960] sm:$0xff]  ;;  %v6698_v10 = vld [vmem:[#allocation8 + $0x2170] sm:$0xff] }
 0x513   : > { %10896 = vmatpush1.bf16.msra.mxu1 %v10895_v20  ;;  %10386 = vmatprep.subr.bf16.mxu0 %v10385_v39  ;;  %v10393_v20 = vpack.c.bf16 %v4421_v14, %v4415_v42  ;;  %v4414_v39 = vld [vmem:[#allocation8 + $0x900] sm:$0xff] }
 0x514   : > { %5746 = vmatmul.mubr.f32.gmra.mrb[128].mxu0 %v14418_v24  ;;  %10898 = vmatprep.subr.bf16.mxu1 %v10897_v23  ;;  %v15491_v23 = vld [vmem:[#allocation32_spill] sm:$0xff]  ;;  %v6716_v40 = vld [vmem:[#allocation8 + $0x2200] sm:$0xff] }
 0x515   : > { %7131 = vmatmul.mubr.f32.gmra.mrb[146].mxu1 %v14470_v12  ;;  %5751 = vmatprep.mubr.f32.mxu0 %v14444_v63  ;;  %v4075_v35 = vadd.f32 %v14302_v55, %v15491_v23  ;;  %v4074_v55 = vadd.f32 %v14297_v33, %v15492_v1  ;;  %v4444_v23 = vld [vmem:[#allocation8 + $0x9f0] sm:$0xff] }
 0x516   : > { %10388 = vmatpush1.bf16.msra.mxu0 %v10387_v11  ;;  %7136 = vmatprep.mubr.f32.mxu1 %v14490_v17  ;;  %v6705_v11 = vld [vmem:[#allocation8 + $0x21a8] sm:$0xff] }
 0x517   : > { %10900 = vmatpush1.bf16.msra.mxu1 %v10899_v21  ;;  %10390 = vmatprep.subr.bf16.mxu0 %v10389_v53  ;;  %v10395_v21 = vpack.c.bf16 %v4420_v8, %v4414_v39  ;;  %v10907_v53 = vpack.c.bf16 %v6692_v61, %v6686_v0  ;;  %v14809_v42 = vmax.f32 %v4075_v35, 0.0  ;;  %v10909_v14 = vpack.c.bf16 %v6705_v11, %v6699_v51  ;;  %v6710_v35 = vld [vmem:[#allocation8 + $0x21d0] sm:$0xff]  ;;  %v4457_v51 = vld [vmem:[#allocation8 + $0xa58] sm:$0xff] }
 0x518   : > { %5752 = vmatmul.mubr.f32.gmra.mrb[130].mxu0 %v14446_v29  ;;  %10902 = vmatprep.subr.bf16.mxu1 %v10901_v15  ;;  %v4432_v15 = vld [vmem:[#allocation8 + $0x990] sm:$0xff]  ;;  %v14814_v39 = vmax.f32 %v4074_v55, 0.0  ;;  %v10911_v8 = vpack.c.bf16 %v6704_v60, %v6698_v10  ;;  %v6723_v11 = vld [vmem:[#allocation8 + $0x2238] sm:$0xff]  ;;  %v10405_v1 = vpack.c.bf16 %v4457_v51, %v4451_v43  ;;  %v4450_v55 = vld [vmem:[#allocation8 + $0xa20] sm:$0xff] }
 0x519   : > { %7137 = vmatmul.mubr.f32.gmra.mrb[148].mxu1 %v14492_v27  ;;  %5757 = vmatprep.mubr.f32.mxu0 %v14468_v48  ;;  %v10399_v33 = vpack.c.bf16 %v4432_v15, %v4426_v4  ;;  %v4456_v4 = vld [vmem:[#allocation8 + $0xa50] sm:$0xff]  ;;  %v4463_v60 = vld [vmem:[#allocation8 + $0xa88] sm:$0xff]  ;;  %v6747_v51 = vld [vmem:[#allocation8 + $0x22f8] sm:$0xff] }
 0x51a   : > { %10392 = vmatpush1.bf16.msra.mxu0 %v10391_v28  ;;  %7142 = vmatprep.mubr.f32.mxu1 %v14519_v30  ;;  %v4445_v28 = vld [vmem:[#allocation8 + $0x9f8] sm:$0xff]  ;;  %v6722_v15 = vld [vmem:[#allocation8 + $0x2230] sm:$0xff]  ;;  %v4475_v43 = vld [vmem:[#allocation8 + $0xae8] sm:$0xff] }
 0x51b   : > { %10904 = vmatpush1.bf16.msra.mxu1 %v10903_v36  ;;  %10394 = vmatprep.subr.bf16.mxu0 %v10393_v20  ;;  %v6711_v36 = vld [vmem:[#allocation8 + $0x21d8] sm:$0xff]  ;;  %v6717_v20 = vld [vmem:[#allocation8 + $0x2208] sm:$0xff]  ;;  %v10401_v0 = vpack.c.bf16 %v4445_v28, %v4439_v6 }
 0x51c   : > { %5758 = vmatmul.mubr.f32.gmra.mrb[132].mxu0 %v14470_v12  ;;  %10906 = vmatprep.subr.bf16.mxu1 %v10905_v16  ;;  %v4438_v16 = vld [vmem:[#allocation8 + $0x9c0] sm:$0xff]  ;;  %v10913_v61 = vpack.c.bf16 %v6717_v20, %v6711_v36  ;;  %v4469_v6 = vld [vmem:[#allocation8 + $0xab8] sm:$0xff]  ;;  %v6741_v36 = vld [vmem:[#allocation8 + $0x22c8] sm:$0xff]  ;;  %v10407_v20 = vpack.c.bf16 %v4456_v4, %v4450_v55 }
 0x51d   : > { %7143 = vmatmul.mubr.f32.gmra.mrb[150].mxu1 %v14523_v38  ;;  %5763 = vmatprep.mubr.f32.mxu0 %v14490_v17  ;;  %v6735_v28 = vld [vmem:[#allocation8 + $0x2298] sm:$0xff]  ;;  %v6746_v4 = vld [vmem:[#allocation8 + $0x22f0] sm:$0xff] }
 0x51e   : > { %10396 = vmatpush1.bf16.msra.mxu0 %v10395_v21  ;;  %7148 = vmatprep.mubr.f32.mxu1 %v14809_v42  ;;  %v6729_v21 = vld [vmem:[#allocation8 + $0x2268] sm:$0xff] }
 0x51f   : > { %10908 = vmatpush1.bf16.msra.mxu1 %v10907_v53  ;;  %10398 = vmatprep.subr.bf16.mxu0 %v10397_v32  ;;  %v10403_v53 = vpack.c.bf16 %v4444_v23, %v4438_v16  ;;  %v10915_v32 = vpack.c.bf16 %v6716_v40, %v6710_v35  ;;  %v10917_v10 = vpack.c.bf16 %v6729_v21, %v6723_v11  ;;  %v6734_v23 = vld [vmem:[#allocation8 + $0x2290] sm:$0xff]  ;;  %v6740_v40 = vld [vmem:[#allocation8 + $0x22c0] sm:$0xff]  ;;  %v6753_v11 = vld [vmem:[#allocation8 + $0x2328] sm:$0xff] }
 0x520   : > { %5764 = vmatmul.mubr.f32.gmra.mrb[134].mxu0 %v14492_v27  ;;  %10910 = vmatprep.subr.bf16.mxu1 %v10909_v14  ;;  %v6728_v14 = vld [vmem:[#allocation8 + $0x2260] sm:$0xff]  ;;  %v10409_v16 = vpack.c.bf16 %v4469_v6, %v4463_v60  ;;  %v10921_v35 = vpack.c.bf16 %v6741_v36, %v6735_v28  ;;  %v4487_v60 = vld [vmem:[#allocation8 + $0xb48] sm:$0xff]  ;;  %v6759_v6 = vld [vmem:[#allocation8 + $0x2358] sm:$0xff] }
 0x521   : > { %7149 = vmatmul.mubr.f32.gmra.mrb[152].mxu1 %v14814_v39  ;;  %5834 = vmatprep.mubr.f32.mxu0 %v14724_v37  ;;  %v6765_v28 = vld [vmem:[#allocation8 + $0x2388] sm:$0xff] }
 0x522   : > { %10400 = vmatpush1.bf16.msra.mxu0 %v10399_v33  ;;  %7219 = vmatprep.mubr.f32.mxu1 %v15483_v62  ;;  %v10919_v33 = vpack.c.bf16 %v6728_v14, %v6722_v15  ;;  %v10925_v15 = vpack.c.bf16 %v6753_v11, %v6747_v51  ;;  %v6752_v14 = vld [vmem:[#allocation8 + $0x2320] sm:$0xff]  ;;  %v6777_v51 = vld [vmem:[#allocation8 + $0x23e8] sm:$0xff] }
 0x523   : > { %10912 = vmatpush1.bf16.msra.mxu1 %v10911_v8  ;;  %10402 = vmatprep.subr.bf16.mxu0 %v10401_v0  ;;  %v4462_v8 = vld [vmem:[#allocation8 + $0xa80] sm:$0xff]  ;;  %v4468_v0 = vld [vmem:[#allocation8 + $0xab0] sm:$0xff] }
 0x524   : > { %10914 = vmatprep.subr.bf16.mxu1 %v10913_v61  ;;  %v4481_v61 = vld [vmem:[#allocation8 + $0xb18] sm:$0xff]  ;;  %v10411_v21 = vpack.c.bf16 %v4468_v0, %v4462_v8  ;;  %v6758_v0 = vld [vmem:[#allocation8 + $0x2350] sm:$0xff] }
 0x525   : > { %v10413_v55 = vpack.c.bf16 %v4481_v61, %v4475_v43  ;;  %v4499_v43 = vld [vmem:[#allocation8 + $0xba8] sm:$0xff]  ;;  %v6771_v61 = vld [vmem:[#allocation8 + $0x23b8] sm:$0xff] }
 0x526   : > { %10404 = vmatpush1.bf16.msra.mxu0 %v10403_v53  ;;  %v10923_v53 = vpack.c.bf16 %v6740_v40, %v6734_v23  ;;  %v10929_v23 = vpack.c.bf16 %v6765_v28, %v6759_v6  ;;  %v6764_v40 = vld [vmem:[#allocation8 + $0x2380] sm:$0xff] }
 0x527   : > { %10916 = vmatpush1.bf16.msra.mxu1 %v10915_v32  ;;  %10406 = vmatprep.subr.bf16.mxu0 %v10405_v1  ;;  %v4474_v32 = vld [vmem:[#allocation8 + $0xae0] sm:$0xff]  ;;  %v4480_v1 = vld [vmem:[#allocation8 + $0xb10] sm:$0xff] }
 0x528   : > { %10918 = vmatprep.subr.bf16.mxu1 %v10917_v10  ;;  %v4493_v10 = vld [vmem:[#allocation8 + $0xb78] sm:$0xff]  ;;  %v10415_v36 = vpack.c.bf16 %v4480_v1, %v4474_v32  ;;  %v6770_v1 = vld [vmem:[#allocation8 + $0x23b0] sm:$0xff] }
 0x529   : > { %v10417_v8 = vpack.c.bf16 %v4493_v10, %v4487_v60  ;;  %v4131_v60 = vld [vmem:[#allocation8 + $0x28] sm:$0xff] }
 0x52a   : > { %10408 = vmatpush1.bf16.msra.mxu0 %v10407_v20  ;;  %v10927_v20 = vpack.c.bf16 %v6752_v14, %v6746_v4  ;;  %v10933_v4 = vpack.c.bf16 %v6777_v51, %v6771_v61  ;;  %v6776_v14 = vld [vmem:[#allocation8 + $0x23e0] sm:$0xff] }
 0x52b   : > { %10920 = vmatpush1.bf16.msra.mxu1 %v10919_v33  ;;  %10410 = vmatprep.subr.bf16.mxu0 %v10409_v16  ;;  %v4486_v33 = vld [vmem:[#allocation8 + $0xb40] sm:$0xff]  ;;  %v4492_v16 = vld [vmem:[#allocation8 + $0xb70] sm:$0xff]  ;;  %v10935_v6 = vpack.c.bf16 %v6776_v14, %v6770_v1 }
 0x52c   : > { %10922 = vmatprep.subr.bf16.mxu1 %v10921_v35  ;;  %v4505_v35 = vld [vmem:[#allocation8 + $0xbd8] sm:$0xff]  ;;  %v10419_v11 = vpack.c.bf16 %v4492_v16, %v4486_v33  ;;  %v15494_v1 = vld [vmem:[#allocation37_spill] sm:$0xff] }
 0x52d   : > { %v10421_v32 = vpack.c.bf16 %v4505_v35, %v4499_v43  ;;  %v4149_v33 = vld [vmem:[#allocation8 + $0xb8] sm:$0xff]  ;;  %v4155_v43 = vld [vmem:[#allocation8 + $0xe8] sm:$0xff] }
 0x52e   : > { %10412 = vmatpush1.bf16.msra.mxu0 %v10411_v21  ;;  %v10931_v21 = vpack.c.bf16 %v6764_v40, %v6758_v0  ;;  %v4148_v40 = vld [vmem:[#allocation8 + $0xb0] sm:$0xff]  ;;  %v4161_v35 = vld [vmem:[#allocation8 + $0x118] sm:$0xff] }
 0x52f   : > { %10924 = vmatpush1.bf16.msra.mxu1 %v10923_v53  ;;  %10414 = vmatprep.subr.bf16.mxu0 %v10413_v55  ;;  %v4498_v53 = vld [vmem:[#allocation8 + $0xba0] sm:$0xff]  ;;  %v4504_v55 = vld [vmem:[#allocation8 + $0xbd0] sm:$0xff]  ;;  %v10561_v51 = vpack.c.bf16 %v4161_v35, %v4155_v43 }
 0x530   : > { %10926 = vmatprep.subr.bf16.mxu1 %v10925_v15  ;;  %v4137_v15 = vld [vmem:[#allocation8 + $0x58] sm:$0xff]  ;;  %v10423_v10 = vpack.c.bf16 %v4504_v55, %v4498_v53  ;;  %v4167_v53 = vld [vmem:[#allocation8 + $0x148] sm:$0xff]  ;;  %v4190_v35 = vld [vmem:[#allocation8 + $0x200] sm:$0xff] }
 0x531   : > { %v10553_v28 = vpack.c.bf16 %v4137_v15, %v4131_v60  ;;  %v4173_v55 = vld [vmem:[#allocation8 + $0x178] sm:$0xff]  ;;  %v4166_v15 = vld [vmem:[#allocation8 + $0x140] sm:$0xff] }
 0x532   : > { %10416 = vmatpush1.bf16.msra.mxu0 %v10415_v36  ;;  %v4130_v36 = vld [vmem:[#allocation8 + $0x20] sm:$0xff]  ;;  %v10565_v60 = vpack.c.bf16 %v4173_v55, %v4167_v53 }
 0x533   : > { %10928 = vmatpush1.bf16.msra.mxu1 %v10927_v20  ;;  %10418 = vmatprep.subr.bf16.mxu0 %v10417_v8  ;;  %v4136_v20 = vld [vmem:[#allocation8 + $0x50] sm:$0xff]  ;;  %v4143_v8 = vld [vmem:[#allocation8 + $0x88] sm:$0xff]  ;;  %v4202_v55 = vld [vmem:[#allocation8 + $0x260] sm:$0xff] }
 0x534   : > { %10930 = vmatprep.subr.bf16.mxu1 %v10929_v23  ;;  %v10555_v16 = vpack.c.bf16 %v4136_v20, %v4130_v36  ;;  %v10557_v0 = vpack.c.bf16 %v4149_v33, %v4143_v8  ;;  %v4142_v23 = vld [vmem:[#allocation8 + $0x80] sm:$0xff]  ;;  %v15496_v36 = vld [vmem:[#allocation39_spill] sm:$0xff] }
 0x535   : > { %v10559_v61 = vpack.c.bf16 %v4148_v40, %v4142_v23  ;;  %v4178_v33 = vld [vmem:[#allocation8 + $0x1a0] sm:$0xff]  ;;  %v4197_v23 = vld [vmem:[#allocation8 + $0x238] sm:$0xff] }
 0x536   : > { %10420 = vmatpush1.bf16.msra.mxu0 %v10419_v11  ;;  %v4154_v11 = vld [vmem:[#allocation8 + $0xe0] sm:$0xff] }
 0x537   : > { %10932 = vmatpush1.bf16.msra.mxu1 %v10931_v21  ;;  %10422 = vmatprep.subr.bf16.mxu0 %v10421_v32  ;;  %v4160_v21 = vld [vmem:[#allocation8 + $0x110] sm:$0xff]  ;;  %v15493_v32 = vld [vmem:[#allocation33_spill] sm:$0xff] }
 0x538   : > { %10934 = vmatprep.subr.bf16.mxu1 %v10933_v4  ;;  %v15495_v4 = vld [vmem:[#allocation38_spill] sm:$0xff]  ;;  %v10563_v14 = vpack.c.bf16 %v4160_v21, %v4154_v11  ;;  %v4209_v11 = vld [vmem:[#allocation8 + $0x298] sm:$0xff] }
 0x53a   : > { %10424 = vmatpush1.bf16.msra.mxu0 %v10423_v10  ;;  %v4172_v10 = vld [vmem:[#allocation8 + $0x170] sm:$0xff] }
 0x53b   : > { %10936 = vmatpush1.bf16.msra.mxu1 %v10935_v6  ;;  %10554 = vmatprep.subr.bf16.mxu0 %v10553_v28  ;;  %v4179_v6 = vld [vmem:[#allocation8 + $0x1a8] sm:$0xff]  ;;  %v4185_v28 = vld [vmem:[#allocation8 + $0x1d8] sm:$0xff]  ;;  %v10567_v20 = vpack.c.bf16 %v4172_v10, %v4166_v15 }
 0x53c   : > { %v10569_v8 = vpack.c.bf16 %v4185_v28, %v4179_v6  ;;  %v4221_v15 = vld [vmem:[#allocation8 + $0x2f8] sm:$0xff]  ;;  %v4214_v28 = vld [vmem:[#allocation8 + $0x2c0] sm:$0xff] }
 0x53d   : > { %5835 = vmatmul.mubr.f32.vlgmr.msra.gmra.mrb[116].mxu0 %v14730_v2 }
 0x53e   : > { %7220 = vmatmul.mubr.f32.vlgmr.msra.gmra.mrb[134].mxu1 %v15484_v22  ;;  %5840 = vmatprep.mubr.f32.mxu0 %v14527_v34 }
 0x53f   : > { %10556 = vmatpush1.bf16.msra.mxu0 %v10555_v16  ;;  %7225 = vmatprep.mubr.f32.mxu1 %v15485_v56  ;;  %v4184_v16 = vld [vmem:[#allocation8 + $0x1d0] sm:$0xff] }
 0x540   : > { %10558 = vmatprep.subr.bf16.mxu0 %v10557_v0  ;;  %v4191_v0 = vld [vmem:[#allocation8 + $0x208] sm:$0xff]  ;;  %v10571_v40 = vpack.c.bf16 %v4184_v16, %v4178_v33  ;;  %v4233_v33 = vld [vmem:[#allocation8 + $0x358] sm:$0xff] }
 0x541   : > { %5841 = vmatmul.mubr.f32.gmra.mrb[118].mxu0 %v15493_v32  ;;  %v10573_v43 = vpack.c.bf16 %v4197_v23, %v4191_v0  ;;  %v4226_v23 = vld [vmem:[#allocation8 + $0x320] sm:$0xff] }
 0x542   : > { %7226 = vmatmul.mubr.f32.gmra.mrb[136].mxu1 %v15494_v1  ;;  %5846 = vmatprep.mubr.f32.mxu0 %v15483_v62 }
 0x543   : > { %10560 = vmatpush1.bf16.msra.mxu0 %v10559_v61  ;;  %7231 = vmatprep.mubr.f32.mxu1 %v15495_v4  ;;  %v4196_v61 = vld [vmem:[#allocation8 + $0x230] sm:$0xff] }
 0x544   : > { %10562 = vmatprep.subr.bf16.mxu0 %v10561_v51  ;;  %v4203_v51 = vld [vmem:[#allocation8 + $0x268] sm:$0xff]  ;;  %v10575_v21 = vpack.c.bf16 %v4196_v61, %v4190_v35  ;;  %v15498_v35 = vld [vmem:[#allocation29_spill] sm:$0xff] }
 0x545   : > { %5847 = vmatmul.mubr.f32.gmra.mrb[120].mxu0 %v15484_v22  ;;  %v10577_v53 = vpack.c.bf16 %v4209_v11, %v4203_v51  ;;  %v4239_v51 = vld [vmem:[#allocation8 + $0x388] sm:$0xff]  ;;  %v4245_v11 = vld [vmem:[#allocation8 + $0x3b8] sm:$0xff] }
 0x546   : > { %7232 = vmatmul.mubr.f32.gmra.mrb[138].mxu1 %v15496_v36  ;;  %5852 = vmatprep.mubr.f32.mxu0 %v15485_v56 }
 0x547   : > { %10564 = vmatpush1.bf16.msra.mxu0 %v10563_v14  ;;  %7237 = vmatprep.mubr.f32.mxu1 %v14590_v47  ;;  %v4208_v14 = vld [vmem:[#allocation8 + $0x290] sm:$0xff] }
 0x548   : > { %10566 = vmatprep.subr.bf16.mxu0 %v10565_v60  ;;  %v4215_v60 = vld [vmem:[#allocation8 + $0x2c8] sm:$0xff]  ;;  %v10579_v10 = vpack.c.bf16 %v4208_v14, %v4202_v55  ;;  %v10589_v55 = vpack.c.bf16 %v4245_v11, %v4239_v51  ;;  %v15500_v14 = vld [vmem:[#allocation44_spill] sm:$0xff]  ;;  %v15505_v51 = vld [vmem:[#allocation47_spill] sm:$0xff] }
 0x549   : > { %5853 = vmatmul.mubr.f32.gmra.mrb[122].mxu0 %v15494_v1  ;;  %v10581_v6 = vpack.c.bf16 %v4221_v15, %v4215_v60  ;;  %v15501_v60 = vld [vmem:[#allocation30_spill] sm:$0xff] }
 0x54a   : > { %7238 = vmatmul.mubr.f32.gmra.mrb[140].mxu1 %v15488_v13  ;;  %5858 = vmatprep.mubr.f32.mxu0 %v15495_v4  ;;  %v4076_v15 = vadd.f32 %v15501_v60, %v15500_v14  ;;  %v4262_v14 = vld [vmem:[#allocation8 + $0x440] sm:$0xff]  ;;  %v4268_v60 = vld [vmem:[#allocation8 + $0x470] sm:$0xff] }
 0x54b   : > { %10568 = vmatpush1.bf16.msra.mxu0 %v10567_v20  ;;  %7243 = vmatprep.mubr.f32.mxu1 %v15489_v5  ;;  %v4220_v20 = vld [vmem:[#allocation8 + $0x2f0] sm:$0xff] }
 0x54c   : > { %10570 = vmatprep.subr.bf16.mxu0 %v10569_v8  ;;  %v4227_v8 = vld [vmem:[#allocation8 + $0x328] sm:$0xff]  ;;  %v10583_v16 = vpack.c.bf16 %v4220_v20, %v4214_v28 }
 0x54d   : > { %5859 = vmatmul.mubr.f32.gmra.mrb[124].mxu0 %v15496_v36  ;;  %v10585_v0 = vpack.c.bf16 %v4233_v33, %v4227_v8  ;;  %v4251_v20 = vld [vmem:[#allocation8 + $0x3e8] sm:$0xff]  ;;  %v4257_v8 = vld [vmem:[#allocation8 + $0x418] sm:$0xff]  ;;  %v15503_v33 = vld [vmem:[#allocation45_spill] sm:$0xff] }
 0x54e   : > { %7244 = vmatmul.mubr.f32.gmra.mrb[142].mxu1 %v15490_v9  ;;  %5864 = vmatprep.mubr.f32.mxu0 %v14590_v47 }
 0x54f   : > { %10572 = vmatpush1.bf16.msra.mxu0 %v10571_v40  ;;  %7249 = vmatprep.mubr.f32.mxu1 %v14618_v25  ;;  %v4232_v40 = vld [vmem:[#allocation8 + $0x350] sm:$0xff] }
 0x550   : > { %10574 = vmatprep.subr.bf16.mxu0 %v10573_v43  ;;  %v15497_v43 = vld [vmem:[#allocation46_spill] sm:$0xff] }
 0x551   : > { %5865 = vmatmul.mubr.f32.gmra.mrb[126].mxu0 %v15488_v13  ;;  %v4077_v61 = vadd.f32 %v15498_v35, %v15497_v43  ;;  %v4256_v43 = vld [vmem:[#allocation8 + $0x410] sm:$0xff]  ;;  %v4263_v35 = vld [vmem:[#allocation8 + $0x448] sm:$0xff] }
 0x552   : > { %7250 = vmatmul.mubr.f32.gmra.mrb[144].mxu1 %v14620_v31  ;;  %5870 = vmatprep.mubr.f32.mxu0 %v15489_v5 }
 0x553   : > { %10576 = vmatpush1.bf16.msra.mxu0 %v10575_v21  ;;  %7255 = vmatprep.mubr.f32.mxu1 %v14632_v52  ;;  %v15499_v21 = vld [vmem:[#allocation42_spill] sm:$0xff]  ;;  %v14857_v28 = vmax.f32 %v4077_v61, 0.0  ;;  %v4269_v61 = vld [vmem:[#allocation8 + $0x478] sm:$0xff] }
 0x554   : > { %10578 = vmatprep.subr.bf16.mxu0 %v10577_v53  ;;  %v10587_v53 = vpack.c.bf16 %v4232_v40, %v4226_v23  ;;  %v10593_v23 = vpack.c.bf16 %v4257_v8, %v4251_v20  ;;  %v4250_v40 = vld [vmem:[#allocation8 + $0x3e0] sm:$0xff]  ;;  %v4280_v8 = vld [vmem:[#allocation8 + $0x4d0] sm:$0xff] }
 0x555   : > { %5871 = vmatmul.mubr.f32.gmra.mrb[128].mxu0 %v15490_v9  ;;  %15502 = vst [vmem:[#allocation49_spill] sm:$0xff] %v14857_v28  ;;  %v10595_v11 = vpack.c.bf16 %v4256_v43, %v4250_v40  ;;  %v4274_v20 = vld [vmem:[#allocation8 + $0x4a0] sm:$0xff]  ;;  %v4292_v40 = vld [vmem:[#allocation8 + $0x530] sm:$0xff]  ;;  %v4305_v43 = vld [vmem:[#allocation8 + $0x598] sm:$0xff] }
 0x556   : > { %7256 = vmatmul.mubr.f32.gmra.mrb[146].mxu1 %v14634_v3  ;;  %5876 = vmatprep.mubr.f32.mxu0 %v14618_v25 }
 0x557   : > { %10580 = vmatpush1.bf16.msra.mxu0 %v10579_v10  ;;  %7261 = vmatprep.mubr.f32.mxu1 %v14646_v7  ;;  %v4238_v10 = vld [vmem:[#allocation8 + $0x380] sm:$0xff] }
 0x558   : > { %10582 = vmatprep.subr.bf16.mxu0 %v10581_v6  ;;  %v4244_v6 = vld [vmem:[#allocation8 + $0x3b0] sm:$0xff] }
 0x559   : > { %5877 = vmatmul.mubr.f32.gmra.mrb[130].mxu0 %v14620_v31 }
 0x55a   : > { %7262 = vmatmul.mubr.f32.gmra.mrb[148].mxu1 %v14648_v41  ;;  %5882 = vmatprep.mubr.f32.mxu0 %v14632_v52 }
 0x55b   : > { %10584 = vmatpush1.bf16.msra.mxu0 %v10583_v16  ;;  %7267 = vmatprep.mubr.f32.mxu1 %v15499_v21  ;;  %v10591_v16 = vpack.c.bf16 %v4244_v6, %v4238_v10  ;;  %v10599_v10 = vpack.c.bf16 %v4268_v60, %v4262_v14  ;;  %v4304_v14 = vld [vmem:[#allocation8 + $0x590] sm:$0xff]  ;;  %v4317_v60 = vld [vmem:[#allocation8 + $0x5f8] sm:$0xff] }
 0x55c   : > { %10586 = vmatprep.subr.bf16.mxu0 %v10585_v0  ;;  %v14862_v0 = vmax.f32 %v4076_v15, 0.0  ;;  %v4281_v15 = vld [vmem:[#allocation8 + $0x4d8] sm:$0xff] }
 0x55d   : > { %5883 = vmatmul.mubr.f32.gmra.mrb[132].mxu0 %v14634_v3 }
 0x55e   : > { %7268 = vmatmul.mubr.f32.gmra.mrb[150].mxu1 %v15503_v33  ;;  %5888 = vmatprep.mubr.f32.mxu0 %v14646_v7  ;;  %15504 = vst [vmem:[#allocation48_spill] sm:$0xff] %v14862_v0  ;;  %v4293_v33 = vld [vmem:[#allocation8 + $0x538] sm:$0xff] }
 0x55f   : > { %10588 = vmatpush1.bf16.msra.mxu0 %v10587_v53  ;;  %7273 = vmatprep.mubr.f32.mxu1 %v14857_v28  ;;  %v10597_v53 = vpack.c.bf16 %v4269_v61, %v4263_v35  ;;  %v4287_v28 = vld [vmem:[#allocation8 + $0x508] sm:$0xff] }
 0x560   : > { %10590 = vmatprep.subr.bf16.mxu0 %v10589_v55  ;;  %v4275_v55 = vld [vmem:[#allocation8 + $0x4a8] sm:$0xff] }
 0x561   : > { %5889 = vmatmul.mubr.f32.gmra.mrb[134].mxu0 %v14648_v41  ;;  %v10601_v6 = vpack.c.bf16 %v4281_v15, %v4275_v55 }
 0x562   : > { %7274 = vmatmul.mubr.f32.gmra.mrb[152].mxu1 %v14862_v0  ;;  %6209 = vmatprep.mubr.f32.mxu0 %v15505_v51  ;;  %v10603_v0 = vpack.c.bf16 %v4280_v8, %v4274_v20  ;;  %v10605_v51 = vpack.c.bf16 %v4293_v33, %v4287_v28  ;;  %v4316_v20 = vld [vmem:[#allocation8 + $0x5f0] sm:$0xff]  ;;  %v4329_v28 = vld [vmem:[#allocation8 + $0x658] sm:$0xff] }
 0x563   : > { %10592 = vmatpush1.bf16.msra.mxu0 %v10591_v16  ;;  %v4286_v16 = vld [vmem:[#allocation8 + $0x500] sm:$0xff] }
 0x564   : > { %10594 = vmatprep.subr.bf16.mxu0 %v10593_v23  ;;  %v4299_v23 = vld [vmem:[#allocation8 + $0x568] sm:$0xff]  ;;  %v10607_v35 = vpack.c.bf16 %v4292_v40, %v4286_v16  ;;  %v4328_v16 = vld [vmem:[#allocation8 + $0x650] sm:$0xff]  ;;  %v4341_v40 = vld [vmem:[#allocation8 + $0x6b8] sm:$0xff] }
 0x565   : > { %v10609_v61 = vpack.c.bf16 %v4305_v43, %v4299_v23 }
 0x567   : > { %10596 = vmatpush1.bf16.msra.mxu0 %v10595_v11  ;;  %v4298_v11 = vld [vmem:[#allocation8 + $0x560] sm:$0xff] }
 0x568   : > { %10598 = vmatprep.subr.bf16.mxu0 %v10597_v53  ;;  %v4311_v53 = vld [vmem:[#allocation8 + $0x5c8] sm:$0xff]  ;;  %v10611_v55 = vpack.c.bf16 %v4304_v14, %v4298_v11  ;;  %v4340_v11 = vld [vmem:[#allocation8 + $0x6b0] sm:$0xff]  ;;  %v4353_v14 = vld [vmem:[#allocation8 + $0x718] sm:$0xff] }
 0x569   : > { %v10613_v15 = vpack.c.bf16 %v4317_v60, %v4311_v53 }
 0x56b   : > { %10600 = vmatpush1.bf16.msra.mxu0 %v10599_v10  ;;  %v4310_v10 = vld [vmem:[#allocation8 + $0x5c0] sm:$0xff] }
 0x56c   : > { %10602 = vmatprep.subr.bf16.mxu0 %v10601_v6  ;;  %v4323_v6 = vld [vmem:[#allocation8 + $0x628] sm:$0xff]  ;;  %v10615_v33 = vpack.c.bf16 %v4316_v20, %v4310_v10  ;;  %v4365_v20 = vld [vmem:[#allocation8 + $0x778] sm:$0xff] }
 0x56d   : > { %v10617_v8 = vpack.c.bf16 %v4329_v28, %v4323_v6  ;;  %v4359_v10 = vld [vmem:[#allocation8 + $0x748] sm:$0xff] }
 0x56e   : > { %v10629_v28 = vpack.c.bf16 %v4365_v20, %v4359_v10  ;;  %v4400_v10 = vld [vmem:[#allocation8 + $0x890] sm:$0xff]  ;;  %v4407_v20 = vld [vmem:[#allocation8 + $0x8c8] sm:$0xff] }
 0x56f   : > { %10604 = vmatpush1.bf16.msra.mxu0 %v10603_v0  ;;  %v4322_v0 = vld [vmem:[#allocation8 + $0x620] sm:$0xff] }
 0x570   : > { %10606 = vmatprep.subr.bf16.mxu0 %v10605_v51  ;;  %v4335_v51 = vld [vmem:[#allocation8 + $0x688] sm:$0xff]  ;;  %v10619_v23 = vpack.c.bf16 %v4328_v16, %v4322_v0 }
 0x571   : > { %v10621_v43 = vpack.c.bf16 %v4341_v40, %v4335_v51  ;;  %v4370_v51 = vld [vmem:[#allocation8 + $0x7a0] sm:$0xff]  ;;  %v4383_v40 = vld [vmem:[#allocation8 + $0x808] sm:$0xff] }
 0x573   : > { %10608 = vmatpush1.bf16.msra.mxu0 %v10607_v35  ;;  %v4334_v35 = vld [vmem:[#allocation8 + $0x680] sm:$0xff] }
 0x574   : > { %10610 = vmatprep.subr.bf16.mxu0 %v10609_v61  ;;  %v4347_v61 = vld [vmem:[#allocation8 + $0x6e8] sm:$0xff]  ;;  %v10623_v53 = vpack.c.bf16 %v4340_v11, %v4334_v35  ;;  %v4382_v11 = vld [vmem:[#allocation8 + $0x800] sm:$0xff] }
 0x575   : > { %v10625_v60 = vpack.c.bf16 %v4353_v14, %v4347_v61  ;;  %v4388_v61 = vld [vmem:[#allocation8 + $0x830] sm:$0xff]  ;;  %v4395_v14 = vld [vmem:[#allocation8 + $0x868] sm:$0xff] }
 0x577   : > { %10612 = vmatpush1.bf16.msra.mxu0 %v10611_v55  ;;  %v4346_v55 = vld [vmem:[#allocation8 + $0x6e0] sm:$0xff] }
 0x578   : > { %10614 = vmatprep.subr.bf16.mxu0 %v10613_v15  ;;  %v4352_v15 = vld [vmem:[#allocation8 + $0x710] sm:$0xff] }
 0x579   : > { %v10627_v6 = vpack.c.bf16 %v4352_v15, %v4346_v55  ;;  %v4394_v15 = vld [vmem:[#allocation8 + $0x860] sm:$0xff] }
 0x57b   : > { %10616 = vmatpush1.bf16.msra.mxu0 %v10615_v33  ;;  %v4358_v33 = vld [vmem:[#allocation8 + $0x740] sm:$0xff] }
 0x57c   : > { %10618 = vmatprep.subr.bf16.mxu0 %v10617_v8  ;;  %v4371_v8 = vld [vmem:[#allocation8 + $0x7a8] sm:$0xff] }
 0x57e   : > { %6210 = vmatmul.mubr.f32.vlgmr.msra.gmra.mrb[136].mxu0 %v14682_v19  ;;  %v4364_v19 = vld [vmem:[#allocation8 + $0x770] sm:$0xff] }
 0x57f   : > { %6215 = vmatprep.mubr.f32.mxu0 %v15474_v44  ;;  %10620 = vmatpush1.bf16.msra.mxu0 %v10619_v23  ;;  %v4377_v44 = vld [vmem:[#allocation8 + $0x7d8] sm:$0xff]  ;;  %v10631_v0 = vpack.c.bf16 %v4364_v19, %v4358_v33  ;;  %v4406_v19 = vld [vmem:[#allocation8 + $0x8c0] sm:$0xff] }
 0x580   : > { %10622 = vmatprep.subr.bf16.mxu0 %v10621_v43  ;;  %v10633_v16 = vpack.c.bf16 %v4377_v44, %v4371_v8  ;;  %v4389_v23 = vld [vmem:[#allocation8 + $0x838] sm:$0xff]  ;;  %v4412_v8 = vld [vmem:[#allocation8 + $0x8f0] sm:$0xff]  ;;  %v4419_v44 = vld [vmem:[#allocation8 + $0x928] sm:$0xff] }
 0x581   : > { %v10637_v35 = vpack.c.bf16 %v4389_v23, %v4383_v40  ;;  %v4424_v40 = vld [vmem:[#allocation8 + $0x950] sm:$0xff]  ;;  %v4431_v23 = vld [vmem:[#allocation8 + $0x988] sm:$0xff] }
 0x582   : > { %6216 = vmatmul.mubr.f32.gmra.mrb[138].mxu0 %v15476_v49  ;;  %v4376_v49 = vld [vmem:[#allocation8 + $0x7d0] sm:$0xff] }
 0x583   : > { %6221 = vmatprep.mubr.f32.mxu0 %v15477_v54  ;;  %10624 = vmatpush1.bf16.msra.mxu0 %v10623_v53  ;;  %v10635_v43 = vpack.c.bf16 %v4376_v49, %v4370_v51  ;;  %v4401_v53 = vld [vmem:[#allocation8 + $0x898] sm:$0xff]  ;;  %v4418_v49 = vld [vmem:[#allocation8 + $0x920] sm:$0xff] }
 0x584   : > { %10626 = vmatprep.subr.bf16.mxu0 %v10625_v60  ;;  %v10639_v60 = vpack.c.bf16 %v4388_v61, %v4382_v11  ;;  %v10641_v55 = vpack.c.bf16 %v4401_v53, %v4395_v14  ;;  %v4430_v61 = vld [vmem:[#allocation8 + $0x980] sm:$0xff]  ;;  %v4436_v14 = vld [vmem:[#allocation8 + $0x9b0] sm:$0xff]  ;;  %v4443_v53 = vld [vmem:[#allocation8 + $0x9e8] sm:$0xff] }
 0x586   : > { %6222 = vmatmul.mubr.f32.gmra.mrb[140].mxu0 %v15478_v45 }
 0x587   : > { %6227 = vmatprep.mubr.f32.mxu0 %v15479_v58  ;;  %10628 = vmatpush1.bf16.msra.mxu0 %v10627_v6  ;;  %v4413_v6 = vld [vmem:[#allocation8 + $0x8f8] sm:$0xff] }
 0x588   : > { %10630 = vmatprep.subr.bf16.mxu0 %v10629_v28  ;;  %v10643_v28 = vpack.c.bf16 %v4400_v10, %v4394_v15  ;;  %v10645_v33 = vpack.c.bf16 %v4413_v6, %v4407_v20  ;;  %v4442_v10 = vld [vmem:[#allocation8 + $0x9e0] sm:$0xff]  ;;  %v4448_v20 = vld [vmem:[#allocation8 + $0xa10] sm:$0xff]  ;;  %v4455_v6 = vld [vmem:[#allocation8 + $0xa48] sm:$0xff] }
 0x58a   : > { %6228 = vmatmul.mubr.f32.gmra.mrb[142].mxu0 %v15480_v26 }
 0x58b   : > { %6233 = vmatprep.mubr.f32.mxu0 %v15481_v57  ;;  %10632 = vmatpush1.bf16.msra.mxu0 %v10631_v0  ;;  %v4425_v0 = vld [vmem:[#allocation8 + $0x958] sm:$0xff] }
 0x58c   : > { %10634 = vmatprep.subr.bf16.mxu0 %v10633_v16  ;;  %v10647_v16 = vpack.c.bf16 %v4412_v8, %v4406_v19  ;;  %v10649_v51 = vpack.c.bf16 %v4425_v0, %v4419_v44  ;;  %v4454_v8 = vld [vmem:[#allocation8 + $0xa40] sm:$0xff]  ;;  %v4460_v44 = vld [vmem:[#allocation8 + $0xa70] sm:$0xff]  ;;  %v4467_v0 = vld [vmem:[#allocation8 + $0xaa8] sm:$0xff] }
 0x58e   : > { %6234 = vmatmul.mubr.f32.gmra.mrb[144].mxu0 %v15482_v46 }
 0x58f   : > { %6239 = vmatprep.mubr.f32.mxu0 %v14396_v50  ;;  %10636 = vmatpush1.bf16.msra.mxu0 %v10635_v43  ;;  %v4437_v43 = vld [vmem:[#allocation8 + $0x9b8] sm:$0xff] }
 0x590   : > { %10638 = vmatprep.subr.bf16.mxu0 %v10637_v35  ;;  %v10651_v35 = vpack.c.bf16 %v4424_v40, %v4418_v49  ;;  %v10653_v11 = vpack.c.bf16 %v4437_v43, %v4431_v23  ;;  %v4466_v40 = vld [vmem:[#allocation8 + $0xaa0] sm:$0xff]  ;;  %v4472_v23 = vld [vmem:[#allocation8 + $0xad0] sm:$0xff]  ;;  %v4479_v43 = vld [vmem:[#allocation8 + $0xb08] sm:$0xff] }
 0x592   : > { %6240 = vmatmul.mubr.f32.gmra.mrb[146].mxu0 %v14398_v59 }
 0x593   : > { %6245 = vmatprep.mubr.f32.mxu0 %v14416_v18  ;;  %10640 = vmatpush1.bf16.msra.mxu0 %v10639_v60  ;;  %v4449_v60 = vld [vmem:[#allocation8 + $0xa18] sm:$0xff] }
 0x594   : > { %10642 = vmatprep.subr.bf16.mxu0 %v10641_v55  ;;  %v10655_v55 = vpack.c.bf16 %v4436_v14, %v4430_v61  ;;  %v10657_v15 = vpack.c.bf16 %v4449_v60, %v4443_v53  ;;  %v4484_v14 = vld [vmem:[#allocation8 + $0xb30] sm:$0xff]  ;;  %v4491_v53 = vld [vmem:[#allocation8 + $0xb68] sm:$0xff]  ;;  %v4497_v60 = vld [vmem:[#allocation8 + $0xb98] sm:$0xff] }
 0x596   : > { %6246 = vmatmul.mubr.f32.gmra.mrb[148].mxu0 %v14418_v24 }
 0x597   : > { %6251 = vmatprep.mubr.f32.mxu0 %v14444_v63  ;;  %10644 = vmatpush1.bf16.msra.mxu0 %v10643_v28  ;;  %v4461_v28 = vld [vmem:[#allocation8 + $0xa78] sm:$0xff] }
 0x598   : > { %10646 = vmatprep.subr.bf16.mxu0 %v10645_v33  ;;  %v10659_v33 = vpack.c.bf16 %v4448_v20, %v4442_v10  ;;  %v10661_v19 = vpack.c.bf16 %v4461_v28, %v4455_v6  ;;  %v4490_v10 = vld [vmem:[#allocation8 + $0xb60] sm:$0xff]  ;;  %v4496_v20 = vld [vmem:[#allocation8 + $0xb90] sm:$0xff]  ;;  %v4503_v6 = vld [vmem:[#allocation8 + $0xbc8] sm:$0xff] }
 0x599   : > { %v4509_v28 = vld [vmem:[#allocation8 + $0xbf8] sm:$0xff] }
 0x59a   : > { %6252 = vmatmul.mubr.f32.gmra.mrb[150].mxu0 %v14446_v29 }
 0x59b   : > { %6257 = vmatprep.mubr.f32.mxu0 %v14468_v48  ;;  %10648 = vmatpush1.bf16.msra.mxu0 %v10647_v16  ;;  %v4473_v16 = vld [vmem:[#allocation8 + $0xad8] sm:$0xff] }
 0x59c   : > { %10650 = vmatprep.subr.bf16.mxu0 %v10649_v51  ;;  %v10663_v51 = vpack.c.bf16 %v4460_v44, %v4454_v8  ;;  %v10665_v49 = vpack.c.bf16 %v4473_v16, %v4467_v0  ;;  %v4502_v8 = vld [vmem:[#allocation8 + $0xbc0] sm:$0xff]  ;;  %v4508_v44 = vld [vmem:[#allocation8 + $0xbf0] sm:$0xff]  ;;  %v6397_v0 = vld [vmem:[#allocation8 + $0x1808] sm:$0xff] }
 0x59d   : > { %v6403_v16 = vld [vmem:[#allocation8 + $0x1838] sm:$0xff] }
 0x59e   : > { %6258 = vmatmul.mubr.f32.gmra.mrb[152].mxu0 %v14470_v12 }
 0x59f   : > { %6263 = vmatprep.mubr.f32.mxu0 %v14490_v17  ;;  %10652 = vmatpush1.bf16.msra.mxu0 %v10651_v35  ;;  %v4485_v35 = vld [vmem:[#allocation8 + $0xb38] sm:$0xff] }
 0x5a0   : > { %10654 = vmatprep.subr.bf16.mxu0 %v10653_v11  ;;  %v10667_v11 = vpack.c.bf16 %v4472_v23, %v4466_v40  ;;  %v10669_v61 = vpack.c.bf16 %v4485_v35, %v4479_v43  ;;  %v6396_v40 = vld [vmem:[#allocation8 + $0x1800] sm:$0xff]  ;;  %v6402_v23 = vld [vmem:[#allocation8 + $0x1830] sm:$0xff]  ;;  %v6409_v43 = vld [vmem:[#allocation8 + $0x1868] sm:$0xff] }
 0x5a1   : > { %v6415_v35 = vld [vmem:[#allocation8 + $0x1898] sm:$0xff] }
 0x5a2   : > { %6264 = vmatmul.mubr.f32.gmra.mrb[154].mxu0 %v14492_v27 }
 0x5a3   : > { %10656 = vmatpush1.bf16.msra.mxu0 %v10655_v55  ;;  %6334 = vmatprep.mubr.f32.mxu0 %v14724_v37  ;;  %v4478_v37 = vld [vmem:[#allocation8 + $0xb00] sm:$0xff] }
 0x5a4   : > { %10658 = vmatprep.subr.bf16.mxu0 %v10657_v15  ;;  %v10671_v55 = vpack.c.bf16 %v4484_v14, %v4478_v37  ;;  %v10673_v15 = vpack.c.bf16 %v4497_v60, %v4491_v53  ;;  %v6408_v37 = vld [vmem:[#allocation8 + $0x1860] sm:$0xff]  ;;  %v6414_v14 = vld [vmem:[#allocation8 + $0x1890] sm:$0xff]  ;;  %v6421_v53 = vld [vmem:[#allocation8 + $0x18c8] sm:$0xff] }
 0x5a5   : > { %v6427_v60 = vld [vmem:[#allocation8 + $0x18f8] sm:$0xff] }
 0x5a7   : > { %10660 = vmatpush1.bf16.msra.mxu0 %v10659_v33  ;;  %v10675_v33 = vpack.c.bf16 %v4496_v20, %v4490_v10  ;;  %v6420_v10 = vld [vmem:[#allocation8 + $0x18c0] sm:$0xff]  ;;  %v6426_v20 = vld [vmem:[#allocation8 + $0x18f0] sm:$0xff] }
 0x5a8   : > { %10662 = vmatprep.subr.bf16.mxu0 %v10661_v19  ;;  %v10677_v19 = vpack.c.bf16 %v4509_v28, %v4503_v6  ;;  %v6433_v6 = vld [vmem:[#allocation8 + $0x1928] sm:$0xff]  ;;  %v6439_v28 = vld [vmem:[#allocation8 + $0x1958] sm:$0xff] }
 0x5ab   : > { %10664 = vmatpush1.bf16.msra.mxu0 %v10663_v51  ;;  %v10679_v51 = vpack.c.bf16 %v4508_v44, %v4502_v8  ;;  %v6432_v8 = vld [vmem:[#allocation8 + $0x1920] sm:$0xff]  ;;  %v6445_v44 = vld [vmem:[#allocation8 + $0x1988] sm:$0xff] }
 0x5ac   : > { %10666 = vmatprep.subr.bf16.mxu0 %v10665_v49  ;;  %v10681_v49 = vpack.c.bf16 %v6403_v16, %v6397_v0 }
 0x5af   : > { %10668 = vmatpush1.bf16.msra.mxu0 %v10667_v11  ;;  %v10683_v11 = vpack.c.bf16 %v6402_v23, %v6396_v40  ;;  %v6463_v40 = vld [vmem:[#allocation8 + $0x1a18] sm:$0xff] }
 0x5b0   : > { %10670 = vmatprep.subr.bf16.mxu0 %v10669_v61  ;;  %v10685_v61 = vpack.c.bf16 %v6415_v35, %v6409_v43  ;;  %v6456_v35 = vld [vmem:[#allocation8 + $0x19e0] sm:$0xff] }
 0x5b3   : > { %10672 = vmatpush1.bf16.msra.mxu0 %v10671_v55  ;;  %v10687_v55 = vpack.c.bf16 %v6414_v14, %v6408_v37  ;;  %v6475_v37 = vld [vmem:[#allocation8 + $0x1a78] sm:$0xff] }
 0x5b4   : > { %10674 = vmatprep.subr.bf16.mxu0 %v10673_v15  ;;  %v10689_v15 = vpack.c.bf16 %v6427_v60, %v6421_v53  ;;  %v6468_v60 = vld [vmem:[#allocation8 + $0x1a40] sm:$0xff] }
 0x5b7   : > { %10676 = vmatpush1.bf16.msra.mxu0 %v10675_v33  ;;  %v10691_v33 = vpack.c.bf16 %v6426_v20, %v6420_v10  ;;  %v6487_v10 = vld [vmem:[#allocation8 + $0x1ad8] sm:$0xff] }
 0x5b8   : > { %10678 = vmatprep.subr.bf16.mxu0 %v10677_v19  ;;  %v10693_v19 = vpack.c.bf16 %v6439_v28, %v6433_v6  ;;  %v6480_v28 = vld [vmem:[#allocation8 + $0x1aa0] sm:$0xff] }
 0x5bb   : > { %10680 = vmatpush1.bf16.msra.mxu0 %v10679_v51  ;;  %v6444_v51 = vld [vmem:[#allocation8 + $0x1980] sm:$0xff] }
 0x5bc   : > { %10682 = vmatprep.subr.bf16.mxu0 %v10681_v49  ;;  %v6457_v49 = vld [vmem:[#allocation8 + $0x19e8] sm:$0xff] }
 0x5bd   : > { %v10701_v43 = vpack.c.bf16 %v6463_v40, %v6457_v49  ;;  %v6504_v40 = vld [vmem:[#allocation8 + $0x1b60] sm:$0xff] }
 0x5be   : > { %6335 = vmatmul.mubr.f32.vlgmr.msra.gmra.mrb[136].mxu0 %v14730_v2  ;;  %v6438_v2 = vld [vmem:[#allocation8 + $0x1950] sm:$0xff] }
 0x5bf   : > { %6340 = vmatprep.mubr.f32.mxu0 %v14527_v34  ;;  %10684 = vmatpush1.bf16.msra.mxu0 %v10683_v11  ;;  %v6451_v34 = vld [vmem:[#allocation8 + $0x19b8] sm:$0xff]  ;;  %v10695_v0 = vpack.c.bf16 %v6438_v2, %v6432_v8  ;;  %v6462_v11 = vld [vmem:[#allocation8 + $0x1a10] sm:$0xff] }
 0x5c0   : > { %10686 = vmatprep.subr.bf16.mxu0 %v10685_v61  ;;  %v10697_v16 = vpack.c.bf16 %v6451_v34, %v6445_v44  ;;  %v6469_v61 = vld [vmem:[#allocation8 + $0x1a48] sm:$0xff]  ;;  %v10703_v14 = vpack.c.bf16 %v6462_v11, %v6456_v35  ;;  %v6499_v8 = vld [vmem:[#allocation8 + $0x1b38] sm:$0xff]  ;;  %v6492_v34 = vld [vmem:[#allocation8 + $0x1b00] sm:$0xff] }
 0x5c1   : > { %v10705_v53 = vpack.c.bf16 %v6475_v37, %v6469_v61  ;;  %v6523_v35 = vld [vmem:[#allocation8 + $0x1bf8] sm:$0xff]  ;;  %v6516_v37 = vld [vmem:[#allocation8 + $0x1bc0] sm:$0xff] }
 0x5c2   : > { %6341 = vmatmul.mubr.f32.gmra.mrb[138].mxu0 %v15493_v32  ;;  %v6450_v32 = vld [vmem:[#allocation8 + $0x19b0] sm:$0xff] }
 0x5c3   : > { %6346 = vmatprep.mubr.f32.mxu0 %v15483_v62  ;;  %10688 = vmatpush1.bf16.msra.mxu0 %v10687_v55  ;;  %v10699_v23 = vpack.c.bf16 %v6450_v32, %v6444_v51  ;;  %v6474_v55 = vld [vmem:[#allocation8 + $0x1a70] sm:$0xff]  ;;  %v6511_v51 = vld [vmem:[#allocation8 + $0x1b98] sm:$0xff] }
 0x5c4   : > { %10690 = vmatprep.subr.bf16.mxu0 %v10689_v15  ;;  %v6481_v15 = vld [vmem:[#allocation8 + $0x1aa8] sm:$0xff]  ;;  %v10707_v20 = vpack.c.bf16 %v6474_v55, %v6468_v60  ;;  %v6535_v60 = vld [vmem:[#allocation8 + $0x1c58] sm:$0xff] }
 0x5c5   : > { %v10709_v6 = vpack.c.bf16 %v6487_v10, %v6481_v15  ;;  %v6528_v10 = vld [vmem:[#allocation8 + $0x1c20] sm:$0xff] }
 0x5c6   : > { %6347 = vmatmul.mubr.f32.gmra.mrb[140].mxu0 %v15484_v22 }
 0x5c7   : > { %6352 = vmatprep.mubr.f32.mxu0 %v15485_v56  ;;  %10692 = vmatpush1.bf16.msra.mxu0 %v10691_v33  ;;  %v6486_v33 = vld [vmem:[#allocation8 + $0x1ad0] sm:$0xff] }
 0x5c8   : > { %10694 = vmatprep.subr.bf16.mxu0 %v10693_v19  ;;  %v6493_v19 = vld [vmem:[#allocation8 + $0x1b08] sm:$0xff]  ;;  %v10711_v2 = vpack.c.bf16 %v6486_v33, %v6480_v28  ;;  %v6547_v28 = vld [vmem:[#allocation8 + $0x1cb8] sm:$0xff] }
 0x5c9   : > { %v10713_v44 = vpack.c.bf16 %v6499_v8, %v6493_v19  ;;  %v6540_v8 = vld [vmem:[#allocation8 + $0x1c80] sm:$0xff] }
 0x5ca   : > { %6353 = vmatmul.mubr.f32.gmra.mrb[142].mxu0 %v15494_v1 }
 0x5cb   : > { %6358 = vmatprep.mubr.f32.mxu0 %v15495_v4  ;;  %10696 = vmatpush1.bf16.msra.mxu0 %v10695_v0  ;;  %v6498_v0 = vld [vmem:[#allocation8 + $0x1b30] sm:$0xff] }
 0x5cc   : > { %10698 = vmatprep.subr.bf16.mxu0 %v10697_v16  ;;  %v6505_v16 = vld [vmem:[#allocation8 + $0x1b68] sm:$0xff]  ;;  %v10715_v32 = vpack.c.bf16 %v6498_v0, %v6492_v34  ;;  %v6559_v34 = vld [vmem:[#allocation8 + $0x1d18] sm:$0xff] }
 0x5cd   : > { %v10717_v49 = vpack.c.bf16 %v6511_v51, %v6505_v16  ;;  %v6552_v51 = vld [vmem:[#allocation8 + $0x1ce0] sm:$0xff] }
 0x5ce   : > { %6359 = vmatmul.mubr.f32.gmra.mrb[144].mxu0 %v15496_v36 }
 0x5cf   : > { %6364 = vmatprep.mubr.f32.mxu0 %v14590_v47  ;;  %10700 = vmatpush1.bf16.msra.mxu0 %v10699_v23  ;;  %v6510_v23 = vld [vmem:[#allocation8 + $0x1b90] sm:$0xff] }
 0x5d0   : > { %10702 = vmatprep.subr.bf16.mxu0 %v10701_v43  ;;  %v6517_v43 = vld [vmem:[#allocation8 + $0x1bc8] sm:$0xff]  ;;  %v10719_v11 = vpack.c.bf16 %v6510_v23, %v6504_v40  ;;  %v6571_v40 = vld [vmem:[#allocation8 + $0x1d78] sm:$0xff] }
 0x5d1   : > { %v10721_v61 = vpack.c.bf16 %v6523_v35, %v6517_v43  ;;  %v6564_v35 = vld [vmem:[#allocation8 + $0x1d40] sm:$0xff] }
 0x5d2   : > { %6365 = vmatmul.mubr.f32.gmra.mrb[146].mxu0 %v15488_v13 }
 0x5d3   : > { %6370 = vmatprep.mubr.f32.mxu0 %v15489_v5  ;;  %10704 = vmatpush1.bf16.msra.mxu0 %v10703_v14  ;;  %v6522_v14 = vld [vmem:[#allocation8 + $0x1bf0] sm:$0xff] }
 0x5d4   : > { %10706 = vmatprep.subr.bf16.mxu0 %v10705_v53  ;;  %v6529_v53 = vld [vmem:[#allocation8 + $0x1c28] sm:$0xff]  ;;  %v10723_v55 = vpack.c.bf16 %v6522_v14, %v6516_v37  ;;  %v6583_v37 = vld [vmem:[#allocation8 + $0x1dd8] sm:$0xff] }
 0x5d5   : > { %v10725_v15 = vpack.c.bf16 %v6535_v60, %v6529_v53  ;;  %v6576_v60 = vld [vmem:[#allocation8 + $0x1da0] sm:$0xff] }
 0x5d6   : > { %6371 = vmatmul.mubr.f32.gmra.mrb[148].mxu0 %v15490_v9 }
 0x5d7   : > { %6376 = vmatprep.mubr.f32.mxu0 %v14618_v25  ;;  %10708 = vmatpush1.bf16.msra.mxu0 %v10707_v20  ;;  %v6534_v20 = vld [vmem:[#allocation8 + $0x1c50] sm:$0xff] }
 0x5d8   : > { %10710 = vmatprep.subr.bf16.mxu0 %v10709_v6  ;;  %v6541_v6 = vld [vmem:[#allocation8 + $0x1c88] sm:$0xff]  ;;  %v10727_v33 = vpack.c.bf16 %v6534_v20, %v6528_v10  ;;  %v6595_v10 = vld [vmem:[#allocation8 + $0x1e38] sm:$0xff] }
 0x5d9   : > { %v10729_v19 = vpack.c.bf16 %v6547_v28, %v6541_v6  ;;  %v6588_v28 = vld [vmem:[#allocation8 + $0x1e00] sm:$0xff] }
 0x5da   : > { %6377 = vmatmul.mubr.f32.gmra.mrb[150].mxu0 %v14620_v31 }
 0x5db   : > { %6382 = vmatprep.mubr.f32.mxu0 %v14632_v52  ;;  %10712 = vmatpush1.bf16.msra.mxu0 %v10711_v2  ;;  %v6546_v2 = vld [vmem:[#allocation8 + $0x1cb0] sm:$0xff] }
 0x5dc   : > { %10714 = vmatprep.subr.bf16.mxu0 %v10713_v44  ;;  %v6553_v44 = vld [vmem:[#allocation8 + $0x1ce8] sm:$0xff]  ;;  %v10731_v0 = vpack.c.bf16 %v6546_v2, %v6540_v8  ;;  %v6607_v8 = vld [vmem:[#allocation8 + $0x1e98] sm:$0xff] }
 0x5dd   : > { %v10733_v16 = vpack.c.bf16 %v6559_v34, %v6553_v44  ;;  %v6600_v34 = vld [vmem:[#allocation8 + $0x1e60] sm:$0xff] }
 0x5de   : > { %6383 = vmatmul.mubr.f32.gmra.mrb[152].mxu0 %v14634_v3 }
 0x5df   : > { %6388 = vmatprep.mubr.f32.mxu0 %v14646_v7  ;;  %10716 = vmatpush1.bf16.msra.mxu0 %v10715_v32  ;;  %v6558_v32 = vld [vmem:[#allocation8 + $0x1d10] sm:$0xff] }
 0x5e0   : > { %10718 = vmatprep.subr.bf16.mxu0 %v10717_v49  ;;  %v6565_v49 = vld [vmem:[#allocation8 + $0x1d48] sm:$0xff]  ;;  %v10735_v23 = vpack.c.bf16 %v6558_v32, %v6552_v51  ;;  %v6619_v51 = vld [vmem:[#allocation8 + $0x1ef8] sm:$0xff] }
 0x5e1   : > { %v10737_v43 = vpack.c.bf16 %v6571_v40, %v6565_v49  ;;  %v6612_v40 = vld [vmem:[#allocation8 + $0x1ec0] sm:$0xff] }
 0x5e2   : > { %6389 = vmatmul.mubr.f32.gmra.mrb[154].mxu0 %v14648_v41 }
 0x5e3   : > { %10720 = vmatpush1.bf16.msra.mxu0 %v10719_v11  ;;  %6844 = vmatprep.mubr.f32.mxu0 %v15477_v54  ;;  %v6570_v11 = vld [vmem:[#allocation8 + $0x1d70] sm:$0xff] }
 0x5e4   : > { %10722 = vmatprep.subr.bf16.mxu0 %v10721_v61  ;;  %v6577_v61 = vld [vmem:[#allocation8 + $0x1da8] sm:$0xff]  ;;  %v10739_v14 = vpack.c.bf16 %v6570_v11, %v6564_v35  ;;  %v6631_v35 = vld [vmem:[#allocation8 + $0x1f58] sm:$0xff] }
 0x5e5   : > { %v10741_v53 = vpack.c.bf16 %v6583_v37, %v6577_v61  ;;  %v6624_v37 = vld [vmem:[#allocation8 + $0x1f20] sm:$0xff] }
 0x5e7   : > { %10724 = vmatpush1.bf16.msra.mxu0 %v10723_v55  ;;  %v6582_v55 = vld [vmem:[#allocation8 + $0x1dd0] sm:$0xff] }
 0x5e8   : > { %10726 = vmatprep.subr.bf16.mxu0 %v10725_v15  ;;  %v6589_v15 = vld [vmem:[#allocation8 + $0x1e08] sm:$0xff]  ;;  %v10743_v20 = vpack.c.bf16 %v6582_v55, %v6576_v60  ;;  %v6643_v60 = vld [vmem:[#allocation8 + $0x1fb8] sm:$0xff] }
 0x5e9   : > { %v10745_v6 = vpack.c.bf16 %v6595_v10, %v6589_v15  ;;  %v6636_v10 = vld [vmem:[#allocation8 + $0x1f80] sm:$0xff] }
 0x5eb   : > { %10728 = vmatpush1.bf16.msra.mxu0 %v10727_v33  ;;  %v6594_v33 = vld [vmem:[#allocation8 + $0x1e30] sm:$0xff] }
 0x5ec   : > { %10730 = vmatprep.subr.bf16.mxu0 %v10729_v19  ;;  %v6601_v19 = vld [vmem:[#allocation8 + $0x1e68] sm:$0xff]  ;;  %v10747_v2 = vpack.c.bf16 %v6594_v33, %v6588_v28  ;;  %v6655_v28 = vld [vmem:[#allocation8 + $0x2018] sm:$0xff] }
 0x5ed   : > { %v10749_v44 = vpack.c.bf16 %v6607_v8, %v6601_v19  ;;  %v6648_v8 = vld [vmem:[#allocation8 + $0x1fe0] sm:$0xff] }
 0x5ef   : > { %10732 = vmatpush1.bf16.msra.mxu0 %v10731_v0  ;;  %v6606_v0 = vld [vmem:[#allocation8 + $0x1e90] sm:$0xff] }
 0x5f0   : > { %10734 = vmatprep.subr.bf16.mxu0 %v10733_v16  ;;  %v6613_v16 = vld [vmem:[#allocation8 + $0x1ec8] sm:$0xff]  ;;  %v10751_v32 = vpack.c.bf16 %v6606_v0, %v6600_v34  ;;  %v6667_v34 = vld [vmem:[#allocation8 + $0x2078] sm:$0xff] }
 0x5f1   : > { %v10753_v49 = vpack.c.bf16 %v6619_v51, %v6613_v16  ;;  %v6660_v51 = vld [vmem:[#allocation8 + $0x2040] sm:$0xff] }
 0x5f3   : > { %10736 = vmatpush1.bf16.msra.mxu0 %v10735_v23  ;;  %v6618_v23 = vld [vmem:[#allocation8 + $0x1ef0] sm:$0xff] }
 0x5f4   : > { %10738 = vmatprep.subr.bf16.mxu0 %v10737_v43  ;;  %v6625_v43 = vld [vmem:[#allocation8 + $0x1f28] sm:$0xff]  ;;  %v10755_v11 = vpack.c.bf16 %v6618_v23, %v6612_v40  ;;  %v6679_v23 = vld [vmem:[#allocation8 + $0x20d8] sm:$0xff] }
 0x5f5   : > { %v10757_v61 = vpack.c.bf16 %v6631_v35, %v6625_v43  ;;  %v6673_v40 = vld [vmem:[#allocation8 + $0x20a8] sm:$0xff] }
 0x5f7   : > { %10740 = vmatpush1.bf16.msra.mxu0 %v10739_v14  ;;  %v6630_v14 = vld [vmem:[#allocation8 + $0x1f50] sm:$0xff] }
 0x5f8   : > { %10742 = vmatprep.subr.bf16.mxu0 %v10741_v53  ;;  %v6637_v53 = vld [vmem:[#allocation8 + $0x1f88] sm:$0xff]  ;;  %v10759_v55 = vpack.c.bf16 %v6630_v14, %v6624_v37  ;;  %v6678_v37 = vld [vmem:[#allocation8 + $0x20d0] sm:$0xff] }
 0x5f9   : > { %v10761_v15 = vpack.c.bf16 %v6643_v60, %v6637_v53  ;;  %v6685_v53 = vld [vmem:[#allocation8 + $0x2108] sm:$0xff]  ;;  %v6691_v60 = vld [vmem:[#allocation8 + $0x2138] sm:$0xff] }
 0x5fb   : > { %10744 = vmatpush1.bf16.msra.mxu0 %v10743_v20  ;;  %v6642_v20 = vld [vmem:[#allocation8 + $0x1fb0] sm:$0xff] }
 0x5fc   : > { %10746 = vmatprep.subr.bf16.mxu0 %v10745_v6  ;;  %v6649_v6 = vld [vmem:[#allocation8 + $0x1fe8] sm:$0xff]  ;;  %v10763_v33 = vpack.c.bf16 %v6642_v20, %v6636_v10  ;;  %v10777_v10 = vpack.c.bf16 %v6691_v60, %v6685_v53  ;;  %v6684_v20 = vld [vmem:[#allocation8 + $0x2100] sm:$0xff]  ;;  %v6727_v60 = vld [vmem:[#allocation8 + $0x2258] sm:$0xff] }
 0x5fd   : > { %v10765_v19 = vpack.c.bf16 %v6655_v28, %v6649_v6  ;;  %v6690_v6 = vld [vmem:[#allocation8 + $0x2130] sm:$0xff]  ;;  %v6721_v53 = vld [vmem:[#allocation8 + $0x2228] sm:$0xff] }
 0x5fe   : > { %6845 = vmatmul.mubr.f32.vlgmr.msra.gmra.mrb[116].mxu0 %v15478_v45 }
 0x5ff   : > { %6850 = vmatprep.mubr.f32.mxu0 %v15479_v58  ;;  %10748 = vmatpush1.bf16.msra.mxu0 %v10747_v2  ;;  %v6654_v2 = vld [vmem:[#allocation8 + $0x2010] sm:$0xff] }
 0x600   : > { %10750 = vmatprep.subr.bf16.mxu0 %v10749_v44  ;;  %v6661_v44 = vld [vmem:[#allocation8 + $0x2048] sm:$0xff]  ;;  %v10767_v0 = vpack.c.bf16 %v6654_v2, %v6648_v8  ;;  %v10779_v2 = vpack.c.bf16 %v6690_v6, %v6684_v20  ;;  %v10789_v20 = vpack.c.bf16 %v6727_v60, %v6721_v53  ;;  %v6720_v6 = vld [vmem:[#allocation8 + $0x2220] sm:$0xff] }
 0x601   : > { %v10769_v16 = vpack.c.bf16 %v6667_v34, %v6661_v44  ;;  %v6696_v34 = vld [vmem:[#allocation8 + $0x2160] sm:$0xff] }
 0x602   : > { %6851 = vmatmul.mubr.f32.gmra.mrb[118].mxu0 %v15480_v26  ;;  %v6744_v60 = vld [vmem:[#allocation8 + $0x22e0] sm:$0xff] }
 0x603   : > { %6856 = vmatprep.mubr.f32.mxu0 %v15481_v57  ;;  %10752 = vmatpush1.bf16.msra.mxu0 %v10751_v32  ;;  %v6666_v32 = vld [vmem:[#allocation8 + $0x2070] sm:$0xff] }
 0x604   : > { %10754 = vmatprep.subr.bf16.mxu0 %v10753_v49  ;;  %v10771_v35 = vpack.c.bf16 %v6666_v32, %v6660_v51  ;;  %v6709_v51 = vld [vmem:[#allocation8 + $0x21c8] sm:$0xff]  ;;  %v6715_v32 = vld [vmem:[#allocation8 + $0x21f8] sm:$0xff] }
 0x606   : > { %6857 = vmatmul.mubr.f32.gmra.mrb[120].mxu0 %v15482_v46 }
 0x607   : > { %6862 = vmatprep.mubr.f32.mxu0 %v14396_v50  ;;  %10756 = vmatpush1.bf16.msra.mxu0 %v10755_v11  ;;  %v10773_v11 = vpack.c.bf16 %v6679_v23, %v6673_v40 }
 0x608   : > { %10758 = vmatprep.subr.bf16.mxu0 %v10757_v61  ;;  %v6672_v61 = vld [vmem:[#allocation8 + $0x20a0] sm:$0xff] }
 0x60a   : > { %6863 = vmatmul.mubr.f32.gmra.mrb[122].mxu0 %v14398_v59 }
 0x60b   : > { %6868 = vmatprep.mubr.f32.mxu0 %v14416_v18  ;;  %10760 = vmatpush1.bf16.msra.mxu0 %v10759_v55 }
 0x60c   : > { %10762 = vmatprep.subr.bf16.mxu0 %v10761_v15  ;;  %v10775_v15 = vpack.c.bf16 %v6678_v37, %v6672_v61  ;;  %v6714_v61 = vld [vmem:[#allocation8 + $0x21f0] sm:$0xff] }
 0x60e   : > { %6869 = vmatmul.mubr.f32.gmra.mrb[124].mxu0 %v14418_v24 }
 0x60f   : > { %6874 = vmatprep.mubr.f32.mxu0 %v14444_v63  ;;  %10764 = vmatpush1.bf16.msra.mxu0 %v10763_v33  ;;  %v6697_v33 = vld [vmem:[#allocation8 + $0x2168] sm:$0xff] }
 0x610   : > { %10766 = vmatprep.subr.bf16.mxu0 %v10765_v19  ;;  %v6703_v19 = vld [vmem:[#allocation8 + $0x2198] sm:$0xff] }
 0x611   : > { %v14917_v49 = vpop.f32.mrb[134].mxu1  ;;  %v10781_v44 = vpack.c.bf16 %v6703_v19, %v6697_v33  ;;  %v6726_v33 = vld [vmem:[#allocation8 + $0x2250] sm:$0xff] }
 0x612   : > { %15506 = vst [vmem:[#allocation51_spill] sm:$0xff] %v14917_v49  ;;  %6875 = vmatmul.mubr.f32.gmra.mrb[126].mxu0 %v14446_v29  ;;  %v14920_v43 = vpop.f32.mrb[135].mxu1 }
 0x613   : > { %6880 = vmatprep.mubr.f32.mxu0 %v14468_v48  ;;  %10768 = vmatpush1.bf16.msra.mxu0 %v10767_v0  ;;  %v6702_v0 = vld [vmem:[#allocation8 + $0x2190] sm:$0xff] }
 0x614   : > { %10770 = vmatprep.subr.bf16.mxu0 %v10769_v16  ;;  %v10783_v23 = vpack.c.bf16 %v6702_v0, %v6696_v34  ;;  %v10791_v0 = vpack.c.bf16 %v6726_v33, %v6720_v6  ;;  %v6763_v6 = vld [vmem:[#allocation8 + $0x2378] sm:$0xff] }
 0x615   : > { %v14923_v14 = vpop.f32.mrb[136].mxu1 }
 0x616   : > { %15507 = vst [vmem:[#allocation50_spill] sm:$0xff] %v14923_v14  ;;  %6881 = vmatmul.mubr.f32.gmra.mrb[128].mxu0 %v14470_v12  ;;  %v14926_v55 = vpop.f32.mrb[137].mxu1 }
 0x617   : > { %6886 = vmatprep.mubr.f32.mxu0 %v14490_v17  ;;  %10772 = vmatpush1.bf16.msra.mxu0 %v10771_v35  ;;  %v10785_v35 = vpack.c.bf16 %v6715_v32, %v6709_v51  ;;  %v6732_v32 = vld [vmem:[#allocation8 + $0x2280] sm:$0xff] }
 0x618   : > { %10774 = vmatprep.subr.bf16.mxu0 %v10773_v11  ;;  %v6708_v11 = vld [vmem:[#allocation8 + $0x21c0] sm:$0xff] }
 0x619   : > { %v14929_v28 = vpop.f32.mrb[138].mxu1 }
 0x61a   : > { %15508 = vst [vmem:[#allocation53_spill] sm:$0xff] %v14929_v28  ;;  %6887 = vmatmul.mubr.f32.gmra.mrb[130].mxu0 %v14492_v27  ;;  %v14932_v8 = vpop.f32.mrb[139].mxu1 }
 0x61b   : > { %6892 = vmatprep.mubr.f32.mxu0 %v14519_v30  ;;  %10776 = vmatpush1.bf16.msra.mxu0 %v10775_v15 }
 0x61c   : > { %10778 = vmatprep.subr.bf16.mxu0 %v10777_v10  ;;  %v10787_v10 = vpack.c.bf16 %v6714_v61, %v6708_v11  ;;  %v6751_v11 = vld [vmem:[#allocation8 + $0x2318] sm:$0xff] }
 0x61d   : > { %v14935_v16 = vpop.f32.mrb[140].mxu1 }
 0x61e   : > { %15509 = vst [vmem:[#allocation52_spill] sm:$0xff] %v14935_v16  ;;  %6893 = vmatmul.mubr.f32.gmra.mrb[132].mxu0 %v14523_v38  ;;  %v14938_v40 = vpop.f32.mrb[141].mxu1  ;;  %v6745_v16 = vld [vmem:[#allocation8 + $0x22e8] sm:$0xff] }
 0x61f   : > { %6898 = vmatprep.mubr.f32.mxu0 %v14809_v42  ;;  %10780 = vmatpush1.bf16.msra.mxu0 %v10779_v2  ;;  %v6733_v2 = vld [vmem:[#allocation8 + $0x2288] sm:$0xff]  ;;  %v10797_v53 = vpack.c.bf16 %v6751_v11, %v6745_v16  ;;  %v6768_v11 = vld [vmem:[#allocation8 + $0x23a0] sm:$0xff] }
 0x620   : > { %10782 = vmatprep.subr.bf16.mxu0 %v10781_v44  ;;  %v6739_v44 = vld [vmem:[#allocation8 + $0x22b8] sm:$0xff] }
 0x621   : > { %v14941_v37 = vpop.f32.mrb[142].mxu1  ;;  %v10793_v51 = vpack.c.bf16 %v6739_v44, %v6733_v2  ;;  %v6756_v44 = vld [vmem:[#allocation8 + $0x2340] sm:$0xff] }
 0x622   : > { %15510 = vst [vmem:[#allocation54_spill] sm:$0xff] %v14941_v37  ;;  %6899 = vmatmul.mubr.f32.gmra.mrb[134].mxu0 %v14814_v39  ;;  %v14944_v15 = vpop.f32.mrb[143].mxu1  ;;  %v6738_v37 = vld [vmem:[#allocation8 + $0x22b0] sm:$0xff] }
 0x623   : > { %10784 = vmatpush1.bf16.msra.mxu0 %v10783_v23  ;;  %6969 = vmatprep.mubr.f32.mxu0 %v15483_v62  ;;  %v10795_v61 = vpack.c.bf16 %v6738_v37, %v6732_v32  ;;  %v6775_v37 = vld [vmem:[#allocation8 + $0x23d8] sm:$0xff] }
 0x624   : > { %10786 = vmatprep.subr.bf16.mxu0 %v10785_v35 }
 0x625   : > { %v14947_v19 = vpop.f32.mrb[144].mxu1 }
 0x626   : > { %15511 = vst [vmem:[#allocation55_spill] sm:$0xff] %v14947_v19  ;;  %v14949_v34 = vpop.f32.mrb[145].mxu1  ;;  %v6750_v19 = vld [vmem:[#allocation8 + $0x2310] sm:$0xff] }
 0x627   : > { %15512 = vst [vmem:[#allocation56_spill] sm:$0xff] %v14949_v34  ;;  %10788 = vmatpush1.bf16.msra.mxu0 %v10787_v10  ;;  %v6757_v10 = vld [vmem:[#allocation8 + $0x2348] sm:$0xff]  ;;  %v10799_v33 = vpack.c.bf16 %v6750_v19, %v6744_v60  ;;  %v6407_v19 = vld [vmem:[#allocation8 + $0x1858] sm:$0xff] }
 0x628   : > { %10790 = vmatprep.subr.bf16.mxu0 %v10789_v20  ;;  %v10801_v2 = vpack.c.bf16 %v6763_v6, %v6757_v10  ;;  %v6400_v6 = vld [vmem:[#allocation8 + $0x1820] sm:$0xff] }
 0x629   : > { %v14951_v23 = vpop.f32.mrb[146].mxu1 }
 0x62a   : > { %15513 = vst [vmem:[#allocation57_spill] sm:$0xff] %v14951_v23  ;;  %v14953_v35 = vpop.f32.mrb[147].mxu1  ;;  %v6762_v23 = vld [vmem:[#allocation8 + $0x2370] sm:$0xff] }
 0x62b   : > { %15514 = vst [vmem:[#allocation58_spill] sm:$0xff] %v14953_v35  ;;  %10792 = vmatpush1.bf16.msra.mxu0 %v10791_v0  ;;  %v6769_v0 = vld [vmem:[#allocation8 + $0x23a8] sm:$0xff]  ;;  %v10803_v16 = vpack.c.bf16 %v6762_v23, %v6756_v44  ;;  %v6418_v44 = vld [vmem:[#allocation8 + $0x18b0] sm:$0xff]  ;;  %v6551_v35 = vld [vmem:[#allocation8 + $0x1cd8] sm:$0xff] }
 0x62c   : > { %10794 = vmatprep.subr.bf16.mxu0 %v10793_v51  ;;  %v10805_v32 = vpack.c.bf16 %v6775_v37, %v6769_v0  ;;  %v6425_v0 = vld [vmem:[#allocation8 + $0x18e8] sm:$0xff]  ;;  %v6431_v37 = vld [vmem:[#allocation8 + $0x1918] sm:$0xff] }
 0x62d   : > { %v14955_v28 = vpop.f32.mrb[148].mxu1 }
 0x62e   : > { %15515 = vst [vmem:[#allocation59_spill] sm:$0xff] %v14955_v28  ;;  %v14957_v20 = vpop.f32.mrb[149].mxu1  ;;  %v6774_v28 = vld [vmem:[#allocation8 + $0x23d0] sm:$0xff] }
 0x62f   : > { %15516 = vst [vmem:[#allocation60_spill] sm:$0xff] %v14957_v20  ;;  %10796 = vmatpush1.bf16.msra.mxu0 %v10795_v61  ;;  %v6401_v61 = vld [vmem:[#allocation8 + $0x1828] sm:$0xff]  ;;  %v10807_v60 = vpack.c.bf16 %v6774_v28, %v6768_v11  ;;  %v6430_v11 = vld [vmem:[#allocation8 + $0x1910] sm:$0xff] }
 0x630   : > { %10798 = vmatprep.subr.bf16.mxu0 %v10797_v53  ;;  %v10937_v10 = vpack.c.bf16 %v6407_v19, %v6401_v61  ;;  %v6413_v20 = vld [vmem:[#allocation8 + $0x1888] sm:$0xff]  ;;  %v6443_v19 = vld [vmem:[#allocation8 + $0x1978] sm:$0xff] }
 0x631   : > { %v14959_v14 = vpop.f32.mrb[150].mxu1  ;;  %v6437_v61 = vld [vmem:[#allocation8 + $0x1948] sm:$0xff] }
 0x632   : > { %15517 = vst [vmem:[#allocation61_spill] sm:$0xff] %v14959_v14  ;;  %v14961_v51 = vpop.f32.mrb[151].mxu1  ;;  %v6406_v14 = vld [vmem:[#allocation8 + $0x1850] sm:$0xff] }
 0x633   : > { %15518 = vst [vmem:[#allocation64_spill] sm:$0xff] %v14961_v51  ;;  %10800 = vmatpush1.bf16.msra.mxu0 %v10799_v33  ;;  %v6419_v51 = vld [vmem:[#allocation8 + $0x18b8] sm:$0xff]  ;;  %v10939_v23 = vpack.c.bf16 %v6406_v14, %v6400_v6 }
 0x634   : > { %10802 = vmatprep.subr.bf16.mxu0 %v10801_v2  ;;  %v10941_v33 = vpack.c.bf16 %v6419_v51, %v6413_v20  ;;  %v6412_v2 = vld [vmem:[#allocation8 + $0x1880] sm:$0xff]  ;;  %v10949_v20 = vpack.c.bf16 %v6443_v19, %v6437_v61  ;;  %v6455_v6 = vld [vmem:[#allocation8 + $0x19d8] sm:$0xff]  ;;  %v6473_v61 = vld [vmem:[#allocation8 + $0x1a68] sm:$0xff] }
 0x635   : > { %v14963_v49 = vpop.f32.mrb[152].mxu1  ;;  %v10943_v28 = vpack.c.bf16 %v6418_v44, %v6412_v2  ;;  %v6436_v51 = vld [vmem:[#allocation8 + $0x1940] sm:$0xff]  ;;  %v6454_v44 = vld [vmem:[#allocation8 + $0x19d0] sm:$0xff]  ;;  %v6479_v19 = vld [vmem:[#allocation8 + $0x1a98] sm:$0xff] }
 0x636   : > { %15519 = vst [vmem:[#allocation65_spill] sm:$0xff] %v14963_v49  ;;  %v14965_v53 = vpop.f32.mrb[153].mxu1  ;;  %v6448_v2 = vld [vmem:[#allocation8 + $0x19a0] sm:$0xff]  ;;  %v6533_v49 = vld [vmem:[#allocation8 + $0x1c48] sm:$0xff] }
 0x637   : > { %15520 = vst [vmem:[#allocation66_spill] sm:$0xff] %v14965_v53  ;;  %10804 = vmatpush1.bf16.msra.mxu0 %v10803_v16  ;;  %v10945_v16 = vpack.c.bf16 %v6431_v37, %v6425_v0  ;;  %v6461_v0 = vld [vmem:[#allocation8 + $0x1a08] sm:$0xff]  ;;  %v6467_v37 = vld [vmem:[#allocation8 + $0x1a38] sm:$0xff] }
 0x638   : > { %10806 = vmatprep.subr.bf16.mxu0 %v10805_v32  ;;  %v6424_v32 = vld [vmem:[#allocation8 + $0x18e0] sm:$0xff]  ;;  %v6539_v53 = vld [vmem:[#allocation8 + $0x1c78] sm:$0xff] }
 0x639   : > { %v10947_v14 = vpack.c.bf16 %v6430_v11, %v6424_v32  ;;  %v6460_v32 = vld [vmem:[#allocation8 + $0x1a00] sm:$0xff]  ;;  %v6466_v11 = vld [vmem:[#allocation8 + $0x1a30] sm:$0xff] }
 0x63b   : > { %10808 = vmatpush1.bf16.msra.mxu0 %v10807_v60  ;;  %v6442_v60 = vld [vmem:[#allocation8 + $0x1970] sm:$0xff] }
 0x63c   : > { %10938 = vmatprep.subr.bf16.mxu0 %v10937_v10  ;;  %v6449_v10 = vld [vmem:[#allocation8 + $0x19a8] sm:$0xff] }
 0x63e   : > { %6970 = vmatmul.mubr.f32.vlgmr.msra.gmra.mrb[116].mxu0 %v15484_v22 }
 0x63f   : > { %6975 = vmatprep.mubr.f32.mxu0 %v15485_v56  ;;  %10940 = vmatpush1.bf16.msra.mxu0 %v10939_v23  ;;  %v10951_v23 = vpack.c.bf16 %v6442_v60, %v6436_v51  ;;  %v6472_v51 = vld [vmem:[#allocation8 + $0x1a60] sm:$0xff]  ;;  %v6478_v60 = vld [vmem:[#allocation8 + $0x1a90] sm:$0xff] }
 0x640   : > { %10942 = vmatprep.subr.bf16.mxu0 %v10941_v33  ;;  %v10953_v33 = vpack.c.bf16 %v6455_v6, %v6449_v10  ;;  %v6485_v10 = vld [vmem:[#allocation8 + $0x1ac8] sm:$0xff]  ;;  %v6491_v6 = vld [vmem:[#allocation8 + $0x1af8] sm:$0xff] }
 0x642   : > { %6976 = vmatmul.mubr.f32.gmra.mrb[118].mxu0 %v15494_v1 }
 0x643   : > { %6981 = vmatprep.mubr.f32.mxu0 %v15495_v4  ;;  %10944 = vmatpush1.bf16.msra.mxu0 %v10943_v28  ;;  %v10955_v28 = vpack.c.bf16 %v6454_v44, %v6448_v2  ;;  %v6484_v2 = vld [vmem:[#allocation8 + $0x1ac0] sm:$0xff]  ;;  %v6490_v44 = vld [vmem:[#allocation8 + $0x1af0] sm:$0xff] }
 0x644   : > { %10946 = vmatprep.subr.bf16.mxu0 %v10945_v16  ;;  %v10957_v16 = vpack.c.bf16 %v6467_v37, %v6461_v0  ;;  %v6497_v0 = vld [vmem:[#allocation8 + $0x1b28] sm:$0xff]  ;;  %v6503_v37 = vld [vmem:[#allocation8 + $0x1b58] sm:$0xff] }
 0x646   : > { %6982 = vmatmul.mubr.f32.gmra.mrb[120].mxu0 %v15496_v36 }
 0x647   : > { %6987 = vmatprep.mubr.f32.mxu0 %v14590_v47  ;;  %10948 = vmatpush1.bf16.msra.mxu0 %v10947_v14  ;;  %v10959_v14 = vpack.c.bf16 %v6466_v11, %v6460_v32  ;;  %v6496_v32 = vld [vmem:[#allocation8 + $0x1b20] sm:$0xff]  ;;  %v6502_v11 = vld [vmem:[#allocation8 + $0x1b50] sm:$0xff] }
 0x648   : > { %10950 = vmatprep.subr.bf16.mxu0 %v10949_v20  ;;  %v10961_v20 = vpack.c.bf16 %v6479_v19, %v6473_v61  ;;  %v6509_v61 = vld [vmem:[#allocation8 + $0x1b88] sm:$0xff]  ;;  %v6515_v19 = vld [vmem:[#allocation8 + $0x1bb8] sm:$0xff] }
 0x64a   : > { %6988 = vmatmul.mubr.f32.gmra.mrb[122].mxu0 %v15488_v13 }
 0x64b   : > { %6993 = vmatprep.mubr.f32.mxu0 %v15489_v5  ;;  %10952 = vmatpush1.bf16.msra.mxu0 %v10951_v23  ;;  %v10963_v23 = vpack.c.bf16 %v6478_v60, %v6472_v51  ;;  %v6508_v51 = vld [vmem:[#allocation8 + $0x1b80] sm:$0xff]  ;;  %v6514_v60 = vld [vmem:[#allocation8 + $0x1bb0] sm:$0xff] }
 0x64c   : > { %10954 = vmatprep.subr.bf16.mxu0 %v10953_v33  ;;  %v10965_v33 = vpack.c.bf16 %v6491_v6, %v6485_v10  ;;  %v6521_v10 = vld [vmem:[#allocation8 + $0x1be8] sm:$0xff]  ;;  %v6527_v6 = vld [vmem:[#allocation8 + $0x1c18] sm:$0xff] }
 0x64e   : > { %6994 = vmatmul.mubr.f32.gmra.mrb[124].mxu0 %v15490_v9 }
 0x64f   : > { %6999 = vmatprep.mubr.f32.mxu0 %v14618_v25  ;;  %10956 = vmatpush1.bf16.msra.mxu0 %v10955_v28  ;;  %v10967_v28 = vpack.c.bf16 %v6490_v44, %v6484_v2  ;;  %v10975_v2 = vpack.c.bf16 %v6514_v60, %v6508_v51  ;;  %v10977_v44 = vpack.c.bf16 %v6527_v6, %v6521_v10  ;;  %v6544_v51 = vld [vmem:[#allocation8 + $0x1ca0] sm:$0xff]  ;;  %v6550_v60 = vld [vmem:[#allocation8 + $0x1cd0] sm:$0xff]  ;;  %v6557_v10 = vld [vmem:[#allocation8 + $0x1d08] sm:$0xff] }
 0x650   : > { %10958 = vmatprep.subr.bf16.mxu0 %v10957_v16  ;;  %v10969_v16 = vpack.c.bf16 %v6503_v37, %v6497_v0  ;;  %v6520_v0 = vld [vmem:[#allocation8 + $0x1be0] sm:$0xff]  ;;  %v6526_v37 = vld [vmem:[#allocation8 + $0x1c10] sm:$0xff]  ;;  %v6563_v6 = vld [vmem:[#allocation8 + $0x1d38] sm:$0xff]  ;;  %v10987_v34 = vpack.c.bf16 %v6550_v60, %v6544_v51 }
 0x651   : > { %v6586_v51 = vld [vmem:[#allocation8 + $0x1df0] sm:$0xff]  ;;  %v6599_v60 = vld [vmem:[#allocation8 + $0x1e58] sm:$0xff] }
 0x652   : > { %7000 = vmatmul.mubr.f32.gmra.mrb[126].mxu0 %v14620_v31 }
 0x653   : > { %7005 = vmatprep.mubr.f32.mxu0 %v14632_v52  ;;  %10960 = vmatpush1.bf16.msra.mxu0 %v10959_v14  ;;  %v10971_v14 = vpack.c.bf16 %v6502_v11, %v6496_v32  ;;  %v10981_v32 = vpack.c.bf16 %v6539_v53, %v6533_v49  ;;  %v6532_v11 = vld [vmem:[#allocation8 + $0x1c40] sm:$0xff]  ;;  %v6575_v49 = vld [vmem:[#allocation8 + $0x1d98] sm:$0xff] }
 0x654   : > { %10962 = vmatprep.subr.bf16.mxu0 %v10961_v20  ;;  %v10973_v20 = vpack.c.bf16 %v6515_v19, %v6509_v61  ;;  %v6538_v61 = vld [vmem:[#allocation8 + $0x1c70] sm:$0xff]  ;;  %v6545_v19 = vld [vmem:[#allocation8 + $0x1ca8] sm:$0xff] }
 0x656   : > { %7006 = vmatmul.mubr.f32.gmra.mrb[128].mxu0 %v14634_v3 }
 0x657   : > { %7011 = vmatprep.mubr.f32.mxu0 %v14646_v7  ;;  %10964 = vmatpush1.bf16.msra.mxu0 %v10963_v23  ;;  %v15521_v23 = vld [vmem:[#allocation45_spill] sm:$0xff] }
 0x658   : > { %10966 = vmatprep.subr.bf16.mxu0 %v10965_v33  ;;  %v15522_v33 = vld [vmem:[#allocation49_spill] sm:$0xff] }
 0x65a   : > { %7012 = vmatmul.mubr.f32.gmra.mrb[130].mxu0 %v14648_v41 }
 0x65b   : > { %7017 = vmatprep.mubr.f32.mxu0 %v15499_v21  ;;  %10968 = vmatpush1.bf16.msra.mxu0 %v10967_v28  ;;  %v15523_v28 = vld [vmem:[#allocation48_spill] sm:$0xff] }
 0x65c   : > { %10970 = vmatprep.subr.bf16.mxu0 %v10969_v16  ;;  %v10979_v16 = vpack.c.bf16 %v6526_v37, %v6520_v0  ;;  %v6562_v0 = vld [vmem:[#allocation8 + $0x1d30] sm:$0xff] }
 0x65e   : > { %7018 = vmatmul.mubr.f32.gmra.mrb[132].mxu0 %v15521_v23 }
 0x65f   : > { %7023 = vmatprep.mubr.f32.mxu0 %v15522_v33  ;;  %10972 = vmatpush1.bf16.msra.mxu0 %v10971_v14  ;;  %v10983_v14 = vpack.c.bf16 %v6538_v61, %v6532_v11  ;;  %v6574_v11 = vld [vmem:[#allocation8 + $0x1d90] sm:$0xff] }
 0x660   : > { %10974 = vmatprep.subr.bf16.mxu0 %v10973_v20  ;;  %v10985_v20 = vpack.c.bf16 %v6551_v35, %v6545_v19  ;;  %v6587_v35 = vld [vmem:[#allocation8 + $0x1df8] sm:$0xff] }
 0x662   : > { %7024 = vmatmul.mubr.f32.gmra.mrb[134].mxu0 %v15523_v28 }
 0x663   : > { %10976 = vmatpush1.bf16.msra.mxu0 %v10975_v2  ;;  %7344 = vmatprep.mubr.f32.mxu0 %v15477_v54  ;;  %v10989_v2 = vpack.c.bf16 %v6563_v6, %v6557_v10  ;;  %v6556_v54 = vld [vmem:[#allocation8 + $0x1d00] sm:$0xff] }
 0x664   : > { %10978 = vmatprep.subr.bf16.mxu0 %v10977_v44  ;;  %v6569_v44 = vld [vmem:[#allocation8 + $0x1d68] sm:$0xff]  ;;  %v10991_v53 = vpack.c.bf16 %v6562_v0, %v6556_v54  ;;  %v6598_v54 = vld [vmem:[#allocation8 + $0x1e50] sm:$0xff]  ;;  %v6611_v0 = vld [vmem:[#allocation8 + $0x1eb8] sm:$0xff] }
 0x665   : > { %v10993_v37 = vpack.c.bf16 %v6575_v49, %v6569_v44 }
 0x667   : > { %10980 = vmatpush1.bf16.msra.mxu0 %v10979_v16  ;;  %v6568_v16 = vld [vmem:[#allocation8 + $0x1d60] sm:$0xff] }
 0x668   : > { %10982 = vmatprep.subr.bf16.mxu0 %v10981_v32  ;;  %v6581_v32 = vld [vmem:[#allocation8 + $0x1dc8] sm:$0xff]  ;;  %v10995_v61 = vpack.c.bf16 %v6574_v11, %v6568_v16  ;;  %v6610_v16 = vld [vmem:[#allocation8 + $0x1eb0] sm:$0xff]  ;;  %v6623_v11 = vld [vmem:[#allocation8 + $0x1f18] sm:$0xff] }
 0x669   : > { %v10997_v19 = vpack.c.bf16 %v6587_v35, %v6581_v32 }
 0x66b   : > { %10984 = vmatpush1.bf16.msra.mxu0 %v10983_v14  ;;  %v6580_v14 = vld [vmem:[#allocation8 + $0x1dc0] sm:$0xff] }
 0x66c   : > { %10986 = vmatprep.subr.bf16.mxu0 %v10985_v20  ;;  %v6593_v20 = vld [vmem:[#allocation8 + $0x1e28] sm:$0xff]  ;;  %v10999_v10 = vpack.c.bf16 %v6586_v51, %v6580_v14  ;;  %v6635_v51 = vld [vmem:[#allocation8 + $0x1f78] sm:$0xff] }
 0x66d   : > { %v11001_v6 = vpack.c.bf16 %v6599_v60, %v6593_v20  ;;  %v6629_v14 = vld [vmem:[#allocation8 + $0x1f48] sm:$0xff] }
 0x66e   : > { %v11013_v60 = vpack.c.bf16 %v6635_v51, %v6629_v14  ;;  %v6676_v14 = vld [vmem:[#allocation8 + $0x20c0] sm:$0xff]  ;;  %v6689_v51 = vld [vmem:[#allocation8 + $0x2128] sm:$0xff] }
 0x66f   : > { %10988 = vmatpush1.bf16.msra.mxu0 %v10987_v34  ;;  %v6592_v34 = vld [vmem:[#allocation8 + $0x1e20] sm:$0xff] }
 0x670   : > { %10990 = vmatprep.subr.bf16.mxu0 %v10989_v2  ;;  %v6605_v2 = vld [vmem:[#allocation8 + $0x1e88] sm:$0xff]  ;;  %v11003_v44 = vpack.c.bf16 %v6598_v54, %v6592_v34 }
 0x671   : > { %v11005_v49 = vpack.c.bf16 %v6611_v0, %v6605_v2  ;;  %v6640_v2 = vld [vmem:[#allocation8 + $0x1fa0] sm:$0xff]  ;;  %v6653_v0 = vld [vmem:[#allocation8 + $0x2008] sm:$0xff] }
 0x673   : > { %10992 = vmatpush1.bf16.msra.mxu0 %v10991_v53  ;;  %v6604_v53 = vld [vmem:[#allocation8 + $0x1e80] sm:$0xff] }
 0x674   : > { %10994 = vmatprep.subr.bf16.mxu0 %v10993_v37  ;;  %v6617_v37 = vld [vmem:[#allocation8 + $0x1ee8] sm:$0xff]  ;;  %v11007_v32 = vpack.c.bf16 %v6610_v16, %v6604_v53  ;;  %v6652_v53 = vld [vmem:[#allocation8 + $0x2000] sm:$0xff] }
 0x675   : > { %v11009_v35 = vpack.c.bf16 %v6623_v11, %v6617_v37  ;;  %v6665_v16 = vld [vmem:[#allocation8 + $0x2068] sm:$0xff] }
 0x677   : > { %10996 = vmatpush1.bf16.msra.mxu0 %v10995_v61  ;;  %v6616_v61 = vld [vmem:[#allocation8 + $0x1ee0] sm:$0xff] }
 0x678   : > { %10998 = vmatprep.subr.bf16.mxu0 %v10997_v19  ;;  %v6622_v19 = vld [vmem:[#allocation8 + $0x1f10] sm:$0xff] }
 0x679   : > { %v11011_v20 = vpack.c.bf16 %v6622_v19, %v6616_v61 }
 0x67b   : > { %11000 = vmatpush1.bf16.msra.mxu0 %v10999_v10  ;;  %v6628_v10 = vld [vmem:[#allocation8 + $0x1f40] sm:$0xff] }
 0x67c   : > { %11002 = vmatprep.subr.bf16.mxu0 %v11001_v6  ;;  %v6641_v6 = vld [vmem:[#allocation8 + $0x1fa8] sm:$0xff] }
 0x67e   : > { %7345 = vmatmul.mubr.f32.vlgmr.msra.gmra.mrb[136].mxu0 %v15478_v45  ;;  %v6634_v45 = vld [vmem:[#allocation8 + $0x1f70] sm:$0xff] }
 0x67f   : > { %7350 = vmatprep.mubr.f32.mxu0 %v15479_v58  ;;  %11004 = vmatpush1.bf16.msra.mxu0 %v11003_v44  ;;  %v6647_v58 = vld [vmem:[#allocation8 + $0x1fd8] sm:$0xff]  ;;  %v11015_v34 = vpack.c.bf16 %v6634_v45, %v6628_v10  ;;  %v6688_v10 = vld [vmem:[#allocation8 + $0x2120] sm:$0xff]  ;;  %v6701_v45 = vld [vmem:[#allocation8 + $0x2188] sm:$0xff] }
 0x680   : > { %11006 = vmatprep.subr.bf16.mxu0 %v11005_v49  ;;  %v11017_v54 = vpack.c.bf16 %v6647_v58, %v6641_v6 }
 0x682   : > { %7351 = vmatmul.mubr.f32.gmra.mrb[138].mxu0 %v15480_v26  ;;  %v6646_v26 = vld [vmem:[#allocation8 + $0x1fd0] sm:$0xff] }
 0x683   : > { %7356 = vmatprep.mubr.f32.mxu0 %v15481_v57  ;;  %11008 = vmatpush1.bf16.msra.mxu0 %v11007_v32  ;;  %v6659_v57 = vld [vmem:[#allocation8 + $0x2038] sm:$0xff]  ;;  %v11019_v44 = vpack.c.bf16 %v6646_v26, %v6640_v2  ;;  %v6664_v32 = vld [vmem:[#allocation8 + $0x2060] sm:$0xff] }
 0x684   : > { %11010 = vmatprep.subr.bf16.mxu0 %v11009_v35  ;;  %v11021_v49 = vpack.c.bf16 %v6659_v57, %v6653_v0  ;;  %v6677_v35 = vld [vmem:[#allocation8 + $0x20c8] sm:$0xff]  ;;  %v6712_v0 = vld [vmem:[#allocation8 + $0x21e0] sm:$0xff] }
 0x685   : > { %v6725_v57 = vld [vmem:[#allocation8 + $0x2248] sm:$0xff] }
 0x686   : > { %7357 = vmatmul.mubr.f32.gmra.mrb[140].mxu0 %v15482_v46  ;;  %v6658_v46 = vld [vmem:[#allocation8 + $0x2030] sm:$0xff] }
 0x687   : > { %7362 = vmatprep.mubr.f32.mxu0 %v14396_v50  ;;  %11012 = vmatpush1.bf16.msra.mxu0 %v11011_v20  ;;  %v6671_v50 = vld [vmem:[#allocation8 + $0x2098] sm:$0xff]  ;;  %v11023_v37 = vpack.c.bf16 %v6658_v46, %v6652_v53  ;;  %v6724_v53 = vld [vmem:[#allocation8 + $0x2240] sm:$0xff]  ;;  %v6737_v46 = vld [vmem:[#allocation8 + $0x22a8] sm:$0xff] }
 0x688   : > { %11014 = vmatprep.subr.bf16.mxu0 %v11013_v60  ;;  %v11025_v11 = vpack.c.bf16 %v6671_v50, %v6665_v16 }
 0x68a   : > { %7363 = vmatmul.mubr.f32.gmra.mrb[142].mxu0 %v14398_v59  ;;  %v6670_v59 = vld [vmem:[#allocation8 + $0x2090] sm:$0xff] }
 0x68b   : > { %7368 = vmatprep.mubr.f32.mxu0 %v14416_v18  ;;  %11016 = vmatpush1.bf16.msra.mxu0 %v11015_v34  ;;  %v6683_v18 = vld [vmem:[#allocation8 + $0x20f8] sm:$0xff]  ;;  %v11027_v61 = vpack.c.bf16 %v6670_v59, %v6664_v32  ;;  %v6700_v34 = vld [vmem:[#allocation8 + $0x2180] sm:$0xff]  ;;  %v6749_v32 = vld [vmem:[#allocation8 + $0x2308] sm:$0xff] }
 0x68c   : > { %11018 = vmatprep.subr.bf16.mxu0 %v11017_v54  ;;  %v11029_v19 = vpack.c.bf16 %v6683_v18, %v6677_v35  ;;  %v6713_v54 = vld [vmem:[#allocation8 + $0x21e8] sm:$0xff]  ;;  %v6755_v59 = vld [vmem:[#allocation8 + $0x2338] sm:$0xff]  ;;  %v6754_v18 = vld [vmem:[#allocation8 + $0x2330] sm:$0xff] }
 0x68d   : > { %v11053_v35 = vpack.c.bf16 %v6755_v59, %v6749_v32 }
 0x68e   : > { %7369 = vmatmul.mubr.f32.gmra.mrb[144].mxu0 %v14418_v24  ;;  %v6682_v24 = vld [vmem:[#allocation8 + $0x20f0] sm:$0xff] }
 0x68f   : > { %7374 = vmatprep.mubr.f32.mxu0 %v14444_v63  ;;  %11020 = vmatpush1.bf16.msra.mxu0 %v11019_v44  ;;  %v6695_v63 = vld [vmem:[#allocation8 + $0x2158] sm:$0xff]  ;;  %v11031_v20 = vpack.c.bf16 %v6682_v24, %v6676_v14 }
 0x690   : > { %11022 = vmatprep.subr.bf16.mxu0 %v11021_v49  ;;  %v11033_v60 = vpack.c.bf16 %v6695_v63, %v6689_v51  ;;  %v6760_v51 = vld [vmem:[#allocation8 + $0x2360] sm:$0xff]  ;;  %v6766_v63 = vld [vmem:[#allocation8 + $0x2390] sm:$0xff] }
 0x692   : > { %7375 = vmatmul.mubr.f32.gmra.mrb[146].mxu0 %v14446_v29  ;;  %v6694_v29 = vld [vmem:[#allocation8 + $0x2150] sm:$0xff] }
 0x693   : > { %7380 = vmatprep.mubr.f32.mxu0 %v14468_v48  ;;  %11024 = vmatpush1.bf16.msra.mxu0 %v11023_v37  ;;  %v6707_v48 = vld [vmem:[#allocation8 + $0x21b8] sm:$0xff]  ;;  %v11035_v6 = vpack.c.bf16 %v6694_v29, %v6688_v10  ;;  %v6736_v37 = vld [vmem:[#allocation8 + $0x22a0] sm:$0xff]  ;;  %v11059_v10 = vpack.c.bf16 %v6766_v63, %v6760_v51  ;;  %v7760_v51 = vld [vmem:[#allocation11 + $0x268] sm:$0xff] }
 0x694   : > { %11026 = vmatprep.subr.bf16.mxu0 %v11025_v11  ;;  %v11037_v58 = vpack.c.bf16 %v6707_v48, %v6701_v45  ;;  %v6742_v11 = vld [vmem:[#allocation8 + $0x22d0] sm:$0xff]  ;;  %v6772_v45 = vld [vmem:[#allocation8 + $0x23c0] sm:$0xff] }
 0x695   : > { %v6778_v48 = vld [vmem:[#allocation8 + $0x23f0] sm:$0xff] }
 0x696   : > { %7381 = vmatmul.mubr.f32.gmra.mrb[148].mxu0 %v14470_v12  ;;  %v6706_v12 = vld [vmem:[#allocation8 + $0x21b0] sm:$0xff] }
 0x697   : > { %7386 = vmatprep.mubr.f32.mxu0 %v14490_v17  ;;  %11028 = vmatpush1.bf16.msra.mxu0 %v11027_v61  ;;  %v6719_v17 = vld [vmem:[#allocation8 + $0x2218] sm:$0xff]  ;;  %v11039_v2 = vpack.c.bf16 %v6706_v12, %v6700_v34  ;;  %v6761_v61 = vld [vmem:[#allocation8 + $0x2368] sm:$0xff] }
 0x698   : > { %11030 = vmatprep.subr.bf16.mxu0 %v11029_v19  ;;  %v11041_v26 = vpack.c.bf16 %v6719_v17, %v6713_v54  ;;  %v6767_v19 = vld [vmem:[#allocation8 + $0x2398] sm:$0xff]  ;;  %v7748_v34 = vld [vmem:[#allocation11 + $0x208] sm:$0xff]  ;;  %v7731_v12 = vld [vmem:[#allocation11 + $0x180] sm:$0xff] }
 0x699   : > { %v11057_v24 = vpack.c.bf16 %v6767_v19, %v6761_v61  ;;  %v7732_v17 = vld [vmem:[#allocation11 + $0x188] sm:$0xff] }
 0x69a   : > { %7387 = vmatmul.mubr.f32.gmra.mrb[150].mxu0 %v14492_v27  ;;  %v6718_v27 = vld [vmem:[#allocation8 + $0x2210] sm:$0xff] }
 0x69b   : > { %7392 = vmatprep.mubr.f32.mxu0 %v14519_v30  ;;  %11032 = vmatpush1.bf16.msra.mxu0 %v11031_v20  ;;  %v6731_v30 = vld [vmem:[#allocation8 + $0x2278] sm:$0xff]  ;;  %v11043_v44 = vpack.c.bf16 %v6718_v27, %v6712_v0  ;;  %v6773_v20 = vld [vmem:[#allocation8 + $0x23c8] sm:$0xff]  ;;  %v11067_v0 = vpack.c.bf16 %v7732_v17, %v7731_v12 }
 0x69c   : > { %11034 = vmatprep.subr.bf16.mxu0 %v11033_v60  ;;  %v11045_v49 = vpack.c.bf16 %v6731_v30, %v6725_v57  ;;  %v6779_v60 = vld [vmem:[#allocation8 + $0x23f8] sm:$0xff] }
 0x69d   : > { %v11061_v29 = vpack.c.bf16 %v6779_v60, %v6773_v20  ;;  %v7733_v57 = vld [vmem:[#allocation11 + $0x190] sm:$0xff]  ;;  %v7734_v30 = vld [vmem:[#allocation11 + $0x198] sm:$0xff]  ;;  %v7743_v20 = vld [vmem:[#allocation11 + $0x1e0] sm:$0xff] }
 0x69e   : > { %7393 = vmatmul.mubr.f32.gmra.mrb[152].mxu0 %v14523_v38  ;;  %v6730_v38 = vld [vmem:[#allocation8 + $0x2270] sm:$0xff] }
 0x69f   : > { %7398 = vmatprep.mubr.f32.mxu0 %v14809_v42  ;;  %11036 = vmatpush1.bf16.msra.mxu0 %v11035_v6  ;;  %v6743_v42 = vld [vmem:[#allocation8 + $0x22d8] sm:$0xff]  ;;  %v11047_v16 = vpack.c.bf16 %v6730_v38, %v6724_v53  ;;  %v11063_v6 = vpack.c.bf16 %v6778_v48, %v6772_v45  ;;  %v11071_v53 = vpack.c.bf16 %v7734_v30, %v7733_v57  ;;  %v7744_v60 = vld [vmem:[#allocation11 + $0x1e8] sm:$0xff] }
 0x6a0   : > { %11038 = vmatprep.subr.bf16.mxu0 %v11037_v58  ;;  %v11049_v50 = vpack.c.bf16 %v6743_v42, %v6737_v46  ;;  %v7747_v58 = vld [vmem:[#allocation11 + $0x200] sm:$0xff]  ;;  %v7736_v42 = vld [vmem:[#allocation11 + $0x1a8] sm:$0xff]  ;;  %v7745_v12 = vld [vmem:[#allocation11 + $0x1f0] sm:$0xff] }
 0x6a1   : > { %v11065_v54 = vpack.c.bf16 %v7748_v34, %v7747_v58  ;;  %v7735_v46 = vld [vmem:[#allocation11 + $0x1a0] sm:$0xff]  ;;  %v7762_v58 = vld [vmem:[#allocation11 + $0x278] sm:$0xff] }
 0x6a2   : > { %7399 = vmatmul.mubr.f32.gmra.mrb[154].mxu0 %v14814_v39  ;;  %v11051_v39 = vpack.c.bf16 %v6742_v11, %v6736_v37  ;;  %v7737_v11 = vld [vmem:[#allocation11 + $0x1b0] sm:$0xff] }
 0x6a3   : > { %11040 = vmatpush1.bf16.msra.mxu0 %v11039_v2  ;;  %7469 = vmatprep.mubr.f32.mxu0 %v15483_v62  ;;  %v6748_v62 = vld [vmem:[#allocation8 + $0x2300] sm:$0xff]  ;;  %v7749_v2 = vld [vmem:[#allocation11 + $0x210] sm:$0xff] }
 0x6a4   : > { %11042 = vmatprep.subr.bf16.mxu0 %v11041_v26  ;;  %v11055_v14 = vpack.c.bf16 %v6754_v18, %v6748_v62  ;;  %v7750_v26 = vld [vmem:[#allocation11 + $0x218] sm:$0xff]  ;;  %11066 = vmatprep.subr.bf16.mxu1 %v11065_v54 }
 0x6a5   : > { %v11069_v27 = vpack.c.bf16 %v7750_v26, %v7749_v2  ;;  %11068 = vmatpush3.bf16.msra.mxu1 %v11067_v0  ;;  %v7742_v62 = vld [vmem:[#allocation11 + $0x1d8] sm:$0xff] }
 0x6a6   : > { %v7746_v54 = vld [vmem:[#allocation11 + $0x1f8] sm:$0xff] }
 0x6a7   : > { %11044 = vmatpush1.bf16.msra.mxu0 %v11043_v44  ;;  %v7751_v44 = vld [vmem:[#allocation11 + $0x220] sm:$0xff]  ;;  %11070 = vmatprep.subr.bf16.mxu1 %v11069_v27  ;;  %v11095_v2 = vpack.c.bf16 %v7746_v54, %v7745_v12  ;;  %v15526_v57 = vld [vmem:[#allocation56_spill] sm:$0xff] }
 0x6a8   : > { %11046 = vmatprep.subr.bf16.mxu0 %v11045_v49  ;;  %v7752_v49 = vld [vmem:[#allocation11 + $0x228] sm:$0xff] }
 0x6a9   : > { %v11073_v38 = vpack.c.bf16 %v7752_v49, %v7751_v44  ;;  %11072 = vmatpush3.bf16.msra.mxu1 %v11071_v53  ;;  %v12522_v44 = vmov 0.0|0.0  }
 0x6ab   : > { %11048 = vmatpush1.bf16.msra.mxu0 %v11047_v16  ;;  %v7753_v16 = vld [vmem:[#allocation11 + $0x230] sm:$0xff]  ;;  %11074 = vmatprep.subr.bf16.mxu1 %v11073_v38 }
 0x6ac   : > { %11050 = vmatprep.subr.bf16.mxu0 %v11049_v50  ;;  %v7754_v50 = vld [vmem:[#allocation11 + $0x238] sm:$0xff] }
 0x6ad   : > { %v11077_v37 = vpack.c.bf16 %v7754_v50, %v7753_v16  ;;  %v15528_v50 = vld [vmem:[#allocation60_spill] sm:$0xff] }
 0x6af   : > { %11052 = vmatpush1.bf16.msra.mxu0 %v11051_v39 }
 0x6b0   : > { %11054 = vmatprep.subr.bf16.mxu0 %v11053_v35  ;;  %v7741_v35 = vld [vmem:[#allocation11 + $0x1d0] sm:$0xff] }
 0x6b1   : > { %v11087_v61 = vpack.c.bf16 %v7742_v62, %v7741_v35 }
 0x6b3   : > { %11056 = vmatpush1.bf16.msra.mxu0 %v11055_v14 }
 0x6b4   : > { %11058 = vmatprep.subr.bf16.mxu0 %v11057_v24  ;;  %v7759_v24 = vld [vmem:[#allocation11 + $0x260] sm:$0xff] }
 0x6b5   : > { %v11089_v63 = vpack.c.bf16 %v7760_v51, %v7759_v24 }
 0x6b7   : > { %11060 = vmatpush1.bf16.msra.mxu0 %v11059_v10 }
 0x6b8   : > { %11062 = vmatprep.subr.bf16.mxu0 %v11061_v29  ;;  %v11091_v29 = vpack.c.bf16 %v7744_v60, %v7743_v20 }
 0x6bb   : > { %11064 = vmatpush1.bf16.msra.mxu0 %v11063_v6  ;;  %v7761_v6 = vld [vmem:[#allocation11 + $0x270] sm:$0xff] }
 0x6be   : > { %7470 = vmatmul.mubr.f32.vlgmr.msra.gmra.mrb[136].mxu0 %v15484_v22  ;;  %v11075_v22 = vpack.c.bf16 %v7736_v42, %v7735_v46  ;;  %v15527_v46 = vld [vmem:[#allocation58_spill] sm:$0xff] }
 0x6bf   : > { %7475 = vmatprep.mubr.f32.mxu0 %v15485_v56  ;;  %v7738_v56 = vld [vmem:[#allocation11 + $0x1b8] sm:$0xff] }
 0x6c0   : > { %11076 = vmatpush3.bf16.msra.mxu1 %v11075_v22  ;;  %v11079_v32 = vpack.c.bf16 %v7738_v56, %v7737_v11 }
 0x6c1   : > { %11078 = vmatprep.subr.bf16.mxu1 %v11077_v37 }
 0x6c2   : > { %7476 = vmatmul.mubr.f32.gmra.mrb[138].mxu0 %v15494_v1 }
 0x6c3   : > { %7481 = vmatprep.mubr.f32.mxu0 %v15495_v4 }
 0x6c4   : > { %11080 = vmatpush3.bf16.msra.mxu1 %v11079_v32 }
 0x6c6   : > { %7482 = vmatmul.mubr.f32.gmra.mrb[140].mxu0 %v15496_v36  ;;  %v15524_v36 = vld [vmem:[#allocation28_spill] sm:$0xff] }
 0x6c7   : > { %7487 = vmatprep.mubr.f32.mxu0 %v14590_v47 }
 0x6ca   : > { %7488 = vmatmul.mubr.f32.gmra.mrb[142].mxu0 %v15488_v13  ;;  %v7756_v13 = vld [vmem:[#allocation11 + $0x248] sm:$0xff] }
 0x6cb   : > { %7493 = vmatprep.mubr.f32.mxu0 %v15489_v5 }
 0x6ce   : > { %7494 = vmatmul.mubr.f32.gmra.mrb[144].mxu0 %v15490_v9 }
 0x6cf   : > { %7499 = vmatprep.mubr.f32.mxu0 %v14618_v25 }
 0x6d2   : > { %7500 = vmatmul.mubr.f32.gmra.mrb[146].mxu0 %v14620_v31 }
 0x6d3   : > { %7505 = vmatprep.mubr.f32.mxu0 %v14632_v52  ;;  %v15029_v52 = vld [vmem:[#allocation9] sm:$0x7] }
 0x6d6   : > { %7506 = vmatmul.mubr.f32.gmra.mrb[148].mxu0 %v14634_v3  ;;  %v7755_v3 = vld [vmem:[#allocation11 + $0x240] sm:$0xff] }
 0x6d7   : > { %7511 = vmatprep.mubr.f32.mxu0 %v14646_v7  ;;  %v7739_v7 = vld [vmem:[#allocation11 + $0x1c0] sm:$0xff]  ;;  %v11081_v5 = vpack.c.bf16 %v7756_v13, %v7755_v3 }
 0x6d9   : > { %11082 = vmatprep.subr.bf16.mxu1 %v11081_v5 }
 0x6da   : > { %7512 = vmatmul.mubr.f32.gmra.mrb[150].mxu0 %v14648_v41  ;;  %v7740_v41 = vld [vmem:[#allocation11 + $0x1c8] sm:$0xff] }
 0x6db   : > { %7517 = vmatprep.mubr.f32.mxu0 %v15499_v21  ;;  %v11083_v1 = vpack.c.bf16 %v7740_v41, %v7739_v7  ;;  %v15525_v21 = vsub.s32 0, %v15524_v36  ;;  %v15530_v7 = vld [vmem:[#allocation66_spill] sm:$0xff] }
 0x6dd   : > { %11084 = vmatpush3.bf16.msra.mxu1 %v11083_v1 }
 0x6de   : > { %7518 = vmatmul.mubr.f32.gmra.mrb[152].mxu0 %v15521_v23  ;;  %v15035_v23 = vrot.slane %v15029_v52, %v15525_v21 }
 0x6df   : > { %7523 = vmatprep.mubr.f32.mxu0 %v15522_v33 }
 0x6e2   : > { %7524 = vmatmul.mubr.f32.gmra.mrb[154].mxu0 %v15523_v28  ;;  %v7758_v28 = vld [vmem:[#allocation11 + $0x258] sm:$0xff] }
 0x711   : > { %v6971_v47 = vpop.f32.mrb[116].mxu0 }
 0x712   : > { %v7590_v25 = vmax.f32 %v6971_v47, %v14920_v43  ;;  %v15027_v31 = vpop.f32.mrb[117].mxu0  ;;  %v7757_v43 = vld [vmem:[#allocation11 + $0x250] sm:$0xff] }
 0x713   : > { %v11085_v39 = vpack.c.bf16 %v7758_v28, %v7757_v43  ;;  %v15529_v47 = vld [vmem:[#allocation64_spill] sm:$0xff]  ;;  %v15531_v28 = vld [vmem:[#allocation51_spill] sm:$0xff] }
 0x715   : > { %v6977_v9 = vpop.f32.mrb[118].mxu0  ;;  %11086 = vmatprep.subr.bf16.mxu1 %v11085_v39 }
 0x716   : > { %v7593_v4 = vmax.f32 %v6977_v9, %v14926_v55  ;;  %v15037_v33 = vpop.f32.mrb[119].mxu0  ;;  %11088 = vmatpush3.bf16.msra.mxu1 %v11087_v61 }
 0x717   : > { %11090 = vmatprep.subr.bf16.mxu1 %v11089_v63 }
 0x718   : > { %v7620_v59 = vmax.f32 %v7590_v25, %v7593_v4 }
 0x719   : > { %v6983_v18 = vpop.f32.mrb[120].mxu0 }
 0x71a   : > { %v15040_v19 = vadd.f32 %v15035_v23, %v7620_v59  ;;  %v7596_v55 = vmax.f32 %v6983_v18, %v14932_v8  ;;  %v15043_v14 = vpop.f32.mrb[121].mxu0  ;;  %11092 = vmatpush3.bf16.msra.mxu1 %v11091_v29  ;;  %v11093_v8 = vpack.c.bf16 %v7762_v58, %v7761_v6  ;;  %v15532_v18 = vld [vmem:[#allocation50_spill] sm:$0xff]  ;;  %v15534_v29 = vld [vmem:[#allocation53_spill] sm:$0xff] }
 0x71c   : > { %11094 = vmatprep.subr.bf16.mxu1 %v11093_v8  ;;  %v15535_v8 = vld [vmem:[#allocation52_spill] sm:$0xff] }
 0x71d   : > { %v6989_v10 = vpop.f32.mrb[122].mxu0 }
 0x71e   : > { %v7599_v45 = vmax.f32 %v6989_v10, %v14938_v40  ;;  %v6991_v48 = vpop.f32.mrb[123].mxu0  ;;  %11096 = vmatpush3.bf16.msra.mxu1 %v11095_v2 }
 0x71f   : > { %11097 = vmatprep.subr.bf16.mxu1 %v12522_v44 }
 0x720   : > { %v7623_v34 = vmax.f32 %v7596_v55, %v7599_v45  ;;  %v15533_v55 = vsub.s32 2, %v15524_v36 }
 0x721   : > { %v6995_v17 = vpop.f32.mrb[124].mxu0 }
 0x722   : > { %v7602_v26 = vmax.f32 %v6995_v17, %v14944_v15  ;;  %v15047_v0 = vpop.f32.mrb[125].mxu0  ;;  %v15081_v24 = vrot.slane %v15029_v52, %v15533_v55  ;;  %v15536_v17 = vsub.s32 1, %v15524_v36 }
 0x724   : > { %v15094_v2 = vrot.slane %v15029_v52, %v15536_v17  ;;  %v7765_v52 = vld [vmem:[#allocation11 + $0x290] sm:$0xff] }
 0x725   : > { %v7001_v27 = vpop.f32.mrb[126].mxu0 }
 0x726   : > { %v7605_v40 = vmax.f32 %v7001_v27, %v15526_v57  ;;  %v15050_v30 = vpop.f32.mrb[127].mxu0  ;;  %v7763_v57 = vld [vmem:[#allocation11 + $0x280] sm:$0xff] }
 0x728   : > { %v7626_v49 = vmax.f32 %v7602_v26, %v7605_v40  ;;  %v7655_v26 = vadd.f32 %v15035_v23, %v7623_v34  ;;  %v7764_v40 = vld [vmem:[#allocation11 + $0x288] sm:$0xff] }
 0x729   : > { %v7007_v53 = vpop.f32.mrb[128].mxu0 }
 0x72a   : > { %v15054_v38 = vadd.f32 %v15035_v23, %v7626_v49  ;;  %v7608_v42 = vmax.f32 %v7007_v53, %v15527_v46  ;;  %v15057_v15 = vpop.f32.mrb[129].mxu0  ;;  %v15537_v46 = vld [vmem:[#allocation54_spill] sm:$0xff]  ;;  %v7670_v36 = vmax.f32 %v7655_v26, 0.0 }
 0x72d   : > { %v7013_v16 = vpop.f32.mrb[130].mxu0 }
 0x72e   : > { %v7611_v22 = vmax.f32 %v7013_v16, %v15528_v50  ;;  %v15060_v37 = vpop.f32.mrb[131].mxu0  ;;  %v11098_v50 = vpack.c.bf16 %v7764_v40, %v7763_v57  ;;  %v7773_v57 = vld [vmem:[#allocation11 + $0x2d0] sm:$0xff]  ;;  %v7774_v40 = vld [vmem:[#allocation11 + $0x2d8] sm:$0xff] }
 0x730   : > { %v7629_v11 = vmax.f32 %v7608_v42, %v7611_v22 }
 0x731   : > { %v7019_v56 = vpop.f32.mrb[132].mxu0 }
 0x732   : > { %v15063_v32 = vadd.f32 %v15035_v23, %v7629_v11  ;;  %v7614_v25 = vmax.f32 %v7019_v56, %v15529_v47  ;;  %v15066_v3 = vpop.f32.mrb[133].mxu0  ;;  %v7766_v11 = vld [vmem:[#allocation11 + $0x298] sm:$0xff]  ;;  %v15538_v56 = vld [vmem:[#allocation55_spill] sm:$0xff] }
 0x735   : > { %v7025_v13 = vpop.f32.mrb[134].mxu0 }
 0x736   : > { %v7617_v5 = vmax.f32 %v7025_v13, %v15530_v7  ;;  %v15069_v41 = vpop.f32.mrb[135].mxu0  ;;  %v15539_v13 = vmov 0.0  }
 0x738   : > { %v7632_v9 = vmax.f32 %v7614_v25, %v7617_v5 }
 0x73a   : > { %v15072_v1 = vadd.f32 %v15035_v23, %v7632_v9  ;;  %v7767_v9 = vld [vmem:[#allocation11 + $0x2a0] sm:$0xff] }
 0x791   : > { %v7471_v4 = vpop.f32.mrb[136].mxu0 }
 0x792   : > { %v7591_v21 = vmax.f32 %v15027_v31, %v7471_v4  ;;  %v7473_v43 = vpop.f32.mrb[137].mxu0  ;;  %v7768_v4 = vld [vmem:[#allocation11 + $0x2a8] sm:$0xff] }
 0x793   : > { %v7592_v59 = vmax.f32 %v15531_v28, %v7473_v43 }
 0x795   : > { %v7477_v39 = vpop.f32.mrb[138].mxu0 }
 0x796   : > { %v7594_v35 = vmax.f32 %v15037_v33, %v7477_v39  ;;  %v7479_v62 = vpop.f32.mrb[139].mxu0 }
 0x797   : > { %v7595_v61 = vmax.f32 %v15532_v18, %v7479_v62  ;;  %v7769_v18 = vld [vmem:[#allocation11 + $0x2b0] sm:$0xff] }
 0x798   : > { %v15083_v51 = vmax.f32 %v7591_v21, %v7594_v35  ;;  %v11104_v35 = vpack.c.bf16 %v7768_v4, %v7767_v9  ;;  %v7700_v4 = vld [vmem:[#allocation11 + $0x90] sm:$0xff] }
 0x799   : > { %v7622_v63 = vmax.f32 %v7592_v59, %v7595_v61  ;;  %v7483_v20 = vpop.f32.mrb[140].mxu0  ;;  %v15540_v59 = vld [vmem:[#allocation57_spill] sm:$0xff] }
 0x79a   : > { %v7597_v31 = vmax.f32 %v15043_v14, %v7483_v20  ;;  %v7485_v60 = vpop.f32.mrb[141].mxu0  ;;  %v7770_v61 = vld [vmem:[#allocation11 + $0x2b8] sm:$0xff]  ;;  %v7653_v9 = vadd.f32 %v15094_v2, %v15083_v51  ;;  %v7687_v51 = vld [vmem:[#allocation11 + $0x28] sm:$0xff] }
 0x79b   : > { %v15087_v10 = vadd.f32 %v15081_v24, %v7622_v63  ;;  %v7598_v33 = vmax.f32 %v15534_v29, %v7485_v60  ;;  %v11107_v60 = vpack.c.bf16 %v7770_v61, %v7769_v18  ;;  %v7702_v61 = vld [vmem:[#allocation11 + $0xa0] sm:$0xff] }
 0x79c   : > { %v7668_v18 = vmax.f32 %v7653_v9, 0.0  ;;  %v7717_v9 = vld [vmem:[#allocation11 + $0x118] sm:$0xff] }
 0x79d   : > { %v7489_v45 = vpop.f32.mrb[142].mxu0 }
 0x79e   : > { %v7600_v6 = vmax.f32 %v6991_v48, %v7489_v45  ;;  %v7491_v58 = vpop.f32.mrb[143].mxu0  ;;  %v7771_v45 = vld [vmem:[#allocation11 + $0x2c0] sm:$0xff] }
 0x79f   : > { %v7601_v12 = vmax.f32 %v15535_v8, %v7491_v58 }
 0x7a0   : > { %v7624_v54 = vmax.f32 %v7597_v31, %v7600_v6  ;;  %v7772_v6 = vld [vmem:[#allocation11 + $0x2c8] sm:$0xff] }
 0x7a1   : > { %v15097_v14 = vmax.f32 %v7598_v33, %v7601_v12  ;;  %v7495_v27 = vpop.f32.mrb[144].mxu0  ;;  %v11110_v26 = vpack.c.bf16 %v7772_v6, %v7771_v45  ;;  %v7707_v45 = vld [vmem:[#allocation11 + $0xc8] sm:$0xff] }
 0x7a2   : > { %v7603_v49 = vmax.f32 %v15047_v0, %v7495_v27  ;;  %v7497_v53 = vpop.f32.mrb[145].mxu0  ;;  %v7656_v48 = vadd.f32 %v15094_v2, %v7624_v54  ;;  %v11101_v0 = vpack.c.bf16 %v7766_v11, %v7765_v52  ;;  %v15542_v54 = vld [vmem:[#allocation61_spill] sm:$0xff] }
 0x7a3   : > { %v7604_v42 = vmax.f32 %v15537_v46, %v7497_v53 }
 0x7a4   : > { %v7671_v16 = vmax.f32 %v7656_v48, 0.0 }
 0x7a5   : > { %v7501_v22 = vpop.f32.mrb[146].mxu0 }
 0x7a6   : > { %v7606_v23 = vmax.f32 %v15050_v30, %v7501_v22  ;;  %v7503_v34 = vpop.f32.mrb[147].mxu0  ;;  %7843 = vmatprep.mubr.f32.mxu1 %v7671_v16 }
 0x7a7   : > { %v7607_v47 = vmax.f32 %v15538_v56, %v7503_v34  ;;  %7844 = vmatmul.mubr.f32.vlgmr.msra.gmra.mrb[154].mxu1 %v7670_v36  ;;  %v7776_v36 = vld [vmem:[#allocation11 + $0x2e8] sm:$0xff]  ;;  %v7698_v34 = vld [vmem:[#allocation11 + $0x80] sm:$0xff] }
 0x7a8   : > { %v7627_v25 = vmax.f32 %v7603_v49, %v7606_v23  ;;  %11099 = vmatpush3.bf16.msra.mxu1 %v11098_v50  ;;  %9615 = vmatprep.mubr.msk.f32.mxu1 %vm12523_vm4, %v15539_v13  ;;  %v7775_v50 = vld [vmem:[#allocation11 + $0x2e0] sm:$0xff]  ;;  %v7778_v23 = vld [vmem:[#allocation11 + $0x2f8] sm:$0xff]  ;;  %v7699_v56 = vld [vmem:[#allocation11 + $0x88] sm:$0xff] }
 0x7a9   : > { %v7628_v7 = vmax.f32 %v7604_v42, %v7607_v47  ;;  %v7507_v5 = vpop.f32.mrb[148].mxu0  ;;  %11100 = vmatprep.subr.bf16.mxu1 %v12522_v44  ;;  %v11113_v42 = vpack.c.bf16 %v7774_v40, %v7773_v57  ;;  %v11116_v11 = vpack.c.bf16 %v7776_v36, %v7775_v50  ;;  %v7692_v40 = vld [vmem:[#allocation11 + $0x50] sm:$0xff]  ;;  %v7713_v36 = vld [vmem:[#allocation11 + $0xf8] sm:$0xff] }
 0x7aa   : > { %v7609_v30 = vmax.f32 %v15057_v15, %v7507_v5  ;;  %v7509_v21 = vpop.f32.mrb[149].mxu0  ;;  %v15109_v43 = vadd.f32 %v15094_v2, %v7627_v25  ;;  %v15541_v15 = vld [vmem:[#allocation59_spill] sm:$0xff]  ;;  %v7657_v25 = vadd.f32 %v15081_v24, %v15097_v14 }
 0x7ab   : > { %v15112_v28 = vadd.f32 %v15081_v24, %v7628_v7  ;;  %v7610_v39 = vmax.f32 %v15540_v59, %v7509_v21  ;;  %v7682_v7 = vld [vmem:[#allocation11] sm:$0xff]  ;;  %v7683_v5 = vld [vmem:[#allocation11 + $0x8] sm:$0xff]  ;;  %v7712_v50 = vld [vmem:[#allocation11 + $0xf0] sm:$0xff] }
 0x7ac   : > { %11102 = vmatpush3.bf16.msra.mxu1 %v11101_v0  ;;  %v11121_v0 = vpack.c.bf16 %v7699_v56, %v7698_v34  ;;  %v11123_v21 = vpack.c.bf16 %v7683_v5, %v7682_v7  ;;  %v7672_v59 = vmax.f32 %v7657_v25, 0.0  ;;  %v7697_v34 = vld [vmem:[#allocation11 + $0x78] sm:$0xff]  ;;  %v7715_v25 = vld [vmem:[#allocation11 + $0x108] sm:$0xff]  ;;  %v7667_v7 = vmax.f32 %v15040_v19, 0.0  ;;  %v7716_v5 = vld [vmem:[#allocation11 + $0x110] sm:$0xff] }
 0x7ad   : > { %v7513_v62 = vpop.f32.mrb[150].mxu0  ;;  %11103 = vmatprep.subr.bf16.mxu1 %v12522_v44  ;;  %v7721_v19 = vld [vmem:[#allocation11 + $0x138] sm:$0xff] }
 0x7ae   : > { %v7612_v55 = vmax.f32 %v15060_v37, %v7513_v62  ;;  %v7515_v63 = vpop.f32.mrb[151].mxu0  ;;  %v7685_v62 = vld [vmem:[#allocation11 + $0x18] sm:$0xff] }
 0x7af   : > { %v7613_v20 = vmax.f32 %v15541_v15, %v7515_v63  ;;  %v7686_v63 = vld [vmem:[#allocation11 + $0x20] sm:$0xff]  ;;  %v7705_v15 = vld [vmem:[#allocation11 + $0xb8] sm:$0xff] }
 0x7b0   : > { %v7630_v31 = vmax.f32 %v7609_v30, %v7612_v55  ;;  %11105 = vmatpush3.bf16.msra.mxu1 %v11104_v35  ;;  %v7701_v30 = vld [vmem:[#allocation11 + $0x98] sm:$0xff]  ;;  %v7684_v35 = vld [vmem:[#allocation11 + $0x10] sm:$0xff] }
 0x7b1   : > { %v7631_v29 = vmax.f32 %v7610_v39, %v7613_v20  ;;  %v7519_v33 = vpop.f32.mrb[152].mxu0  ;;  %11106 = vmatprep.subr.bf16.mxu1 %v12522_v44  ;;  %v11125_v39 = vpack.c.bf16 %v7701_v30, %v7700_v4  ;;  %v11127_v14 = vpack.c.bf16 %v7685_v62, %v7684_v35  ;;  %v11131_v20 = vpack.c.bf16 %v7687_v51, %v7686_v63  ;;  %v7718_v30 = vld [vmem:[#allocation11 + $0x120] sm:$0xff]  ;;  %v7727_v51 = vld [vmem:[#allocation11 + $0x168] sm:$0xff] }
 0x7b2   : > { %v7615_v58 = vmax.f32 %v15066_v3, %v7519_v33  ;;  %v7521_v8 = vpop.f32.mrb[153].mxu0  ;;  %v15121_v12 = vadd.f32 %v15094_v2, %v7630_v31  ;;  %v15543_v3 = vld [vmem:[#allocation65_spill] sm:$0xff]  ;;  %v11157_v4 = vpack.c.bf16 %v7717_v9, %v7716_v5 }
 0x7b3   : > { %v15124_v37 = vadd.f32 %v15081_v24, %v7631_v29  ;;  %v7616_v17 = vmax.f32 %v15542_v54, %v7521_v8  ;;  %v7689_v29 = vld [vmem:[#allocation11 + $0x38] sm:$0xff]  ;;  %v7706_v33 = vld [vmem:[#allocation11 + $0xc0] sm:$0xff]  ;;  %v7691_v54 = vld [vmem:[#allocation11 + $0x48] sm:$0xff] }
 0x7b4   : > { %11108 = vmatpush3.bf16.msra.mxu1 %v11107_v60  ;;  %v7688_v60 = vld [vmem:[#allocation11 + $0x30] sm:$0xff]  ;;  %v7690_v8 = vld [vmem:[#allocation11 + $0x40] sm:$0xff] }
 0x7b5   : > { %v7525_v27 = vpop.f32.mrb[154].mxu0  ;;  %11109 = vmatprep.subr.bf16.mxu1 %v12522_v44  ;;  %v11135_v6 = vpack.c.bf16 %v7689_v29, %v7688_v60  ;;  %v7722_v62 = vld [vmem:[#allocation11 + $0x140] sm:$0xff]  ;;  %v8077_v60 = vld [vmem:[#allocation11 + $0x388] sm:$0xff] }
 0x7b6   : > { %v7618_v49 = vmax.f32 %v15069_v41, %v7525_v27  ;;  %v7527_v53 = vpop.f32.mrb[155].mxu0  ;;  %v7777_v41 = vld [vmem:[#allocation11 + $0x2f0] sm:$0xff]  ;;  %v11139_v27 = vpack.c.bf16 %v7691_v54, %v7690_v8  ;;  %v7726_v63 = vld [vmem:[#allocation11 + $0x160] sm:$0xff]  ;;  %v8079_v8 = vld [vmem:[#allocation11 + $0x398] sm:$0xff] }
 0x7b7   : > { %v7619_v48 = vmax.f32 %v15543_v3, %v7527_v53  ;;  %v11119_v47 = vpack.c.bf16 %v7778_v23, %v7777_v41  ;;  %v7710_v53 = vld [vmem:[#allocation11 + $0xe0] sm:$0xff]  ;;  %v7711_v3 = vld [vmem:[#allocation11 + $0xe8] sm:$0xff]  ;;  %v11149_v41 = vpack.c.bf16 %v7713_v36, %v7712_v50  ;;  %v7696_v23 = vld [vmem:[#allocation11 + $0x70] sm:$0xff] }
 0x7b8   : > { %v7633_v46 = vmax.f32 %v7615_v58, %v7618_v49  ;;  %11111 = vmatpush3.bf16.msra.mxu1 %v11110_v26  ;;  %v11137_v58 = vpack.c.bf16 %v7707_v45, %v7706_v33  ;;  %v7709_v26 = vld [vmem:[#allocation11 + $0xd8] sm:$0xff]  ;;  %v11151_v56 = vpack.c.bf16 %v7697_v34, %v7696_v23  ;;  %v8060_v45 = vld [vmem:[#allocation11 + $0x300] sm:$0xff] }
 0x7b9   : > { %v7634_v16 = vmax.f32 %v7616_v17, %v7619_v48  ;;  %11112 = vmatprep.subr.bf16.mxu1 %v12522_v44  ;;  %v7708_v17 = vld [vmem:[#allocation11 + $0xd0] sm:$0xff]  ;;  %v7693_v49 = vld [vmem:[#allocation11 + $0x58] sm:$0xff]  ;;  %v8084_v23 = vld [vmem:[#allocation11 + $0x3c0] sm:$0xff] }
 0x7ba   : > { %v15132_v22 = vadd.f32 %v15094_v2, %v7633_v46  ;;  %v7704_v2 = vld [vmem:[#allocation11 + $0xb0] sm:$0xff]  ;;  %v11141_v57 = vpack.c.bf16 %v7709_v26, %v7708_v17  ;;  %v11143_v48 = vpack.c.bf16 %v7693_v49, %v7692_v40  ;;  %v11145_v46 = vpack.c.bf16 %v7711_v3, %v7710_v53  ;;  %v8080_v49 = vld [vmem:[#allocation11 + $0x3a0] sm:$0xff]  ;;  %v8081_v53 = vld [vmem:[#allocation11 + $0x3a8] sm:$0xff] }
 0x7bb   : > { %v15135_v52 = vadd.f32 %v15081_v24, %v7634_v16  ;;  %v7703_v24 = vld [vmem:[#allocation11 + $0xa8] sm:$0xff]  ;;  %v11133_v31 = vpack.c.bf16 %v7705_v15, %v7704_v2  ;;  %v11172_v2 = vpack.c.bf16 %v7727_v51, %v7726_v63  ;;  %v7728_v15 = vld [vmem:[#allocation11 + $0x170] sm:$0xff]  ;;  %v7669_v17 = vmax.f32 %v15087_v10, 0.0  ;;  %v8083_v50 = vld [vmem:[#allocation11 + $0x3b8] sm:$0xff] }
 0x7bc   : > { %11114 = vmatpush3.bf16.msra.mxu1 %v11113_v42  ;;  %v11129_v55 = vpack.c.bf16 %v7703_v24, %v7702_v61  ;;  %v7694_v42 = vld [vmem:[#allocation11 + $0x60] sm:$0xff]  ;;  %v7695_v16 = vld [vmem:[#allocation11 + $0x68] sm:$0xff]  ;;  %v7724_v24 = vld [vmem:[#allocation11 + $0x150] sm:$0xff]  ;;  %v7674_v40 = vmax.f32 %v15109_v43, 0.0 }
 0x7bd   : > { %11115 = vmatprep.subr.bf16.mxu1 %v12522_v44  ;;  %v8085_v43 = vld [vmem:[#allocation11 + $0x3c8] sm:$0xff]  ;;  %v8075_v63 = vld [vmem:[#allocation11 + $0x378] sm:$0xff] }
 0x7c0   : > { %11117 = vmatpush3.bf16.msra.mxu1 %v11116_v11  ;;  %v11147_v11 = vpack.c.bf16 %v7695_v16, %v7694_v42  ;;  %v8065_v42 = vld [vmem:[#allocation11 + $0x328] sm:$0xff]  ;;  %v8082_v16 = vld [vmem:[#allocation11 + $0x3b0] sm:$0xff] }
 0x7c1   : > { %11118 = vmatprep.subr.bf16.mxu1 %v12522_v44  ;;  %v11189_v36 = vpack.c.bf16 %v8083_v50, %v8082_v16  ;;  %v8266_v16 = vld [vmem:[#allocation11 + $0x500] sm:$0xff]  ;;  %v8267_v50 = vld [vmem:[#allocation11 + $0x508] sm:$0xff] }
 0x7c4   : > { %11120 = vmatpush3.bf16.msra.mxu1 %v11119_v47  ;;  %v7714_v47 = vld [vmem:[#allocation11 + $0x100] sm:$0xff] }
 0x7c5   : > { %11122 = vmatprep.subr.bf16.mxu1 %v11121_v0  ;;  %v11154_v0 = vpack.c.bf16 %v7715_v25, %v7714_v47  ;;  %v8068_v47 = vld [vmem:[#allocation11 + $0x340] sm:$0xff]  ;;  %v8069_v25 = vld [vmem:[#allocation11 + $0x348] sm:$0xff] }
 0x7c6   : > { %v11195_v5 = vpack.c.bf16 %v8069_v25, %v8068_v47  ;;  %v8252_v25 = vld [vmem:[#allocation11 + $0x490] sm:$0xff] }
 0x7c7   : > { %9616 = vmatmul.mubr.f32.vlgmr.msra.gmra.mrb[156].mxu1 %v7672_v59 }
 0x7c8   : > { %11124 = vmatpush3.bf16.msra.mxu1 %v11123_v21  ;;  %7983 = vmatprep.mubr.f32.mxu1 %v7668_v18  ;;  %v7719_v21 = vld [vmem:[#allocation11 + $0x128] sm:$0xff] }
 0x7c9   : > { %11126 = vmatprep.subr.bf16.mxu1 %v11125_v39  ;;  %v11160_v59 = vpack.c.bf16 %v7719_v21, %v7718_v30  ;;  %v7720_v39 = vld [vmem:[#allocation11 + $0x130] sm:$0xff]  ;;  %v7723_v18 = vld [vmem:[#allocation11 + $0x148] sm:$0xff]  ;;  %v8071_v30 = vld [vmem:[#allocation11 + $0x358] sm:$0xff] }
 0x7ca   : > { %v11163_v35 = vpack.c.bf16 %v7721_v19, %v7720_v39  ;;  %v11166_v61 = vpack.c.bf16 %v7723_v18, %v7722_v62  ;;  %v8088_v21 = vld [vmem:[#allocation11 + $0x3e0] sm:$0xff]  ;;  %v8073_v62 = vld [vmem:[#allocation11 + $0x368] sm:$0xff]  ;;  %v8090_v18 = vld [vmem:[#allocation11 + $0x3f0] sm:$0xff] }
 0x7cc   : > { %11128 = vmatpush3.bf16.msra.mxu1 %v11127_v14  ;;  %v7725_v14 = vld [vmem:[#allocation11 + $0x158] sm:$0xff] }
 0x7cd   : > { %11130 = vmatprep.subr.bf16.mxu1 %v11129_v55  ;;  %v11169_v55 = vpack.c.bf16 %v7725_v14, %v7724_v24 }
 0x7d0   : > { %11132 = vmatpush3.bf16.msra.mxu1 %v11131_v20  ;;  %v7729_v20 = vld [vmem:[#allocation11 + $0x178] sm:$0xff] }
 0x7d1   : > { %11134 = vmatprep.subr.bf16.mxu1 %v11133_v31  ;;  %v8076_v31 = vld [vmem:[#allocation11 + $0x380] sm:$0xff]  ;;  %v11175_v29 = vpack.c.bf16 %v7729_v20, %v7728_v15  ;;  %v8093_v15 = vld [vmem:[#allocation11 + $0x408] sm:$0xff] }
 0x7d2   : > { %v11177_v33 = vpack.c.bf16 %v8077_v60, %v8076_v31  ;;  %v7673_v31 = vmax.f32 %v15054_v38, 0.0  ;;  %v8094_v60 = vld [vmem:[#allocation11 + $0x410] sm:$0xff]  ;;  %v8099_v38 = vld [vmem:[#allocation11 + $0x438] sm:$0xff] }
 0x7d4   : > { %11136 = vmatpush3.bf16.msra.mxu1 %v11135_v6  ;;  %v8061_v6 = vld [vmem:[#allocation11 + $0x308] sm:$0xff] }
 0x7d5   : > { %11138 = vmatprep.subr.bf16.mxu1 %v11137_v58  ;;  %v8078_v58 = vld [vmem:[#allocation11 + $0x390] sm:$0xff]  ;;  %v11179_v54 = vpack.c.bf16 %v8061_v6, %v8060_v45  ;;  %v8096_v45 = vld [vmem:[#allocation11 + $0x420] sm:$0xff]  ;;  %v8097_v6 = vld [vmem:[#allocation11 + $0x428] sm:$0xff] }
 0x7d6   : > { %v11181_v26 = vpack.c.bf16 %v8079_v8, %v8078_v58  ;;  %v11216_v58 = vpack.c.bf16 %v8097_v6, %v8096_v45  ;;  %v8098_v8 = vld [vmem:[#allocation11 + $0x430] sm:$0xff] }
 0x7d8   : > { %11140 = vmatpush3.bf16.msra.mxu1 %v11139_v27  ;;  %v8062_v27 = vld [vmem:[#allocation11 + $0x310] sm:$0xff] }
 0x7d9   : > { %11142 = vmatprep.subr.bf16.mxu1 %v11141_v57  ;;  %v8063_v57 = vld [vmem:[#allocation11 + $0x318] sm:$0xff] }
 0x7da   : > { %v11183_v3 = vpack.c.bf16 %v8063_v57, %v8062_v27  ;;  %v8102_v57 = vld [vmem:[#allocation11 + $0x450] sm:$0xff] }
 0x7dc   : > { %11144 = vmatpush3.bf16.msra.mxu1 %v11143_v48  ;;  %v11185_v48 = vpack.c.bf16 %v8081_v53, %v8080_v49  ;;  %v8104_v53 = vld [vmem:[#allocation11 + $0x460] sm:$0xff] }
 0x7dd   : > { %11146 = vmatprep.subr.bf16.mxu1 %v11145_v46  ;;  %v8064_v46 = vld [vmem:[#allocation11 + $0x320] sm:$0xff] }
 0x7de   : > { %v11187_v10 = vpack.c.bf16 %v8065_v42, %v8064_v46  ;;  %v8106_v46 = vld [vmem:[#allocation11 + $0x470] sm:$0xff]  ;;  %v8107_v42 = vld [vmem:[#allocation11 + $0x478] sm:$0xff] }
 0x7e0   : > { %11148 = vmatpush3.bf16.msra.mxu1 %v11147_v11  ;;  %v8066_v11 = vld [vmem:[#allocation11 + $0x330] sm:$0xff] }
 0x7e1   : > { %11150 = vmatprep.subr.bf16.mxu1 %v11149_v41  ;;  %v8067_v41 = vld [vmem:[#allocation11 + $0x338] sm:$0xff] }
 0x7e2   : > { %v11191_v34 = vpack.c.bf16 %v8067_v41, %v8066_v11  ;;  %v8250_v11 = vld [vmem:[#allocation11 + $0x480] sm:$0xff]  ;;  %v8251_v41 = vld [vmem:[#allocation11 + $0x488] sm:$0xff] }
 0x7e4   : > { %11152 = vmatpush3.bf16.msra.mxu1 %v11151_v56  ;;  %v11193_v56 = vpack.c.bf16 %v8085_v43, %v8084_v23  ;;  %v8268_v23 = vld [vmem:[#allocation11 + $0x510] sm:$0xff]  ;;  %v8269_v43 = vld [vmem:[#allocation11 + $0x518] sm:$0xff] }
 0x7e5   : > { %11153 = vmatprep.subr.bf16.mxu1 %v12522_v44  ;;  %v11237_v47 = vpack.c.bf16 %v8269_v43, %v8268_v23  ;;  %v8290_v23 = vld [vmem:[#allocation11 + $0x5c0] sm:$0xff]  ;;  %v8291_v43 = vld [vmem:[#allocation11 + $0x5c8] sm:$0xff] }
 0x7e7   : > { %7984 = vmatmul.mubr.f32.vlgmr.msra.gmra.mrb[158].mxu1 %v7667_v7  ;;  %v8087_v7 = vld [vmem:[#allocation11 + $0x3d8] sm:$0xff] }
 0x7e8   : > { %11155 = vmatpush3.bf16.msra.mxu1 %v11154_v0  ;;  %9650 = vmatprep.mubr.msk.f32.mxu1 %vm12523_vm4, %v15539_v13  ;;  %v8086_v0 = vld [vmem:[#allocation11 + $0x3d0] sm:$0xff] }
 0x7e9   : > { %11156 = vmatprep.subr.bf16.mxu1 %v12522_v44  ;;  %v11197_v9 = vpack.c.bf16 %v8087_v7, %v8086_v0  ;;  %v8253_v0 = vld [vmem:[#allocation11 + $0x498] sm:$0xff]  ;;  %v7677_v7 = vmax.f32 %v15121_v12, 0.0  ;;  %v8275_v12 = vld [vmem:[#allocation11 + $0x548] sm:$0xff] }
 0x7ec   : > { %11158 = vmatpush3.bf16.msra.mxu1 %v11157_v4  ;;  %v8070_v4 = vld [vmem:[#allocation11 + $0x350] sm:$0xff] }
 0x7ed   : > { %11159 = vmatprep.subr.bf16.mxu1 %v12522_v44  ;;  %v11199_v39 = vpack.c.bf16 %v8071_v30, %v8070_v4  ;;  %v11239_v4 = vpack.c.bf16 %v8253_v0, %v8252_v25  ;;  %v8294_v0 = vld [vmem:[#allocation11 + $0x5e0] sm:$0xff] }
 0x7f0   : > { %11161 = vmatpush3.bf16.msra.mxu1 %v11160_v59  ;;  %v8089_v59 = vld [vmem:[#allocation11 + $0x3e8] sm:$0xff] }
 0x7f1   : > { %11162 = vmatprep.subr.bf16.mxu1 %v12522_v44  ;;  %v11201_v19 = vpack.c.bf16 %v8089_v59, %v8088_v21  ;;  %v8254_v21 = vld [vmem:[#allocation11 + $0x4a0] sm:$0xff]  ;;  %v8255_v59 = vld [vmem:[#allocation11 + $0x4a8] sm:$0xff] }
 0x7f4   : > { %11164 = vmatpush3.bf16.msra.mxu1 %v11163_v35  ;;  %v8072_v35 = vld [vmem:[#allocation11 + $0x360] sm:$0xff] }
 0x7f5   : > { %11165 = vmatprep.subr.bf16.mxu1 %v12522_v44  ;;  %v11203_v24 = vpack.c.bf16 %v8073_v62, %v8072_v35  ;;  %v8256_v62 = vld [vmem:[#allocation11 + $0x4b0] sm:$0xff] }
 0x7f8   : > { %11167 = vmatpush3.bf16.msra.mxu1 %v11166_v61  ;;  %v8091_v61 = vld [vmem:[#allocation11 + $0x3f8] sm:$0xff] }
 0x7f9   : > { %11168 = vmatprep.subr.bf16.mxu1 %v12522_v44  ;;  %v11205_v14 = vpack.c.bf16 %v8091_v61, %v8090_v18  ;;  %v8257_v18 = vld [vmem:[#allocation11 + $0x4b8] sm:$0xff]  ;;  %v8274_v61 = vld [vmem:[#allocation11 + $0x540] sm:$0xff] }
 0x7fc   : > { %11170 = vmatpush3.bf16.msra.mxu1 %v11169_v55  ;;  %v8074_v55 = vld [vmem:[#allocation11 + $0x370] sm:$0xff] }
 0x7fd   : > { %11171 = vmatprep.subr.bf16.mxu1 %v12522_v44  ;;  %v11207_v51 = vpack.c.bf16 %v8075_v63, %v8074_v55  ;;  %v8258_v55 = vld [vmem:[#allocation11 + $0x4c0] sm:$0xff]  ;;  %v8259_v63 = vld [vmem:[#allocation11 + $0x4c8] sm:$0xff] }
 0x800   : > { %11173 = vmatpush3.bf16.msra.mxu1 %v11172_v2  ;;  %v8092_v2 = vld [vmem:[#allocation11 + $0x400] sm:$0xff] }
 0x801   : > { %11174 = vmatprep.subr.bf16.mxu1 %v12522_v44  ;;  %v11210_v20 = vpack.c.bf16 %v8093_v15, %v8092_v2  ;;  %v8277_v2 = vld [vmem:[#allocation11 + $0x558] sm:$0xff]  ;;  %v11251_v15 = vpack.c.bf16 %v8259_v63, %v8258_v55  ;;  %v8442_v63 = vld [vmem:[#allocation11 + $0x610] sm:$0xff] }
 0x804   : > { %11176 = vmatpush3.bf16.msra.mxu1 %v11175_v29  ;;  %v8095_v29 = vld [vmem:[#allocation11 + $0x418] sm:$0xff] }
 0x805   : > { %11178 = vmatprep.subr.bf16.mxu1 %v11177_v33  ;;  %v11213_v33 = vpack.c.bf16 %v8095_v29, %v8094_v60  ;;  %v8261_v60 = vld [vmem:[#allocation11 + $0x4d8] sm:$0xff]  ;;  %v8278_v29 = vld [vmem:[#allocation11 + $0x560] sm:$0xff] }
 0x807   : > { %9651 = vmatmul.mubr.f32.vlgmr.msra.gmra.mrb[160].mxu1 %v7669_v17  ;;  %v8100_v17 = vld [vmem:[#allocation11 + $0x440] sm:$0xff] }
 0x808   : > { %11180 = vmatpush3.bf16.msra.mxu1 %v11179_v54  ;;  %8172 = vmatprep.mubr.f32.mxu1 %v7674_v40  ;;  %v11219_v54 = vpack.c.bf16 %v8099_v38, %v8098_v8  ;;  %v8103_v40 = vld [vmem:[#allocation11 + $0x458] sm:$0xff]  ;;  %v8263_v8 = vld [vmem:[#allocation11 + $0x4e8] sm:$0xff]  ;;  %v8280_v38 = vld [vmem:[#allocation11 + $0x570] sm:$0xff] }
 0x809   : > { %11182 = vmatprep.subr.bf16.mxu1 %v11181_v26  ;;  %v8101_v26 = vld [vmem:[#allocation11 + $0x448] sm:$0xff]  ;;  %v11225_v49 = vpack.c.bf16 %v8103_v40, %v8102_v57  ;;  %v8265_v57 = vld [vmem:[#allocation11 + $0x4f8] sm:$0xff] }
 0x80a   : > { %v11222_v27 = vpack.c.bf16 %v8101_v26, %v8100_v17 }
 0x80c   : > { %11184 = vmatpush3.bf16.msra.mxu1 %v11183_v3  ;;  %v8105_v3 = vld [vmem:[#allocation11 + $0x468] sm:$0xff] }
 0x80d   : > { %11186 = vmatprep.subr.bf16.mxu1 %v11185_v48  ;;  %v11228_v48 = vpack.c.bf16 %v8105_v3, %v8104_v53  ;;  %v8283_v53 = vld [vmem:[#allocation11 + $0x588] sm:$0xff] }
 0x810   : > { %11188 = vmatpush3.bf16.msra.mxu1 %v11187_v10  ;;  %v11231_v10 = vpack.c.bf16 %v8107_v42, %v8106_v46  ;;  %v8284_v46 = vld [vmem:[#allocation11 + $0x590] sm:$0xff]  ;;  %v8285_v42 = vld [vmem:[#allocation11 + $0x598] sm:$0xff] }
 0x811   : > { %11190 = vmatprep.subr.bf16.mxu1 %v11189_v36  ;;  %v11233_v36 = vpack.c.bf16 %v8267_v50, %v8266_v16  ;;  %v11269_v16 = vpack.c.bf16 %v8285_v42, %v8284_v46  ;;  %v8286_v50 = vld [vmem:[#allocation11 + $0x5a0] sm:$0xff]  ;;  %v8451_v46 = vld [vmem:[#allocation11 + $0x658] sm:$0xff] }
 0x812   : > { %v8468_v42 = vld [vmem:[#allocation11 + $0x6e0] sm:$0xff] }
 0x814   : > { %11192 = vmatpush3.bf16.msra.mxu1 %v11191_v34  ;;  %v11235_v34 = vpack.c.bf16 %v8251_v41, %v8250_v11  ;;  %v8288_v11 = vld [vmem:[#allocation11 + $0x5b0] sm:$0xff] }
 0x815   : > { %11194 = vmatprep.subr.bf16.mxu1 %v11193_v56  ;;  %v7675_v56 = vmax.f32 %v15112_v28, 0.0  ;;  %v11243_v28 = vpack.c.bf16 %v8255_v59, %v8254_v21  ;;  %v8296_v21 = vld [vmem:[#allocation11 + $0x5f0] sm:$0xff]  ;;  %v8297_v59 = vld [vmem:[#allocation11 + $0x5f8] sm:$0xff] }
 0x818   : > { %11196 = vmatpush3.bf16.msra.mxu1 %v11195_v5  ;;  %v8270_v5 = vld [vmem:[#allocation11 + $0x520] sm:$0xff] }
 0x819   : > { %11198 = vmatprep.subr.bf16.mxu1 %v11197_v9  ;;  %v8271_v9 = vld [vmem:[#allocation11 + $0x528] sm:$0xff] }
 0x81a   : > { %v11241_v30 = vpack.c.bf16 %v8271_v9, %v8270_v5 }
 0x81c   : > { %11200 = vmatpush3.bf16.msra.mxu1 %v11199_v39  ;;  %v8272_v39 = vld [vmem:[#allocation11 + $0x530] sm:$0xff] }
 0x81d   : > { %11202 = vmatprep.subr.bf16.mxu1 %v11201_v19  ;;  %v8273_v19 = vld [vmem:[#allocation11 + $0x538] sm:$0xff] }
 0x81e   : > { %v11245_v35 = vpack.c.bf16 %v8273_v19, %v8272_v39  ;;  %v8456_v39 = vld [vmem:[#allocation11 + $0x680] sm:$0xff]  ;;  %v8457_v19 = vld [vmem:[#allocation11 + $0x688] sm:$0xff] }
 0x820   : > { %11204 = vmatpush3.bf16.msra.mxu1 %v11203_v24  ;;  %v11247_v24 = vpack.c.bf16 %v8257_v18, %v8256_v62  ;;  %v8440_v62 = vld [vmem:[#allocation11 + $0x600] sm:$0xff]  ;;  %v8441_v18 = vld [vmem:[#allocation11 + $0x608] sm:$0xff] }
 0x821   : > { %11206 = vmatprep.subr.bf16.mxu1 %v11205_v14  ;;  %v11249_v14 = vpack.c.bf16 %v8275_v12, %v8274_v61  ;;  %v8458_v61 = vld [vmem:[#allocation11 + $0x690] sm:$0xff]  ;;  %v8459_v12 = vld [vmem:[#allocation11 + $0x698] sm:$0xff] }
 0x822   : > { %v11293_v55 = vpack.c.bf16 %v8459_v12, %v8458_v61  ;;  %v8480_v61 = vld [vmem:[#allocation11 + $0x740] sm:$0xff]  ;;  %v8481_v12 = vld [vmem:[#allocation11 + $0x748] sm:$0xff] }
 0x824   : > { %11208 = vmatpush3.bf16.msra.mxu1 %v11207_v51  ;;  %v8276_v51 = vld [vmem:[#allocation11 + $0x550] sm:$0xff] }
 0x825   : > { %11209 = vmatprep.subr.bf16.mxu1 %v12522_v44 }
 0x827   : > { %8173 = vmatmul.mubr.f32.vlgmr.msra.gmra.mrb[162].mxu1 %v7673_v31  ;;  %v8260_v31 = vld [vmem:[#allocation11 + $0x4d0] sm:$0xff] }
 0x828   : > { %11211 = vmatpush3.bf16.msra.mxu1 %v11210_v20  ;;  %9685 = vmatprep.mubr.msk.f32.mxu1 %vm12523_vm4, %v15539_v13  ;;  %v11253_v20 = vpack.c.bf16 %v8277_v2, %v8276_v51  ;;  %v11255_v45 = vpack.c.bf16 %v8261_v60, %v8260_v31  ;;  %v8443_v51 = vld [vmem:[#allocation11 + $0x618] sm:$0xff]  ;;  %v7680_v2 = vmax.f32 %v15132_v22, 0.0  ;;  %v8465_v22 = vld [vmem:[#allocation11 + $0x6c8] sm:$0xff] }
 0x829   : > { %11212 = vmatprep.subr.bf16.mxu1 %v12522_v44  ;;  %v11295_v31 = vpack.c.bf16 %v8443_v51, %v8442_v63  ;;  %v8484_v51 = vld [vmem:[#allocation11 + $0x760] sm:$0xff] }
 0x82c   : > { %11214 = vmatpush3.bf16.msra.mxu1 %v11213_v33  ;;  %v8279_v33 = vld [vmem:[#allocation11 + $0x568] sm:$0xff] }
 0x82d   : > { %11215 = vmatprep.subr.bf16.mxu1 %v12522_v44  ;;  %v11257_v6 = vpack.c.bf16 %v8279_v33, %v8278_v29  ;;  %v8444_v29 = vld [vmem:[#allocation11 + $0x620] sm:$0xff]  ;;  %v8445_v33 = vld [vmem:[#allocation11 + $0x628] sm:$0xff] }
 0x830   : > { %11217 = vmatpush3.bf16.msra.mxu1 %v11216_v58  ;;  %v8262_v58 = vld [vmem:[#allocation11 + $0x4e0] sm:$0xff] }
 0x831   : > { %11218 = vmatprep.subr.bf16.mxu1 %v12522_v44  ;;  %v11259_v17 = vpack.c.bf16 %v8263_v8, %v8262_v58  ;;  %v8446_v8 = vld [vmem:[#allocation11 + $0x630] sm:$0xff] }
 0x834   : > { %11220 = vmatpush3.bf16.msra.mxu1 %v11219_v54  ;;  %v8281_v54 = vld [vmem:[#allocation11 + $0x578] sm:$0xff] }
 0x835   : > { %11221 = vmatprep.subr.bf16.mxu1 %v12522_v44  ;;  %v11261_v26 = vpack.c.bf16 %v8281_v54, %v8280_v38  ;;  %v8447_v38 = vld [vmem:[#allocation11 + $0x638] sm:$0xff]  ;;  %v8464_v54 = vld [vmem:[#allocation11 + $0x6c0] sm:$0xff] }
 0x838   : > { %11223 = vmatpush3.bf16.msra.mxu1 %v11222_v27  ;;  %v8264_v27 = vld [vmem:[#allocation11 + $0x4f0] sm:$0xff] }
 0x839   : > { %11224 = vmatprep.subr.bf16.mxu1 %v12522_v44  ;;  %v11263_v40 = vpack.c.bf16 %v8265_v57, %v8264_v27  ;;  %v8448_v27 = vld [vmem:[#allocation11 + $0x640] sm:$0xff]  ;;  %v8449_v57 = vld [vmem:[#allocation11 + $0x648] sm:$0xff] }
 0x83c   : > { %11226 = vmatpush3.bf16.msra.mxu1 %v11225_v49  ;;  %v8282_v49 = vld [vmem:[#allocation11 + $0x580] sm:$0xff] }
 0x83d   : > { %11227 = vmatprep.subr.bf16.mxu1 %v12522_v44  ;;  %v11266_v3 = vpack.c.bf16 %v8283_v53, %v8282_v49  ;;  %v8467_v49 = vld [vmem:[#allocation11 + $0x6d8] sm:$0xff]  ;;  %v11307_v53 = vpack.c.bf16 %v8449_v57, %v8448_v27  ;;  %v8639_v27 = vld [vmem:[#allocation14 + $0x8] sm:$0xff] }
 0x83e   : > { %v8640_v57 = vld [vmem:[#allocation14 + $0x10] sm:$0xff] }
 0x840   : > { %11229 = vmatpush3.bf16.msra.mxu1 %v11228_v48  ;;  %v7676_v48 = vmax.f32 %v15063_v32, 0.0  ;;  %v8289_v32 = vld [vmem:[#allocation11 + $0x5b8] sm:$0xff] }
 0x841   : > { %11230 = vmatprep.subr.bf16.mxu1 %v12522_v44  ;;  %v11275_v41 = vpack.c.bf16 %v8289_v32, %v8288_v11  ;;  %v8453_v11 = vld [vmem:[#allocation11 + $0x668] sm:$0xff] }
 0x844   : > { %11232 = vmatpush3.bf16.msra.mxu1 %v11231_v10  ;;  %v8287_v10 = vld [vmem:[#allocation11 + $0x5a8] sm:$0xff] }
 0x845   : > { %11234 = vmatprep.subr.bf16.mxu1 %v11233_v36  ;;  %v11272_v36 = vpack.c.bf16 %v8287_v10, %v8286_v50 }
 0x847   : > { %9686 = vmatmul.mubr.f32.vlgmr.msra.gmra.mrb[164].mxu1 %v7675_v56  ;;  %v8292_v56 = vld [vmem:[#allocation11 + $0x5d0] sm:$0xff] }
 0x848   : > { %11236 = vmatpush3.bf16.msra.mxu1 %v11235_v34  ;;  %8362 = vmatprep.mubr.f32.mxu1 %v7677_v7  ;;  %v11278_v34 = vpack.c.bf16 %v8291_v43, %v8290_v23  ;;  %v8295_v7 = vld [vmem:[#allocation11 + $0x5e8] sm:$0xff]  ;;  %v8471_v23 = vld [vmem:[#allocation11 + $0x6f8] sm:$0xff] }
 0x849   : > { %11238 = vmatprep.subr.bf16.mxu1 %v11237_v47  ;;  %v8293_v47 = vld [vmem:[#allocation11 + $0x5d8] sm:$0xff] }
 0x84a   : > { %v11281_v25 = vpack.c.bf16 %v8293_v47, %v8292_v56 }
 0x84c   : > { %11240 = vmatpush3.bf16.msra.mxu1 %v11239_v4 }
 0x84d   : > { %11242 = vmatprep.subr.bf16.mxu1 %v11241_v30  ;;  %v11284_v30 = vpack.c.bf16 %v8295_v7, %v8294_v0  ;;  %v8455_v0 = vld [vmem:[#allocation11 + $0x678] sm:$0xff] }
 0x850   : > { %11244 = vmatpush3.bf16.msra.mxu1 %v11243_v28  ;;  %v11287_v28 = vpack.c.bf16 %v8297_v59, %v8296_v21  ;;  %v7679_v21 = vmax.f32 %v15072_v1, 0.0  ;;  %v8474_v59 = vld [vmem:[#allocation11 + $0x710] sm:$0xff]  ;;  %v8479_v1 = vld [vmem:[#allocation11 + $0x738] sm:$0xff] }
 0x851   : > { %11246 = vmatprep.subr.bf16.mxu1 %v11245_v35  ;;  %v11289_v35 = vpack.c.bf16 %v8457_v19, %v8456_v39  ;;  %v8476_v19 = vld [vmem:[#allocation11 + $0x720] sm:$0xff] }
 0x854   : > { %11248 = vmatpush3.bf16.msra.mxu1 %v11247_v24  ;;  %v11291_v24 = vpack.c.bf16 %v8441_v18, %v8440_v62  ;;  %v8478_v62 = vld [vmem:[#allocation11 + $0x730] sm:$0xff] }
 0x855   : > { %11250 = vmatprep.subr.bf16.mxu1 %v11249_v14  ;;  %v7678_v14 = vmax.f32 %v15124_v37, 0.0  ;;  %v11299_v37 = vpack.c.bf16 %v8445_v33, %v8444_v29  ;;  %v11331_v18 = vpack.c.bf16 %v8479_v1, %v8478_v62  ;;  %v8486_v29 = vld [vmem:[#allocation11 + $0x770] sm:$0xff]  ;;  %v8487_v33 = vld [vmem:[#allocation11 + $0x778] sm:$0xff] }
 0x858   : > { %11252 = vmatpush3.bf16.msra.mxu1 %v11251_v15  ;;  %v8460_v15 = vld [vmem:[#allocation11 + $0x6a0] sm:$0xff] }
 0x859   : > { %11254 = vmatprep.subr.bf16.mxu1 %v11253_v20  ;;  %v8461_v20 = vld [vmem:[#allocation11 + $0x6a8] sm:$0xff] }
 0x85a   : > { %v11297_v60 = vpack.c.bf16 %v8461_v20, %v8460_v15 }
 0x85c   : > { %11256 = vmatpush3.bf16.msra.mxu1 %v11255_v45  ;;  %v8462_v45 = vld [vmem:[#allocation11 + $0x6b0] sm:$0xff] }
 0x85d   : > { %11258 = vmatprep.subr.bf16.mxu1 %v11257_v6  ;;  %v8463_v6 = vld [vmem:[#allocation11 + $0x6b8] sm:$0xff] }
 0x85e   : > { %v11301_v58 = vpack.c.bf16 %v8463_v6, %v8462_v45  ;;  %v11343_v6 = vpack.c.bf16 %v8487_v33, %v8486_v29 }
 0x860   : > { %11260 = vmatpush3.bf16.msra.mxu1 %v11259_v17  ;;  %v11303_v17 = vpack.c.bf16 %v8447_v38, %v8446_v8 }
 0x861   : > { %11262 = vmatprep.subr.bf16.mxu1 %v11261_v26  ;;  %v11305_v26 = vpack.c.bf16 %v8465_v22, %v8464_v54 }
 0x864   : > { %11264 = vmatpush3.bf16.msra.mxu1 %v11263_v40  ;;  %v8466_v40 = vld [vmem:[#allocation11 + $0x6d0] sm:$0xff] }
 0x865   : > { %11265 = vmatprep.subr.bf16.mxu1 %v12522_v44 }
 0x867   : > { %8363 = vmatmul.mubr.f32.vlgmr.msra.gmra.mrb[166].mxu1 %v7676_v48  ;;  %v8450_v48 = vld [vmem:[#allocation11 + $0x650] sm:$0xff] }
 0x868   : > { %11267 = vmatpush3.bf16.msra.mxu1 %v11266_v3  ;;  %9720 = vmatprep.mubr.msk.f32.mxu1 %vm12523_vm4, %v15539_v13  ;;  %v11309_v3 = vpack.c.bf16 %v8467_v49, %v8466_v40  ;;  %v11311_v50 = vpack.c.bf16 %v8451_v46, %v8450_v48  ;;  %v8641_v49 = vld [vmem:[#allocation14 + $0x18] sm:$0xff] }
 0x869   : > { %11268 = vmatprep.subr.bf16.mxu1 %v12522_v44  ;;  %v8645_v46 = vld [vmem:[#allocation14 + $0x38] sm:$0xff] }
 0x86c   : > { %11270 = vmatpush3.bf16.msra.mxu1 %v11269_v16  ;;  %v8469_v16 = vld [vmem:[#allocation11 + $0x6e8] sm:$0xff] }
 0x86d   : > { %11271 = vmatprep.subr.bf16.mxu1 %v12522_v44  ;;  %v11313_v10 = vpack.c.bf16 %v8469_v16, %v8468_v42  ;;  %v8646_v16 = vld [vmem:[#allocation14 + $0x40] sm:$0xff] }
 0x870   : > { %11273 = vmatpush3.bf16.msra.mxu1 %v11272_v36  ;;  %v8452_v36 = vld [vmem:[#allocation11 + $0x660] sm:$0xff] }
 0x871   : > { %11274 = vmatprep.subr.bf16.mxu1 %v12522_v44  ;;  %v11315_v56 = vpack.c.bf16 %v8453_v11, %v8452_v36  ;;  %v8648_v36 = vld [vmem:[#allocation14 + $0x50] sm:$0xff]  ;;  %v8649_v11 = vld [vmem:[#allocation14 + $0x58] sm:$0xff] }
 0x874   : > { %11276 = vmatpush3.bf16.msra.mxu1 %v11275_v41  ;;  %v8470_v41 = vld [vmem:[#allocation11 + $0x6f0] sm:$0xff] }
 0x875   : > { %11277 = vmatprep.subr.bf16.mxu1 %v12522_v44  ;;  %v11317_v47 = vpack.c.bf16 %v8471_v23, %v8470_v41  ;;  %v8650_v41 = vld [vmem:[#allocation14 + $0x60] sm:$0xff]  ;;  %v8651_v23 = vld [vmem:[#allocation14 + $0x68] sm:$0xff] }
 0x878   : > { %11279 = vmatpush3.bf16.msra.mxu1 %v11278_v34 }
 0x879   : > { %11280 = vmatprep.subr.bf16.mxu1 %v12522_v44 }
 0x87a   : > { %v9338_v5 = vpop.f32.mrb[154].mxu1 }
 0x87b   : > { %v9339_v9 = vpop.f32.mrb[155].mxu1 }
 0x87c   : > { %v15178_v4 = vadd.f32 %v9339_v9, %v9338_v5  ;;  %11282 = vmatpush3.bf16.msra.mxu1 %v11281_v25  ;;  %v8454_v25 = vld [vmem:[#allocation11 + $0x670] sm:$0xff]  ;;  %v8472_v5 = vld [vmem:[#allocation11 + $0x700] sm:$0xff]  ;;  %v8473_v9 = vld [vmem:[#allocation11 + $0x708] sm:$0xff] }
 0x87d   : > { %11283 = vmatprep.subr.bf16.mxu1 %v12522_v44  ;;  %v11319_v7 = vpack.c.bf16 %v8455_v0, %v8454_v25  ;;  %v8652_v0 = vld [vmem:[#allocation14 + $0x70] sm:$0xff] }
 0x880   : > { %11285 = vmatpush3.bf16.msra.mxu1 %v11284_v30  ;;  %v11322_v30 = vpack.c.bf16 %v8473_v9, %v8472_v5 }
 0x881   : > { %11286 = vmatprep.subr.bf16.mxu1 %v12522_v44 }
 0x884   : > { %11288 = vmatpush3.bf16.msra.mxu1 %v11287_v28  ;;  %v8477_v28 = vld [vmem:[#allocation11 + $0x728] sm:$0xff] }
 0x885   : > { %11290 = vmatprep.subr.bf16.mxu1 %v11289_v35  ;;  %v11328_v35 = vpack.c.bf16 %v8477_v28, %v8476_v19 }
 0x887   : > { %9721 = vmatmul.mubr.f32.vlgmr.msra.gmra.mrb[168].mxu1 %v7678_v14  ;;  %v8482_v14 = vld [vmem:[#allocation11 + $0x750] sm:$0xff] }
 0x888   : > { %11292 = vmatpush3.bf16.msra.mxu1 %v11291_v24  ;;  %8552 = vmatprep.mubr.f32.mxu1 %v7680_v2  ;;  %v11334_v24 = vpack.c.bf16 %v8481_v12, %v8480_v61  ;;  %v8485_v2 = vld [vmem:[#allocation11 + $0x768] sm:$0xff] }
 0x889   : > { %11294 = vmatprep.subr.bf16.mxu1 %v11293_v55  ;;  %v8483_v55 = vld [vmem:[#allocation11 + $0x758] sm:$0xff] }
 0x88a   : > { %v11337_v63 = vpack.c.bf16 %v8483_v55, %v8482_v14  ;;  %v9301_v55 = vld [vmem:[#allocation15] ss:$0 sm:$0xff] }
 0x88c   : > { %11296 = vmatpush3.bf16.msra.mxu1 %v11295_v31 }
 0x88d   : > { %11298 = vmatprep.subr.bf16.mxu1 %v11297_v60  ;;  %v11340_v60 = vpack.c.bf16 %v8485_v2, %v8484_v51 }
 0x890   : > { %11300 = vmatpush3.bf16.msra.mxu1 %v11299_v37  ;;  %v7681_v37 = vmax.f32 %v15135_v52, 0.0  ;;  %v8642_v52 = vld [vmem:[#allocation14 + $0x20] sm:$0xff] }
 0x891   : > { %11302 = vmatprep.subr.bf16.mxu1 %v11301_v58 }
 0x894   : > { %11304 = vmatpush3.bf16.msra.mxu1 %v11303_v17 }
 0x895   : > { %11306 = vmatprep.subr.bf16.mxu1 %v11305_v26  ;;  %v8638_v26 = vld [vmem:[#allocation14] sm:$0xff] }
 0x896   : > { %v11346_v40 = vpack.c.bf16 %v8639_v27, %v8638_v26 }
 0x898   : > { %11308 = vmatpush3.bf16.msra.mxu1 %v11307_v53  ;;  %v11349_v53 = vpack.c.bf16 %v8641_v49, %v8640_v57 }
 0x899   : > { %11310 = vmatprep.subr.bf16.mxu1 %v11309_v3  ;;  %v8643_v3 = vld [vmem:[#allocation14 + $0x28] sm:$0xff] }
 0x89a   : > { %v7915_v32 = vpop.f32.mrb[156].mxu1  ;;  %v11352_v48 = vpack.c.bf16 %v8643_v3, %v8642_v52 }
 0x89b   : > { %v7916_v43 = vadd.f32 %v15178_v4, %v7915_v32  ;;  %v9617_v34 = vpop.f32.mrb[157].mxu1  ;;  %v8475_v4 = vld [vmem:[#allocation11 + $0x718] sm:$0xff]  ;;  %v11361_v32 = vpack.c.bf16 %v8649_v11, %v8648_v36 }
 0x89c   : > { %11312 = vmatpush3.bf16.msra.mxu1 %v11311_v50  ;;  %v11325_v39 = vpack.c.bf16 %v8475_v4, %v8474_v59  ;;  %v8647_v50 = vld [vmem:[#allocation14 + $0x48] sm:$0xff]  ;;  %v11364_v34 = vpack.c.bf16 %v8651_v23, %v8650_v41 }
 0x89d   : > { %11314 = vmatprep.subr.bf16.mxu1 %v11313_v10  ;;  %v11358_v10 = vpack.c.bf16 %v8647_v50, %v8646_v16 }
 0x8a0   : > { %11316 = vmatpush3.bf16.msra.mxu1 %v11315_v56 }
 0x8a1   : > { %11318 = vmatprep.subr.bf16.mxu1 %v11317_v47 }
 0x8a4   : > { %11320 = vmatpush3.bf16.msra.mxu1 %v11319_v7  ;;  %v8653_v7 = vld [vmem:[#allocation14 + $0x78] sm:$0xff] }
 0x8a5   : > { %11321 = vmatprep.subr.bf16.mxu1 %v12522_v44  ;;  %v11367_v5 = vpack.c.bf16 %v8653_v7, %v8652_v0 }
 0x8a7   : > { %8553 = vmatmul.mubr.f32.vlgmr.msra.gmra.mrb[170].mxu1 %v7679_v21 }
 0x8a8   : > { %11323 = vmatpush3.bf16.msra.mxu1 %v11322_v30  ;;  %9755 = vmatprep.mubr.msk.f32.mxu1 %vm12523_vm4, %v15539_v13 }
 0x8a9   : > { %11324 = vmatprep.subr.bf16.mxu1 %v12522_v44 }
 0x8ac   : > { %11326 = vmatpush3.bf16.msra.mxu1 %v11325_v39 }
 0x8ad   : > { %11327 = vmatprep.subr.bf16.mxu1 %v12522_v44 }
 0x8b0   : > { %11329 = vmatpush3.bf16.msra.mxu1 %v11328_v35 }
 0x8b1   : > { %11330 = vmatprep.subr.bf16.mxu1 %v12522_v44 }
 0x8b4   : > { %11332 = vmatpush3.bf16.msra.mxu1 %v11331_v18 }
 0x8b5   : > { %11333 = vmatprep.subr.bf16.mxu1 %v12522_v44 }
 0x8b8   : > { %11335 = vmatpush3.bf16.msra.mxu1 %v11334_v24 }
 0x8b9   : > { %11336 = vmatprep.subr.bf16.mxu1 %v12522_v44 }
 0x8ba   : > { %v9390_v15 = vpop.f32.mrb[158].mxu1 }
 0x8bb   : > { %v9391_v20 = vpop.f32.mrb[159].mxu1 }
 0x8bc   : > { %v9392_v31 = vadd.f32 %v9391_v20, %v9390_v15  ;;  %11338 = vmatpush3.bf16.msra.mxu1 %v11337_v63 }
 0x8bd   : > { %11339 = vmatprep.subr.bf16.mxu1 %v12522_v44 }
 0x8be   : > { %v7986_v45 = vadd.f32 %v9392_v31, %v7916_v43 }
 0x8c0   : > { %11341 = vmatpush3.bf16.msra.mxu1 %v11340_v60 }
 0x8c1   : > { %11342 = vmatprep.subr.bf16.mxu1 %v12522_v44 }
 0x8c4   : > { %11344 = vmatpush3.bf16.msra.mxu1 %v11343_v6 }
 0x8c5   : > { %11345 = vmatprep.subr.bf16.mxu1 %v12522_v44 }
 0x8c7   : > { %9756 = vmatmul.mubr.f32.vlgmr.msra.gmra.mrb[172].mxu1 %v7681_v37 }
 0x8c8   : > { %9790 = vmatprep.mubr.msk.f32.mxu1 %vm12523_vm4, %v15539_v13  ;;  %11347 = vmatpush3.bf16.msra.mxu1 %v11346_v40  ;;  %v8644_v13 = vld [vmem:[#allocation14 + $0x30] sm:$0xff] }
 0x8c9   : > { %11348 = vmatprep.subr.bf16.mxu1 %v12522_v44  ;;  %v11355_v42 = vpack.c.bf16 %v8645_v46, %v8644_v13 }
 0x8cc   : > { %11350 = vmatpush3.bf16.msra.mxu1 %v11349_v53 }
 0x8cd   : > { %11351 = vmatprep.subr.bf16.mxu1 %v12522_v44 }
 0x8d0   : > { %11353 = vmatpush3.bf16.msra.mxu1 %v11352_v48 }
 0x8d1   : > { %11354 = vmatprep.subr.bf16.mxu1 %v12522_v44 }
 0x8d4   : > { %11356 = vmatpush3.bf16.msra.mxu1 %v11355_v42 }
 0x8d5   : > { %11357 = vmatprep.subr.bf16.mxu1 %v12522_v44 }
 0x8d8   : > { %11359 = vmatpush3.bf16.msra.mxu1 %v11358_v10 }
 0x8d9   : > { %11360 = vmatprep.subr.bf16.mxu1 %v12522_v44 }
 0x8da   : > { %v8055_v58 = vpop.f32.mrb[160].mxu1 }
 0x8db   : > { %v8056_v8 = vadd.f32 %v8055_v58, %v7986_v45  ;;  %v9652_v38 = vpop.f32.mrb[161].mxu1 }
 0x8dc   : > { %11362 = vmatpush3.bf16.msra.mxu1 %v11361_v32 }
 0x8dd   : > { %11363 = vmatprep.subr.bf16.mxu1 %v12522_v44 }
 0x8e0   : > { %11365 = vmatpush3.bf16.msra.mxu1 %v11364_v34 }
 0x8e1   : > { %11366 = vmatprep.subr.bf16.mxu1 %v12522_v44  ;;  %v9300_v44 = vld [vmem:[#allocation12] ss:$0 sm:$0xff] }
 0x8e4   : > { %11368 = vmatpush3.bf16.msra.mxu1 %v11367_v5 }
 0x8fa   : > { %v9442_v54 = vpop.f32.mrb[162].mxu1 }
 0x8fb   : > { %v9443_v22 = vpop.f32.mrb[163].mxu1 }
 0x8fc   : > { %v9444_v17 = vadd.f32 %v9443_v22, %v9442_v54 }
 0x91a   : > { %v8244_v43 = vpop.f32.mrb[164].mxu1 }
 0x91b   : > { %v8245_v56 = vadd.f32 %v9444_v17, %v8244_v43  ;;  %v9687_v47 = vpop.f32.mrb[165].mxu1 }
 0x91d   : > { %v8248_v25 = vadd.f32 %v8245_v56, %v8056_v8 }
 0x93a   : > { %v9494_v9 = vpop.f32.mrb[166].mxu1 }
 0x93b   : > { %v9495_v30 = vpop.f32.mrb[167].mxu1 }
 0x93c   : > { %v9496_v21 = vadd.f32 %v9495_v30, %v9494_v9 }
 0x95a   : > { %v8434_v59 = vpop.f32.mrb[168].mxu1 }
 0x95b   : > { %v8435_v4 = vadd.f32 %v9496_v21, %v8434_v59  ;;  %v9722_v39 = vpop.f32.mrb[169].mxu1 }
 0x95d   : > { %v8438_v19 = vadd.f32 %v8435_v4, %v8248_v25 }
 0x97a   : > { %v9546_v28 = vpop.f32.mrb[170].mxu1 }
 0x97b   : > { %v9547_v35 = vpop.f32.mrb[171].mxu1 }
 0x97c   : > { %v9548_v62 = vadd.f32 %v9547_v35, %v9546_v28 }
 0x99a   : > { %v8624_v1 = vpop.f32.mrb[172].mxu1 }
 0x99b   : > { %v8625_v18 = vadd.f32 %v9548_v62, %v8624_v1  ;;  %v9757_v61 = vpop.f32.mrb[173].mxu1 }
 0x99d   : > { %v8628_v12 = vadd.f32 %v8625_v18, %v8438_v19 }
 0x99f   : > { %v8636_v24 = vadd.f32 %v9300_v44, %v8628_v12 }
 0x9a1   : > { %v8637_v14 = vmax.f32 %v8636_v24, 0.0 }
 0x9a3   : > { %9791 = vmatmul.mubr.f32.vlgmr.msra.gmra.mrb[174].mxu1 %v8637_v14 }
 0xa76   : > { %v8727_v63 = vpop.f32.mrb[174].mxu1 }
 0xa77   : > { %v8728_v51 = vadd.f32 %v9301_v55, %v8727_v63  ;;  %v9792_v2 = vpop.f32.mrb[175].mxu1 }
 0xa79   : > { %8731 = vst [vmem:[%s581_s2] sm:$0xff] %v8728_v51 }
 0xa7a   : > { %12435 = shalt.err (!%p12432_p11)
}
 0xa7b   : > { %s12436_s26 = scalar_lea.hbm %s15212_s23, 128  ;;  %s12440_s19 = scalar_lea.hbm %s15265_s9, 256 }
 0xa7c   : > { %p12437_p12 = scmp.ne.s32.totalorder %s15212_s23, %s12436_s26  ;;  %p12441_p8 = scmp.lt.u32.totalorder %s15212_s23, %s15265_s9 }
 0xa7d   : > { %p12442_p9 = scmp.lt.u32.totalorder %s12440_s19, %s12436_s26  ;;  %p12444_p0 = scmp.lt.u32.totalorder %s12436_s26, %s15212_s23 }
 0xa7e   : > { %p12438_p4 = pnand %p12437_p12, %p15544_p2 }
 0xa7f   : > { %p12443_p13 = por %p12442_p9, %p12441_p8 }
 0xa80   : > { %p12439_p7 = pneg %p12438_p4 }
 0xa81   : > { %p12445_p3 = por %p12444_p0, %p12443_p13 }
 0xa83   : > { %p12446_p6 = pnand %p12445_p3, %p12439_p7 }
 0xa85   : > { %12449 = shalt.err (!%p12446_p6)
}
 0xa86   : > { %12091 = dma.vmem_to_hbm [thread:$0]  (%p15544_p2), %s15214_s17, 128, %s15212_s23, %s8733_s4  }
 0xa87 PF: > { %s15545_s15 = sld [smem:[#allocation24_spill]]  ;;  %s15546_s22 = sld [smem:[#allocation27_spill]] }
 0xa8d   : > { %s8758_s28 = sand.u32 1, %s15545_s15   ;;  %p15547_p5 = scmp.ne.s32.totalorder %s15546_s22, 0 }
 0xa8e   : > { %s8759_s2 = scalar_lea.sflag [#allocation5], %s8758_s28 }
 0xa8f   : > { %p12119_p10 = pnand %p8900_p1, %p15547_p5 }
 0xa91   : > { %12487 = dma.done.wait (!%p12119_p10), %s8759_s2, 128  }
 0xa92   : > { %12489 = vsyncadd (!%p12119_p10), %s8759_s2, 4294967168  ;;  %s15548_s12 = sld [smem:[#allocation25_spill]]  ;;  %s15549_s18 = sld [smem:[#allocation26_spill]] }
 0xa93   : > { %s15550_s30 = smov %s12496_s10  ;;  %s15551_s10 = smov %s12500_s11 }
 0xa98   : > { %p24_p11 = scmp.ge.s32.totalorder %s15548_s12, 4   ;;  %s15552_s11 = smov %s15549_s18 }
 0xa9a   :  { %26 = sbr.rel (!%p24_p11) target bundleno = 11 (0xb), region = 177 }
 0xaa1   :  { %8764 = vsyncpa [#allocation4], 1 }
 0xaa2   :  { %8766 = vsyncpa [#allocation4 + $0x1], 1 }
 0xaa3   :  { %8767 = vsyncpa [#allocation7], 1 }
 0xaa4   :  { %8768 = vsyncpa [#allocation10], 1 }
 0xaa5   :  { %8769 = vsyncpa [#allocation13], 1 }
 0xaa6   :  { %8770 = vsyncpa [#allocation16], 1 }
 0xaa7   :  { %8771 = vsyncpa [#allocation5], 1 }
 0xaa8   :  { %8773 = vsyncpa [#allocation5 + $0x1], 1 }

</bundles_post_ra>
